<compile_context>
chip_gen: v6e
topology: v6e:2x2x1
jax: 0.10.0
libtpu: 0.0.40
codegen_flags: <defaults>
</compile_context>

<pallas_src>
import jax
import jax.numpy as jnp
from jax.experimental import pallas as pl
from jax.experimental.pallas import tpu as pltpu

# ---- synthetic network dimensions (tiny, deterministic) --------------------
NUM_CLASSES = 4
N = 2               # batch
C_IN = 4            # input channels
H_IN = W_IN = 16    # input spatial size
C1, C2 = 8, 16      # trunk widths
HO1 = 8             # spatial H after stem (stride 2)
HO2 = 4             # spatial H after down (stride 2)
WF = 16             # full-resolution W carried through the trunk
CP = 128            # every channel dim zero-padded to 128 lanes in the kernel
W_PAD1 = 24         # padded W extent of the stem-output staging buffer
W_PAD2 = 24         # padded W extent of the cv1-output staging buffer
M_OUT = N * HO2 * WF  # rows of the head output (full-res W, subsampled later)


# ----------------------------------------------------------------------------
# Fused Pallas kernel: whole conv trunk + detection head in one launch.
# ----------------------------------------------------------------------------
def _yolov10_kernel(x_ref,
                    ws_ref, bs_ref,      # stem  3x3 /2
                    wd_ref, bd_ref,      # down  3x3 /2
                    w1_ref, b1_ref,      # cv1   1x1
                    w2_ref, b2_ref,      # cv2   3x3
                    wb_ref, bb_ref,      # head: box 1x1
                    wc_ref, bc_ref,      # head: cls 1x1
                    box_ref, cls_ref,    # outputs (lane-dense, 128 wide)
                    x_buf, s_buf, c_buf):  # VMEM staging (zero-padded borders)
    f32, bf16 = jnp.float32, jnp.bfloat16

    def silu(v):
        return v * jax.nn.sigmoid(v)

    def conv3x3(src, w_taps, b_row, h_out, h_stride, w_dilation):
        """3x3 conv as a sum of 9 shifted [M,128] @ [128,128] MXU matmuls.

        H is handled at its true stride (leading dim only); W is kept at full
        resolution with dilated taps (extra columns discarded in the wrapper).
        Returns the f32 pre-activation of shape [N * h_out * WF, 128].
        """
        m = N * h_out * WF
        acc = jnp.zeros((m, CP), f32)
        for di in range(3):
            for dj in range(3):
                w0 = dj * w_dilation
                win = src[:, di:di + h_stride * h_out, w0:w0 + WF, :]
                if h_stride == 2:          # true stride-2 along H (leading dim)
                    win = win.reshape(N, h_out, 2, WF, CP)[:, :, 0]
                lhs = win.reshape(m, CP)   # layout-identity collapse (W=16, C=128)
                acc = acc + jnp.dot(lhs, w_taps[3 * di + dj],
                                    preferred_element_type=f32)
        return acc + b_row[...]

    # -- stage the (spatially pre-padded) input; channels 4 -> 128 lanes ------
    x_buf[...] = jnp.zeros_like(x_buf)
    s_buf[...] = jnp.zeros_like(s_buf)
    c_buf[...] = jnp.zeros_like(c_buf)
    x_buf[:, :, :, 0:C_IN] = x_ref[...]

    # -- stem: Conv3x3 /2 + SiLU ----------------------------------------------
    s = silu(conv3x3(x_buf, ws_ref, bs_ref, HO1, 2, 1))           # [512, 128] f32
    s_buf[:, 1:1 + HO1, 2:2 + WF, :] = s.astype(bf16).reshape(N, HO1, WF, CP)

    # -- downsample: Conv3x3 /2 + SiLU (kept live for the residual) -----------
    d = silu(conv3x3(s_buf, wd_ref, bd_ref, HO2, 2, 2))           # [128, 128] f32

    # -- bottleneck cv1: Conv1x1 + SiLU ----------------------------------------
    c1 = silu(jnp.dot(d.astype(bf16), w1_ref[...],
                      preferred_element_type=f32) + b1_ref[...])
    c_buf[:, 1:1 + HO2, 4:4 + WF, :] = c1.astype(bf16).reshape(N, HO2, WF, CP)

    # -- bottleneck cv2: Conv3x3 + SiLU, residual add fused in-kernel ----------
    y = silu(conv3x3(c_buf, w2_ref, b2_ref, HO2, 1, 4))
    feat = (d + y).astype(bf16)                                   # residual

    # -- detect head: raw box regressions + sigmoid class scores --------------
    box_ref[...] = (jnp.dot(feat, wb_ref[...], preferred_element_type=f32)
                    + bb_ref[...])
    cls_ref[...] = jax.nn.sigmoid(
        jnp.dot(feat, wc_ref[...], preferred_element_type=f32) + bc_ref[...])


# ----------------------------------------------------------------------------
# pallas_call wrapper
# ----------------------------------------------------------------------------
def _full_block(shape):
    nd = len(shape)
    return pl.BlockSpec(shape, lambda *_: (0,) * nd)


def _yolo_pallas_call():
    in_shapes = [
        (N, H_IN + 2, W_IN + 2, C_IN),              # padded input (bf16)
        (9, CP, CP), (1, CP),                       # stem
        (9, CP, CP), (1, CP),                       # down
        (CP, CP),    (1, CP),                       # cv1
        (9, CP, CP), (1, CP),                       # cv2
        (CP, CP),    (1, CP),                       # head-box
        (CP, CP),    (1, CP),                       # head-cls
    ]
    return pl.pallas_call(
        _yolov10_kernel,
        out_shape=(jax.ShapeDtypeStruct((M_OUT, CP), jnp.float32),
                   jax.ShapeDtypeStruct((M_OUT, CP), jnp.float32)),
        grid=(1,),
        in_specs=[_full_block(s) for s in in_shapes],
        out_specs=(_full_block((M_OUT, CP)), _full_block((M_OUT, CP))),
        scratch_shapes=[
            pltpu.VMEM((N, H_IN + 2, W_IN + 2, CP), jnp.bfloat16),  # x_buf
            pltpu.VMEM((N, HO1 + 2, W_PAD1, CP), jnp.bfloat16),     # s_buf
            pltpu.VMEM((N, HO2 + 2, W_PAD2, CP), jnp.bfloat16),     # c_buf
        ],
        compiler_params=pltpu.CompilerParams(
            dimension_semantics=("arbitrary",)),
        cost_estimate=pl.CostEstimate(
            flops=165_000_000, transcendentals=100_000,
            bytes_accessed=1_200_000),
    )


# ----------------------------------------------------------------------------
# Parameters: standard conv shapes + one-time packing into lane-dense bf16.
# ----------------------------------------------------------------------------
def init_params(key):
    ks = jax.random.split(key, 10)

    def w_init(k, shape):
        fan_in = shape[0] * shape[1] * shape[2]
        return jax.random.normal(k, shape, jnp.float32) / jnp.sqrt(fan_in)

    def b_init(k, n):
        return 0.1 * jax.random.normal(k, (n,), jnp.float32)

    return {
        "stem_w": w_init(ks[0], (3, 3, C_IN, C1)), "stem_b": b_init(ks[1], C1),
        "down_w": w_init(ks[2], (3, 3, C1, C2)),   "down_b": b_init(ks[3], C2),
        "cv1_w":  w_init(ks[4], (1, 1, C2, C2)),   "cv1_b":  b_init(ks[5], C2),
        "cv2_w":  w_init(ks[6], (3, 3, C2, C2)),   "cv2_b":  b_init(ks[7], C2),
        "head_w": w_init(ks[8], (1, 1, C2, 4 + NUM_CLASSES)),
        "head_b": b_init(ks[9], 4 + NUM_CLASSES),
    }


def pack_params(p):
    """One-time packing (outside the hot path): conv weights -> per-tap
    [kh*kw, 128, 128] bf16 matrices (zero-padded lanes => unmasked MXU tiles),
    biases -> [1, 128] f32 rows, head split into box / class column groups."""
    def taps(w):
        kh, kw, cin, cout = w.shape
        wp = jnp.zeros((kh * kw, CP, CP), jnp.float32)
        wp = wp.at[:, :cin, :cout].set(w.reshape(kh * kw, cin, cout))
        return wp.astype(jnp.bfloat16)

    def mat(w2d):
        wp = jnp.zeros((CP, CP), jnp.float32)
        return wp.at[:w2d.shape[0], :w2d.shape[1]].set(w2d).astype(jnp.bfloat16)

    def bias(b):
        return jnp.zeros((1, CP), jnp.float32).at[0, :b.shape[0]].set(b)

    head_w = p["head_w"].reshape(C2, 4 + NUM_CLASSES)
    return {
        "stem_w": taps(p["stem_w"]), "stem_b": bias(p["stem_b"]),
        "down_w": taps(p["down_w"]), "down_b": bias(p["down_b"]),
        "cv1_w":  mat(p["cv1_w"].reshape(C2, C2)), "cv1_b": bias(p["cv1_b"]),
        "cv2_w":  taps(p["cv2_w"]), "cv2_b": bias(p["cv2_b"]),
        "box_w":  mat(head_w[:, :4]), "box_b": bias(p["head_b"][:4]),
        "cls_w":  mat(head_w[:, 4:]), "cls_b": bias(p["head_b"][4:]),
    }


# ----------------------------------------------------------------------------
# Forward pass (inference path of YOLOv10.forward, i.e. targets=None).
# ----------------------------------------------------------------------------
@jax.jit
def yolov10_forward(x_nchw, packed):
    x = jnp.transpose(x_nchw, (0, 2, 3, 1))                       # NCHW -> NHWC
    xpad = jnp.pad(x, ((0, 0), (1, 1), (1, 1), (0, 0))).astype(jnp.bfloat16)
    box, cls = _yolo_pallas_call()(
        xpad,
        packed["stem_w"], packed["stem_b"],
        packed["down_w"], packed["down_b"],
        packed["cv1_w"], packed["cv1_b"],
        packed["cv2_w"], packed["cv2_b"],
        packed["box_w"], packed["box_b"],
        packed["cls_w"], packed["cls_b"],
    )
    # Rows are ordered (n, h, w_fullres); the true (stride-2 twice) detection
    # grid lives at w_fullres % 4 == 0, real channels in the leading lanes.
    box = box.reshape(N, HO2, WF, CP)[:, :, ::4, :4]
    cls = cls.reshape(N, HO2, WF, CP)[:, :, ::4, :NUM_CLASSES]
    det = jnp.concatenate([box, cls], axis=-1)                    # [N, 4, 4, 4+nc]
    # detections per anchor cell: [N, anchors, 4 box + NUM_CLASSES scores]
    return det.reshape(N, HO2 * (WF // 4), 4 + NUM_CLASSES)


if __name__ == "__main__":
    key = jax.random.PRNGKey(0)
    k_x, k_p = jax.random.split(key)
    x = jax.random.normal(k_x, (N, C_IN, H_IN, W_IN), jnp.float32)  # [N, C, H, W]
    params = init_params(k_p)
    packed = pack_params(params)

    out = yolov10_forward(x, packed)
    out = jax.block_until_ready(out)

    assert out.shape == (N, 16, 4 + NUM_CLASSES), out.shape
    assert out.dtype == jnp.float32
    assert bool(jnp.all(jnp.isfinite(out)))
    # class scores must be valid probabilities (sigmoid applied in-kernel)
    cls_scores = out[..., 4:]
    assert bool(jnp.all((cls_scores >= 0.0) & (cls_scores <= 1.0)))
    print("KERNEL_OK")
</pallas_src>

<mosaic_0001>
module attributes {stable_mosaic.version = 11 : i64} {
  func.func @_yolov10_kernel(%arg0: i32, %arg1: memref<2x18x18x4xbf16, #tpu.memory_space<vmem>>, %arg2: memref<9x128x128xbf16, #tpu.memory_space<vmem>>, %arg3: memref<1x128xf32, #tpu.memory_space<vmem>>, %arg4: memref<9x128x128xbf16, #tpu.memory_space<vmem>>, %arg5: memref<1x128xf32, #tpu.memory_space<vmem>>, %arg6: memref<128x128xbf16, #tpu.memory_space<vmem>>, %arg7: memref<1x128xf32, #tpu.memory_space<vmem>>, %arg8: memref<9x128x128xbf16, #tpu.memory_space<vmem>>, %arg9: memref<1x128xf32, #tpu.memory_space<vmem>>, %arg10: memref<128x128xbf16, #tpu.memory_space<vmem>>, %arg11: memref<1x128xf32, #tpu.memory_space<vmem>>, %arg12: memref<128x128xbf16, #tpu.memory_space<vmem>>, %arg13: memref<1x128xf32, #tpu.memory_space<vmem>>, %arg14: memref<128x128xf32, #tpu.memory_space<vmem>>, %arg15: memref<128x128xf32, #tpu.memory_space<vmem>>, %arg16: memref<2x18x18x128xbf16, #tpu.memory_space<vmem>>, %arg17: memref<2x10x24x128xbf16, #tpu.memory_space<vmem>>, %arg18: memref<2x6x24x128xbf16, #tpu.memory_space<vmem>>) attributes {dimension_semantics = [#tpu.dimension_semantics<arbitrary>], iteration_bounds = array<i64: 1>, scalar_prefetch = 0 : i64, scratch_operands = 3 : i64, tpu.core_type = #tpu.core_type<tc>, window_params = [{pipeline_mode = #tpu.pipeline_mode<synchronous>, transform_indices = @transform_0, window_bounds = array<i64: 2, 18, 18, 4>}, {pipeline_mode = #tpu.pipeline_mode<synchronous>, transform_indices = @transform_1, window_bounds = array<i64: 9, 128, 128>}, {pipeline_mode = #tpu.pipeline_mode<synchronous>, transform_indices = @transform_2, window_bounds = array<i64: 1, 128>}, {pipeline_mode = #tpu.pipeline_mode<synchronous>, transform_indices = @transform_3, window_bounds = array<i64: 9, 128, 128>}, {pipeline_mode = #tpu.pipeline_mode<synchronous>, transform_indices = @transform_4, window_bounds = array<i64: 1, 128>}, {pipeline_mode = #tpu.pipeline_mode<synchronous>, transform_indices = @transform_5, window_bounds = array<i64: 128, 128>}, {pipeline_mode = #tpu.pipeline_mode<synchronous>, transform_indices = @transform_6, window_bounds = array<i64: 1, 128>}, {pipeline_mode = #tpu.pipeline_mode<synchronous>, transform_indices = @transform_7, window_bounds = array<i64: 9, 128, 128>}, {pipeline_mode = #tpu.pipeline_mode<synchronous>, transform_indices = @transform_8, window_bounds = array<i64: 1, 128>}, {pipeline_mode = #tpu.pipeline_mode<synchronous>, transform_indices = @transform_9, window_bounds = array<i64: 128, 128>}, {pipeline_mode = #tpu.pipeline_mode<synchronous>, transform_indices = @transform_10, window_bounds = array<i64: 1, 128>}, {pipeline_mode = #tpu.pipeline_mode<synchronous>, transform_indices = @transform_11, window_bounds = array<i64: 128, 128>}, {pipeline_mode = #tpu.pipeline_mode<synchronous>, transform_indices = @transform_12, window_bounds = array<i64: 1, 128>}, {pipeline_mode = #tpu.pipeline_mode<synchronous>, transform_indices = @transform_13, window_bounds = array<i64: 128, 128>}, {pipeline_mode = #tpu.pipeline_mode<synchronous>, transform_indices = @transform_14, window_bounds = array<i64: 128, 128>}]} {
    %cst = arith.constant 0.000000e+00 : bf16
    %0 = vector.broadcast %cst : bf16 to vector<2x18x18x128xbf16>
    %c0 = arith.constant 0 : index
    %c0_0 = arith.constant 0 : index
    %c0_1 = arith.constant 0 : index
    %c0_2 = arith.constant 0 : index
    %1 = vector.load %arg16[%c0, %c0_0, %c0_1, %c0_2] : memref<2x18x18x128xbf16, #tpu.memory_space<vmem>>, vector<2x18x18x128xbf16>
    tpu.vector_store %arg16[%c0, %c0_0, %c0_1, %c0_2], %0 {strides = array<i32>} : memref<2x18x18x128xbf16, #tpu.memory_space<vmem>>, vector<2x18x18x128xbf16>,
    %cst_3 = arith.constant 0.000000e+00 : bf16
    %2 = vector.broadcast %cst_3 : bf16 to vector<2x10x24x128xbf16>
    %c0_4 = arith.constant 0 : index
    %c0_5 = arith.constant 0 : index
    %c0_6 = arith.constant 0 : index
    %c0_7 = arith.constant 0 : index
    %3 = vector.load %arg17[%c0_4, %c0_5, %c0_6, %c0_7] : memref<2x10x24x128xbf16, #tpu.memory_space<vmem>>, vector<2x10x24x128xbf16>
    tpu.vector_store %arg17[%c0_4, %c0_5, %c0_6, %c0_7], %2 {strides = array<i32>} : memref<2x10x24x128xbf16, #tpu.memory_space<vmem>>, vector<2x10x24x128xbf16>,
    %cst_8 = arith.constant 0.000000e+00 : bf16
    %4 = vector.broadcast %cst_8 : bf16 to vector<2x6x24x128xbf16>
    %c0_9 = arith.constant 0 : index
    %c0_10 = arith.constant 0 : index
    %c0_11 = arith.constant 0 : index
    %c0_12 = arith.constant 0 : index
    %5 = vector.load %arg18[%c0_9, %c0_10, %c0_11, %c0_12] : memref<2x6x24x128xbf16, #tpu.memory_space<vmem>>, vector<2x6x24x128xbf16>
    tpu.vector_store %arg18[%c0_9, %c0_10, %c0_11, %c0_12], %4 {strides = array<i32>} : memref<2x6x24x128xbf16, #tpu.memory_space<vmem>>, vector<2x6x24x128xbf16>,
    %c0_13 = arith.constant 0 : index
    %c0_14 = arith.constant 0 : index
    %c0_15 = arith.constant 0 : index
    %c0_16 = arith.constant 0 : index
    %6 = vector.load %arg1[%c0_13, %c0_14, %c0_15, %c0_16] : memref<2x18x18x4xbf16, #tpu.memory_space<vmem>>, vector<2x18x18x4xbf16>
    %c0_17 = arith.constant 0 : index
    %c0_18 = arith.constant 0 : index
    %c0_19 = arith.constant 0 : index
    %c0_20 = arith.constant 0 : index
    %7 = vector.load %arg16[%c0_17, %c0_18, %c0_19, %c0_20] : memref<2x18x18x128xbf16, #tpu.memory_space<vmem>>, vector<2x18x18x4xbf16>
    tpu.vector_store %arg16[%c0_17, %c0_18, %c0_19, %c0_20], %6 {strides = array<i32>} : memref<2x18x18x128xbf16, #tpu.memory_space<vmem>>, vector<2x18x18x4xbf16>,
    %cst_21 = arith.constant 0.000000e+00 : f32
    %8 = vector.broadcast %cst_21 : f32 to vector<256x128xf32>
    %c0_22 = arith.constant 0 : index
    %c0_23 = arith.constant 0 : index
    %c0_24 = arith.constant 0 : index
    %c0_25 = arith.constant 0 : index
    %9 = vector.load %arg16[%c0_22, %c0_23, %c0_24, %c0_25] : memref<2x18x18x128xbf16, #tpu.memory_space<vmem>>, vector<2x16x16x128xbf16>
    %10 = vector.shape_cast %9 : vector<2x16x16x128xbf16> to vector<2x8x2x16x128xbf16>
    %11 = vector.extract_strided_slice %10 {offsets = [0, 0, 0, 0, 0], sizes = [2, 8, 1, 16, 128], strides = [1, 1, 1, 1, 1]} : vector<2x8x2x16x128xbf16> to vector<2x8x1x16x128xbf16>
    %12 = vector.shape_cast %11 : vector<2x8x1x16x128xbf16> to vector<2x8x16x128xbf16>
    %13 = vector.shape_cast %12 : vector<2x8x16x128xbf16> to vector<256x128xbf16>
    %c0_26 = arith.constant 0 : index
    %c0_27 = arith.constant 0 : index
    %c0_28 = arith.constant 0 : index
    %14 = vector.load %arg2[%c0_26, %c0_27, %c0_28] : memref<9x128x128xbf16, #tpu.memory_space<vmem>>, vector<1x128x128xbf16>
    %15 = vector.shape_cast %14 : vector<1x128x128xbf16> to vector<128x128xbf16>
    %cst_29 = arith.constant dense<0.000000e+00> : vector<256x128xf32>
    %16 = tpu.matmul %13, %15, %cst_29 {dimension_numbers = #tpu.dot_dimension_numbers<[1], [0], [0], [1], [0, 0, 1, 1], [], []>} : vector<256x128xbf16>, vector<128x128xbf16>, vector<256x128xf32> -> vector<256x128xf32>
    %17 = arith.addf %8, %16 : vector<256x128xf32>
    %c0_30 = arith.constant 0 : index
    %c0_31 = arith.constant 0 : index
    %c1 = arith.constant 1 : index
    %c0_32 = arith.constant 0 : index
    %18 = vector.load %arg16[%c0_30, %c0_31, %c1, %c0_32] : memref<2x18x18x128xbf16, #tpu.memory_space<vmem>>, vector<2x16x16x128xbf16>
    %19 = vector.shape_cast %18 : vector<2x16x16x128xbf16> to vector<2x8x2x16x128xbf16>
    %20 = vector.extract_strided_slice %19 {offsets = [0, 0, 0, 0, 0], sizes = [2, 8, 1, 16, 128], strides = [1, 1, 1, 1, 1]} : vector<2x8x2x16x128xbf16> to vector<2x8x1x16x128xbf16>
    %21 = vector.shape_cast %20 : vector<2x8x1x16x128xbf16> to vector<2x8x16x128xbf16>
    %22 = vector.shape_cast %21 : vector<2x8x16x128xbf16> to vector<256x128xbf16>
    %c1_33 = arith.constant 1 : index
    %c0_34 = arith.constant 0 : index
    %c0_35 = arith.constant 0 : index
    %23 = vector.load %arg2[%c1_33, %c0_34, %c0_35] : memref<9x128x128xbf16, #tpu.memory_space<vmem>>, vector<1x128x128xbf16>
    %24 = vector.shape_cast %23 : vector<1x128x128xbf16> to vector<128x128xbf16>
    %cst_36 = arith.constant dense<0.000000e+00> : vector<256x128xf32>
    %25 = tpu.matmul %22, %24, %cst_36 {dimension_numbers = #tpu.dot_dimension_numbers<[1], [0], [0], [1], [0, 0, 1, 1], [], []>} : vector<256x128xbf16>, vector<128x128xbf16>, vector<256x128xf32> -> vector<256x128xf32>
    %26 = arith.addf %17, %25 : vector<256x128xf32>
    %c0_37 = arith.constant 0 : index
    %c0_38 = arith.constant 0 : index
    %c2 = arith.constant 2 : index
    %c0_39 = arith.constant 0 : index
    %27 = vector.load %arg16[%c0_37, %c0_38, %c2, %c0_39] : memref<2x18x18x128xbf16, #tpu.memory_space<vmem>>, vector<2x16x16x128xbf16>
    %28 = vector.shape_cast %27 : vector<2x16x16x128xbf16> to vector<2x8x2x16x128xbf16>
    %29 = vector.extract_strided_slice %28 {offsets = [0, 0, 0, 0, 0], sizes = [2, 8, 1, 16, 128], strides = [1, 1, 1, 1, 1]} : vector<2x8x2x16x128xbf16> to vector<2x8x1x16x128xbf16>
    %30 = vector.shape_cast %29 : vector<2x8x1x16x128xbf16> to vector<2x8x16x128xbf16>
    %31 = vector.shape_cast %30 : vector<2x8x16x128xbf16> to vector<256x128xbf16>
    %c2_40 = arith.constant 2 : index
    %c0_41 = arith.constant 0 : index
    %c0_42 = arith.constant 0 : index
    %32 = vector.load %arg2[%c2_40, %c0_41, %c0_42] : memref<9x128x128xbf16, #tpu.memory_space<vmem>>, vector<1x128x128xbf16>
    %33 = vector.shape_cast %32 : vector<1x128x128xbf16> to vector<128x128xbf16>
    %cst_43 = arith.constant dense<0.000000e+00> : vector<256x128xf32>
    %34 = tpu.matmul %31, %33, %cst_43 {dimension_numbers = #tpu.dot_dimension_numbers<[1], [0], [0], [1], [0, 0, 1, 1], [], []>} : vector<256x128xbf16>, vector<128x128xbf16>, vector<256x128xf32> -> vector<256x128xf32>
    %35 = arith.addf %26, %34 : vector<256x128xf32>
    %c0_44 = arith.constant 0 : index
    %c1_45 = arith.constant 1 : index
    %c0_46 = arith.constant 0 : index
    %c0_47 = arith.constant 0 : index
    %36 = vector.load %arg16[%c0_44, %c1_45, %c0_46, %c0_47] : memref<2x18x18x128xbf16, #tpu.memory_space<vmem>>, vector<2x16x16x128xbf16>
    %37 = vector.shape_cast %36 : vector<2x16x16x128xbf16> to vector<2x8x2x16x128xbf16>
    %38 = vector.extract_strided_slice %37 {offsets = [0, 0, 0, 0, 0], sizes = [2, 8, 1, 16, 128], strides = [1, 1, 1, 1, 1]} : vector<2x8x2x16x128xbf16> to vector<2x8x1x16x128xbf16>
    %39 = vector.shape_cast %38 : vector<2x8x1x16x128xbf16> to vector<2x8x16x128xbf16>
    %40 = vector.shape_cast %39 : vector<2x8x16x128xbf16> to vector<256x128xbf16>
    %c3 = arith.constant 3 : index
    %c0_48 = arith.constant 0 : index
    %c0_49 = arith.constant 0 : index
    %41 = vector.load %arg2[%c3, %c0_48, %c0_49] : memref<9x128x128xbf16, #tpu.memory_space<vmem>>, vector<1x128x128xbf16>
    %42 = vector.shape_cast %41 : vector<1x128x128xbf16> to vector<128x128xbf16>
    %cst_50 = arith.constant dense<0.000000e+00> : vector<256x128xf32>
    %43 = tpu.matmul %40, %42, %cst_50 {dimension_numbers = #tpu.dot_dimension_numbers<[1], [0], [0], [1], [0, 0, 1, 1], [], []>} : vector<256x128xbf16>, vector<128x128xbf16>, vector<256x128xf32> -> vector<256x128xf32>
    %44 = arith.addf %35, %43 : vector<256x128xf32>
    %c0_51 = arith.constant 0 : index
    %c1_52 = arith.constant 1 : index
    %c1_53 = arith.constant 1 : index
    %c0_54 = arith.constant 0 : index
    %45 = vector.load %arg16[%c0_51, %c1_52, %c1_53, %c0_54] : memref<2x18x18x128xbf16, #tpu.memory_space<vmem>>, vector<2x16x16x128xbf16>
    %46 = vector.shape_cast %45 : vector<2x16x16x128xbf16> to vector<2x8x2x16x128xbf16>
    %47 = vector.extract_strided_slice %46 {offsets = [0, 0, 0, 0, 0], sizes = [2, 8, 1, 16, 128], strides = [1, 1, 1, 1, 1]} : vector<2x8x2x16x128xbf16> to vector<2x8x1x16x128xbf16>
    %48 = vector.shape_cast %47 : vector<2x8x1x16x128xbf16> to vector<2x8x16x128xbf16>
    %49 = vector.shape_cast %48 : vector<2x8x16x128xbf16> to vector<256x128xbf16>
    %c4 = arith.constant 4 : index
    %c0_55 = arith.constant 0 : index
    %c0_56 = arith.constant 0 : index
    %50 = vector.load %arg2[%c4, %c0_55, %c0_56] : memref<9x128x128xbf16, #tpu.memory_space<vmem>>, vector<1x128x128xbf16>
    %51 = vector.shape_cast %50 : vector<1x128x128xbf16> to vector<128x128xbf16>
    %cst_57 = arith.constant dense<0.000000e+00> : vector<256x128xf32>
    %52 = tpu.matmul %49, %51, %cst_57 {dimension_numbers = #tpu.dot_dimension_numbers<[1], [0], [0], [1], [0, 0, 1, 1], [], []>} : vector<256x128xbf16>, vector<128x128xbf16>, vector<256x128xf32> -> vector<256x128xf32>
    %53 = arith.addf %44, %52 : vector<256x128xf32>
    %c0_58 = arith.constant 0 : index
    %c1_59 = arith.constant 1 : index
    %c2_60 = arith.constant 2 : index
    %c0_61 = arith.constant 0 : index
    %54 = vector.load %arg16[%c0_58, %c1_59, %c2_60, %c0_61] : memref<2x18x18x128xbf16, #tpu.memory_space<vmem>>, vector<2x16x16x128xbf16>
    %55 = vector.shape_cast %54 : vector<2x16x16x128xbf16> to vector<2x8x2x16x128xbf16>
    %56 = vector.extract_strided_slice %55 {offsets = [0, 0, 0, 0, 0], sizes = [2, 8, 1, 16, 128], strides = [1, 1, 1, 1, 1]} : vector<2x8x2x16x128xbf16> to vector<2x8x1x16x128xbf16>
    %57 = vector.shape_cast %56 : vector<2x8x1x16x128xbf16> to vector<2x8x16x128xbf16>
    %58 = vector.shape_cast %57 : vector<2x8x16x128xbf16> to vector<256x128xbf16>
    %c5 = arith.constant 5 : index
    %c0_62 = arith.constant 0 : index
    %c0_63 = arith.constant 0 : index
    %59 = vector.load %arg2[%c5, %c0_62, %c0_63] : memref<9x128x128xbf16, #tpu.memory_space<vmem>>, vector<1x128x128xbf16>
    %60 = vector.shape_cast %59 : vector<1x128x128xbf16> to vector<128x128xbf16>
    %cst_64 = arith.constant dense<0.000000e+00> : vector<256x128xf32>
    %61 = tpu.matmul %58, %60, %cst_64 {dimension_numbers = #tpu.dot_dimension_numbers<[1], [0], [0], [1], [0, 0, 1, 1], [], []>} : vector<256x128xbf16>, vector<128x128xbf16>, vector<256x128xf32> -> vector<256x128xf32>
    %62 = arith.addf %53, %61 : vector<256x128xf32>
    %c0_65 = arith.constant 0 : index
    %c2_66 = arith.constant 2 : index
    %c0_67 = arith.constant 0 : index
    %c0_68 = arith.constant 0 : index
    %63 = vector.load %arg16[%c0_65, %c2_66, %c0_67, %c0_68] : memref<2x18x18x128xbf16, #tpu.memory_space<vmem>>, vector<2x16x16x128xbf16>
    %64 = vector.shape_cast %63 : vector<2x16x16x128xbf16> to vector<2x8x2x16x128xbf16>
    %65 = vector.extract_strided_slice %64 {offsets = [0, 0, 0, 0, 0], sizes = [2, 8, 1, 16, 128], strides = [1, 1, 1, 1, 1]} : vector<2x8x2x16x128xbf16> to vector<2x8x1x16x128xbf16>
    %66 = vector.shape_cast %65 : vector<2x8x1x16x128xbf16> to vector<2x8x16x128xbf16>
    %67 = vector.shape_cast %66 : vector<2x8x16x128xbf16> to vector<256x128xbf16>
    %c6 = arith.constant 6 : index
    %c0_69 = arith.constant 0 : index
    %c0_70 = arith.constant 0 : index
    %68 = vector.load %arg2[%c6, %c0_69, %c0_70] : memref<9x128x128xbf16, #tpu.memory_space<vmem>>, vector<1x128x128xbf16>
    %69 = vector.shape_cast %68 : vector<1x128x128xbf16> to vector<128x128xbf16>
    %cst_71 = arith.constant dense<0.000000e+00> : vector<256x128xf32>
    %70 = tpu.matmul %67, %69, %cst_71 {dimension_numbers = #tpu.dot_dimension_numbers<[1], [0], [0], [1], [0, 0, 1, 1], [], []>} : vector<256x128xbf16>, vector<128x128xbf16>, vector<256x128xf32> -> vector<256x128xf32>
    %71 = arith.addf %62, %70 : vector<256x128xf32>
    %c0_72 = arith.constant 0 : index
    %c2_73 = arith.constant 2 : index
    %c1_74 = arith.constant 1 : index
    %c0_75 = arith.constant 0 : index
    %72 = vector.load %arg16[%c0_72, %c2_73, %c1_74, %c0_75] : memref<2x18x18x128xbf16, #tpu.memory_space<vmem>>, vector<2x16x16x128xbf16>
    %73 = vector.shape_cast %72 : vector<2x16x16x128xbf16> to vector<2x8x2x16x128xbf16>
    %74 = vector.extract_strided_slice %73 {offsets = [0, 0, 0, 0, 0], sizes = [2, 8, 1, 16, 128], strides = [1, 1, 1, 1, 1]} : vector<2x8x2x16x128xbf16> to vector<2x8x1x16x128xbf16>
    %75 = vector.shape_cast %74 : vector<2x8x1x16x128xbf16> to vector<2x8x16x128xbf16>
    %76 = vector.shape_cast %75 : vector<2x8x16x128xbf16> to vector<256x128xbf16>
    %c7 = arith.constant 7 : index
    %c0_76 = arith.constant 0 : index
    %c0_77 = arith.constant 0 : index
    %77 = vector.load %arg2[%c7, %c0_76, %c0_77] : memref<9x128x128xbf16, #tpu.memory_space<vmem>>, vector<1x128x128xbf16>
    %78 = vector.shape_cast %77 : vector<1x128x128xbf16> to vector<128x128xbf16>
    %cst_78 = arith.constant dense<0.000000e+00> : vector<256x128xf32>
    %79 = tpu.matmul %76, %78, %cst_78 {dimension_numbers = #tpu.dot_dimension_numbers<[1], [0], [0], [1], [0, 0, 1, 1], [], []>} : vector<256x128xbf16>, vector<128x128xbf16>, vector<256x128xf32> -> vector<256x128xf32>
    %80 = arith.addf %71, %79 : vector<256x128xf32>
    %c0_79 = arith.constant 0 : index
    %c2_80 = arith.constant 2 : index
    %c2_81 = arith.constant 2 : index
    %c0_82 = arith.constant 0 : index
    %81 = vector.load %arg16[%c0_79, %c2_80, %c2_81, %c0_82] : memref<2x18x18x128xbf16, #tpu.memory_space<vmem>>, vector<2x16x16x128xbf16>
    %82 = vector.shape_cast %81 : vector<2x16x16x128xbf16> to vector<2x8x2x16x128xbf16>
    %83 = vector.extract_strided_slice %82 {offsets = [0, 0, 0, 0, 0], sizes = [2, 8, 1, 16, 128], strides = [1, 1, 1, 1, 1]} : vector<2x8x2x16x128xbf16> to vector<2x8x1x16x128xbf16>
    %84 = vector.shape_cast %83 : vector<2x8x1x16x128xbf16> to vector<2x8x16x128xbf16>
    %85 = vector.shape_cast %84 : vector<2x8x16x128xbf16> to vector<256x128xbf16>
    %c8 = arith.constant 8 : index
    %c0_83 = arith.constant 0 : index
    %c0_84 = arith.constant 0 : index
    %86 = vector.load %arg2[%c8, %c0_83, %c0_84] : memref<9x128x128xbf16, #tpu.memory_space<vmem>>, vector<1x128x128xbf16>
    %87 = vector.shape_cast %86 : vector<1x128x128xbf16> to vector<128x128xbf16>
    %cst_85 = arith.constant dense<0.000000e+00> : vector<256x128xf32>
    %88 = tpu.matmul %85, %87, %cst_85 {dimension_numbers = #tpu.dot_dimension_numbers<[1], [0], [0], [1], [0, 0, 1, 1], [], []>} : vector<256x128xbf16>, vector<128x128xbf16>, vector<256x128xf32> -> vector<256x128xf32>
    %89 = arith.addf %80, %88 : vector<256x128xf32>
    %c0_86 = arith.constant 0 : index
    %c0_87 = arith.constant 0 : index
    %90 = vector.load %arg3[%c0_86, %c0_87] : memref<1x128xf32, #tpu.memory_space<vmem>>, vector<1x128xf32>
    %91 = vector.broadcast %90 : vector<1x128xf32> to vector<256x128xf32>
    %92 = arith.addf %89, %91 : vector<256x128xf32>
    %93 = arith.negf %92 : vector<256x128xf32>
    %94 = math.exp %93 : vector<256x128xf32>
    %cst_88 = arith.constant 1.000000e+00 : f32
    %95 = vector.broadcast %cst_88 : f32 to vector<256x128xf32>
    %96 = arith.addf %95, %94 : vector<256x128xf32>
    %97 = arith.divf %95, %96 : vector<256x128xf32>
    %98 = arith.mulf %92, %97 : vector<256x128xf32>
    %99 = arith.truncf %98 : vector<256x128xf32> to vector<256x128xbf16>
    %100 = vector.shape_cast %99 : vector<256x128xbf16> to vector<2x8x16x128xbf16>
    %c0_89 = arith.constant 0 : index
    %c1_90 = arith.constant 1 : index
    %c2_91 = arith.constant 2 : index
    %c0_92 = arith.constant 0 : index
    %101 = vector.load %arg17[%c0_89, %c1_90, %c2_91, %c0_92] : memref<2x10x24x128xbf16, #tpu.memory_space<vmem>>, vector<2x8x16x128xbf16>
    tpu.vector_store %arg17[%c0_89, %c1_90, %c2_91, %c0_92], %100 {strides = array<i32>} : memref<2x10x24x128xbf16, #tpu.memory_space<vmem>>, vector<2x8x16x128xbf16>,
    %cst_93 = arith.constant 0.000000e+00 : f32
    %102 = vector.broadcast %cst_93 : f32 to vector<128x128xf32>
    %c0_94 = arith.constant 0 : index
    %c0_95 = arith.constant 0 : index
    %c0_96 = arith.constant 0 : index
    %c0_97 = arith.constant 0 : index
    %103 = vector.load %arg17[%c0_94, %c0_95, %c0_96, %c0_97] : memref<2x10x24x128xbf16, #tpu.memory_space<vmem>>, vector<2x8x16x128xbf16>
    %104 = vector.shape_cast %103 : vector<2x8x16x128xbf16> to vector<2x4x2x16x128xbf16>
    %105 = vector.extract_strided_slice %104 {offsets = [0, 0, 0, 0, 0], sizes = [2, 4, 1, 16, 128], strides = [1, 1, 1, 1, 1]} : vector<2x4x2x16x128xbf16> to vector<2x4x1x16x128xbf16>
    %106 = vector.shape_cast %105 : vector<2x4x1x16x128xbf16> to vector<2x4x16x128xbf16>
    %107 = vector.shape_cast %106 : vector<2x4x16x128xbf16> to vector<128x128xbf16>
    %c0_98 = arith.constant 0 : index
    %c0_99 = arith.constant 0 : index
    %c0_100 = arith.constant 0 : index
    %108 = vector.load %arg4[%c0_98, %c0_99, %c0_100] : memref<9x128x128xbf16, #tpu.memory_space<vmem>>, vector<1x128x128xbf16>
    %109 = vector.shape_cast %108 : vector<1x128x128xbf16> to vector<128x128xbf16>
    %cst_101 = arith.constant dense<0.000000e+00> : vector<128x128xf32>
    %110 = tpu.matmul %107, %109, %cst_101 {dimension_numbers = #tpu.dot_dimension_numbers<[1], [0], [0], [1], [0, 0, 1, 1], [], []>} : vector<128x128xbf16>, vector<128x128xbf16>, vector<128x128xf32> -> vector<128x128xf32>
    %111 = arith.addf %102, %110 : vector<128x128xf32>
    %c0_102 = arith.constant 0 : index
    %c0_103 = arith.constant 0 : index
    %c2_104 = arith.constant 2 : index
    %c0_105 = arith.constant 0 : index
    %112 = vector.load %arg17[%c0_102, %c0_103, %c2_104, %c0_105] : memref<2x10x24x128xbf16, #tpu.memory_space<vmem>>, vector<2x8x16x128xbf16>
    %113 = vector.shape_cast %112 : vector<2x8x16x128xbf16> to vector<2x4x2x16x128xbf16>
    %114 = vector.extract_strided_slice %113 {offsets = [0, 0, 0, 0, 0], sizes = [2, 4, 1, 16, 128], strides = [1, 1, 1, 1, 1]} : vector<2x4x2x16x128xbf16> to vector<2x4x1x16x128xbf16>
    %115 = vector.shape_cast %114 : vector<2x4x1x16x128xbf16> to vector<2x4x16x128xbf16>
    %116 = vector.shape_cast %115 : vector<2x4x16x128xbf16> to vector<128x128xbf16>
    %c1_106 = arith.constant 1 : index
    %c0_107 = arith.constant 0 : index
    %c0_108 = arith.constant 0 : index
    %117 = vector.load %arg4[%c1_106, %c0_107, %c0_108] : memref<9x128x128xbf16, #tpu.memory_space<vmem>>, vector<1x128x128xbf16>
    %118 = vector.shape_cast %117 : vector<1x128x128xbf16> to vector<128x128xbf16>
    %cst_109 = arith.constant dense<0.000000e+00> : vector<128x128xf32>
    %119 = tpu.matmul %116, %118, %cst_109 {dimension_numbers = #tpu.dot_dimension_numbers<[1], [0], [0], [1], [0, 0, 1, 1], [], []>} : vector<128x128xbf16>, vector<128x128xbf16>, vector<128x128xf32> -> vector<128x128xf32>
    %120 = arith.addf %111, %119 : vector<128x128xf32>
    %c0_110 = arith.constant 0 : index
    %c0_111 = arith.constant 0 : index
    %c4_112 = arith.constant 4 : index
    %c0_113 = arith.constant 0 : index
    %121 = vector.load %arg17[%c0_110, %c0_111, %c4_112, %c0_113] : memref<2x10x24x128xbf16, #tpu.memory_space<vmem>>, vector<2x8x16x128xbf16>
    %122 = vector.shape_cast %121 : vector<2x8x16x128xbf16> to vector<2x4x2x16x128xbf16>
    %123 = vector.extract_strided_slice %122 {offsets = [0, 0, 0, 0, 0], sizes = [2, 4, 1, 16, 128], strides = [1, 1, 1, 1, 1]} : vector<2x4x2x16x128xbf16> to vector<2x4x1x16x128xbf16>
    %124 = vector.shape_cast %123 : vector<2x4x1x16x128xbf16> to vector<2x4x16x128xbf16>
    %125 = vector.shape_cast %124 : vector<2x4x16x128xbf16> to vector<128x128xbf16>
    %c2_114 = arith.constant 2 : index
    %c0_115 = arith.constant 0 : index
    %c0_116 = arith.constant 0 : index
    %126 = vector.load %arg4[%c2_114, %c0_115, %c0_116] : memref<9x128x128xbf16, #tpu.memory_space<vmem>>, vector<1x128x128xbf16>
    %127 = vector.shape_cast %126 : vector<1x128x128xbf16> to vector<128x128xbf16>
    %cst_117 = arith.constant dense<0.000000e+00> : vector<128x128xf32>
    %128 = tpu.matmul %125, %127, %cst_117 {dimension_numbers = #tpu.dot_dimension_numbers<[1], [0], [0], [1], [0, 0, 1, 1], [], []>} : vector<128x128xbf16>, vector<128x128xbf16>, vector<128x128xf32> -> vector<128x128xf32>
    %129 = arith.addf %120, %128 : vector<128x128xf32>
    %c0_118 = arith.constant 0 : index
    %c1_119 = arith.constant 1 : index
    %c0_120 = arith.constant 0 : index
    %c0_121 = arith.constant 0 : index
    %130 = vector.load %arg17[%c0_118, %c1_119, %c0_120, %c0_121] : memref<2x10x24x128xbf16, #tpu.memory_space<vmem>>, vector<2x8x16x128xbf16>
    %131 = vector.shape_cast %130 : vector<2x8x16x128xbf16> to vector<2x4x2x16x128xbf16>
    %132 = vector.extract_strided_slice %131 {offsets = [0, 0, 0, 0, 0], sizes = [2, 4, 1, 16, 128], strides = [1, 1, 1, 1, 1]} : vector<2x4x2x16x128xbf16> to vector<2x4x1x16x128xbf16>
    %133 = vector.shape_cast %132 : vector<2x4x1x16x128xbf16> to vector<2x4x16x128xbf16>
    %134 = vector.shape_cast %133 : vector<2x4x16x128xbf16> to vector<128x128xbf16>
    %c3_122 = arith.constant 3 : index
    %c0_123 = arith.constant 0 : index
    %c0_124 = arith.constant 0 : index
    %135 = vector.load %arg4[%c3_122, %c0_123, %c0_124] : memref<9x128x128xbf16, #tpu.memory_space<vmem>>, vector<1x128x128xbf16>
    %136 = vector.shape_cast %135 : vector<1x128x128xbf16> to vector<128x128xbf16>
    %cst_125 = arith.constant dense<0.000000e+00> : vector<128x128xf32>
    %137 = tpu.matmul %134, %136, %cst_125 {dimension_numbers = #tpu.dot_dimension_numbers<[1], [0], [0], [1], [0, 0, 1, 1], [], []>} : vector<128x128xbf16>, vector<128x128xbf16>, vector<128x128xf32> -> vector<128x128xf32>
    %138 = arith.addf %129, %137 : vector<128x128xf32>
    %c0_126 = arith.constant 0 : index
    %c1_127 = arith.constant 1 : index
    %c2_128 = arith.constant 2 : index
    %c0_129 = arith.constant 0 : index
    %139 = vector.load %arg17[%c0_126, %c1_127, %c2_128, %c0_129] : memref<2x10x24x128xbf16, #tpu.memory_space<vmem>>, vector<2x8x16x128xbf16>
    %140 = vector.shape_cast %139 : vector<2x8x16x128xbf16> to vector<2x4x2x16x128xbf16>
    %141 = vector.extract_strided_slice %140 {offsets = [0, 0, 0, 0, 0], sizes = [2, 4, 1, 16, 128], strides = [1, 1, 1, 1, 1]} : vector<2x4x2x16x128xbf16> to vector<2x4x1x16x128xbf16>
    %142 = vector.shape_cast %141 : vector<2x4x1x16x128xbf16> to vector<2x4x16x128xbf16>
    %143 = vector.shape_cast %142 : vector<2x4x16x128xbf16> to vector<128x128xbf16>
    %c4_130 = arith.constant 4 : index
    %c0_131 = arith.constant 0 : index
    %c0_132 = arith.constant 0 : index
    %144 = vector.load %arg4[%c4_130, %c0_131, %c0_132] : memref<9x128x128xbf16, #tpu.memory_space<vmem>>, vector<1x128x128xbf16>
    %145 = vector.shape_cast %144 : vector<1x128x128xbf16> to vector<128x128xbf16>
    %cst_133 = arith.constant dense<0.000000e+00> : vector<128x128xf32>
    %146 = tpu.matmul %143, %145, %cst_133 {dimension_numbers = #tpu.dot_dimension_numbers<[1], [0], [0], [1], [0, 0, 1, 1], [], []>} : vector<128x128xbf16>, vector<128x128xbf16>, vector<128x128xf32> -> vector<128x128xf32>
    %147 = arith.addf %138, %146 : vector<128x128xf32>
    %c0_134 = arith.constant 0 : index
    %c1_135 = arith.constant 1 : index
    %c4_136 = arith.constant 4 : index
    %c0_137 = arith.constant 0 : index
    %148 = vector.load %arg17[%c0_134, %c1_135, %c4_136, %c0_137] : memref<2x10x24x128xbf16, #tpu.memory_space<vmem>>, vector<2x8x16x128xbf16>
    %149 = vector.shape_cast %148 : vector<2x8x16x128xbf16> to vector<2x4x2x16x128xbf16>
    %150 = vector.extract_strided_slice %149 {offsets = [0, 0, 0, 0, 0], sizes = [2, 4, 1, 16, 128], strides = [1, 1, 1, 1, 1]} : vector<2x4x2x16x128xbf16> to vector<2x4x1x16x128xbf16>
    %151 = vector.shape_cast %150 : vector<2x4x1x16x128xbf16> to vector<2x4x16x128xbf16>
    %152 = vector.shape_cast %151 : vector<2x4x16x128xbf16> to vector<128x128xbf16>
    %c5_138 = arith.constant 5 : index
    %c0_139 = arith.constant 0 : index
    %c0_140 = arith.constant 0 : index
    %153 = vector.load %arg4[%c5_138, %c0_139, %c0_140] : memref<9x128x128xbf16, #tpu.memory_space<vmem>>, vector<1x128x128xbf16>
    %154 = vector.shape_cast %153 : vector<1x128x128xbf16> to vector<128x128xbf16>
    %cst_141 = arith.constant dense<0.000000e+00> : vector<128x128xf32>
    %155 = tpu.matmul %152, %154, %cst_141 {dimension_numbers = #tpu.dot_dimension_numbers<[1], [0], [0], [1], [0, 0, 1, 1], [], []>} : vector<128x128xbf16>, vector<128x128xbf16>, vector<128x128xf32> -> vector<128x128xf32>
    %156 = arith.addf %147, %155 : vector<128x128xf32>
    %c0_142 = arith.constant 0 : index
    %c2_143 = arith.constant 2 : index
    %c0_144 = arith.constant 0 : index
    %c0_145 = arith.constant 0 : index
    %157 = vector.load %arg17[%c0_142, %c2_143, %c0_144, %c0_145] : memref<2x10x24x128xbf16, #tpu.memory_space<vmem>>, vector<2x8x16x128xbf16>
    %158 = vector.shape_cast %157 : vector<2x8x16x128xbf16> to vector<2x4x2x16x128xbf16>
    %159 = vector.extract_strided_slice %158 {offsets = [0, 0, 0, 0, 0], sizes = [2, 4, 1, 16, 128], strides = [1, 1, 1, 1, 1]} : vector<2x4x2x16x128xbf16> to vector<2x4x1x16x128xbf16>
    %160 = vector.shape_cast %159 : vector<2x4x1x16x128xbf16> to vector<2x4x16x128xbf16>
    %161 = vector.shape_cast %160 : vector<2x4x16x128xbf16> to vector<128x128xbf16>
    %c6_146 = arith.constant 6 : index
    %c0_147 = arith.constant 0 : index
    %c0_148 = arith.constant 0 : index
    %162 = vector.load %arg4[%c6_146, %c0_147, %c0_148] : memref<9x128x128xbf16, #tpu.memory_space<vmem>>, vector<1x128x128xbf16>
    %163 = vector.shape_cast %162 : vector<1x128x128xbf16> to vector<128x128xbf16>
    %cst_149 = arith.constant dense<0.000000e+00> : vector<128x128xf32>
    %164 = tpu.matmul %161, %163, %cst_149 {dimension_numbers = #tpu.dot_dimension_numbers<[1], [0], [0], [1], [0, 0, 1, 1], [], []>} : vector<128x128xbf16>, vector<128x128xbf16>, vector<128x128xf32> -> vector<128x128xf32>
    %165 = arith.addf %156, %164 : vector<128x128xf32>
    %c0_150 = arith.constant 0 : index
    %c2_151 = arith.constant 2 : index
    %c2_152 = arith.constant 2 : index
    %c0_153 = arith.constant 0 : index
    %166 = vector.load %arg17[%c0_150, %c2_151, %c2_152, %c0_153] : memref<2x10x24x128xbf16, #tpu.memory_space<vmem>>, vector<2x8x16x128xbf16>
    %167 = vector.shape_cast %166 : vector<2x8x16x128xbf16> to vector<2x4x2x16x128xbf16>
    %168 = vector.extract_strided_slice %167 {offsets = [0, 0, 0, 0, 0], sizes = [2, 4, 1, 16, 128], strides = [1, 1, 1, 1, 1]} : vector<2x4x2x16x128xbf16> to vector<2x4x1x16x128xbf16>
    %169 = vector.shape_cast %168 : vector<2x4x1x16x128xbf16> to vector<2x4x16x128xbf16>
    %170 = vector.shape_cast %169 : vector<2x4x16x128xbf16> to vector<128x128xbf16>
    %c7_154 = arith.constant 7 : index
    %c0_155 = arith.constant 0 : index
    %c0_156 = arith.constant 0 : index
    %171 = vector.load %arg4[%c7_154, %c0_155, %c0_156] : memref<9x128x128xbf16, #tpu.memory_space<vmem>>, vector<1x128x128xbf16>
    %172 = vector.shape_cast %171 : vector<1x128x128xbf16> to vector<128x128xbf16>
    %cst_157 = arith.constant dense<0.000000e+00> : vector<128x128xf32>
    %173 = tpu.matmul %170, %172, %cst_157 {dimension_numbers = #tpu.dot_dimension_numbers<[1], [0], [0], [1], [0, 0, 1, 1], [], []>} : vector<128x128xbf16>, vector<128x128xbf16>, vector<128x128xf32> -> vector<128x128xf32>
    %174 = arith.addf %165, %173 : vector<128x128xf32>
    %c0_158 = arith.constant 0 : index
    %c2_159 = arith.constant 2 : index
    %c4_160 = arith.constant 4 : index
    %c0_161 = arith.constant 0 : index
    %175 = vector.load %arg17[%c0_158, %c2_159, %c4_160, %c0_161] : memref<2x10x24x128xbf16, #tpu.memory_space<vmem>>, vector<2x8x16x128xbf16>
    %176 = vector.shape_cast %175 : vector<2x8x16x128xbf16> to vector<2x4x2x16x128xbf16>
    %177 = vector.extract_strided_slice %176 {offsets = [0, 0, 0, 0, 0], sizes = [2, 4, 1, 16, 128], strides = [1, 1, 1, 1, 1]} : vector<2x4x2x16x128xbf16> to vector<2x4x1x16x128xbf16>
    %178 = vector.shape_cast %177 : vector<2x4x1x16x128xbf16> to vector<2x4x16x128xbf16>
    %179 = vector.shape_cast %178 : vector<2x4x16x128xbf16> to vector<128x128xbf16>
    %c8_162 = arith.constant 8 : index
    %c0_163 = arith.constant 0 : index
    %c0_164 = arith.constant 0 : index
    %180 = vector.load %arg4[%c8_162, %c0_163, %c0_164] : memref<9x128x128xbf16, #tpu.memory_space<vmem>>, vector<1x128x128xbf16>
    %181 = vector.shape_cast %180 : vector<1x128x128xbf16> to vector<128x128xbf16>
    %cst_165 = arith.constant dense<0.000000e+00> : vector<128x128xf32>
    %182 = tpu.matmul %179, %181, %cst_165 {dimension_numbers = #tpu.dot_dimension_numbers<[1], [0], [0], [1], [0, 0, 1, 1], [], []>} : vector<128x128xbf16>, vector<128x128xbf16>, vector<128x128xf32> -> vector<128x128xf32>
    %183 = arith.addf %174, %182 : vector<128x128xf32>
    %c0_166 = arith.constant 0 : index
    %c0_167 = arith.constant 0 : index
    %184 = vector.load %arg5[%c0_166, %c0_167] : memref<1x128xf32, #tpu.memory_space<vmem>>, vector<1x128xf32>
    %185 = vector.broadcast %184 : vector<1x128xf32> to vector<128x128xf32>
    %186 = arith.addf %183, %185 : vector<128x128xf32>
    %187 = arith.negf %186 : vector<128x128xf32>
    %188 = math.exp %187 : vector<128x128xf32>
    %cst_168 = arith.constant 1.000000e+00 : f32
    %189 = vector.broadcast %cst_168 : f32 to vector<128x128xf32>
    %190 = arith.addf %189, %188 : vector<128x128xf32>
    %191 = arith.divf %189, %190 : vector<128x128xf32>
    %192 = arith.mulf %186, %191 : vector<128x128xf32>
    %193 = arith.truncf %192 : vector<128x128xf32> to vector<128x128xbf16>
    %c0_169 = arith.constant 0 : index
    %c0_170 = arith.constant 0 : index
    %194 = vector.load %arg6[%c0_169, %c0_170] : memref<128x128xbf16, #tpu.memory_space<vmem>>, vector<128x128xbf16>
    %cst_171 = arith.constant dense<0.000000e+00> : vector<128x128xf32>
    %195 = tpu.matmul %193, %194, %cst_171 {dimension_numbers = #tpu.dot_dimension_numbers<[1], [0], [0], [1], [0, 0, 1, 1], [], []>} : vector<128x128xbf16>, vector<128x128xbf16>, vector<128x128xf32> -> vector<128x128xf32>
    %c0_172 = arith.constant 0 : index
    %c0_173 = arith.constant 0 : index
    %196 = vector.load %arg7[%c0_172, %c0_173] : memref<1x128xf32, #tpu.memory_space<vmem>>, vector<1x128xf32>
    %197 = vector.broadcast %196 : vector<1x128xf32> to vector<128x128xf32>
    %198 = arith.addf %195, %197 : vector<128x128xf32>
    %199 = arith.negf %198 : vector<128x128xf32>
    %200 = math.exp %199 : vector<128x128xf32>
    %cst_174 = arith.constant 1.000000e+00 : f32
    %201 = vector.broadcast %cst_174 : f32 to vector<128x128xf32>
    %202 = arith.addf %201, %200 : vector<128x128xf32>
    %203 = arith.divf %201, %202 : vector<128x128xf32>
    %204 = arith.mulf %198, %203 : vector<128x128xf32>
    %205 = arith.truncf %204 : vector<128x128xf32> to vector<128x128xbf16>
    %206 = vector.shape_cast %205 : vector<128x128xbf16> to vector<2x4x16x128xbf16>
    %c0_175 = arith.constant 0 : index
    %c1_176 = arith.constant 1 : index
    %c4_177 = arith.constant 4 : index
    %c0_178 = arith.constant 0 : index
    %207 = vector.load %arg18[%c0_175, %c1_176, %c4_177, %c0_178] : memref<2x6x24x128xbf16, #tpu.memory_space<vmem>>, vector<2x4x16x128xbf16>
    tpu.vector_store %arg18[%c0_175, %c1_176, %c4_177, %c0_178], %206 {strides = array<i32>} : memref<2x6x24x128xbf16, #tpu.memory_space<vmem>>, vector<2x4x16x128xbf16>,
    %cst_179 = arith.constant 0.000000e+00 : f32
    %208 = vector.broadcast %cst_179 : f32 to vector<128x128xf32>
    %c0_180 = arith.constant 0 : index
    %c0_181 = arith.constant 0 : index
    %c0_182 = arith.constant 0 : index
    %c0_183 = arith.constant 0 : index
    %209 = vector.load %arg18[%c0_180, %c0_181, %c0_182, %c0_183] : memref<2x6x24x128xbf16, #tpu.memory_space<vmem>>, vector<2x4x16x128xbf16>
    %210 = vector.shape_cast %209 : vector<2x4x16x128xbf16> to vector<128x128xbf16>
    %c0_184 = arith.constant 0 : index
    %c0_185 = arith.constant 0 : index
    %c0_186 = arith.constant 0 : index
    %211 = vector.load %arg8[%c0_184, %c0_185, %c0_186] : memref<9x128x128xbf16, #tpu.memory_space<vmem>>, vector<1x128x128xbf16>
    %212 = vector.shape_cast %211 : vector<1x128x128xbf16> to vector<128x128xbf16>
    %cst_187 = arith.constant dense<0.000000e+00> : vector<128x128xf32>
    %213 = tpu.matmul %210, %212, %cst_187 {dimension_numbers = #tpu.dot_dimension_numbers<[1], [0], [0], [1], [0, 0, 1, 1], [], []>} : vector<128x128xbf16>, vector<128x128xbf16>, vector<128x128xf32> -> vector<128x128xf32>
    %214 = arith.addf %208, %213 : vector<128x128xf32>
    %c0_188 = arith.constant 0 : index
    %c0_189 = arith.constant 0 : index
    %c4_190 = arith.constant 4 : index
    %c0_191 = arith.constant 0 : index
    %215 = vector.load %arg18[%c0_188, %c0_189, %c4_190, %c0_191] : memref<2x6x24x128xbf16, #tpu.memory_space<vmem>>, vector<2x4x16x128xbf16>
    %216 = vector.shape_cast %215 : vector<2x4x16x128xbf16> to vector<128x128xbf16>
    %c1_192 = arith.constant 1 : index
    %c0_193 = arith.constant 0 : index
    %c0_194 = arith.constant 0 : index
    %217 = vector.load %arg8[%c1_192, %c0_193, %c0_194] : memref<9x128x128xbf16, #tpu.memory_space<vmem>>, vector<1x128x128xbf16>
    %218 = vector.shape_cast %217 : vector<1x128x128xbf16> to vector<128x128xbf16>
    %cst_195 = arith.constant dense<0.000000e+00> : vector<128x128xf32>
    %219 = tpu.matmul %216, %218, %cst_195 {dimension_numbers = #tpu.dot_dimension_numbers<[1], [0], [0], [1], [0, 0, 1, 1], [], []>} : vector<128x128xbf16>, vector<128x128xbf16>, vector<128x128xf32> -> vector<128x128xf32>
    %220 = arith.addf %214, %219 : vector<128x128xf32>
    %c0_196 = arith.constant 0 : index
    %c0_197 = arith.constant 0 : index
    %c8_198 = arith.constant 8 : index
    %c0_199 = arith.constant 0 : index
    %221 = vector.load %arg18[%c0_196, %c0_197, %c8_198, %c0_199] : memref<2x6x24x128xbf16, #tpu.memory_space<vmem>>, vector<2x4x16x128xbf16>
    %222 = vector.shape_cast %221 : vector<2x4x16x128xbf16> to vector<128x128xbf16>
    %c2_200 = arith.constant 2 : index
    %c0_201 = arith.constant 0 : index
    %c0_202 = arith.constant 0 : index
    %223 = vector.load %arg8[%c2_200, %c0_201, %c0_202] : memref<9x128x128xbf16, #tpu.memory_space<vmem>>, vector<1x128x128xbf16>
    %224 = vector.shape_cast %223 : vector<1x128x128xbf16> to vector<128x128xbf16>
    %cst_203 = arith.constant dense<0.000000e+00> : vector<128x128xf32>
    %225 = tpu.matmul %222, %224, %cst_203 {dimension_numbers = #tpu.dot_dimension_numbers<[1], [0], [0], [1], [0, 0, 1, 1], [], []>} : vector<128x128xbf16>, vector<128x128xbf16>, vector<128x128xf32> -> vector<128x128xf32>
    %226 = arith.addf %220, %225 : vector<128x128xf32>
    %c0_204 = arith.constant 0 : index
    %c1_205 = arith.constant 1 : index
    %c0_206 = arith.constant 0 : index
    %c0_207 = arith.constant 0 : index
    %227 = vector.load %arg18[%c0_204, %c1_205, %c0_206, %c0_207] : memref<2x6x24x128xbf16, #tpu.memory_space<vmem>>, vector<2x4x16x128xbf16>
    %228 = vector.shape_cast %227 : vector<2x4x16x128xbf16> to vector<128x128xbf16>
    %c3_208 = arith.constant 3 : index
    %c0_209 = arith.constant 0 : index
    %c0_210 = arith.constant 0 : index
    %229 = vector.load %arg8[%c3_208, %c0_209, %c0_210] : memref<9x128x128xbf16, #tpu.memory_space<vmem>>, vector<1x128x128xbf16>
    %230 = vector.shape_cast %229 : vector<1x128x128xbf16> to vector<128x128xbf16>
    %cst_211 = arith.constant dense<0.000000e+00> : vector<128x128xf32>
    %231 = tpu.matmul %228, %230, %cst_211 {dimension_numbers = #tpu.dot_dimension_numbers<[1], [0], [0], [1], [0, 0, 1, 1], [], []>} : vector<128x128xbf16>, vector<128x128xbf16>, vector<128x128xf32> -> vector<128x128xf32>
    %232 = arith.addf %226, %231 : vector<128x128xf32>
    %c0_212 = arith.constant 0 : index
    %c1_213 = arith.constant 1 : index
    %c4_214 = arith.constant 4 : index
    %c0_215 = arith.constant 0 : index
    %233 = vector.load %arg18[%c0_212, %c1_213, %c4_214, %c0_215] : memref<2x6x24x128xbf16, #tpu.memory_space<vmem>>, vector<2x4x16x128xbf16>
    %234 = vector.shape_cast %233 : vector<2x4x16x128xbf16> to vector<128x128xbf16>
    %c4_216 = arith.constant 4 : index
    %c0_217 = arith.constant 0 : index
    %c0_218 = arith.constant 0 : index
    %235 = vector.load %arg8[%c4_216, %c0_217, %c0_218] : memref<9x128x128xbf16, #tpu.memory_space<vmem>>, vector<1x128x128xbf16>
    %236 = vector.shape_cast %235 : vector<1x128x128xbf16> to vector<128x128xbf16>
    %cst_219 = arith.constant dense<0.000000e+00> : vector<128x128xf32>
    %237 = tpu.matmul %234, %236, %cst_219 {dimension_numbers = #tpu.dot_dimension_numbers<[1], [0], [0], [1], [0, 0, 1, 1], [], []>} : vector<128x128xbf16>, vector<128x128xbf16>, vector<128x128xf32> -> vector<128x128xf32>
    %238 = arith.addf %232, %237 : vector<128x128xf32>
    %c0_220 = arith.constant 0 : index
    %c1_221 = arith.constant 1 : index
    %c8_222 = arith.constant 8 : index
    %c0_223 = arith.constant 0 : index
    %239 = vector.load %arg18[%c0_220, %c1_221, %c8_222, %c0_223] : memref<2x6x24x128xbf16, #tpu.memory_space<vmem>>, vector<2x4x16x128xbf16>
    %240 = vector.shape_cast %239 : vector<2x4x16x128xbf16> to vector<128x128xbf16>
    %c5_224 = arith.constant 5 : index
    %c0_225 = arith.constant 0 : index
    %c0_226 = arith.constant 0 : index
    %241 = vector.load %arg8[%c5_224, %c0_225, %c0_226] : memref<9x128x128xbf16, #tpu.memory_space<vmem>>, vector<1x128x128xbf16>
    %242 = vector.shape_cast %241 : vector<1x128x128xbf16> to vector<128x128xbf16>
    %cst_227 = arith.constant dense<0.000000e+00> : vector<128x128xf32>
    %243 = tpu.matmul %240, %242, %cst_227 {dimension_numbers = #tpu.dot_dimension_numbers<[1], [0], [0], [1], [0, 0, 1, 1], [], []>} : vector<128x128xbf16>, vector<128x128xbf16>, vector<128x128xf32> -> vector<128x128xf32>
    %244 = arith.addf %238, %243 : vector<128x128xf32>
    %c0_228 = arith.constant 0 : index
    %c2_229 = arith.constant 2 : index
    %c0_230 = arith.constant 0 : index
    %c0_231 = arith.constant 0 : index
    %245 = vector.load %arg18[%c0_228, %c2_229, %c0_230, %c0_231] : memref<2x6x24x128xbf16, #tpu.memory_space<vmem>>, vector<2x4x16x128xbf16>
    %246 = vector.shape_cast %245 : vector<2x4x16x128xbf16> to vector<128x128xbf16>
    %c6_232 = arith.constant 6 : index
    %c0_233 = arith.constant 0 : index
    %c0_234 = arith.constant 0 : index
    %247 = vector.load %arg8[%c6_232, %c0_233, %c0_234] : memref<9x128x128xbf16, #tpu.memory_space<vmem>>, vector<1x128x128xbf16>
    %248 = vector.shape_cast %247 : vector<1x128x128xbf16> to vector<128x128xbf16>
    %cst_235 = arith.constant dense<0.000000e+00> : vector<128x128xf32>
    %249 = tpu.matmul %246, %248, %cst_235 {dimension_numbers = #tpu.dot_dimension_numbers<[1], [0], [0], [1], [0, 0, 1, 1], [], []>} : vector<128x128xbf16>, vector<128x128xbf16>, vector<128x128xf32> -> vector<128x128xf32>
    %250 = arith.addf %244, %249 : vector<128x128xf32>
    %c0_236 = arith.constant 0 : index
    %c2_237 = arith.constant 2 : index
    %c4_238 = arith.constant 4 : index
    %c0_239 = arith.constant 0 : index
    %251 = vector.load %arg18[%c0_236, %c2_237, %c4_238, %c0_239] : memref<2x6x24x128xbf16, #tpu.memory_space<vmem>>, vector<2x4x16x128xbf16>
    %252 = vector.shape_cast %251 : vector<2x4x16x128xbf16> to vector<128x128xbf16>
    %c7_240 = arith.constant 7 : index
    %c0_241 = arith.constant 0 : index
    %c0_242 = arith.constant 0 : index
    %253 = vector.load %arg8[%c7_240, %c0_241, %c0_242] : memref<9x128x128xbf16, #tpu.memory_space<vmem>>, vector<1x128x128xbf16>
    %254 = vector.shape_cast %253 : vector<1x128x128xbf16> to vector<128x128xbf16>
    %cst_243 = arith.constant dense<0.000000e+00> : vector<128x128xf32>
    %255 = tpu.matmul %252, %254, %cst_243 {dimension_numbers = #tpu.dot_dimension_numbers<[1], [0], [0], [1], [0, 0, 1, 1], [], []>} : vector<128x128xbf16>, vector<128x128xbf16>, vector<128x128xf32> -> vector<128x128xf32>
    %256 = arith.addf %250, %255 : vector<128x128xf32>
    %c0_244 = arith.constant 0 : index
    %c2_245 = arith.constant 2 : index
    %c8_246 = arith.constant 8 : index
    %c0_247 = arith.constant 0 : index
    %257 = vector.load %arg18[%c0_244, %c2_245, %c8_246, %c0_247] : memref<2x6x24x128xbf16, #tpu.memory_space<vmem>>, vector<2x4x16x128xbf16>
    %258 = vector.shape_cast %257 : vector<2x4x16x128xbf16> to vector<128x128xbf16>
    %c8_248 = arith.constant 8 : index
    %c0_249 = arith.constant 0 : index
    %c0_250 = arith.constant 0 : index
    %259 = vector.load %arg8[%c8_248, %c0_249, %c0_250] : memref<9x128x128xbf16, #tpu.memory_space<vmem>>, vector<1x128x128xbf16>
    %260 = vector.shape_cast %259 : vector<1x128x128xbf16> to vector<128x128xbf16>
    %cst_251 = arith.constant dense<0.000000e+00> : vector<128x128xf32>
    %261 = tpu.matmul %258, %260, %cst_251 {dimension_numbers = #tpu.dot_dimension_numbers<[1], [0], [0], [1], [0, 0, 1, 1], [], []>} : vector<128x128xbf16>, vector<128x128xbf16>, vector<128x128xf32> -> vector<128x128xf32>
    %262 = arith.addf %256, %261 : vector<128x128xf32>
    %c0_252 = arith.constant 0 : index
    %c0_253 = arith.constant 0 : index
    %263 = vector.load %arg9[%c0_252, %c0_253] : memref<1x128xf32, #tpu.memory_space<vmem>>, vector<1x128xf32>
    %264 = vector.broadcast %263 : vector<1x128xf32> to vector<128x128xf32>
    %265 = arith.addf %262, %264 : vector<128x128xf32>
    %266 = arith.negf %265 : vector<128x128xf32>
    %267 = math.exp %266 : vector<128x128xf32>
    %cst_254 = arith.constant 1.000000e+00 : f32
    %268 = vector.broadcast %cst_254 : f32 to vector<128x128xf32>
    %269 = arith.addf %268, %267 : vector<128x128xf32>
    %270 = arith.divf %268, %269 : vector<128x128xf32>
    %271 = arith.mulf %265, %270 : vector<128x128xf32>
    %272 = arith.addf %192, %271 : vector<128x128xf32>
    %273 = arith.truncf %272 : vector<128x128xf32> to vector<128x128xbf16>
    %c0_255 = arith.constant 0 : index
    %c0_256 = arith.constant 0 : index
    %274 = vector.load %arg10[%c0_255, %c0_256] : memref<128x128xbf16, #tpu.memory_space<vmem>>, vector<128x128xbf16>
    %cst_257 = arith.constant dense<0.000000e+00> : vector<128x128xf32>
    %275 = tpu.matmul %273, %274, %cst_257 {dimension_numbers = #tpu.dot_dimension_numbers<[1], [0], [0], [1], [0, 0, 1, 1], [], []>} : vector<128x128xbf16>, vector<128x128xbf16>, vector<128x128xf32> -> vector<128x128xf32>
    %c0_258 = arith.constant 0 : index
    %c0_259 = arith.constant 0 : index
    %276 = vector.load %arg11[%c0_258, %c0_259] : memref<1x128xf32, #tpu.memory_space<vmem>>, vector<1x128xf32>
    %277 = vector.broadcast %276 : vector<1x128xf32> to vector<128x128xf32>
    %278 = arith.addf %275, %277 : vector<128x128xf32>
    %c0_260 = arith.constant 0 : index
    %c0_261 = arith.constant 0 : index
    %279 = vector.load %arg14[%c0_260, %c0_261] : memref<128x128xf32, #tpu.memory_space<vmem>>, vector<128x128xf32>
    tpu.vector_store %arg14[%c0_260, %c0_261], %278 {strides = array<i32>} : memref<128x128xf32, #tpu.memory_space<vmem>>, vector<128x128xf32>,
    %c0_262 = arith.constant 0 : index
    %c0_263 = arith.constant 0 : index
    %280 = vector.load %arg12[%c0_262, %c0_263] : memref<128x128xbf16, #tpu.memory_space<vmem>>, vector<128x128xbf16>
    %cst_264 = arith.constant dense<0.000000e+00> : vector<128x128xf32>
    %281 = tpu.matmul %273, %280, %cst_264 {dimension_numbers = #tpu.dot_dimension_numbers<[1], [0], [0], [1], [0, 0, 1, 1], [], []>} : vector<128x128xbf16>, vector<128x128xbf16>, vector<128x128xf32> -> vector<128x128xf32>
    %c0_265 = arith.constant 0 : index
    %c0_266 = arith.constant 0 : index
    %282 = vector.load %arg13[%c0_265, %c0_266] : memref<1x128xf32, #tpu.memory_space<vmem>>, vector<1x128xf32>
    %283 = vector.broadcast %282 : vector<1x128xf32> to vector<128x128xf32>
    %284 = arith.addf %281, %283 : vector<128x128xf32>
    %285 = arith.negf %284 : vector<128x128xf32>
    %286 = math.exp %285 : vector<128x128xf32>
    %cst_267 = arith.constant 1.000000e+00 : f32
    %287 = vector.broadcast %cst_267 : f32 to vector<128x128xf32>
    %288 = arith.addf %287, %286 : vector<128x128xf32>
    %289 = arith.divf %287, %288 : vector<128x128xf32>
    %c0_268 = arith.constant 0 : index
    %c0_269 = arith.constant 0 : index
    %290 = vector.load %arg15[%c0_268, %c0_269] : memref<128x128xf32, #tpu.memory_space<vmem>>, vector<128x128xf32>
    tpu.vector_store %arg15[%c0_268, %c0_269], %289 {strides = array<i32>} : memref<128x128xf32, #tpu.memory_space<vmem>>, vector<128x128xf32>,
    return
  }
  func.func @transform_0(%arg0: i32) -> (i32, i32, i32, i32) {
    %c0_i32 = arith.constant 0 : i32
    %c0_i32_0 = arith.constant 0 : i32
    %c0_i32_1 = arith.constant 0 : i32
    %c0_i32_2 = arith.constant 0 : i32
    %c0_i32_3 = arith.constant 0 : i32
    return %c0_i32, %c0_i32_0, %c0_i32_1, %c0_i32_2 : i32, i32, i32, i32
  }
  func.func @transform_1(%arg0: i32) -> (i32, i32, i32) {
    %c0_i32 = arith.constant 0 : i32
    %c0_i32_0 = arith.constant 0 : i32
    %c0_i32_1 = arith.constant 0 : i32
    %c0_i32_2 = arith.constant 0 : i32
    return %c0_i32, %c0_i32_0, %c0_i32_1 : i32, i32, i32
  }
  func.func @transform_2(%arg0: i32) -> (i32, i32) {
    %c0_i32 = arith.constant 0 : i32
    %c0_i32_0 = arith.constant 0 : i32
    %c0_i32_1 = arith.constant 0 : i32
    return %c0_i32, %c0_i32_0 : i32, i32
  }
  func.func @transform_3(%arg0: i32) -> (i32, i32, i32) {
    %c0_i32 = arith.constant 0 : i32
    %c0_i32_0 = arith.constant 0 : i32
    %c0_i32_1 = arith.constant 0 : i32
    %c0_i32_2 = arith.constant 0 : i32
    return %c0_i32, %c0_i32_0, %c0_i32_1 : i32, i32, i32
  }
  func.func @transform_4(%arg0: i32) -> (i32, i32) {
    %c0_i32 = arith.constant 0 : i32
    %c0_i32_0 = arith.constant 0 : i32
    %c0_i32_1 = arith.constant 0 : i32
    return %c0_i32, %c0_i32_0 : i32, i32
  }
  func.func @transform_5(%arg0: i32) -> (i32, i32) {
    %c0_i32 = arith.constant 0 : i32
    %c0_i32_0 = arith.constant 0 : i32
    %c0_i32_1 = arith.constant 0 : i32
    return %c0_i32, %c0_i32_0 : i32, i32
  }
  func.func @transform_6(%arg0: i32) -> (i32, i32) {
    %c0_i32 = arith.constant 0 : i32
    %c0_i32_0 = arith.constant 0 : i32
    %c0_i32_1 = arith.constant 0 : i32
    return %c0_i32, %c0_i32_0 : i32, i32
  }
  func.func @transform_7(%arg0: i32) -> (i32, i32, i32) {
    %c0_i32 = arith.constant 0 : i32
    %c0_i32_0 = arith.constant 0 : i32
    %c0_i32_1 = arith.constant 0 : i32
    %c0_i32_2 = arith.constant 0 : i32
    return %c0_i32, %c0_i32_0, %c0_i32_1 : i32, i32, i32
  }
  func.func @transform_8(%arg0: i32) -> (i32, i32) {
    %c0_i32 = arith.constant 0 : i32
    %c0_i32_0 = arith.constant 0 : i32
    %c0_i32_1 = arith.constant 0 : i32
    return %c0_i32, %c0_i32_0 : i32, i32
  }
  func.func @transform_9(%arg0: i32) -> (i32, i32) {
    %c0_i32 = arith.constant 0 : i32
    %c0_i32_0 = arith.constant 0 : i32
    %c0_i32_1 = arith.constant 0 : i32
    return %c0_i32, %c0_i32_0 : i32, i32
  }
  func.func @transform_10(%arg0: i32) -> (i32, i32) {
    %c0_i32 = arith.constant 0 : i32
    %c0_i32_0 = arith.constant 0 : i32
    %c0_i32_1 = arith.constant 0 : i32
    return %c0_i32, %c0_i32_0 : i32, i32
  }
  func.func @transform_11(%arg0: i32) -> (i32, i32) {
    %c0_i32 = arith.constant 0 : i32
    %c0_i32_0 = arith.constant 0 : i32
    %c0_i32_1 = arith.constant 0 : i32
    return %c0_i32, %c0_i32_0 : i32, i32
  }
  func.func @transform_12(%arg0: i32) -> (i32, i32) {
    %c0_i32 = arith.constant 0 : i32
    %c0_i32_0 = arith.constant 0 : i32
    %c0_i32_1 = arith.constant 0 : i32
    return %c0_i32, %c0_i32_0 : i32, i32
  }
  func.func @transform_13(%arg0: i32) -> (i32, i32) {
    %c0_i32 = arith.constant 0 : i32
    %c0_i32_0 = arith.constant 0 : i32
    %c0_i32_1 = arith.constant 0 : i32
    return %c0_i32, %c0_i32_0 : i32, i32
  }
  func.func @transform_14(%arg0: i32) -> (i32, i32) {
    %c0_i32 = arith.constant 0 : i32
    %c0_i32_0 = arith.constant 0 : i32
    %c0_i32_1 = arith.constant 0 : i32
    return %c0_i32, %c0_i32_0 : i32, i32
  }
}

</mosaic_0001>

<bundles_post_ra>
// kernel: yolov10_forward.1
= control target key start
LH: loop header
LB: loop body
LE: loop exit
PB: predicated region body
PF: predicated region fallthrough
CT: control target
= control target key end

     0   :  { %20 = vsyncpa [#allocation6], 0  ;;  %s20341_s0 = inlined_call_operand.vmem [shape: bf16[2,18,18,4], index: 0, kind: input, shape index: {}]   ;;  %s20342_s1 = inlined_call_operand.vmem [shape: bf16[9,128,128], index: 1, kind: input, shape index: {}]   ;;  %s20343_s2 = inlined_call_operand.vmem [shape: f32[1,128], index: 2, kind: input, shape index: {}]   ;;  %s20344_s3 = inlined_call_operand.vmem [shape: bf16[9,128,128], index: 3, kind: input, shape index: {}]   ;;  %s20345_s4 = inlined_call_operand.vmem [shape: f32[1,128], index: 4, kind: input, shape index: {}]   ;;  %s20346_s5 = inlined_call_operand.hbm [shape: bf16[128,128], index: 5, kind: input, shape index: {}]   ;;  %s20347_s6 = inlined_call_operand.vmem [shape: f32[1,128], index: 6, kind: input, shape index: {}]   ;;  %s20348_s7 = inlined_call_operand.hbm [shape: bf16[9,128,128], index: 7, kind: input, shape index: {}]   ;;  %s20349_s8 = inlined_call_operand.vmem [shape: f32[1,128], index: 8, kind: input, shape index: {}]   ;;  %s20350_s9 = inlined_call_operand.hbm [shape: bf16[128,128], index: 9, kind: input, shape index: {}]   ;;  %s20351_s10 = inlined_call_operand.vmem [shape: f32[1,128], index: 10, kind: input, shape index: {}]   ;;  %s20352_s11 = inlined_call_operand.hbm [shape: bf16[128,128], index: 11, kind: input, shape index: {}]   ;;  %s20353_s12 = inlined_call_operand.vmem [shape: f32[1,128], index: 12, kind: input, shape index: {}]   ;;  %s20354_s13 = inlined_call_operand.vmem [shape: f32[128,128], index: 13, kind: output, shape index: {0}]   ;;  %s20355_s14 = inlined_call_operand.vmem [shape: f32[128,128], index: 14, kind: output, shape index: {1}]  }
   0x1   :  { %21 = vsyncpa [#allocation8], 0 }
   0x2   :  { %22 = vsyncpa [#allocation11], 0  ;;  %s15494_s29 = smov [#allocation7]   ;;  %s15495_s15 = smov [#allocation5]  }
   0x3   :  { %s52_s30 = sshll.u32 %s15494_s29, 4  ;;  %s38_s16 = sshll.u32 %s15495_s15, 4  ;;  %s53_s30 = int_to_ptr.vmem [resolvable:$true] %s52_s30  ;;  %s39_s16 = int_to_ptr.vmem [resolvable:$true] %s38_s16 }
   0x4   :  { %s15416_s17 = scalar_lea.vmem %s53_s30, 9216  ;;  %p15421_p1 = scmp.lt.s32.totalorder %s53_s30, %s53_s30 }
   0x5   :  { %p15417_p0 = scmp.ne.s32.totalorder %s53_s30, %s15416_s17  ;;  %p15422_p2 = scmp.lt.s32.totalorder %s15416_s17, %s15416_s17 }
   0x7   :  { %p15423_p3 = por %p15422_p2, %p15421_p1 }
   0x9   :  { %p15424_p4 = pnand %p15423_p3, %p15417_p0 }
   0xb   :  { %15427 = shalt.err (!%p15424_p4)
}
   0xc   :  { %s15496_s18 = smov 64   ;;  %s15497_s19 = smov 4  }
   0xd   :  { %58 = dma.hbm_to_vmem [thread:$0]  %s20348_s7, 9216, %s53_s30, [#allocation8], %s15496_s18, %s15496_s18, %s15497_s19  }
   0xe   :  { %s15436_s22 = scalar_lea.vmem %s39_s16, 1024  ;;  %p15441_p6 = scmp.lt.s32.totalorder %s39_s16, %s39_s16 }
   0xf   :  { %p15437_p5 = scmp.ne.s32.totalorder %s39_s16, %s15436_s22  ;;  %p15442_p7 = scmp.lt.s32.totalorder %s15436_s22, %s15436_s22 }
  0x11   :  { %p15443_p8 = por %p15442_p7, %p15441_p6 }
  0x13   :  { %p15444_p9 = pnand %p15443_p8, %p15437_p5 }
  0x15   :  { %15447 = shalt.err (!%p15444_p9)
}
  0x16   :  { %44 = dma.hbm_to_vmem [thread:$0]  %s20346_s5, 1024, %s39_s16, [#allocation6], %s15496_s18, %s15496_s18, %s15497_s19  }
  0x17   :  { %s15498_s25 = smov [#allocation9]   ;;  %s15499_s27 = smov [#allocation10]  }
  0x18   :  { %s66_s26 = sshll.u32 %s15498_s25, 4  ;;  %s80_s28 = sshll.u32 %s15499_s27, 4  ;;  %s67_s26 = int_to_ptr.vmem [resolvable:$true] %s66_s26  ;;  %s81_s28 = int_to_ptr.vmem [resolvable:$true] %s80_s28 }
  0x19   :  { %s15456_s7 = scalar_lea.vmem %s67_s26, 1024  ;;  %p15461_p11 = scmp.lt.s32.totalorder %s67_s26, %s67_s26 }
  0x1a   :  { %p15457_p10 = scmp.ne.s32.totalorder %s67_s26, %s15456_s7  ;;  %p15462_p12 = scmp.lt.s32.totalorder %s15456_s7, %s15456_s7 }
  0x1c   :  { %p15463_p13 = por %p15462_p12, %p15461_p11 }
  0x1e   :  { %p15464_p0 = pnand %p15463_p13, %p15457_p10 }
  0x20   :  { %15467 = shalt.err (!%p15464_p0)
}
  0x21   :  { %72 = dma.hbm_to_vmem [thread:$0]  %s20350_s9, 1024, %s67_s26, [#allocation8], %s15496_s18, %s15496_s18, %s15497_s19  }
  0x22   :  { %s15476_s5 = scalar_lea.vmem %s81_s28, 1024  ;;  %p15481_p2 = scmp.lt.s32.totalorder %s81_s28, %s81_s28 }
  0x23   :  { %p15477_p1 = scmp.ne.s32.totalorder %s81_s28, %s15476_s5  ;;  %p15482_p3 = scmp.lt.s32.totalorder %s15476_s5, %s15476_s5 }
  0x25   :  { %p15483_p4 = por %p15482_p3, %p15481_p2 }
  0x27   :  { %p15484_p5 = pnand %p15483_p4, %p15477_p1 }
  0x29   :  { %15487 = shalt.err (!%p15484_p5)
}
  0x2a   :  { %86 = dma.hbm_to_vmem [thread:$0]  %s20352_s11, 1024, %s81_s28, [#allocation11], %s15496_s18, %s15496_s18, %s15497_s19  }
  0x2b   :  { %15488 = dma.done.wait [#allocation6], 1024  }
  0x2c   :  { %15489 = vsyncadd [#allocation6], 4294966272 }
  0x2d   :  { %15490 = dma.done.wait [#allocation8], 10240  }
  0x2e   :  { %15491 = vsyncadd [#allocation8], 4294957056 }
  0x2f   :  { %15492 = dma.done.wait [#allocation11], 1024  }
  0x30   :  { %15493 = vsyncadd [#allocation11], 4294966272  ;;  %v15500_v0 = vmov 0   ;;  %vm414_vm0 = vcmask 27648   ;;  %vm417_vm1 = vcmask 24576   ;;  %v14654_v1 = vld [vmem:[%s20342_s1 + $0x78] sm:$0xff]  }
  0x31   :  { %102 = vst [vmem:[#allocation2] sm:$0xf] %v15500_v0  ;;  %103 = vst [vmem:[#allocation2 + $0x4] sm:$0xf] %v15500_v0  ;;  %v14655_v2 = vld [vmem:[%s20342_s1 + $0x38] sm:$0xff]   ;;  %13527 = vmatprep.subr.bf16.mxu0 %v14654_v1  ;;  %v14656_v3 = vld [vmem:[%s20342_s1 + $0x70] sm:$0xff]  }
  0x32   :  { %104 = vst [vmem:[#allocation2 + $0x8] sm:$0x1] %v15500_v0  ;;  %105 = vst [vmem:[#allocation2 + $0xc] sm:$0xf] %v15500_v0  ;;  %13575 = vmatprep.subr.bf16.mxu1 %v14655_v2  ;;  %13528 = vmatpush3.bf16.msra.mxu0 %v14654_v1  ;;  %v14657_v4 = vld [vmem:[%s20342_s1 + $0x30] sm:$0xff]   ;;  %v14658_v5 = vld [vmem:[%s20342_s1 + $0x68] sm:$0xff]  }
  0x33   :  { %106 = vst [vmem:[#allocation2 + $0x10] sm:$0xf] %v15500_v0  ;;  %107 = vst [vmem:[#allocation2 + $0x14] sm:$0x1] %v15500_v0  ;;  %13576 = vmatpush3.bf16.msra.mxu1 %v14655_v2  ;;  %13529 = vmatprep.subr.bf16.mxu0 %v14656_v3  ;;  %v14659_v6 = vld [vmem:[%s20342_s1 + $0x28] sm:$0xff]   ;;  %v14660_v7 = vld [vmem:[%s20342_s1 + $0x60] sm:$0xff]  }
  0x34   :  { %108 = vst [vmem:[#allocation2 + $0x18] sm:$0xf] %v15500_v0  ;;  %109 = vst [vmem:[#allocation2 + $0x1c] sm:$0xf] %v15500_v0  ;;  %13577 = vmatprep.subr.bf16.mxu1 %v14657_v4  ;;  %v14661_v8 = vld [vmem:[%s20342_s1 + $0x20] sm:$0xff]   ;;  %v14662_v9 = vld [vmem:[%s20342_s1 + $0x58] sm:$0xff]  }
  0x35   :  { %110 = vst [vmem:[#allocation2 + $0x20] sm:$0x1] %v15500_v0  ;;  %111 = vst [vmem:[#allocation2 + $0x24] sm:$0xf] %v15500_v0  ;;  %v14663_v10 = vld [vmem:[%s20342_s1 + $0x18] sm:$0xff]   ;;  %v14664_v11 = vld [vmem:[%s20342_s1 + $0x50] sm:$0xff]  }
  0x36   :  { %112 = vst [vmem:[#allocation2 + $0x28] sm:$0xf] %v15500_v0  ;;  %113 = vst [vmem:[#allocation2 + $0x2c] sm:$0x1] %v15500_v0  ;;  %13530 = vmatpush3.bf16.msra.mxu0 %v14656_v3  ;;  %v14665_v12 = vld [vmem:[%s20342_s1 + $0x10] sm:$0xff]   ;;  %v14666_v19 = vld [vmem:[%s20342_s1 + $0x48] sm:$0xff]  }
  0x37   :  { %114 = vst [vmem:[#allocation2 + $0x30] sm:$0xf] %v15500_v0  ;;  %115 = vst [vmem:[#allocation2 + $0x34] sm:$0xf] %v15500_v0  ;;  %13578 = vmatpush3.bf16.msra.mxu1 %v14657_v4  ;;  %13531 = vmatprep.subr.bf16.mxu0 %v14658_v5  ;;  %v306_v13 = vld [vmem:[%s20341_s0] sm:$0xf] }
  0x38   :  { %116 = vst [vmem:[#allocation2 + $0x38] sm:$0x1] %v15500_v0  ;;  %117 = vst [vmem:[#allocation2 + $0x3c] sm:$0xf] %v15500_v0  ;;  %13579 = vmatprep.subr.bf16.mxu1 %v14659_v6  ;;  %v307_v14 = vld [vmem:[%s20341_s0 + $0x4] sm:$0xf] }
  0x39   :  { %118 = vst [vmem:[#allocation2 + $0x40] sm:$0xf] %v15500_v0  ;;  %119 = vst [vmem:[#allocation2 + $0x44] sm:$0x1] %v15500_v0  ;;  %v308_v15 = vld [vmem:[%s20341_s0 + $0x8] sm:$0x1] }
  0x3a   :  { %120 = vst [vmem:[#allocation2 + $0x48] sm:$0xf] %v15500_v0  ;;  %121 = vst [vmem:[#allocation2 + $0x4c] sm:$0xf] %v15500_v0  ;;  %13532 = vmatpush3.bf16.msra.mxu0 %v14658_v5  ;;  %v312_v16 = vld [vmem:[%s20341_s0 + $0x18] sm:$0xf] }
  0x3b   :  { %122 = vst [vmem:[#allocation2 + $0x50] sm:$0x1] %v15500_v0  ;;  %123 = vst [vmem:[#allocation2 + $0x54] sm:$0xf] %v15500_v0  ;;  %13580 = vmatpush3.bf16.msra.mxu1 %v14659_v6  ;;  %13533 = vmatprep.subr.bf16.mxu0 %v14660_v7  ;;  %v313_v17 = vld [vmem:[%s20341_s0 + $0x1c] sm:$0xf] }
  0x3c   :  { %124 = vst [vmem:[#allocation2 + $0x58] sm:$0xf] %v15500_v0  ;;  %125 = vst [vmem:[#allocation2 + $0x5c] sm:$0x1] %v15500_v0  ;;  %13581 = vmatprep.subr.bf16.mxu1 %v14661_v8  ;;  %v314_v18 = vld [vmem:[%s20341_s0 + $0x20] sm:$0x1] }
  0x3d   :  { %126 = vst [vmem:[#allocation2 + $0x60] sm:$0xf] %v15500_v0  ;;  %127 = vst [vmem:[#allocation2 + $0x64] sm:$0xf] %v15500_v0  ;;  %vm588_vm2 = vsmask.f32 3328 }
  0x3e   :  { %128 = vst [vmem:[#allocation2 + $0x68] sm:$0x1] %v15500_v0  ;;  %129 = vst [vmem:[#allocation2 + $0x6c] sm:$0xf] %v15500_v0  ;;  %13534 = vmatpush3.bf16.msra.mxu0 %v14660_v7  ;;  %vm589_vm3 = vsmask.f32 7440 }
  0x3f   :  { %130 = vst [vmem:[#allocation2 + $0x70] sm:$0xf] %v15500_v0  ;;  %131 = vst [vmem:[#allocation2 + $0x74] sm:$0x1] %v15500_v0  ;;  %13582 = vmatpush3.bf16.msra.mxu1 %v14661_v8  ;;  %13535 = vmatprep.subr.bf16.mxu0 %v14662_v9  ;;  %v318_v20 = vld [vmem:[%s20341_s0 + $0x30] sm:$0xf] }
  0x40   :  { %132 = vst [vmem:[#allocation2 + $0x78] sm:$0xf] %v15500_v0  ;;  %133 = vst [vmem:[#allocation2 + $0x7c] sm:$0xf] %v15500_v0  ;;  %13583 = vmatprep.subr.bf16.mxu1 %v14663_v10  ;;  %v319_v21 = vld [vmem:[%s20341_s0 + $0x34] sm:$0xf] }
  0x41   :  { %134 = vst [vmem:[#allocation2 + $0x80] sm:$0x1] %v15500_v0  ;;  %135 = vst [vmem:[#allocation2 + $0x84] sm:$0xf] %v15500_v0  ;;  %v320_v22 = vld [vmem:[%s20341_s0 + $0x38] sm:$0x1] }
  0x42   :  { %136 = vst [vmem:[#allocation2 + $0x88] sm:$0xf] %v15500_v0  ;;  %137 = vst [vmem:[#allocation2 + $0x8c] sm:$0x1] %v15500_v0  ;;  %13536 = vmatpush3.bf16.msra.mxu0 %v14662_v9  ;;  %v324_v23 = vld [vmem:[%s20341_s0 + $0x48] sm:$0xf] }
  0x43   :  { %138 = vst [vmem:[#allocation2 + $0x90] sm:$0xf] %v15500_v0  ;;  %139 = vst [vmem:[#allocation2 + $0x94] sm:$0xf] %v15500_v0  ;;  %13584 = vmatpush3.bf16.msra.mxu1 %v14663_v10  ;;  %13537 = vmatprep.subr.bf16.mxu0 %v14664_v11  ;;  %v325_v24 = vld [vmem:[%s20341_s0 + $0x4c] sm:$0xf] }
  0x44   :  { %140 = vst [vmem:[#allocation2 + $0x98] sm:$0x1] %v15500_v0  ;;  %141 = vst [vmem:[#allocation2 + $0x9c] sm:$0xf] %v15500_v0  ;;  %v326_v25 = vld [vmem:[%s20341_s0 + $0x50] sm:$0x1]  ;;  %13585 = vmatprep.subr.bf16.mxu1 %v14665_v12 }
  0x45   :  { %142 = vst [vmem:[#allocation2 + $0xa0] sm:$0xf] %v15500_v0  ;;  %143 = vst [vmem:[#allocation2 + $0xa4] sm:$0x1] %v15500_v0  ;;  %v14667_v26 = vld [vmem:[%s20342_s1 + $0x8] sm:$0xff]   ;;  %v14668_v27 = vld [vmem:[%s20342_s1 + $0x40] sm:$0xff]  }
  0x46   :  { %144 = vst [vmem:[#allocation2 + $0xa8] sm:$0xf] %v15500_v0  ;;  %145 = vst [vmem:[#allocation2 + $0xac] sm:$0xf] %v15500_v0  ;;  %v330_v28 = vld [vmem:[%s20341_s0 + $0x60] sm:$0xf]  ;;  %13538 = vmatpush3.bf16.msra.mxu0 %v14664_v11 }
  0x47   :  { %146 = vst [vmem:[#allocation2 + $0xb0] sm:$0x1] %v15500_v0  ;;  %147 = vst [vmem:[#allocation2 + $0xb4] sm:$0xf] %v15500_v0  ;;  %v331_v29 = vld [vmem:[%s20341_s0 + $0x64] sm:$0xf]  ;;  %13586 = vmatpush3.bf16.msra.mxu1 %v14665_v12  ;;  %13539 = vmatprep.subr.bf16.mxu0 %v14666_v19 }
  0x48   :  { %148 = vst [vmem:[#allocation2 + $0xb8] sm:$0xf] %v15500_v0  ;;  %149 = vst [vmem:[#allocation2 + $0xbc] sm:$0x1] %v15500_v0  ;;  %v332_v30 = vld [vmem:[%s20341_s0 + $0x68] sm:$0x1]  ;;  %13587 = vmatprep.subr.bf16.mxu1 %v14667_v26 }
  0x49   :  { %150 = vst [vmem:[#allocation2 + $0xc0] sm:$0xf] %v15500_v0  ;;  %151 = vst [vmem:[#allocation2 + $0xc4] sm:$0xf] %v15500_v0  ;;  %v14669_v31 = vld [vmem:[%s20342_s1] sm:$0xff]   ;;  %v15929_v56 = vld [vmem:[%s20342_s1 + $0xb8] sm:$0xff]  }
  0x4a   :  { %152 = vst [vmem:[#allocation2 + $0xc8] sm:$0x1] %v15500_v0  ;;  %156 = vst [vmem:[#allocation2 + $0xd8] sm:$0xf] %v15500_v0  ;;  %v336_v32 = vld [vmem:[%s20341_s0 + $0x78] sm:$0xf]  ;;  %13540 = vmatpush3.bf16.msra.mxu0 %v14666_v19 }
  0x4b   :  { %157 = vst [vmem:[#allocation2 + $0xdc] sm:$0xf] %v15500_v0  ;;  %158 = vst [vmem:[#allocation2 + $0xe0] sm:$0x1] %v15500_v0  ;;  %v337_v33 = vld [vmem:[%s20341_s0 + $0x7c] sm:$0xf]  ;;  %13588 = vmatpush3.bf16.msra.mxu1 %v14667_v26  ;;  %13541 = vmatprep.subr.bf16.mxu0 %v14668_v27 }
  0x4c   :  { %159 = vst [vmem:[#allocation2 + $0xe4] sm:$0xf] %v15500_v0  ;;  %160 = vst [vmem:[#allocation2 + $0xe8] sm:$0xf] %v15500_v0  ;;  %v338_v34 = vld [vmem:[%s20341_s0 + $0x80] sm:$0x1]  ;;  %13589 = vmatprep.subr.bf16.mxu1 %v14669_v31 }
  0x4d   :  { %161 = vst [vmem:[#allocation2 + $0xec] sm:$0x1] %v15500_v0  ;;  %162 = vst [vmem:[#allocation2 + $0xf0] sm:$0xf] %v15500_v0  ;;  %vm1618_vm5 = vcmask 1042432   ;;  %vm1619_vm6 = vcmask 1046532  }
  0x4e   :  { %163 = vst [vmem:[#allocation2 + $0xf4] sm:$0xf] %v15500_v0  ;;  %164 = vst [vmem:[#allocation2 + $0xf8] sm:$0x1] %v15500_v0  ;;  %13542 = vmatpush3.bf16.msra.mxu0 %v14668_v27  ;;  %vm6411_vm8 = vcmask 1041408   ;;  %vm6412_vm9 = vcmask 1045508  }
  0x4f   :  { %165 = vst [vmem:[#allocation2 + $0xfc] sm:$0xf] %v15500_v0  ;;  %166 = vst [vmem:[#allocation2 + $0x100] sm:$0xf] %v15500_v0  ;;  %13590 = vmatpush3.bf16.msra.mxu1 %v14669_v31  ;;  %13623 = vmatprep.subr.bf16.mxu0 %v15929_v56  ;;  %vm5692_vm11 = vcmask 1040384   ;;  %vm5693_vm12 = vcmask 1044484  }
  0x50   :  { %167 = vst [vmem:[#allocation2 + $0x104] sm:$0x1] %v15500_v0  ;;  %168 = vst [vmem:[#allocation2 + $0x108] sm:$0xf] %v15500_v0 }
  0x51   :  { %169 = vst [vmem:[#allocation2 + $0x10c] sm:$0xf] %v15500_v0  ;;  %170 = vst [vmem:[#allocation2 + $0x110] sm:$0x1] %v15500_v0 }
  0x52   :  { %171 = vst [vmem:[#allocation2 + $0x114] sm:$0xf] %v15500_v0  ;;  %172 = vst [vmem:[#allocation2 + $0x118] sm:$0xf] %v15500_v0 }
  0x53   :  { %173 = vst [vmem:[#allocation2 + $0x11c] sm:$0x1] %v15500_v0  ;;  %174 = vst [vmem:[#allocation2 + $0x120] sm:$0xf] %v15500_v0 }
  0x54   :  { %175 = vst [vmem:[#allocation2 + $0x124] sm:$0xf] %v15500_v0  ;;  %176 = vst [vmem:[#allocation2 + $0x128] sm:$0x1] %v15500_v0 }
  0x55   :  { %177 = vst [vmem:[#allocation2 + $0x12c] sm:$0xf] %v15500_v0  ;;  %178 = vst [vmem:[#allocation2 + $0x130] sm:$0xf] %v15500_v0 }
  0x56   :  { %179 = vst [vmem:[#allocation2 + $0x134] sm:$0x1] %v15500_v0  ;;  %180 = vst [vmem:[#allocation2 + $0x138] sm:$0xf] %v15500_v0 }
  0x57   :  { %181 = vst [vmem:[#allocation2 + $0x13c] sm:$0xf] %v15500_v0  ;;  %182 = vst [vmem:[#allocation2 + $0x140] sm:$0x1] %v15500_v0 }
  0x58   :  { %183 = vst [vmem:[#allocation2 + $0x144] sm:$0xf] %v15500_v0  ;;  %184 = vst [vmem:[#allocation2 + $0x148] sm:$0xf] %v15500_v0 }
  0x59   :  { %185 = vst [vmem:[#allocation2 + $0x14c] sm:$0x1] %v15500_v0  ;;  %186 = vst [vmem:[#allocation2 + $0x150] sm:$0xf] %v15500_v0 }
  0x5a   :  { %187 = vst [vmem:[#allocation2 + $0x154] sm:$0xf] %v15500_v0  ;;  %188 = vst [vmem:[#allocation2 + $0x158] sm:$0x1] %v15500_v0 }
  0x5b   :  { %189 = vst [vmem:[#allocation2 + $0x15c] sm:$0xf] %v15500_v0  ;;  %190 = vst [vmem:[#allocation2 + $0x160] sm:$0xf] %v15500_v0 }
  0x5c   :  { %191 = vst [vmem:[#allocation2 + $0x164] sm:$0x1] %v15500_v0  ;;  %192 = vst [vmem:[#allocation2 + $0x168] sm:$0xf] %v15500_v0 }
  0x5d   :  { %193 = vst [vmem:[#allocation2 + $0x16c] sm:$0xf] %v15500_v0  ;;  %194 = vst [vmem:[#allocation2 + $0x170] sm:$0x1] %v15500_v0 }
  0x5e   :  { %195 = vst [vmem:[#allocation2 + $0x174] sm:$0xf] %v15500_v0  ;;  %196 = vst [vmem:[#allocation2 + $0x178] sm:$0xf] %v15500_v0 }
  0x5f   :  { %197 = vst [vmem:[#allocation2 + $0x17c] sm:$0x1] %v15500_v0  ;;  %198 = vst [vmem:[#allocation2 + $0x180] sm:$0xf] %v15500_v0 }
  0x60   :  { %199 = vst [vmem:[#allocation2 + $0x184] sm:$0xf] %v15500_v0  ;;  %200 = vst [vmem:[#allocation2 + $0x188] sm:$0x1] %v15500_v0 }
  0x61   :  { %201 = vst [vmem:[#allocation2 + $0x18c] sm:$0xf] %v15500_v0  ;;  %202 = vst [vmem:[#allocation2 + $0x190] sm:$0xf] %v15500_v0 }
  0x62   :  { %203 = vst [vmem:[#allocation2 + $0x194] sm:$0x1] %v15500_v0  ;;  %204 = vst [vmem:[#allocation2 + $0x198] sm:$0xf] %v15500_v0 }
  0x63   :  { %205 = vst [vmem:[#allocation2 + $0x19c] sm:$0xf] %v15500_v0  ;;  %206 = vst [vmem:[#allocation2 + $0x1a0] sm:$0x1] %v15500_v0 }
  0x64   :  { %210 = vst [vmem:[#allocation3] sm:$0xf] %v15500_v0  ;;  %211 = vst [vmem:[#allocation3 + $0x4] sm:$0xf] %v15500_v0 }
  0x65   :  { %212 = vst [vmem:[#allocation3 + $0x8] sm:$0xf] %v15500_v0  ;;  %213 = vst [vmem:[#allocation3 + $0xc] sm:$0xf] %v15500_v0 }
  0x66   :  { %214 = vst [vmem:[#allocation3 + $0x10] sm:$0xf] %v15500_v0  ;;  %215 = vst [vmem:[#allocation3 + $0x14] sm:$0xf] %v15500_v0 }
  0x67   :  { %216 = vst [vmem:[#allocation3 + $0x18] sm:$0xf] %v15500_v0  ;;  %217 = vst [vmem:[#allocation3 + $0x1c] sm:$0xf] %v15500_v0 }
  0x68   :  { %218 = vst [vmem:[#allocation3 + $0x20] sm:$0xf] %v15500_v0  ;;  %219 = vst [vmem:[#allocation3 + $0x24] sm:$0xf] %v15500_v0 }
  0x69   :  { %220 = vst [vmem:[#allocation3 + $0x28] sm:$0xf] %v15500_v0  ;;  %221 = vst [vmem:[#allocation3 + $0x2c] sm:$0xf] %v15500_v0 }
  0x6a   :  { %222 = vst [vmem:[#allocation3 + $0x30] sm:$0xf] %v15500_v0  ;;  %223 = vst [vmem:[#allocation3 + $0x34] sm:$0xf] %v15500_v0 }
  0x6b   :  { %224 = vst [vmem:[#allocation3 + $0x38] sm:$0xf] %v15500_v0  ;;  %225 = vst [vmem:[#allocation3 + $0x3c] sm:$0xf] %v15500_v0 }
  0x6c   :  { %226 = vst [vmem:[#allocation3 + $0x40] sm:$0xf] %v15500_v0  ;;  %227 = vst [vmem:[#allocation3 + $0x44] sm:$0xf] %v15500_v0 }
  0x6d   :  { %228 = vst [vmem:[#allocation3 + $0x48] sm:$0xf] %v15500_v0  ;;  %229 = vst [vmem:[#allocation3 + $0x4c] sm:$0xf] %v15500_v0 }
  0x6e   :  { %230 = vst [vmem:[#allocation3 + $0x50] sm:$0xf] %v15500_v0  ;;  %231 = vst [vmem:[#allocation3 + $0x54] sm:$0xf] %v15500_v0 }
  0x6f   :  { %232 = vst [vmem:[#allocation3 + $0x58] sm:$0xf] %v15500_v0  ;;  %233 = vst [vmem:[#allocation3 + $0x5c] sm:$0xf] %v15500_v0 }
  0x70   :  { %234 = vst [vmem:[#allocation3 + $0x60] sm:$0xf] %v15500_v0  ;;  %235 = vst [vmem:[#allocation3 + $0x64] sm:$0xf] %v15500_v0 }
  0x71   :  { %236 = vst [vmem:[#allocation3 + $0x68] sm:$0xf] %v15500_v0  ;;  %240 = vst [vmem:[#allocation3 + $0x78] sm:$0xf] %v15500_v0 }
  0x72   :  { %241 = vst [vmem:[#allocation3 + $0x7c] sm:$0xf] %v15500_v0  ;;  %242 = vst [vmem:[#allocation3 + $0x80] sm:$0xf] %v15500_v0 }
  0x73   :  { %243 = vst [vmem:[#allocation3 + $0x84] sm:$0xf] %v15500_v0  ;;  %244 = vst [vmem:[#allocation3 + $0x88] sm:$0xf] %v15500_v0 }
  0x74   :  { %245 = vst [vmem:[#allocation3 + $0x8c] sm:$0xf] %v15500_v0  ;;  %246 = vst [vmem:[#allocation3 + $0x90] sm:$0xf] %v15500_v0 }
  0x75   :  { %247 = vst [vmem:[#allocation3 + $0x94] sm:$0xf] %v15500_v0  ;;  %248 = vst [vmem:[#allocation3 + $0x98] sm:$0xf] %v15500_v0 }
  0x76   :  { %249 = vst [vmem:[#allocation3 + $0x9c] sm:$0xf] %v15500_v0  ;;  %250 = vst [vmem:[#allocation3 + $0xa0] sm:$0xf] %v15500_v0 }
  0x77   :  { %251 = vst [vmem:[#allocation3 + $0xa4] sm:$0xf] %v15500_v0  ;;  %252 = vst [vmem:[#allocation3 + $0xa8] sm:$0xf] %v15500_v0 }
  0x78   :  { %253 = vst [vmem:[#allocation3 + $0xac] sm:$0xf] %v15500_v0  ;;  %254 = vst [vmem:[#allocation3 + $0xb0] sm:$0xf] %v15500_v0 }
  0x79   :  { %255 = vst [vmem:[#allocation3 + $0xb4] sm:$0xf] %v15500_v0  ;;  %256 = vst [vmem:[#allocation3 + $0xb8] sm:$0xf] %v15500_v0 }
  0x7a   :  { %257 = vst [vmem:[#allocation3 + $0xbc] sm:$0xf] %v15500_v0  ;;  %258 = vst [vmem:[#allocation3 + $0xc0] sm:$0xf] %v15500_v0 }
  0x7b   :  { %259 = vst [vmem:[#allocation3 + $0xc4] sm:$0xf] %v15500_v0  ;;  %260 = vst [vmem:[#allocation3 + $0xc8] sm:$0xf] %v15500_v0 }
  0x7c   :  { %261 = vst [vmem:[#allocation3 + $0xcc] sm:$0xf] %v15500_v0  ;;  %262 = vst [vmem:[#allocation3 + $0xd0] sm:$0xf] %v15500_v0 }
  0x7d   :  { %263 = vst [vmem:[#allocation3 + $0xd4] sm:$0xf] %v15500_v0  ;;  %264 = vst [vmem:[#allocation3 + $0xd8] sm:$0xf] %v15500_v0 }
  0x7e   :  { %265 = vst [vmem:[#allocation3 + $0xdc] sm:$0xf] %v15500_v0  ;;  %266 = vst [vmem:[#allocation3 + $0xe0] sm:$0xf] %v15500_v0 }
  0x7f   :  { %270 = vst [vmem:[#allocation4] sm:$0xf] %v15500_v0  ;;  %271 = vst [vmem:[#allocation4 + $0x4] sm:$0xf] %v15500_v0 }
  0x80   :  { %272 = vst [vmem:[#allocation4 + $0x8] sm:$0xf] %v15500_v0  ;;  %273 = vst [vmem:[#allocation4 + $0xc] sm:$0xf] %v15500_v0 }
  0x81   :  { %274 = vst [vmem:[#allocation4 + $0x10] sm:$0xf] %v15500_v0  ;;  %275 = vst [vmem:[#allocation4 + $0x14] sm:$0xf] %v15500_v0 }
  0x82   :  { %276 = vst [vmem:[#allocation4 + $0x18] sm:$0xf] %v15500_v0  ;;  %277 = vst [vmem:[#allocation4 + $0x1c] sm:$0xf] %v15500_v0 }
  0x83   :  { %278 = vst [vmem:[#allocation4 + $0x20] sm:$0xf] %v15500_v0  ;;  %279 = vst [vmem:[#allocation4 + $0x24] sm:$0xf] %v15500_v0 }
  0x84   :  { %280 = vst [vmem:[#allocation4 + $0x28] sm:$0xf] %v15500_v0  ;;  %281 = vst [vmem:[#allocation4 + $0x2c] sm:$0xf] %v15500_v0 }
  0x85   :  { %282 = vst [vmem:[#allocation4 + $0x30] sm:$0xf] %v15500_v0  ;;  %283 = vst [vmem:[#allocation4 + $0x34] sm:$0xf] %v15500_v0 }
  0x86   :  { %284 = vst [vmem:[#allocation4 + $0x38] sm:$0xf] %v15500_v0  ;;  %285 = vst [vmem:[#allocation4 + $0x3c] sm:$0xf] %v15500_v0 }
  0x87   :  { %286 = vst [vmem:[#allocation4 + $0x40] sm:$0xf] %v15500_v0  ;;  %287 = vst [vmem:[#allocation4 + $0x44] sm:$0xf] %v15500_v0 }
  0x88   :  { %288 = vst [vmem:[#allocation4 + $0x48] sm:$0xf] %v15500_v0  ;;  %289 = vst [vmem:[#allocation4 + $0x4c] sm:$0xf] %v15500_v0 }
  0x89   :  { %290 = vst [vmem:[#allocation4 + $0x50] sm:$0xf] %v15500_v0  ;;  %291 = vst [vmem:[#allocation4 + $0x54] sm:$0xf] %v15500_v0 }
  0x8a   :  { %292 = vst [vmem:[#allocation4 + $0x58] sm:$0xf] %v15500_v0  ;;  %293 = vst [vmem:[#allocation4 + $0x5c] sm:$0xf] %v15500_v0 }
  0x8b   :  { %294 = vst [vmem:[#allocation4 + $0x60] sm:$0xf] %v15500_v0  ;;  %295 = vst [vmem:[#allocation4 + $0x64] sm:$0xf] %v15500_v0 }
  0x8c   :  { %296 = vst [vmem:[#allocation4 + $0x68] sm:$0xf] %v15500_v0  ;;  %297 = vst [vmem:[#allocation4 + $0x6c] sm:$0xf] %v15500_v0 }
  0x8d   :  { %298 = vst [vmem:[#allocation4 + $0x70] sm:$0xf] %v15500_v0  ;;  %299 = vst [vmem:[#allocation4 + $0x74] sm:$0xf] %v15500_v0 }
  0x8e   :  { %300 = vst [vmem:[#allocation4 + $0x78] sm:$0xf] %v15500_v0  ;;  %301 = vst [vmem:[#allocation4 + $0x7c] sm:$0xf] %v15500_v0 }
  0x8f   :  { %302 = vst [vmem:[#allocation4 + $0x80] sm:$0xf] %v15500_v0  ;;  %303 = vst [vmem:[#allocation4 + $0x84] sm:$0xf] %v15500_v0 }
  0x90   :  { %304 = vst [vmem:[#allocation4 + $0x88] sm:$0xf] %v15500_v0  ;;  %305 = vst [vmem:[#allocation4 + $0x8c] sm:$0xf] %v15500_v0 }
  0x91   :  { %415 = vst.msk [vmem:[#allocation2] sm:$0xf] %vm414_vm0, %v306_v13  ;;  %416 = vst.msk [vmem:[#allocation2 + $0x4] sm:$0xf] %vm414_vm0, %v307_v14 }
  0x92   :  { %418 = vst.msk [vmem:[#allocation2 + $0x8] sm:$0x1] %vm417_vm1, %v308_v15  ;;  %424 = vst.msk [vmem:[#allocation2 + $0x20] sm:$0x1] %vm417_vm1, %v314_v18 }
  0x93   :  { %422 = vst.msk [vmem:[#allocation2 + $0x18] sm:$0xf] %vm414_vm0, %v312_v16  ;;  %423 = vst.msk [vmem:[#allocation2 + $0x1c] sm:$0xf] %vm414_vm0, %v313_v17 }
  0x94   :  { %428 = vst.msk [vmem:[#allocation2 + $0x30] sm:$0xf] %vm414_vm0, %v318_v20  ;;  %429 = vst.msk [vmem:[#allocation2 + $0x34] sm:$0xf] %vm414_vm0, %v319_v21 }
  0x95   :  { %430 = vst.msk [vmem:[#allocation2 + $0x38] sm:$0x1] %vm417_vm1, %v320_v22  ;;  %436 = vst.msk [vmem:[#allocation2 + $0x50] sm:$0x1] %vm417_vm1, %v326_v25 }
  0x96   :  { %434 = vst.msk [vmem:[#allocation2 + $0x48] sm:$0xf] %vm414_vm0, %v324_v23  ;;  %435 = vst.msk [vmem:[#allocation2 + $0x4c] sm:$0xf] %vm414_vm0, %v325_v24 }
  0x97   :  { %440 = vst.msk [vmem:[#allocation2 + $0x60] sm:$0xf] %vm414_vm0, %v330_v28  ;;  %441 = vst.msk [vmem:[#allocation2 + $0x64] sm:$0xf] %vm414_vm0, %v331_v29 }
  0x98   :  { %442 = vst.msk [vmem:[#allocation2 + $0x68] sm:$0x1] %vm417_vm1, %v332_v30  ;;  %v524_v35 = vld [vmem:[#allocation2] sm:$0xf]  ;;  %v15909_v36 = vld [vmem:[#allocation2 + $0x4] sm:$0xf]  ;;  %vm15935_vm4 = vmor %vm588_vm2, %vm589_vm3 }
  0x99   :  { %v15911_v37 = vld [vmem:[#allocation2 + $0x8] sm:$0x1]  ;;  %446 = vst.msk [vmem:[#allocation2 + $0x78] sm:$0xf] %vm414_vm0, %v336_v32  ;;  %447 = vst.msk [vmem:[#allocation2 + $0x7c] sm:$0xf] %vm414_vm0, %v337_v33  ;;  %v11913_v45 = vcombine.low %v524_v35, %v15909_v36 }
  0x9a   :  { %448 = vst.msk [vmem:[#allocation2 + $0x80] sm:$0x1] %vm417_vm1, %v338_v34  ;;  %v592_v38 = vshrl.u32 %v524_v35, 16  ;;  %v595_v39 = vshll.u32 %v524_v35, 16  ;;  %v601_v40 = vshll.u32 %v15909_v36, 16  ;;  %v605_v41 = vshrl.u32 %v15909_v36, 16  ;;  %vm16320_vm7 = vmor %vm1618_vm5, %vm1619_vm6 }
  0x9b   :  { %v526_v42 = vld [vmem:[#allocation2 + $0x18] sm:$0xf]  ;;  %v611_v43 = vshll.u32 %v15911_v37, 16  ;;  %v1626_v44 = vrot.slane %v15911_v37, 5  ;;  %v15921_v46 = vld [vmem:[#allocation2 + $0x1c] sm:$0xf]  ;;  %13591 = vmatprep.mubr.bf16.mxu1 %v11913_v45  ;;  %vm18076_vm10 = vmor %vm6411_vm8, %vm6412_vm9 }
  0x9c   :  { %v15923_v47 = vld [vmem:[#allocation2 + $0x20] sm:$0x1]  ;;  %v594_v48 = vrot.slane %v592_v38, 4  ;;  %v597_v49 = vrot.slane %v595_v39, 5  ;;  %v603_v50 = vrot.slane %v601_v40, 5  ;;  %v607_v51 = vrot.slane %v605_v41, 4  ;;  %vm18479_vm13 = vmor %vm5692_vm11, %vm5693_vm12 }
  0x9d   :  { %v613_v52 = vrot.slane %v611_v43, 5  ;;  %v616_v53 = vshrl.u32 %v526_v42, 16  ;;  %v619_v54 = vshll.u32 %v526_v42, 16  ;;  %v625_v55 = vshll.u32 %v15921_v46, 16  ;;  %v528_v61 = vld [vmem:[#allocation2 + $0x30] sm:$0xf] }
  0x9e   :  { %v598_v57 = vor.u32 %v597_v49, %v594_v48  ;;  %v608_v58 = vor.u32 %v607_v51, %v603_v50  ;;  %v629_v59 = vshrl.u32 %v15921_v46, 16  ;;  %v635_v60 = vshll.u32 %v15923_v47, 16  ;;  %v15940_v3 = vld [vmem:[#allocation2 + $0x34] sm:$0xf]  ;;  %v15944_v10 = vld [vmem:[#allocation2 + $0x38] sm:$0x1] }
  0x9f   :  { %v618_v63 = vrot.slane %v616_v53, 4  ;;  %v621_v0 = vrot.slane %v619_v54, 5  ;;  %v627_v1 = vrot.slane %v625_v55, 5  ;;  %v1633_v2 = vrot.slane %v15923_v47, 5  ;;  %v15951_v17 = vld [vmem:[#allocation2 + $0x48] sm:$0xf] }
  0xa0   :  { %v599_v4 = vrot.slane %v598_v57, 4  ;;  %v609_v5 = vrot.slane %v608_v58, 4  ;;  %v631_v6 = vrot.slane %v629_v59, 4  ;;  %v637_v7 = vrot.slane %v635_v60, 5  ;;  %v15953_v18 = vld [vmem:[#allocation2 + $0x4c] sm:$0xf] }
  0xa1   :  { %v622_v8 = vor.u32 %v621_v0, %v618_v63  ;;  %v11914_v9 = vcombine.low %v526_v42, %v15921_v46  ;;  %v640_v11 = vshrl.u32 %v528_v61, 16  ;;  %v643_v12 = vshll.u32 %v528_v61, 16  ;;  %v15955_v23 = vld [vmem:[#allocation2 + $0x50] sm:$0x1]  ;;  %v15961_v28 = vld [vmem:[#allocation2 + $0x60] sm:$0xf] }
  0xa2   :  { %v604_v13 = vsel %vm15935_vm4, %v599_v4, %v603_v50  ;;  %v614_v14 = vsel %vm15935_vm4, %v609_v5, %v613_v52  ;;  %v632_v15 = vor.u32 %v631_v6, %v627_v1  ;;  %v649_v16 = vshll.u32 %v15940_v3, 16  ;;  %v15970_v33 = vld [vmem:[%s20342_s1 + $0xb0] sm:$0xff]   ;;  %v15975_v40 = vld [vmem:[#allocation2 + $0x64] sm:$0xf]  ;;  %v14685_v42 = vld [vmem:[%s20342_s1 + $0xf8] sm:$0xff]  }
  0xa3   :  { %v11889_v19 = vcombine.low %v604_v13, %v614_v14  ;;  %v623_v20 = vrot.slane %v622_v8, 4  ;;  %v642_v21 = vrot.slane %v640_v11, 4  ;;  %v645_v22 = vrot.slane %v643_v12, 5  ;;  %13592 = vmatmul.mubr.bf16.vlgmr.msra.gmra.mxu1 %v11914_v9  ;;  %v342_v41 = vld [vmem:[%s20341_s0 + $0x90] sm:$0xf]  ;;  %13671 = vmatprep.subr.bf16.mxu1 %v14685_v42  ;;  %v16011_v0 = vld [vmem:[%s20342_s1 + $0xa8] sm:$0xff]  }
  0xa4   :  { %v633_v24 = vrot.slane %v632_v15, 4  ;;  %v15957_v25 = vrot.slane %v649_v16, 5  ;;  %v653_v26 = vshrl.u32 %v15940_v3, 16  ;;  %v659_v27 = vshll.u32 %v15944_v10, 16  ;;  %v15984_v50 = vld [vmem:[#allocation2 + $0x68] sm:$0x1]  ;;  %13672 = vmatpush3.bf16.msra.mxu1 %v14685_v42 }
  0xa5   :  { %13543 = vmatprep.mubr.bf16.mxu0 %v11889_v19  ;;  %v628_v29 = vsel %vm15935_vm4, %v623_v20, %v627_v1  ;;  %v646_v30 = vor.u32 %v645_v22, %v642_v21  ;;  %v11915_v31 = vcombine.low %v528_v61, %v15940_v3  ;;  %v664_v32 = vshrl.u32 %v15951_v17, 16  ;;  %v343_v51 = vld [vmem:[%s20341_s0 + $0x94] sm:$0xf]  ;;  %452 = vst.msk [vmem:[#allocation2 + $0x90] sm:$0xf] %vm414_vm0, %v342_v41  ;;  %v14690_v12 = vld [vmem:[%s20342_s1 + $0xe8] sm:$0xff]  }
  0xa6   :  { %v638_v34 = vsel %vm15935_vm4, %v633_v24, %v637_v7  ;;  %v655_v35 = vrot.slane %v653_v26, 4  ;;  %v661_v38 = vrot.slane %v659_v27, 5  ;;  %v667_v39 = vshll.u32 %v15951_v17, 16  ;;  %v14686_v52 = vld [vmem:[%s20342_s1 + $0xf0] sm:$0xff]   ;;  %v344_v58 = vld [vmem:[%s20341_s0 + $0x98] sm:$0x1] }
  0xa7   :  { %v11890_v43 = vcombine.low %v628_v29, %v638_v34  ;;  %v647_v45 = vrot.slane %v646_v30, 4  ;;  %13595 = vmatprep.mubr.bf16.mxu1 %v11915_v31  ;;  %v666_v48 = vrot.slane %v664_v32, 4  ;;  %v673_v49 = vshll.u32 %v15953_v18, 16  ;;  %453 = vst.msk [vmem:[#allocation2 + $0x94] sm:$0xf] %vm414_vm0, %v343_v51  ;;  %13673 = vmatprep.subr.bf16.mxu1 %v14686_v52 }
  0xa8   :  { %v656_v53 = vor.u32 %v655_v35, %v15957_v25  ;;  %v669_v54 = vrot.slane %v667_v39, 5  ;;  %v677_v55 = vshrl.u32 %v15953_v18, 16  ;;  %v683_v57 = vshll.u32 %v15955_v23, 16  ;;  %454 = vst.msk [vmem:[#allocation2 + $0x98] sm:$0x1] %vm417_vm1, %v344_v58  ;;  %13674 = vmatpush3.bf16.msra.mxu1 %v14686_v52  ;;  %v16064_v39 = vld [vmem:[%s20342_s1 + $0xe0] sm:$0xff]  }
  0xa9   :  { %13544 = vmatmul.mubr.bf16.vlgmr.msra.gmra.mxu0 %v11890_v43  ;;  %v652_v59 = vsel %vm15935_vm4, %v647_v45, %v15957_v25  ;;  %v16003_v60 = vrot.slane %v673_v49, 5  ;;  %v11916_v61 = vcombine.low %v15951_v17, %v15953_v18  ;;  %v688_v63 = vshrl.u32 %v15961_v28, 16  ;;  %v348_v1 = vld [vmem:[%s20341_s0 + $0xa8] sm:$0xf]  ;;  %v349_v4 = vld [vmem:[%s20341_s0 + $0xac] sm:$0xf]  ;;  %13675 = vmatprep.subr.bf16.mxu1 %v14690_v12 }
  0xaa   :  { %13624 = vmatpush3.bf16.msra.mxu0 %v15929_v56  ;;  %v657_v5 = vrot.slane %v656_v53, 4  ;;  %v670_v6 = vor.u32 %v669_v54, %v666_v48  ;;  %v679_v7 = vrot.slane %v677_v55, 4  ;;  %v685_v8 = vrot.slane %v683_v57, 5  ;;  %v16021_v9 = vld [vmem:[#allocation2 + $0x78] sm:$0xf] }
  0xab   :  { %v350_v11 = vld [vmem:[%s20341_s0 + $0xb0] sm:$0x1]  ;;  %458 = vst.msk [vmem:[#allocation2 + $0xa8] sm:$0xf] %vm414_vm0, %v348_v1  ;;  %459 = vst.msk [vmem:[#allocation2 + $0xac] sm:$0xf] %vm414_vm0, %v349_v4  ;;  %13625 = vmatprep.subr.bf16.mxu0 %v15970_v33  ;;  %13596 = vmatmul.mubr.bf16.gmra.mxu1 %v11916_v61  ;;  %v11917_v35 = vcombine.low %v15961_v28, %v15975_v40 }
  0xac   :  { %v690_v56 = vrot.slane %v688_v63, 4  ;;  %v691_v13 = vshll.u32 %v15961_v28, 16  ;;  %v697_v14 = vshll.u32 %v15975_v40, 16  ;;  %v701_v15 = vshrl.u32 %v15975_v40, 16  ;;  %v16035_v16 = vld [vmem:[#allocation2 + $0x7c] sm:$0xf]  ;;  %13676 = vmatpush3.bf16.msra.mxu1 %v14690_v12 }
  0xad   :  { %v16037_v17 = vld [vmem:[#allocation2 + $0x80] sm:$0x1]  ;;  %460 = vst.msk [vmem:[#allocation2 + $0xb0] sm:$0x1] %vm417_vm1, %v350_v11  ;;  %v662_v19 = vsel %vm15935_vm4, %v657_v5, %v661_v38  ;;  %v671_v20 = vrot.slane %v670_v6, 4  ;;  %v680_v21 = vor.u32 %v679_v7, %v16003_v60  ;;  %v707_v22 = vshll.u32 %v15984_v50, 16  ;;  %13599 = vmatprep.mubr.bf16.mxu1 %v11917_v35  ;;  %13677 = vmatprep.subr.bf16.mxu1 %v16064_v39 }
  0xae   :  { %v360_v24 = vld [vmem:[%s20341_s0 + $0xd8] sm:$0xf]  ;;  %v11891_v25 = vcombine.low %v652_v59, %v662_v19  ;;  %v693_v26 = vrot.slane %v691_v13, 5  ;;  %v699_v27 = vrot.slane %v697_v14, 5  ;;  %v703_v29 = vrot.slane %v701_v15, 4  ;;  %13626 = vmatpush3.bf16.msra.mxu0 %v15970_v33  ;;  %v14681_v28 = vld [vmem:[%s20342_s1 + $0xa0] sm:$0xff]  }
  0xaf   :  { %v361_v30 = vld [vmem:[%s20341_s0 + $0xdc] sm:$0xf]  ;;  %470 = vst.msk [vmem:[#allocation2 + $0xd8] sm:$0xf] %vm414_vm0, %v360_v24  ;;  %v676_v31 = vsel %vm15935_vm4, %v671_v20, %v16003_v60  ;;  %v681_v32 = vrot.slane %v680_v21, 4  ;;  %v709_v34 = vrot.slane %v707_v22, 5  ;;  %13627 = vmatprep.subr.bf16.mxu0 %v16011_v0  ;;  %v11918_v7 = vcombine.low %v16021_v9, %v16035_v16 }
  0xb0   :  { %v362_v38 = vld [vmem:[%s20341_s0 + $0xe0] sm:$0x1]  ;;  %471 = vst.msk [vmem:[#allocation2 + $0xdc] sm:$0xf] %vm414_vm0, %v361_v30  ;;  %13547 = vmatprep.mubr.bf16.mxu0 %v11891_v25  ;;  %v694_v41 = vor.u32 %v693_v26, %v690_v56  ;;  %v704_v42 = vor.u32 %v703_v29, %v699_v27  ;;  %v712_v33 = vshrl.u32 %v16021_v9, 16  ;;  %v715_v43 = vshll.u32 %v16021_v9, 16  ;;  %13678 = vmatpush3.bf16.msra.mxu1 %v16064_v39 }
  0xb1   :  { %472 = vst.msk [vmem:[#allocation2 + $0xe0] sm:$0x1] %vm417_vm1, %v362_v38  ;;  %v366_v45 = vld [vmem:[%s20341_s0 + $0xf0] sm:$0xf]  ;;  %v686_v48 = vsel %vm15935_vm4, %v681_v32, %v685_v8  ;;  %v721_v49 = vshll.u32 %v16035_v16, 16  ;;  %v725_v51 = vshrl.u32 %v16035_v16, 16 }
  0xb2   :  { %v731_v52 = vshll.u32 %v16037_v17, 16  ;;  %v536_v53 = vld [vmem:[#allocation2 + $0x90] sm:$0xf]  ;;  %476 = vst.msk [vmem:[#allocation2 + $0xf0] sm:$0xf] %vm414_vm0, %v366_v45  ;;  %v11892_v54 = vcombine.low %v676_v31, %v686_v48  ;;  %v695_v55 = vrot.slane %v694_v41, 4  ;;  %13628 = vmatpush3.bf16.msra.mxu0 %v16011_v0 }
  0xb3   :  { %v705_v57 = vrot.slane %v704_v42, 4  ;;  %v714_v58 = vrot.slane %v712_v33, 4  ;;  %v16082_v59 = vld [vmem:[#allocation2 + $0x94] sm:$0xf]  ;;  %v717_v60 = vrot.slane %v715_v43, 5  ;;  %v723_v61 = vrot.slane %v721_v49, 5  ;;  %13629 = vmatprep.subr.bf16.mxu0 %v14681_v28  ;;  %13600 = vmatmul.mubr.bf16.gmra.mxu1 %v11918_v7 }
  0xb4   :  { %v727_v63 = vrot.slane %v725_v51, 4  ;;  %v733_v1 = vrot.slane %v731_v52, 5  ;;  %v16085_v4 = vld [vmem:[#allocation2 + $0x98] sm:$0x1]  ;;  %13548 = vmatmul.mubr.bf16.gmra.mxu0 %v11892_v54  ;;  %v700_v5 = vsel %vm15935_vm4, %v695_v55, %v699_v27  ;;  %v736_v8 = vshrl.u32 %v536_v53, 16  ;;  %v14689_v32 = vld [vmem:[%s20342_s1 + $0x90] sm:$0xff]  }
  0xb5   :  { %v710_v6 = vsel %vm15935_vm4, %v705_v57, %v709_v34  ;;  %v367_v0 = vld [vmem:[%s20341_s0 + $0xf4] sm:$0xf]  ;;  %v14684_v11 = vld [vmem:[%s20342_s1 + $0x98] sm:$0xff]   ;;  %v718_v56 = vor.u32 %v717_v60, %v714_v58  ;;  %v739_v14 = vshll.u32 %v536_v53, 16  ;;  %v538_v15 = vld [vmem:[#allocation2 + $0xa8] sm:$0xf]  ;;  %v11919_v30 = vcombine.low %v536_v53, %v16082_v59 }
  0xb6   :  { %v11893_v12 = vcombine.low %v700_v5, %v710_v6  ;;  %v728_v13 = vor.u32 %v727_v63, %v723_v61  ;;  %v368_v19 = vld [vmem:[%s20341_s0 + $0xf8] sm:$0x1]  ;;  %477 = vst.msk [vmem:[#allocation2 + $0xf4] sm:$0xf] %vm414_vm0, %v367_v0  ;;  %v738_v20 = vrot.slane %v736_v8, 4  ;;  %v745_v21 = vshll.u32 %v16082_v59, 16  ;;  %13630 = vmatpush3.bf16.msra.mxu0 %v14681_v28 }
  0xb7   :  { %v14695_v9 = vld [vmem:[%s20342_s1 + $0xd8] sm:$0xff]   ;;  %v749_v22 = vshrl.u32 %v16082_v59, 16  ;;  %v755_v24 = vshll.u32 %v16085_v4, 16  ;;  %v16110_v25 = vld [vmem:[#allocation2 + $0xac] sm:$0xf]  ;;  %v719_v26 = vrot.slane %v718_v56, 4  ;;  %13631 = vmatprep.subr.bf16.mxu0 %v14684_v11  ;;  %13603 = vmatprep.mubr.bf16.mxu1 %v11919_v30 }
  0xb8   :  { %478 = vst.msk [vmem:[#allocation2 + $0xf8] sm:$0x1] %vm417_vm1, %v368_v19  ;;  %13551 = vmatprep.mubr.bf16.mxu0 %v11893_v12  ;;  %v729_v27 = vrot.slane %v728_v13, 4  ;;  %v741_v29 = vrot.slane %v739_v14, 5  ;;  %v16114_v31 = vld [vmem:[#allocation2 + $0xb0] sm:$0x1]  ;;  %13679 = vmatprep.subr.bf16.mxu1 %v14695_v9 }
  0xb9   :  { %v747_v34 = vrot.slane %v745_v21, 5  ;;  %v751_v35 = vrot.slane %v749_v22, 4  ;;  %v757_v38 = vrot.slane %v755_v24, 5  ;;  %v760_v41 = vshrl.u32 %v538_v15, 16  ;;  %v16119_v42 = vld [vmem:[#allocation2 + $0xd8] sm:$0xf]  ;;  %13680 = vmatpush3.bf16.msra.mxu1 %v14695_v9 }
  0xba   :  { %v724_v33 = vsel %vm15935_vm4, %v719_v26, %v723_v61  ;;  %v734_v43 = vsel %vm15935_vm4, %v729_v27, %v733_v1  ;;  %v742_v28 = vor.u32 %v741_v29, %v738_v20  ;;  %v763_v45 = vshll.u32 %v538_v15, 16  ;;  %v16126_v48 = vld [vmem:[#allocation2 + $0xdc] sm:$0xf]  ;;  %v14696_v49 = vld [vmem:[%s20342_s1 + $0xd0] sm:$0xff]   ;;  %v16134_v60 = vld [vmem:[#allocation2 + $0xe0] sm:$0x1]  ;;  %13632 = vmatpush3.bf16.msra.mxu0 %v14684_v11 }
  0xbb   :  { %v11894_v51 = vcombine.low %v724_v33, %v734_v43  ;;  %v752_v52 = vor.u32 %v751_v35, %v747_v34  ;;  %v762_v53 = vrot.slane %v760_v41, 4  ;;  %v769_v39 = vshll.u32 %v16110_v25, 16  ;;  %v16138_v6 = vld [vmem:[#allocation2 + $0xf0] sm:$0xf]  ;;  %13633 = vmatprep.subr.bf16.mxu0 %v14689_v32  ;;  %v14694_v7 = vld [vmem:[%s20342_s1 + $0x88] sm:$0xff]   ;;  %13681 = vmatprep.subr.bf16.mxu1 %v14696_v49 }
  0xbc   :  { %v743_v54 = vrot.slane %v742_v28, 4  ;;  %v765_v55 = vrot.slane %v763_v45, 5  ;;  %v773_v57 = vshrl.u32 %v16110_v25, 16  ;;  %v779_v58 = vshll.u32 %v16114_v31, 16  ;;  %v372_v20 = vld [vmem:[%s20341_s0 + $0x108] sm:$0xf] }
  0xbd   :  { %13552 = vmatmul.mubr.bf16.gmra.mxu0 %v11894_v51  ;;  %v753_v61 = vrot.slane %v752_v52, 4  ;;  %v771_v63 = vrot.slane %v769_v39, 5  ;;  %v11920_v1 = vcombine.low %v538_v15, %v16110_v25  ;;  %v784_v5 = vshrl.u32 %v16119_v42, 16  ;;  %v16145_v56 = vld [vmem:[#allocation2 + $0xf4] sm:$0xf]  ;;  %v14700_v21 = vld [vmem:[%s20342_s1 + $0xc8] sm:$0xff]   ;;  %13682 = vmatpush3.bf16.msra.mxu1 %v14696_v49 }
  0xbe   :  { %v748_v8 = vsel %vm15935_vm4, %v743_v54, %v747_v34  ;;  %v766_v0 = vor.u32 %v765_v55, %v762_v53  ;;  %v775_v12 = vrot.slane %v773_v57, 4  ;;  %v781_v11 = vrot.slane %v779_v58, 5  ;;  %v373_v27 = vld [vmem:[%s20341_s0 + $0x10c] sm:$0xf]  ;;  %v374_v29 = vld [vmem:[%s20341_s0 + $0x110] sm:$0x1]  ;;  %13634 = vmatpush3.bf16.msra.mxu0 %v14689_v32  ;;  %13683 = vmatprep.subr.bf16.mxu1 %v14700_v21 }
  0xbf   :  { %v758_v13 = vsel %vm15935_vm4, %v753_v61, %v757_v38  ;;  %13604 = vmatmul.mubr.bf16.gmra.mxu1 %v11920_v1  ;;  %v786_v14 = vrot.slane %v784_v5, 4  ;;  %v787_v15 = vshll.u32 %v16119_v42, 16  ;;  %v793_v19 = vshll.u32 %v16126_v48, 16  ;;  %482 = vst.msk [vmem:[#allocation2 + $0x108] sm:$0xf] %vm414_vm0, %v372_v20  ;;  %13635 = vmatprep.subr.bf16.mxu0 %v14694_v7  ;;  %v14699_v32 = vld [vmem:[%s20342_s1 + $0x80] sm:$0xff]  }
  0xc0   :  { %v11895_v22 = vcombine.low %v748_v8, %v758_v13  ;;  %v767_v9 = vrot.slane %v766_v0, 4  ;;  %v776_v24 = vor.u32 %v775_v12, %v771_v63  ;;  %v797_v26 = vshrl.u32 %v16126_v48, 16  ;;  %v16168_v41 = vld [vmem:[#allocation2 + $0xf8] sm:$0x1]  ;;  %483 = vst.msk [vmem:[#allocation2 + $0x10c] sm:$0xf] %vm414_vm0, %v373_v27 }
  0xc1   :  { %v789_v30 = vrot.slane %v787_v15, 5  ;;  %v795_v34 = vrot.slane %v793_v19, 5  ;;  %v803_v35 = vshll.u32 %v16134_v60, 16  ;;  %v11921_v38 = vcombine.low %v16119_v42, %v16126_v48  ;;  %484 = vst.msk [vmem:[#allocation2 + $0x110] sm:$0x1] %vm417_vm1, %v374_v29  ;;  %v14701_v57 = vld [vmem:[%s20342_s1 + $0xc0] sm:$0xff]   ;;  %13684 = vmatpush3.bf16.msra.mxu1 %v14700_v21 }
  0xc2   :  { %v378_v33 = vld [vmem:[%s20341_s0 + $0x120] sm:$0xf]  ;;  %13555 = vmatprep.mubr.bf16.mxu0 %v11895_v22  ;;  %v772_v43 = vsel %vm15935_vm4, %v767_v9, %v771_v63  ;;  %v777_v42 = vrot.slane %v776_v24, 4  ;;  %v799_v28 = vrot.slane %v797_v26, 4  ;;  %v808_v45 = vshrl.u32 %v16138_v6, 16  ;;  %13636 = vmatpush3.bf16.msra.mxu0 %v14694_v7  ;;  %v16201_v12 = vld [vmem:[%s20342_s1 + $0x138] sm:$0xff]  }
  0xc3   :  { %v379_v51 = vld [vmem:[%s20341_s0 + $0x124] sm:$0xf]  ;;  %488 = vst.msk [vmem:[#allocation2 + $0x120] sm:$0xf] %vm414_vm0, %v378_v33  ;;  %v790_v52 = vor.u32 %v789_v30, %v786_v14  ;;  %v805_v53 = vrot.slane %v803_v35, 5  ;;  %13607 = vmatprep.mubr.bf16.mxu1 %v11921_v38  ;;  %v811_v39 = vshll.u32 %v16138_v6, 16  ;;  %13637 = vmatprep.subr.bf16.mxu0 %v14699_v32  ;;  %v11922_v15 = vcombine.low %v16138_v6, %v16145_v56 }
  0xc4   :  { %v817_v54 = vshll.u32 %v16145_v56, 16  ;;  %v380_v55 = vld [vmem:[%s20341_s0 + $0x128] sm:$0x1]  ;;  %489 = vst.msk [vmem:[#allocation2 + $0x124] sm:$0xf] %vm414_vm0, %v379_v51  ;;  %v782_v49 = vsel %vm15935_vm4, %v777_v42, %v781_v11  ;;  %v800_v58 = vor.u32 %v799_v28, %v795_v34  ;;  %v810_v61 = vrot.slane %v808_v45, 4  ;;  %13685 = vmatprep.subr.bf16.mxu1 %v14701_v57 }
  0xc5   :  { %v821_v63 = vshrl.u32 %v16145_v56, 16  ;;  %490 = vst.msk [vmem:[#allocation2 + $0x128] sm:$0x1] %vm417_vm1, %v380_v55  ;;  %v11896_v1 = vcombine.low %v772_v43, %v782_v49  ;;  %v791_v5 = vrot.slane %v790_v52, 4  ;;  %v813_v8 = vrot.slane %v811_v39, 5  ;;  %v16209_v7 = vld [vmem:[%s20342_s1 + $0x178] sm:$0xff]   ;;  %13686 = vmatpush3.bf16.msra.mxu1 %v14701_v57 }
  0xc6   :  { %v819_v0 = vrot.slane %v817_v54, 5  ;;  %v801_v13 = vrot.slane %v800_v58, 4  ;;  %v827_v11 = vshll.u32 %v16168_v41, 16  ;;  %v544_v22 = vld [vmem:[#allocation2 + $0x108] sm:$0xf]  ;;  %13638 = vmatpush3.bf16.msra.mxu0 %v14699_v32  ;;  %13767 = vmatprep.subr.bf16.mxu1 %v16209_v7 }
  0xc7   :  { %v823_v14 = vrot.slane %v821_v63, 4  ;;  %13556 = vmatmul.mubr.bf16.gmra.mxu0 %v11896_v1  ;;  %v796_v19 = vsel %vm15935_vm4, %v791_v5, %v795_v34  ;;  %v814_v20 = vor.u32 %v813_v8, %v810_v61  ;;  %13608 = vmatmul.mubr.bf16.gmra.mxu1 %v11922_v15  ;;  %v16215_v6 = vld [vmem:[#allocation2 + $0x10c] sm:$0xf]  ;;  %v832_v27 = vshrl.u32 %v544_v22, 16  ;;  %v384_v54 = vld [vmem:[%s20341_s0 + $0x138] sm:$0xf] }
  0xc8   :  { %v806_v9 = vsel %vm15935_vm4, %v801_v13, %v805_v53  ;;  %v829_v26 = vrot.slane %v827_v11, 5  ;;  %v16217_v21 = vld [vmem:[#allocation2 + $0x110] sm:$0x1]  ;;  %v835_v35 = vshll.u32 %v544_v22, 16  ;;  %v841_v34 = vshll.u32 %v16215_v6, 16  ;;  %13719 = vmatprep.subr.bf16.mxu0 %v16201_v12 }
  0xc9   :  { %v824_v24 = vor.u32 %v823_v14, %v819_v0  ;;  %v11897_v29 = vcombine.low %v796_v19, %v806_v9  ;;  %v815_v30 = vrot.slane %v814_v20, 4  ;;  %v834_v43 = vrot.slane %v832_v27, 4  ;;  %v385_v61 = vld [vmem:[%s20341_s0 + $0x13c] sm:$0xf]  ;;  %494 = vst.msk [vmem:[#allocation2 + $0x138] sm:$0xf] %vm414_vm0, %v384_v54 }
  0xca   :  { %v546_v38 = vld [vmem:[#allocation2 + $0x120] sm:$0xf]  ;;  %v845_v42 = vshrl.u32 %v16215_v6, 16  ;;  %v851_v28 = vshll.u32 %v16217_v21, 16  ;;  %v837_v51 = vrot.slane %v835_v35, 5  ;;  %v843_v52 = vrot.slane %v841_v34, 5 }
  0xcb   :  { %v825_v33 = vrot.slane %v824_v24, 4  ;;  %v16223_v45 = vld [vmem:[#allocation2 + $0x124] sm:$0xf]  ;;  %13559 = vmatprep.mubr.bf16.mxu0 %v11897_v29  ;;  %v820_v32 = vsel %vm15935_vm4, %v815_v30, %v819_v0  ;;  %v11923_v53 = vcombine.low %v544_v22, %v16215_v6  ;;  %v856_v58 = vshrl.u32 %v546_v38, 16  ;;  %v386_v0 = vld [vmem:[%s20341_s0 + $0x140] sm:$0x1] }
  0xcc   :  { %v16228_v39 = vld [vmem:[#allocation2 + $0x128] sm:$0x1]  ;;  %v847_v57 = vrot.slane %v845_v42, 4  ;;  %v853_v49 = vrot.slane %v851_v28, 5  ;;  %v838_v1 = vor.u32 %v837_v51, %v834_v43  ;;  %v859_v5 = vshll.u32 %v546_v38, 16 }
  0xcd   :  { %v830_v55 = vsel %vm15935_vm4, %v825_v33, %v829_v26  ;;  %13611 = vmatprep.mubr.bf16.mxu1 %v11923_v53  ;;  %v865_v8 = vshll.u32 %v16223_v45, 16  ;;  %495 = vst.msk [vmem:[#allocation2 + $0x13c] sm:$0xf] %vm414_vm0, %v385_v61  ;;  %v390_v13 = vld [vmem:[%s20341_s0 + $0x150] sm:$0xf]  ;;  %v858_v11 = vrot.slane %v856_v58, 4  ;;  %v11924_v26 = vcombine.low %v546_v38, %v16223_v45 }
  0xce   :  { %v11898_v63 = vcombine.low %v820_v32, %v830_v55  ;;  %v848_v14 = vor.u32 %v847_v57, %v843_v52  ;;  %v869_v15 = vshrl.u32 %v16223_v45, 16  ;;  %v875_v19 = vshll.u32 %v16228_v39, 16  ;;  %496 = vst.msk [vmem:[#allocation2 + $0x140] sm:$0x1] %vm417_vm1, %v386_v0  ;;  %v391_v20 = vld [vmem:[%s20341_s0 + $0x154] sm:$0xf] }
  0xcf   :  { %500 = vst.msk [vmem:[#allocation2 + $0x150] sm:$0xf] %vm414_vm0, %v390_v13  ;;  %v839_v22 = vrot.slane %v838_v1, 4  ;;  %v861_v9 = vrot.slane %v859_v5, 5  ;;  %v867_v24 = vrot.slane %v865_v8, 5  ;;  %v1623_v34 = vrot.slane %v15909_v36, 5  ;;  %13612 = vmatmul.mubr.bf16.gmra.mxu1 %v11924_v26 }
  0xd0   :  { %13560 = vmatmul.mubr.bf16.gmra.mxu0 %v11898_v63  ;;  %v392_v27 = vld [vmem:[%s20341_s0 + $0x158] sm:$0x1]  ;;  %501 = vst.msk [vmem:[#allocation2 + $0x154] sm:$0xf] %vm414_vm0, %v391_v20  ;;  %v849_v29 = vrot.slane %v848_v14, 4  ;;  %v871_v30 = vrot.slane %v869_v15, 4 }
  0xd1   :  { %v877_v35 = vrot.slane %v875_v19, 5  ;;  %502 = vst.msk [vmem:[#allocation2 + $0x158] sm:$0x1] %vm417_vm1, %v392_v27  ;;  %v844_v33 = vsel %vm15935_vm4, %v839_v22, %v843_v52  ;;  %v862_v43 = vor.u32 %v861_v9, %v858_v11  ;;  %v396_v28 = vld [vmem:[%s20341_s0 + $0x168] sm:$0xf]  ;;  %v16275_v52 = vrot.slane %v1623_v34, 4 }
  0xd2   :  { %v854_v38 = vsel %vm15935_vm4, %v849_v29, %v853_v49  ;;  %v872_v42 = vor.u32 %v871_v30, %v867_v24  ;;  %v548_v53 = vld [vmem:[#allocation2 + $0x138] sm:$0xf]  ;;  %v397_v54 = vld [vmem:[%s20341_s0 + $0x16c] sm:$0xf]  ;;  %506 = vst.msk [vmem:[#allocation2 + $0x168] sm:$0xf] %vm414_vm0, %v396_v28 }
  0xd3   :  { %v11899_v32 = vcombine.low %v844_v33, %v854_v38  ;;  %v863_v51 = vrot.slane %v862_v43, 4  ;;  %v880_v49 = vshrl.u32 %v548_v53, 16  ;;  %v883_v58 = vshll.u32 %v548_v53, 16  ;;  %507 = vst.msk [vmem:[#allocation2 + $0x16c] sm:$0xf] %vm414_vm0, %v397_v54 }
  0xd4   :  { %v873_v55 = vrot.slane %v872_v42, 4  ;;  %v16277_v57 = vld [vmem:[#allocation2 + $0x13c] sm:$0xf]  ;;  %v1630_v61 = vrot.slane %v15921_v46, 5  ;;  %v322_v47 = vld [vmem:[%s20341_s0 + $0x40] sm:$0xf] }
  0xd5   :  { %13563 = vmatprep.mubr.bf16.mxu0 %v11899_v32  ;;  %v868_v63 = vsel %vm15935_vm4, %v863_v51, %v867_v24  ;;  %v16283_v1 = vld [vmem:[#allocation2 + $0x140] sm:$0x1]  ;;  %v889_v5 = vshll.u32 %v16277_v57, 16  ;;  %v893_v8 = vshrl.u32 %v16277_v57, 16  ;;  %v11925_v0 = vcombine.low %v548_v53, %v16277_v57  ;;  %432 = vst.msk [vmem:[#allocation2 + $0x40] sm:$0xf] %vm414_vm0, %v322_v47 }
  0xd6   :  { %v550_v13 = vld [vmem:[#allocation2 + $0x150] sm:$0xf]  ;;  %v878_v14 = vsel %vm15935_vm4, %v873_v55, %v877_v35  ;;  %v882_v11 = vrot.slane %v880_v49, 4  ;;  %v885_v15 = vrot.slane %v883_v58, 5  ;;  %v899_v19 = vshll.u32 %v16283_v1, 16 }
  0xd7   :  { %v16291_v20 = vld [vmem:[#allocation2 + $0x154] sm:$0xf]  ;;  %v11900_v22 = vcombine.low %v868_v63, %v878_v14  ;;  %v891_v9 = vrot.slane %v889_v5, 5  ;;  %v895_v24 = vrot.slane %v893_v8, 4  ;;  %13615 = vmatprep.mubr.bf16.mxu1 %v11925_v0  ;;  %v904_v27 = vshrl.u32 %v550_v13, 16 }
  0xd8   :  { %v16293_v26 = vld [vmem:[#allocation2 + $0x158] sm:$0x1]  ;;  %v886_v29 = vor.u32 %v885_v15, %v882_v11  ;;  %v901_v30 = vrot.slane %v899_v19, 5  ;;  %v907_v33 = vshll.u32 %v550_v13, 16  ;;  %v913_v43 = vshll.u32 %v16291_v20, 16 }
  0xd9   :  { %v398_v35 = vld [vmem:[%s20341_s0 + $0x170] sm:$0x1]  ;;  %13564 = vmatmul.mubr.bf16.gmra.mxu0 %v11900_v22  ;;  %v896_v38 = vor.u32 %v895_v24, %v891_v9  ;;  %v906_v42 = vrot.slane %v904_v27, 4  ;;  %v917_v28 = vshrl.u32 %v16291_v20, 16  ;;  %v923_v32 = vshll.u32 %v16293_v26, 16 }
  0xda   :  { %508 = vst.msk [vmem:[#allocation2 + $0x170] sm:$0x1] %vm417_vm1, %v398_v35  ;;  %v402_v51 = vld [vmem:[%s20341_s0 + $0x180] sm:$0xf]  ;;  %v887_v53 = vrot.slane %v886_v29, 4  ;;  %v909_v54 = vrot.slane %v907_v33, 5  ;;  %v11926_v49 = vcombine.low %v550_v13, %v16291_v20 }
  0xdb   :  { %v915_v55 = vrot.slane %v913_v43, 5  ;;  %v552_v58 = vld [vmem:[#allocation2 + $0x168] sm:$0xf]  ;;  %512 = vst.msk [vmem:[#allocation2 + $0x180] sm:$0xf] %vm414_vm0, %v402_v51  ;;  %v897_v63 = vrot.slane %v896_v38, 4 }
  0xdc   :  { %v919_v5 = vrot.slane %v917_v28, 4  ;;  %v925_v8 = vrot.slane %v923_v32, 5  ;;  %v16307_v0 = vld [vmem:[#allocation2 + $0x16c] sm:$0xf]  ;;  %v928_v14 = vshrl.u32 %v552_v58, 16  ;;  %v892_v11 = vsel %vm15935_vm4, %v887_v53, %v891_v9  ;;  %13616 = vmatmul.mubr.bf16.gmra.mxu1 %v11926_v49 }
  0xdd   :  { %v910_v15 = vor.u32 %v909_v54, %v906_v42  ;;  %v931_v19 = vshll.u32 %v552_v58, 16  ;;  %v937_v22 = vshll.u32 %v16307_v0, 16  ;;  %v403_v13 = vld [vmem:[%s20341_s0 + $0x184] sm:$0xf]  ;;  %v404_v24 = vld [vmem:[%s20341_s0 + $0x188] sm:$0x1]  ;;  %v902_v9 = vsel %vm15935_vm4, %v897_v63, %v901_v30 }
  0xde   :  { %v20411_v27 = vmov 0  ;;  %v920_v29 = vor.u32 %v919_v5, %v915_v55  ;;  %v930_v33 = vrot.slane %v928_v14, 4  ;;  %v941_v43 = vshrl.u32 %v16307_v0, 16  ;;  %513 = vst.msk [vmem:[#allocation2 + $0x184] sm:$0xf] %vm414_vm0, %v403_v13 }
  0xdf   :  { %v20412_v27 = vsel %vm16320_vm7, 4294967295, %v20411_v27  ;;  %514 = vst.msk [vmem:[#allocation2 + $0x188] sm:$0x1] %vm417_vm1, %v404_v24  ;;  %v11901_v35 = vcombine.low %v892_v11, %v902_v9  ;;  %v911_v38 = vrot.slane %v910_v15, 4  ;;  %v933_v42 = vrot.slane %v931_v19, 5 }
  0xe0   :  { %20413 = vst [vmem:[#allocation15_spill] sm:$0xff] %v20412_v27  ;;  %v939_v28 = vrot.slane %v937_v22, 5  ;;  %v921_v32 = vrot.slane %v920_v29, 4  ;;  %v943_v51 = vrot.slane %v941_v43, 4  ;;  %v11927_v53 = vcombine.low %v552_v58, %v16307_v0  ;;  %v1570_v5 = vld [vmem:[#allocation2] sm:$0xe] }
  0xe1   :  { %v16335_v30 = vsel %vm16320_vm7, %v16275_v52, %v1626_v44  ;;  %13567 = vmatprep.mubr.bf16.mxu0 %v11901_v35  ;;  %v916_v54 = vsel %vm15935_vm4, %v911_v38, %v915_v55  ;;  %v16339_v49 = vld [vmem:[#allocation2 + $0x170] sm:$0x1]  ;;  %v934_v63 = vor.u32 %v933_v42, %v930_v33  ;;  %v11937_v15 = vrot.slane %v1570_v5, 9  ;;  %v1571_v19 = vld [vmem:[#allocation2 + $0x18] sm:$0xe] }
  0xe2   :  { %v926_v14 = vsel %vm15935_vm4, %v921_v32, %v925_v8  ;;  %v944_v11 = vor.u32 %v943_v51, %v939_v28  ;;  %v947_v58 = vshll.u32 %v16339_v49, 16  ;;  %13619 = vmatprep.mubr.bf16.mxu1 %v11927_v53  ;;  %v554_v37 = vld [vmem:[#allocation2 + $0x180] sm:$0xf]  ;;  %v11938_v8 = vrot.slane %v1571_v19, 9  ;;  %v310_v5 = vld [vmem:[%s20341_s0 + $0x10] sm:$0xf] }
  0xe3   :  { %v11902_v44 = vcombine.low %v916_v54, %v926_v14  ;;  %v935_v52 = vrot.slane %v934_v63, 4  ;;  %v952_v22 = vshrl.u32 %v554_v37, 16  ;;  %v955_v13 = vshll.u32 %v554_v37, 16  ;;  %v315_v14 = vld [vmem:[%s20341_s0 + $0x24] sm:$0xf] }
  0xe4   :  { %v945_v24 = vrot.slane %v944_v11, 4  ;;  %v949_v55 = vrot.slane %v947_v58, 5  ;;  %v16348_v9 = vsel %vm16320_vm7, %v11937_v15, %v1623_v34  ;;  %v316_v11 = vld [vmem:[%s20341_s0 + $0x28] sm:$0xf]  ;;  %v1632_v19 = vrot.slane %v1630_v61, 4 }
  0xe5   :  { %13568 = vmatmul.mubr.bf16.gmra.mxu0 %v11902_v44  ;;  %v940_v29 = vsel %vm15935_vm4, %v935_v52, %v939_v28  ;;  %v16352_v33 = vld [vmem:[#allocation2 + $0x184] sm:$0xf]  ;;  %v954_v35 = vrot.slane %v952_v22, 4  ;;  %v957_v38 = vrot.slane %v955_v13, 5  ;;  %v11969_v42 = vcombine.low %v16348_v9, %v16335_v30  ;;  %v309_v28 = vld [vmem:[%s20341_s0 + $0xc] sm:$0xf] }
  0xe6   :  { %v16354_v43 = vld [vmem:[#allocation2 + $0x188] sm:$0x1]  ;;  %v950_v36 = vsel %vm15935_vm4, %v945_v24, %v949_v55  ;;  %v961_v34 = vshll.u32 %v16352_v33, 16  ;;  %v965_v32 = vshrl.u32 %v16352_v33, 16  ;;  %v11928_v63 = vcombine.low %v554_v37, %v16352_v33  ;;  %419 = vst.msk [vmem:[#allocation2 + $0xc] sm:$0xf] %vm414_vm0, %v309_v28 }
  0xe7   :  { %v971_v51 = vshll.u32 %v16354_v43, 16  ;;  %v11903_v53 = vcombine.low %v940_v29, %v950_v36  ;;  %v958_v54 = vor.u32 %v957_v38, %v954_v35  ;;  %v16381_v37 = vsel %vm16320_vm7, %v11938_v8, %v1630_v61  ;;  %420 = vst.msk [vmem:[#allocation2 + $0x10] sm:$0xf] %vm414_vm0, %v310_v5  ;;  %425 = vst.msk [vmem:[#allocation2 + $0x24] sm:$0xf] %vm414_vm0, %v315_v14 }
  0xe8   :  { %v963_v58 = vrot.slane %v961_v34, 5  ;;  %v967_v15 = vrot.slane %v965_v32, 4  ;;  %426 = vst.msk [vmem:[#allocation2 + $0x28] sm:$0xf] %vm414_vm0, %v316_v11  ;;  %v1572_v44 = vld [vmem:[#allocation2 + $0x30] sm:$0xe]  ;;  %13620 = vmatmul.mubr.bf16.gmra.mxu1 %v11928_v63  ;;  %v16395_v46 = vsel %vm16320_vm7, %v1632_v19, %v1633_v2 }
  0xe9   :  { %13571 = vmatprep.mubr.bf16.mxu0 %v11903_v53  ;;  %v959_v52 = vrot.slane %v958_v54, 4  ;;  %v973_v22 = vrot.slane %v971_v51, 5  ;;  %v1637_v13 = vrot.slane %v15940_v3, 5  ;;  %v16389_v24 = vld [vmem:[#allocation2 + $0x48] sm:$0xe]  ;;  %v11939_v61 = vrot.slane %v1572_v44, 9 }
  0xea   :  { %v968_v55 = vor.u32 %v967_v15, %v963_v58  ;;  %v1644_v8 = vrot.slane %v15953_v18, 5  ;;  %v11970_v29 = vcombine.low %v16381_v37, %v16395_v46  ;;  %v1640_v35 = vrot.slane %v15944_v10, 5  ;;  %v321_v3 = vld [vmem:[%s20341_s0 + $0x3c] sm:$0xf]  ;;  %v327_v10 = vld [vmem:[%s20341_s0 + $0x54] sm:$0xf] }
  0xeb   :  { %v11940_v38 = vrot.slane %v16389_v24, 9  ;;  %v964_v2 = vsel %vm15935_vm4, %v959_v52, %v963_v58  ;;  %v1639_v34 = vrot.slane %v1637_v13, 4  ;;  %431 = vst.msk [vmem:[#allocation2 + $0x3c] sm:$0xf] %vm414_vm0, %v321_v3  ;;  %v328_v51 = vld [vmem:[%s20341_s0 + $0x58] sm:$0xf] }
  0xec   :  { %v969_v36 = vrot.slane %v968_v55, 4  ;;  %v16412_v32 = vrot.slane %v1644_v8, 4  ;;  %437 = vst.msk [vmem:[#allocation2 + $0x54] sm:$0xf] %vm414_vm0, %v327_v10  ;;  %v1574_v28 = vld [vmem:[#allocation2 + $0x60] sm:$0xe]  ;;  %v1638_v10 = vsel %vm16320_vm7, %v11939_v61, %v1637_v13 }
  0xed   :  { %v1651_v53 = vrot.slane %v15975_v40, 5  ;;  %v1654_v54 = vrot.slane %v15984_v50, 5  ;;  %v1647_v5 = vrot.slane %v15955_v23, 5  ;;  %438 = vst.msk [vmem:[#allocation2 + $0x58] sm:$0xf] %vm414_vm0, %v328_v51  ;;  %v11941_v14 = vrot.slane %v1574_v28, 9 }
  0xee   :  { %v974_v63 = vsel %vm15935_vm4, %v969_v36, %v973_v22  ;;  %v1575_v11 = vld [vmem:[#allocation2 + $0x78] sm:$0xe]  ;;  %v14718_v58 = vld [vmem:[%s20342_s1 + $0x170] sm:$0xff]   ;;  %v1658_v22 = vrot.slane %v16035_v16, 5  ;;  %v1661_v55 = vrot.slane %v16037_v17, 5  ;;  %v1665_v9 = vrot.slane %v16082_v59, 5 }
  0xef   :  { %v11904_v15 = vcombine.low %v964_v2, %v974_v63  ;;  %v14703_v19 = vld [vmem:[#allocation2 + $0xc] sm:$0xff]   ;;  %v1653_v44 = vrot.slane %v1651_v53, 4  ;;  %v14704_v52 = vld [vmem:[#allocation2 + $0x24] sm:$0xff]   ;;  %v16434_v40 = vsel %vm16320_vm7, %v11941_v14, %v1651_v53  ;;  %v11942_v50 = vrot.slane %v1575_v11, 9  ;;  %v1578_v37 = vld [vmem:[#allocation2 + $0xd8] sm:$0xe] }
  0xf0   :  { %13687 = vmatprep.mubr.bf16.mxu1 %v14703_v19  ;;  %v333_v47 = vld [vmem:[%s20341_s0 + $0x6c] sm:$0xf]  ;;  %v1660_v2 = vrot.slane %v1658_v22, 4  ;;  %v334_v36 = vld [vmem:[%s20341_s0 + $0x70] sm:$0xf]  ;;  %v1641_v51 = vsel %vm16320_vm7, %v1639_v34, %v1640_v35  ;;  %v1668_v53 = vrot.slane %v16085_v4, 5 }
  0xf1   :  { %13572 = vmatmul.mubr.bf16.gmra.mxu0 %v11904_v15  ;;  %v16440_v3 = vsel %vm16320_vm7, %v1653_v44, %v1654_v54  ;;  %13688 = vmatmul.mubr.bf16.vlgmr.msra.gmra.mxu1 %v14704_v52  ;;  %v16452_v17 = vsel %vm16320_vm7, %v11942_v50, %v1658_v22  ;;  %443 = vst.msk [vmem:[#allocation2 + $0x6c] sm:$0xf] %vm414_vm0, %v333_v47  ;;  %v339_v30 = vld [vmem:[%s20341_s0 + $0x84] sm:$0xf]  ;;  %444 = vst.msk [vmem:[#allocation2 + $0x70] sm:$0xf] %vm414_vm0, %v334_v36 }
  0xf2   :  { %13639 = vmatprep.mubr.bf16.mxu0 %v11969_v42  ;;  %v11973_v16 = vcombine.low %v16434_v40, %v16440_v3  ;;  %v16465_v42 = vld [vmem:[%s20342_s1 + $0x168] sm:$0xff]   ;;  %v14706_v28 = vld [vmem:[#allocation2 + $0x3c] sm:$0xff]   ;;  %449 = vst.msk [vmem:[#allocation2 + $0x84] sm:$0xf] %vm414_vm0, %v339_v30  ;;  %13768 = vmatpush3.bf16.msra.mxu1 %v16209_v7  ;;  %v16477_v59 = vsel %vm16320_vm7, %v1660_v2, %v1661_v55  ;;  %v1576_v61 = vld [vmem:[#allocation2 + $0x90] sm:$0xe] }
  0xf3   :  { %v340_v13 = vld [vmem:[%s20341_s0 + $0x88] sm:$0xf]  ;;  %13769 = vmatprep.subr.bf16.mxu1 %v14718_v58  ;;  %v14705_v35 = vld [vmem:[%s20342_s1 + $0x130] sm:$0xff]   ;;  %13691 = vmatprep.mubr.bf16.mxu1 %v14706_v28  ;;  %v11974_v4 = vcombine.low %v16452_v17, %v16477_v59  ;;  %v11943_v7 = vrot.slane %v1576_v61, 9  ;;  %v1667_v54 = vrot.slane %v1665_v9, 4  ;;  %v1672_v63 = vrot.slane %v16110_v25, 5 }
  0xf4   :  { %v14707_v34 = vld [vmem:[#allocation2 + $0x54] sm:$0xff]   ;;  %450 = vst.msk [vmem:[#allocation2 + $0x88] sm:$0xf] %vm414_vm0, %v340_v13  ;;  %v11971_v14 = vcombine.low %v1638_v10, %v1641_v51  ;;  %v1577_v11 = vld [vmem:[#allocation2 + $0xa8] sm:$0xe]  ;;  %v1675_v15 = vrot.slane %v16114_v31, 5  ;;  %v1648_v10 = vsel %vm16320_vm7, %v16412_v32, %v1647_v5 }
  0xf5   :  { %v1679_v19 = vrot.slane %v16126_v48, 5  ;;  %v16493_v44 = vsel %vm16320_vm7, %v11943_v7, %v1665_v9  ;;  %v16497_v52 = vsel %vm16320_vm7, %v1667_v54, %v1668_v53  ;;  %v11944_v50 = vrot.slane %v1577_v11, 9  ;;  %v345_v25 = vld [vmem:[%s20341_s0 + $0x9c] sm:$0xf]  ;;  %v14723_v31 = vld [vmem:[%s20342_s1 + $0x160] sm:$0xff]   ;;  %v14708_v2 = vld [vmem:[%s20342_s1 + $0x128] sm:$0xff]  }
  0xf6   :  { %v1674_v22 = vrot.slane %v1672_v63, 4  ;;  %13770 = vmatpush3.bf16.msra.mxu1 %v14718_v58  ;;  %v11975_v48 = vcombine.low %v16493_v44, %v16497_v52  ;;  %v346_v55 = vld [vmem:[%s20341_s0 + $0xa0] sm:$0xf]  ;;  %455 = vst.msk [vmem:[#allocation2 + $0x9c] sm:$0xf] %vm414_vm0, %v345_v25  ;;  %v1645_v9 = vsel %vm16320_vm7, %v11940_v38, %v1644_v8  ;;  %v11945_v28 = vrot.slane %v1578_v37, 9 }
  0xf7   :  { %v351_v47 = vld [vmem:[%s20341_s0 + $0xb4] sm:$0xf]  ;;  %v352_v58 = vld [vmem:[%s20341_s0 + $0xb8] sm:$0xf]  ;;  %13771 = vmatprep.subr.bf16.mxu1 %v16465_v42  ;;  %v16526_v36 = vsel %vm16320_vm7, %v11944_v50, %v1672_v63  ;;  %456 = vst.msk [vmem:[#allocation2 + $0xa0] sm:$0xf] %vm414_vm0, %v346_v55  ;;  %v11972_v5 = vcombine.low %v1645_v9, %v1648_v10 }
  0xf8   :  { %v16530_v30 = vsel %vm16320_vm7, %v1674_v22, %v1675_v15  ;;  %461 = vst.msk [vmem:[#allocation2 + $0xb4] sm:$0xf] %vm414_vm0, %v351_v47  ;;  %462 = vst.msk [vmem:[#allocation2 + $0xb8] sm:$0xf] %vm414_vm0, %v352_v58  ;;  %v1681_v46 = vrot.slane %v1679_v19, 4  ;;  %v14709_v51 = vld [vmem:[#allocation2 + $0x6c] sm:$0xff]   ;;  %v16558_v8 = vsel %vm16320_vm7, %v11945_v28, %v1679_v19 }
  0xf9   :  { %13640 = vmatmul.mubr.bf16.vlgmr.msra.gmra.mxu0 %v11970_v29  ;;  %v1682_v29 = vrot.slane %v16134_v60, 5  ;;  %v11976_v60 = vcombine.low %v16526_v36, %v16530_v30  ;;  %13692 = vmatmul.mubr.bf16.gmra.mxu1 %v14707_v34  ;;  %v1686_v24 = vrot.slane %v16145_v56, 5  ;;  %v1689_v23 = vrot.slane %v16168_v41, 5  ;;  %v14727_v32 = vld [vmem:[%s20342_s1 + $0x158] sm:$0xff]   ;;  %v14711_v56 = vld [vmem:[%s20342_s1 + $0x120] sm:$0xff]   ;;  %v14728_v50 = vld [vmem:[%s20342_s1 + $0x150] sm:$0xff]  }
  0xfa   :  { %13720 = vmatpush3.bf16.msra.mxu0 %v16201_v12  ;;  %13643 = vmatprep.mubr.bf16.mxu0 %v11971_v14  ;;  %v1579_v12 = vld [vmem:[#allocation2 + $0xf0] sm:$0xe]  ;;  %v363_v61 = vld [vmem:[%s20341_s0 + $0xe4] sm:$0xf]  ;;  %v1693_v34 = vrot.slane %v16215_v6, 5  ;;  %v14714_v15 = vld [vmem:[%s20342_s1 + $0x118] sm:$0xff]  }
  0xfb   :  { %13721 = vmatprep.subr.bf16.mxu0 %v14705_v35  ;;  %v16552_v18 = vsel %vm16320_vm7, %v1681_v46, %v1682_v29  ;;  %13695 = vmatprep.mubr.bf16.mxu1 %v14709_v51  ;;  %v11946_v38 = vrot.slane %v1579_v12, 9  ;;  %v14710_v53 = vld [vmem:[#allocation2 + $0x84] sm:$0xff]   ;;  %v1688_v13 = vrot.slane %v1686_v24, 4  ;;  %473 = vst.msk [vmem:[#allocation2 + $0xe4] sm:$0xf] %vm414_vm0, %v363_v61  ;;  %v1696_v19 = vrot.slane %v16217_v21, 5 }
  0xfc   :  { %13772 = vmatpush3.bf16.msra.mxu1 %v16465_v42  ;;  %v11977_v41 = vcombine.low %v16558_v8, %v16552_v18  ;;  %v364_v42 = vld [vmem:[%s20341_s0 + $0xe8] sm:$0xf]  ;;  %v369_v54 = vld [vmem:[%s20341_s0 + $0xfc] sm:$0xf]  ;;  %v370_v63 = vld [vmem:[%s20341_s0 + $0x100] sm:$0xf] }
  0xfd   :  { %13773 = vmatprep.subr.bf16.mxu1 %v14723_v31  ;;  %v16578_v7 = vsel %vm16320_vm7, %v11946_v38, %v1686_v24  ;;  %474 = vst.msk [vmem:[#allocation2 + $0xe8] sm:$0xf] %vm414_vm0, %v364_v42  ;;  %v16590_v6 = vsel %vm16320_vm7, %v1688_v13, %v1689_v23  ;;  %479 = vst.msk [vmem:[#allocation2 + $0xfc] sm:$0xf] %vm414_vm0, %v369_v54  ;;  %v1695_v11 = vrot.slane %v1693_v34, 4  ;;  %v1703_v55 = vrot.slane %v16228_v39, 5 }
  0xfe   :  { %13722 = vmatpush3.bf16.msra.mxu0 %v14705_v35  ;;  %480 = vst.msk [vmem:[#allocation2 + $0x100] sm:$0xf] %vm414_vm0, %v370_v63  ;;  %v14712_v35 = vld [vmem:[#allocation2 + $0x9c] sm:$0xff]   ;;  %v11978_v14 = vcombine.low %v16578_v7, %v16590_v6  ;;  %v1580_v22 = vld [vmem:[#allocation2 + $0x108] sm:$0xe]  ;;  %v14719_v29 = vld [vmem:[%s20342_s1 + $0x110] sm:$0xff]  }
  0xff   :  { %13723 = vmatprep.subr.bf16.mxu0 %v14708_v2  ;;  %v1581_v25 = vld [vmem:[#allocation2 + $0x120] sm:$0xe]  ;;  %v11947_v47 = vrot.slane %v1580_v22, 9  ;;  %v16610_v21 = vsel %vm16320_vm7, %v1695_v11, %v1696_v19  ;;  %v14732_v40 = vld [vmem:[%s20342_s1 + $0x148] sm:$0xff]   ;;  %v376_v39 = vld [vmem:[%s20341_s0 + $0x118] sm:$0xf] }
 0x100   :  { %13774 = vmatpush3.bf16.msra.mxu1 %v14723_v31  ;;  %v1700_v31 = vrot.slane %v16223_v45, 5  ;;  %v11948_v58 = vrot.slane %v1581_v25, 9  ;;  %v375_v45 = vld [vmem:[%s20341_s0 + $0x114] sm:$0xf]  ;;  %486 = vst.msk [vmem:[#allocation2 + $0x118] sm:$0xf] %vm414_vm0, %v376_v39 }
 0x101   :  { %13644 = vmatmul.mubr.bf16.gmra.mxu0 %v11972_v5  ;;  %13775 = vmatprep.subr.bf16.mxu1 %v14727_v32  ;;  %v16624_v37 = vsel %vm16320_vm7, %v11947_v47, %v1693_v34  ;;  %485 = vst.msk [vmem:[#allocation2 + $0x114] sm:$0xf] %vm414_vm0, %v375_v45  ;;  %v381_v24 = vld [vmem:[%s20341_s0 + $0x12c] sm:$0xf]  ;;  %v14733_v23 = vld [vmem:[%s20342_s1 + $0x140] sm:$0xff]   ;;  %v1721_v59 = vrot.slane %v16307_v0, 5 }
 0x102   :  { %13647 = vmatprep.mubr.bf16.mxu0 %v11973_v16  ;;  %13724 = vmatpush3.bf16.msra.mxu0 %v14708_v2  ;;  %v1702_v3 = vrot.slane %v1700_v31, 4  ;;  %v1707_v16 = vrot.slane %v16277_v57, 5  ;;  %v14713_v2 = vld [vmem:[#allocation2 + $0xb4] sm:$0xff]   ;;  %v16628_v46 = vsel %vm16320_vm7, %v11948_v58, %v1700_v31  ;;  %v1710_v57 = vrot.slane %v16283_v1, 5  ;;  %v382_v1 = vld [vmem:[%s20341_s0 + $0x130] sm:$0xf] }
 0x103   :  { %13696 = vmatmul.mubr.bf16.gmra.mxu1 %v14710_v53  ;;  %13725 = vmatprep.subr.bf16.mxu0 %v14711_v56  ;;  %v11979_v10 = vcombine.low %v16624_v37, %v16610_v21  ;;  %491 = vst.msk [vmem:[#allocation2 + $0x12c] sm:$0xf] %vm414_vm0, %v381_v24  ;;  %492 = vst.msk [vmem:[#allocation2 + $0x130] sm:$0xf] %vm414_vm0, %v382_v1  ;;  %v1583_v5 = vld [vmem:[#allocation2 + $0x150] sm:$0xe] }
 0x104   :  { %13699 = vmatprep.mubr.bf16.mxu1 %v14712_v35  ;;  %13776 = vmatpush3.bf16.msra.mxu1 %v14727_v32  ;;  %v14715_v9 = vld [vmem:[#allocation2 + $0xe4] sm:$0xff]   ;;  %v16640_v51 = vsel %vm16320_vm7, %v1702_v3, %v1703_v55  ;;  %v1709_v28 = vrot.slane %v1707_v16, 4  ;;  %v1582_v32 = vld [vmem:[#allocation2 + $0x138] sm:$0xe]  ;;  %v1714_v53 = vrot.slane %v16291_v20, 5  ;;  %v11950_v42 = vrot.slane %v1583_v5, 9 }
 0x105   :  { %13777 = vmatprep.subr.bf16.mxu1 %v14728_v50  ;;  %v11980_v12 = vcombine.low %v16628_v46, %v16640_v51  ;;  %v14724_v13 = vld [vmem:[%s20342_s1 + $0x108] sm:$0xff]   ;;  %v11949_v61 = vrot.slane %v1582_v32, 9  ;;  %v387_v20 = vld [vmem:[%s20341_s0 + $0x144] sm:$0xf]  ;;  %v1724_v52 = vrot.slane %v16339_v49, 5  ;;  %v16691_v0 = vld [vmem:[%s20342_s1 + $0x1f8] sm:$0xff]  }
 0x106   :  { %13726 = vmatpush3.bf16.msra.mxu0 %v14711_v56  ;;  %v16657_v38 = vsel %vm16320_vm7, %v1709_v28, %v1710_v57  ;;  %v1717_v56 = vrot.slane %v16293_v26, 5  ;;  %v1716_v17 = vrot.slane %v1714_v53, 4  ;;  %v388_v26 = vld [vmem:[%s20341_s0 + $0x148] sm:$0xf]  ;;  %v16683_v44 = vsel %vm16320_vm7, %v11950_v42, %v1714_v53  ;;  %497 = vst.msk [vmem:[#allocation2 + $0x144] sm:$0xf] %vm414_vm0, %v387_v20 }
 0x107   :  { %13727 = vmatprep.subr.bf16.mxu0 %v14714_v15  ;;  %498 = vst.msk [vmem:[#allocation2 + $0x148] sm:$0xf] %vm414_vm0, %v388_v26  ;;  %v393_v63 = vld [vmem:[%s20341_s0 + $0x15c] sm:$0xf]  ;;  %v394_v49 = vld [vmem:[%s20341_s0 + $0x160] sm:$0xf] }
 0x108   :  { %13778 = vmatpush3.bf16.msra.mxu1 %v14728_v50  ;;  %v16697_v54 = vsel %vm16320_vm7, %v1716_v17, %v1717_v56  ;;  %v14729_v35 = vld [vmem:[%s20342_s1 + $0x100] sm:$0xff]   ;;  %503 = vst.msk [vmem:[#allocation2 + $0x15c] sm:$0xf] %vm414_vm0, %v393_v63  ;;  %504 = vst.msk [vmem:[#allocation2 + $0x160] sm:$0xf] %vm414_vm0, %v394_v49  ;;  %v1723_v19 = vrot.slane %v1721_v59, 4 }
 0x109   :  { %13648 = vmatmul.mubr.bf16.gmra.mxu0 %v11974_v4  ;;  %13779 = vmatprep.subr.bf16.mxu1 %v14732_v40  ;;  %v16679_v4 = vsel %vm16320_vm7, %v11949_v61, %v1707_v16  ;;  %v11982_v11 = vcombine.low %v16683_v44, %v16697_v54  ;;  %v1584_v50 = vld [vmem:[#allocation2 + $0x168] sm:$0xe]  ;;  %v1585_v22 = vld [vmem:[#allocation2 + $0x180] sm:$0xe]  ;;  %v1728_v25 = vrot.slane %v16352_v33, 5  ;;  %v1731_v31 = vrot.slane %v16354_v43, 5 }
 0x10a   :  { %13651 = vmatprep.mubr.bf16.mxu0 %v11975_v48  ;;  %13728 = vmatpush3.bf16.msra.mxu0 %v14714_v15  ;;  %v14716_v48 = vld [vmem:[#allocation2 + $0xfc] sm:$0xff]   ;;  %v11981_v34 = vcombine.low %v16679_v4, %v16657_v38  ;;  %v14720_v15 = vld [vmem:[#allocation2 + $0x114] sm:$0xff]   ;;  %v11951_v55 = vrot.slane %v1584_v50, 9  ;;  %v16719_v47 = vsel %vm16320_vm7, %v1723_v19, %v1724_v52  ;;  %v11952_v58 = vrot.slane %v1585_v22, 9  ;;  %v406_v3 = vld [vmem:[%s20341_s0 + $0x190] sm:$0xf] }
 0x10b   :  { %13700 = vmatmul.mubr.bf16.gmra.mxu1 %v14713_v2  ;;  %13729 = vmatprep.subr.bf16.mxu0 %v14719_v29  ;;  %v1730_v33 = vrot.slane %v1728_v25, 4  ;;  %v399_v43 = vld [vmem:[%s20341_s0 + $0x174] sm:$0xf]  ;;  %v400_v36 = vld [vmem:[%s20341_s0 + $0x178] sm:$0xf]  ;;  %v14721_v45 = vld [vmem:[#allocation2 + $0x12c] sm:$0xff]  }
 0x10c   :  { %13703 = vmatprep.mubr.bf16.mxu1 %v14715_v9  ;;  %13780 = vmatpush3.bf16.msra.mxu1 %v14732_v40  ;;  %v16733_v30 = vsel %vm16320_vm7, %v11951_v55, %v1721_v59  ;;  %509 = vst.msk [vmem:[#allocation2 + $0x174] sm:$0xf] %vm414_vm0, %v399_v43  ;;  %510 = vst.msk [vmem:[#allocation2 + $0x178] sm:$0xf] %vm414_vm0, %v400_v36  ;;  %v16744_v18 = vld [vmem:[%s20342_s1 + $0x1b8] sm:$0xff]  }
 0x10d   :  { %13781 = vmatprep.subr.bf16.mxu1 %v14733_v23  ;;  %v11983_v8 = vcombine.low %v16733_v30, %v16719_v47  ;;  %v405_v40 = vld [vmem:[%s20341_s0 + $0x18c] sm:$0xf]  ;;  %516 = vst.msk [vmem:[#allocation2 + $0x190] sm:$0xf] %vm414_vm0, %v406_v3  ;;  %v311_v2 = vld [vmem:[%s20341_s0 + $0x14] sm:$0x1] }
 0x10e   :  { %13730 = vmatpush3.bf16.msra.mxu0 %v14719_v29  ;;  %515 = vst.msk [vmem:[#allocation2 + $0x18c] sm:$0xf] %vm414_vm0, %v405_v40  ;;  %v14725_v16 = vld [vmem:[#allocation2 + $0x144] sm:$0xff]   ;;  %v2442_v29 = vld [vmem:[#allocation2 + $0xc] sm:$0xf] }
 0x10f   :  { %13731 = vmatprep.subr.bf16.mxu0 %v14724_v13  ;;  %v2443_v57 = vld [vmem:[#allocation2 + $0x10] sm:$0xf]  ;;  %421 = vst.msk [vmem:[#allocation2 + $0x14] sm:$0x1] %vm417_vm1, %v311_v2  ;;  %v2491_v9 = vshrl.u32 %v2442_v29, 16  ;;  %v2494_v28 = vshll.u32 %v2442_v29, 16 }
 0x110   :  { %13782 = vmatpush3.bf16.msra.mxu1 %v14733_v23  ;;  %v2500_v24 = vshll.u32 %v2443_v57, 16  ;;  %v2504_v1 = vshrl.u32 %v2443_v57, 16  ;;  %v317_v23 = vld [vmem:[%s20341_s0 + $0x2c] sm:$0x1]  ;;  %v2445_v32 = vld [vmem:[#allocation2 + $0x24] sm:$0xf] }
 0x111   :  { %13652 = vmatmul.mubr.bf16.gmra.mxu0 %v11976_v60  ;;  %13863 = vmatprep.subr.bf16.mxu1 %v16691_v0  ;;  %v16737_v60 = vsel %vm16320_vm7, %v11952_v58, %v1728_v25  ;;  %427 = vst.msk [vmem:[#allocation2 + $0x2c] sm:$0x1] %vm417_vm1, %v317_v23  ;;  %v2446_v5 = vld [vmem:[#allocation2 + $0x28] sm:$0xf]  ;;  %v2493_v53 = vrot.slane %v2491_v9, 4  ;;  %v2496_v56 = vrot.slane %v2494_v28, 5 }
 0x112   :  { %13655 = vmatprep.mubr.bf16.mxu0 %v11977_v41  ;;  %13732 = vmatpush3.bf16.msra.mxu0 %v14724_v13  ;;  %v16750_v41 = vsel %vm16320_vm7, %v1730_v33, %v1731_v31  ;;  %v2502_v13 = vrot.slane %v2500_v24, 5  ;;  %v2506_v61 = vrot.slane %v2504_v1, 4  ;;  %v2515_v42 = vshrl.u32 %v2445_v32, 16  ;;  %v14726_v20 = vld [vmem:[#allocation2 + $0x15c] sm:$0xff]   ;;  %v3196_v59 = vld [vmem:[#allocation2 + $0xc] sm:$0xe] }
 0x113   :  { %13704 = vmatmul.mubr.bf16.gmra.mxu1 %v14716_v48  ;;  %13733 = vmatprep.subr.bf16.mxu0 %v14729_v35  ;;  %v11984_v39 = vcombine.low %v16737_v60, %v16750_v41  ;;  %v2518_v17 = vshll.u32 %v2445_v32, 16  ;;  %v2497_v26 = vor.u32 %v2496_v56, %v2493_v53  ;;  %v3197_v52 = vld [vmem:[#allocation2 + $0x24] sm:$0xe]  ;;  %v14730_v48 = vld [vmem:[#allocation2 + $0x174] sm:$0xff]   ;;  %v2528_v49 = vshrl.u32 %v2446_v5, 16 }
 0x114   :  { %13707 = vmatprep.mubr.bf16.mxu1 %v14720_v15  ;;  %v2507_v7 = vor.u32 %v2506_v61, %v2502_v13  ;;  %v2517_v6 = vrot.slane %v2515_v42, 4  ;;  %v12073_v21 = vrot.slane %v3196_v59, 9  ;;  %v3262_v37 = vrot.slane %v2443_v57, 5  ;;  %v2448_v43 = vld [vmem:[#allocation2 + $0x3c] sm:$0xf] }
 0x115   :  { %v2520_v63 = vrot.slane %v2518_v17, 5  ;;  %v2498_v15 = vrot.slane %v2497_v26, 4  ;;  %v12074_v22 = vrot.slane %v3197_v52, 9  ;;  %v2530_v58 = vrot.slane %v2528_v49, 4  ;;  %v329_v9 = vld [vmem:[%s20341_s0 + $0x5c] sm:$0x1] }
 0x116   :  { %13734 = vmatpush3.bf16.msra.mxu0 %v14729_v35  ;;  %v2444_v35 = vld [vmem:[#allocation2 + $0x14] sm:$0x1]  ;;  %v2508_v19 = vrot.slane %v2507_v7, 4  ;;  %v16783_v33 = vsel %vm16320_vm7, %v12073_v21, %v3262_v37  ;;  %v3264_v3 = vrot.slane %v3262_v37, 4  ;;  %v3269_v57 = vrot.slane %v2446_v5, 5  ;;  %v14731_v61 = vld [vmem:[#allocation2 + $0x18c] sm:$0xff]  }
 0x117   :  { %13815 = vmatprep.subr.bf16.mxu0 %v16744_v18  ;;  %v2510_v25 = vshll.u32 %v2444_v35, 16  ;;  %v2521_v55 = vor.u32 %v2520_v63, %v2517_v6  ;;  %v2503_v36 = vsel %vm15935_vm4, %v2498_v15, %v2502_v13  ;;  %v2449_v28 = vld [vmem:[#allocation2 + $0x40] sm:$0xf]  ;;  %v2539_v24 = vshrl.u32 %v2448_v43, 16  ;;  %439 = vst.msk [vmem:[#allocation2 + $0x5c] sm:$0x1] %vm417_vm1, %v329_v9 }
 0x118   :  { %v2447_v31 = vld [vmem:[#allocation2 + $0x2c] sm:$0x1]  ;;  %v2451_v23 = vld [vmem:[#allocation2 + $0x54] sm:$0xf]  ;;  %v3271_v53 = vrot.slane %v3269_v57, 4  ;;  %v2548_v26 = vshll.u32 %v2449_v28, 16 }
 0x119   :  { %13656 = vmatmul.mubr.bf16.gmra.mxu0 %v11978_v14  ;;  %v2524_v14 = vshll.u32 %v2446_v5, 16  ;;  %v2534_v40 = vshll.u32 %v2447_v31, 16  ;;  %v2522_v2 = vrot.slane %v2521_v55, 4  ;;  %v16808_v5 = vsel %vm16320_vm7, %v12074_v22, %v3269_v57  ;;  %v16810_v13 = vld [vmem:[#allocation2 + $0x58] sm:$0xf] }
 0x11a   :  { %13659 = vmatprep.mubr.bf16.mxu0 %v11979_v10  ;;  %v323_v10 = vld [vmem:[%s20341_s0 + $0x44] sm:$0x1]  ;;  %v2541_v56 = vrot.slane %v2539_v24, 4  ;;  %v2552_v7 = vshrl.u32 %v2449_v28, 16  ;;  %v2563_v52 = vshrl.u32 %v2451_v23, 16  ;;  %v2550_v37 = vrot.slane %v2548_v26, 5 }
 0x11b   :  { %13708 = vmatmul.mubr.bf16.gmra.mxu1 %v14721_v45  ;;  %v2526_v50 = vrot.slane %v2524_v14, 5  ;;  %433 = vst.msk [vmem:[#allocation2 + $0x44] sm:$0x1] %vm417_vm1, %v323_v10  ;;  %v3265_v45 = vrot.slane %v2444_v35, 5  ;;  %v2536_v46 = vrot.slane %v2534_v40, 5  ;;  %v2576_v55 = vshrl.u32 %v16810_v13, 16 }
 0x11c   :  { %13711 = vmatprep.mubr.bf16.mxu1 %v14725_v16  ;;  %v2512_v16 = vrot.slane %v2510_v25, 5  ;;  %v335_v63 = vld [vmem:[%s20341_s0 + $0x74] sm:$0x1]  ;;  %v2554_v10 = vrot.slane %v2552_v7, 4  ;;  %v2565_v15 = vrot.slane %v2563_v52, 4 }
 0x11d   :  { %v2531_v29 = vor.u32 %v2530_v58, %v2526_v50  ;;  %v3266_v51 = vsel %vm16320_vm7, %v3264_v3, %v3265_v45  ;;  %v2527_v4 = vsel %vm15935_vm4, %v2522_v2, %v2526_v50  ;;  %445 = vst.msk [vmem:[#allocation2 + $0x74] sm:$0x1] %vm417_vm1, %v335_v63  ;;  %v2572_v50 = vshll.u32 %v16810_v13, 16  ;;  %v341_v44 = vld [vmem:[%s20341_s0 + $0x8c] sm:$0x1] }
 0x11e   :  { %v2513_v38 = vsel %vm15935_vm4, %v2508_v19, %v2512_v16  ;;  %v12105_v1 = vcombine.low %v16783_v33, %v3266_v51  ;;  %v2566_v19 = vshll.u32 %v2451_v23, 16  ;;  %v2555_v25 = vor.u32 %v2554_v10, %v2550_v37  ;;  %451 = vst.msk [vmem:[#allocation2 + $0x8c] sm:$0x1] %vm417_vm1, %v341_v44  ;;  %v2454_v3 = vld [vmem:[#allocation2 + $0x6c] sm:$0xf] }
 0x11f   :  { %v16804_v32 = vcombine.low %v2503_v36, %v2513_v38  ;;  %v3199_v36 = vld [vmem:[#allocation2 + $0x54] sm:$0xe]  ;;  %v3283_v38 = vrot.slane %v16810_v13, 5  ;;  %v2590_v26 = vshll.u32 %v2454_v3, 16  ;;  %v2457_v7 = vld [vmem:[#allocation2 + $0x84] sm:$0xf] }
 0x120   :  { %v2568_v54 = vrot.slane %v2566_v19, 5  ;;  %v2556_v30 = vrot.slane %v2555_v25, 4  ;;  %v12076_v51 = vrot.slane %v3199_v36, 9 }
 0x121   :  { %13660 = vmatmul.mubr.bf16.gmra.mxu0 %v11980_v12  ;;  %v3272_v12 = vrot.slane %v2447_v31, 5  ;;  %v2453_v31 = vld [vmem:[#allocation2 + $0x5c] sm:$0x1] }
 0x122   :  { %13663 = vmatprep.mubr.bf16.mxu0 %v11981_v34  ;;  %v2532_v34 = vrot.slane %v2531_v29, 4  ;;  %v2450_v17 = vld [vmem:[#allocation2 + $0x44] sm:$0x1]  ;;  %v2582_v33 = vshll.u32 %v2453_v31, 16  ;;  %v2569_v45 = vor.u32 %v2568_v54, %v2565_v15 }
 0x123   :  { %13712 = vmatmul.mubr.bf16.gmra.mxu1 %v14726_v20  ;;  %v2542_v20 = vshll.u32 %v2448_v43, 16  ;;  %v16818_v14 = vsel %vm16320_vm7, %v3271_v53, %v3272_v12  ;;  %v2558_v59 = vshll.u32 %v2450_v17, 16  ;;  %v3276_v43 = vrot.slane %v2449_v28, 5 }
 0x124   :  { %13715 = vmatprep.mubr.bf16.mxu1 %v14730_v48  ;;  %v2537_v42 = vsel %vm15935_vm4, %v2532_v34, %v2536_v46  ;;  %v3198_v48 = vld [vmem:[#allocation2 + $0x3c] sm:$0xe]  ;;  %v12106_v49 = vcombine.low %v16808_v5, %v16818_v14  ;;  %v3279_v40 = vrot.slane %v2450_v17, 5  ;;  %v2584_v16 = vrot.slane %v2582_v33, 5  ;;  %v347_v34 = vld [vmem:[%s20341_s0 + $0xa4] sm:$0x1] }
 0x125   :  { %v16814_v6 = vcombine.low %v2527_v4, %v2537_v42  ;;  %v2544_v21 = vrot.slane %v2542_v20, 5  ;;  %v2560_v35 = vrot.slane %v2558_v59, 5  ;;  %v12075_v58 = vrot.slane %v3198_v48, 9  ;;  %v16849_v4 = vld [vmem:[#allocation2 + $0x70] sm:$0xf] }
 0x126   :  { %v3278_v29 = vrot.slane %v3276_v43, 4  ;;  %v2570_v28 = vrot.slane %v2569_v45, 4  ;;  %v3286_v53 = vrot.slane %v2453_v31, 5  ;;  %457 = vst.msk [vmem:[#allocation2 + $0xa4] sm:$0x1] %vm417_vm1, %v347_v34  ;;  %v14740_v42 = vld [vmem:[%s20342_s1 + $0x1f0] sm:$0xff]   ;;  %v16867_v17 = vsel %vm16320_vm7, %v12076_v51, %v3283_v38 }
 0x127   :  { %v2545_v22 = vor.u32 %v2544_v21, %v2541_v56  ;;  %v3277_v2 = vsel %vm16320_vm7, %v12075_v58, %v3276_v43  ;;  %v2561_v9 = vsel %vm15935_vm4, %v2556_v30, %v2560_v35  ;;  %v16854_v56 = vld [vmem:[#allocation2 + $0x74] sm:$0x1]  ;;  %v3285_v20 = vrot.slane %v3283_v38, 4  ;;  %v353_v59 = vld [vmem:[%s20341_s0 + $0xbc] sm:$0x1]  ;;  %v14742_v31 = vld [vmem:[%s20342_s1 + $0x1e8] sm:$0xff]  }
 0x128   :  { %v3280_v24 = vsel %vm16320_vm7, %v3278_v29, %v3279_v40  ;;  %v2600_v52 = vshrl.u32 %v16849_v4, 16  ;;  %v16877_v48 = vld [vmem:[#allocation2 + $0x88] sm:$0xf]  ;;  %463 = vst.msk [vmem:[#allocation2 + $0xbc] sm:$0x1] %vm417_vm1, %v353_v59  ;;  %v2592_v21 = vrot.slane %v2590_v26, 5 }
 0x129   :  { %13664 = vmatmul.mubr.bf16.gmra.mxu0 %v11982_v11  ;;  %v2574_v11 = vrot.slane %v2572_v50, 5  ;;  %v2546_v47 = vrot.slane %v2545_v22, 4  ;;  %v12107_v23 = vcombine.low %v3277_v2, %v3280_v24  ;;  %v16888_v10 = vld [vmem:[#allocation2 + $0x8c] sm:$0x1]  ;;  %v3200_v35 = vld [vmem:[#allocation2 + $0x6c] sm:$0xe] }
 0x12a   :  { %13667 = vmatprep.mubr.bf16.mxu0 %v11983_v8  ;;  %v2578_v8 = vrot.slane %v2576_v55, 4  ;;  %v2602_v50 = vrot.slane %v2600_v52, 4  ;;  %v2611_v22 = vshrl.u32 %v2457_v7, 16  ;;  %v2620_v25 = vshll.u32 %v16877_v48, 16  ;;  %v14743_v45 = vld [vmem:[%s20342_s1 + $0x1e0] sm:$0xff]  }
 0x12b   :  { %13716 = vmatmul.mubr.bf16.gmra.mxu1 %v14731_v61  ;;  %v2551_v57 = vsel %vm15935_vm4, %v2546_v47, %v2550_v37  ;;  %v2587_v61 = vshrl.u32 %v2454_v3, 16  ;;  %v2575_v13 = vsel %vm15935_vm4, %v2570_v28, %v2574_v11  ;;  %v2606_v37 = vshll.u32 %v16854_v56, 16  ;;  %v16918_v38 = vld [vmem:[#allocation2 + $0xa0] sm:$0xf] }
 0x12c   :  { %13783 = vmatprep.mubr.bf16.mxu1 %v12105_v1  ;;  %v2579_v46 = vor.u32 %v2578_v8, %v2574_v11  ;;  %v16844_v12 = vcombine.low %v2551_v57, %v2561_v9  ;;  %v2613_v58 = vrot.slane %v2611_v22, 4  ;;  %v2624_v44 = vshrl.u32 %v16877_v48, 16  ;;  %v3201_v11 = vld [vmem:[#allocation2 + $0x84] sm:$0xe]  ;;  %v2460_v9 = vld [vmem:[#allocation2 + $0x9c] sm:$0xf] }
 0x12d   :  { %v2589_v41 = vrot.slane %v2587_v61, 4  ;;  %v2608_v14 = vrot.slane %v2606_v37, 5  ;;  %v2630_v54 = vshll.u32 %v16888_v10, 16  ;;  %v2622_v36 = vrot.slane %v2620_v25, 5  ;;  %v14746_v22 = vld [vmem:[%s20342_s1 + $0x1d0] sm:$0xff]  }
 0x12e   :  { %v2580_v1 = vrot.slane %v2579_v46, 4  ;;  %v12077_v47 = vrot.slane %v3200_v35, 9  ;;  %v2626_v8 = vrot.slane %v2624_v44, 4  ;;  %v3290_v3 = vrot.slane %v16849_v4, 5  ;;  %v365_v46 = vld [vmem:[%s20341_s0 + $0xec] sm:$0x1] }
 0x12f   :  { %v2593_v5 = vor.u32 %v2592_v21, %v2589_v41  ;;  %v2632_v40 = vrot.slane %v2630_v54, 5  ;;  %v3293_v29 = vrot.slane %v16854_v56, 5  ;;  %v12078_v57 = vrot.slane %v3201_v11, 9  ;;  %475 = vst.msk [vmem:[#allocation2 + $0xec] sm:$0x1] %vm417_vm1, %v365_v46  ;;  %v14745_v41 = vld [vmem:[%s20342_s1 + $0x1d8] sm:$0xff]  }
 0x130   :  { %v2585_v60 = vsel %vm15935_vm4, %v2580_v1, %v2584_v16  ;;  %v2627_v51 = vor.u32 %v2626_v8, %v2622_v36  ;;  %v3291_v28 = vsel %vm16320_vm7, %v12077_v47, %v3290_v3  ;;  %v3292_v24 = vrot.slane %v3290_v3, 4  ;;  %v14737_v21 = vld [vmem:[%s20342_s1 + $0x1a0] sm:$0xff]   ;;  %v3203_v54 = vld [vmem:[#allocation2 + $0xb4] sm:$0xe] }
 0x131   :  { %13668 = vmatmul.mubr.bf16.gmra.mxu0 %v11984_v39  ;;  %v2596_v39 = vshll.u32 %v16849_v4, 16  ;;  %v16883_v63 = vcombine.low %v2575_v13, %v2585_v60  ;;  %v2594_v33 = vrot.slane %v2593_v5, 4  ;;  %v3300_v1 = vrot.slane %v16888_v10, 5  ;;  %v16938_v60 = vld [vmem:[#allocation2 + $0xb8] sm:$0xf] }
 0x132   :  { %13735 = vmatprep.mubr.bf16.mxu0 %v16804_v32  ;;  %v3287_v32 = vsel %vm16320_vm7, %v3285_v20, %v3286_v53  ;;  %v371_v53 = vld [vmem:[%s20341_s0 + $0x104] sm:$0x1]  ;;  %v2628_v56 = vrot.slane %v2627_v51, 4  ;;  %v3294_v61 = vsel %vm16320_vm7, %v3292_v24, %v3293_v29  ;;  %v2635_v13 = vshrl.u32 %v2460_v9, 16  ;;  %v14748_v51 = vld [vmem:[%s20342_s1 + $0x1c8] sm:$0xff]  }
 0x133   :  { %13784 = vmatmul.mubr.bf16.vlgmr.msra.gmra.mxu1 %v12106_v49  ;;  %v12108_v15 = vcombine.low %v16867_v17, %v3287_v32  ;;  %v2598_v19 = vrot.slane %v2596_v39, 5  ;;  %v2614_v49 = vshll.u32 %v2457_v7, 16  ;;  %v2638_v17 = vshll.u32 %v2460_v9, 16  ;;  %481 = vst.msk [vmem:[#allocation2 + $0x104] sm:$0x1] %vm417_vm1, %v371_v53 }
 0x134   :  { %13787 = vmatprep.mubr.bf16.mxu1 %v12107_v23  ;;  %13864 = vmatpush3.bf16.msra.mxu1 %v16691_v0  ;;  %v14735_v0 = vld [vmem:[%s20342_s1 + $0x1b0] sm:$0xff]   ;;  %v12109_v26 = vcombine.low %v3291_v28, %v3294_v61  ;;  %v2633_v39 = vsel %vm15935_vm4, %v2628_v56, %v2632_v40  ;;  %v2637_v52 = vrot.slane %v2635_v13, 4  ;;  %v2644_v32 = vshll.u32 %v16918_v38, 16  ;;  %v2466_v8 = vld [vmem:[#allocation2 + $0xe4] sm:$0xf]  ;;  %v14738_v40 = vld [vmem:[%s20342_s1 + $0x198] sm:$0xff]  }
 0x135   :  { %13865 = vmatprep.subr.bf16.mxu1 %v14740_v42  ;;  %v2603_v55 = vor.u32 %v2602_v50, %v2598_v19  ;;  %v2616_v43 = vrot.slane %v2614_v49, 5  ;;  %v2599_v16 = vsel %vm15935_vm4, %v2594_v33, %v2598_v19  ;;  %v2463_v23 = vld [vmem:[#allocation2 + $0xb4] sm:$0xf]  ;;  %v2648_v35 = vshrl.u32 %v16918_v38, 16  ;;  %v16955_v19 = vld [vmem:[#allocation2 + $0xbc] sm:$0x1] }
 0x136   :  { %v3202_v50 = vld [vmem:[#allocation2 + $0x9c] sm:$0xe]  ;;  %v2646_v49 = vrot.slane %v2644_v32, 5  ;;  %v2659_v25 = vshrl.u32 %v2463_v23, 16  ;;  %v2668_v44 = vshll.u32 %v16938_v60, 16  ;;  %v2672_v33 = vshrl.u32 %v16938_v60, 16 }
 0x137   :  { %v2604_v30 = vrot.slane %v2603_v55, 4  ;;  %v2617_v2 = vor.u32 %v2616_v43, %v2613_v58  ;;  %v2662_v58 = vshll.u32 %v2463_v23, 16  ;;  %v2678_v43 = vshll.u32 %v16955_v19, 16  ;;  %v383_v56 = vld [vmem:[%s20341_s0 + $0x134] sm:$0x1] }
 0x138   :  { %13866 = vmatpush3.bf16.msra.mxu1 %v14740_v42  ;;  %v16931_v42 = vld [vmem:[#allocation2 + $0xa4] sm:$0x1]  ;;  %v12080_v46 = vrot.slane %v3203_v54, 9  ;;  %v3314_v23 = vrot.slane %v16955_v19, 5  ;;  %v2683_v53 = vshrl.u32 %v2466_v8, 16  ;;  %v14741_v61 = vld [vmem:[%s20342_s1 + $0x190] sm:$0xff]  }
 0x139   :  { %13736 = vmatmul.mubr.bf16.vlgmr.msra.gmra.mxu0 %v16814_v6  ;;  %13867 = vmatprep.subr.bf16.mxu1 %v14742_v31  ;;  %v2609_v6 = vsel %vm15935_vm4, %v2604_v30, %v2608_v14  ;;  %v2618_v34 = vrot.slane %v2617_v2, 4  ;;  %v2664_v47 = vrot.slane %v2662_v58, 5  ;;  %v2670_v30 = vrot.slane %v2668_v44, 5  ;;  %493 = vst.msk [vmem:[#allocation2 + $0x134] sm:$0x1] %vm417_vm1, %v383_v56 }
 0x13a   :  { %13816 = vmatpush3.bf16.msra.mxu0 %v16744_v18  ;;  %13739 = vmatprep.mubr.bf16.mxu0 %v16844_v12  ;;  %v12053_v4 = vcombine.low %v2599_v16, %v2609_v6  ;;  %v14736_v18 = vld [vmem:[%s20342_s1 + $0x1a8] sm:$0xff]   ;;  %v3297_v12 = vrot.slane %v16877_v48, 5  ;;  %v2640_v48 = vrot.slane %v2638_v17, 5  ;;  %v2680_v16 = vrot.slane %v2678_v43, 5  ;;  %v377_v6 = vld [vmem:[%s20341_s0 + $0x11c] sm:$0x1] }
 0x13b   :  { %13817 = vmatprep.subr.bf16.mxu0 %v14735_v0  ;;  %13788 = vmatmul.mubr.bf16.gmra.mxu1 %v12108_v15  ;;  %v2623_v20 = vsel %vm15935_vm4, %v2618_v34, %v2622_v36  ;;  %v2654_v15 = vshll.u32 %v16931_v42, 16  ;;  %v3304_v2 = vrot.slane %v16918_v38, 5  ;;  %v3307_v9 = vrot.slane %v16931_v42, 5  ;;  %v16980_v34 = vld [vmem:[#allocation2 + $0xe8] sm:$0xf] }
 0x13c   :  { %13868 = vmatpush3.bf16.msra.mxu1 %v14742_v31  ;;  %v3298_v7 = vsel %vm16320_vm7, %v12078_v57, %v3297_v12  ;;  %v3299_v59 = vrot.slane %v3297_v12, 4  ;;  %v16949_v37 = vcombine.low %v2623_v20, %v2633_v39  ;;  %13791 = vmatprep.mubr.bf16.mxu1 %v12109_v26  ;;  %v2641_v14 = vor.u32 %v2640_v48, %v2637_v52  ;;  %v16996_v26 = vld [vmem:[#allocation2 + $0xec] sm:$0x1] }
 0x13d   :  { %13869 = vmatprep.subr.bf16.mxu1 %v14743_v45  ;;  %v2650_v31 = vrot.slane %v2648_v35, 4  ;;  %v2656_v55 = vrot.slane %v2654_v15, 5  ;;  %v3306_v38 = vrot.slane %v3304_v2, 4  ;;  %487 = vst.msk [vmem:[#allocation2 + $0x11c] sm:$0x1] %vm417_vm1, %v377_v6  ;;  %v2685_v52 = vrot.slane %v2683_v53, 4 }
 0x13e   :  { %13818 = vmatpush3.bf16.msra.mxu0 %v14735_v0  ;;  %v3301_v10 = vsel %vm16320_vm7, %v3299_v59, %v3300_v1  ;;  %v2642_v11 = vrot.slane %v2641_v14, 4  ;;  %v2661_v0 = vrot.slane %v2659_v25, 4  ;;  %v14749_v59 = vld [vmem:[%s20342_s1 + $0x1c0] sm:$0xff]   ;;  %v2686_v32 = vshll.u32 %v2466_v8, 16 }
 0x13f   :  { %13819 = vmatprep.subr.bf16.mxu0 %v14736_v18  ;;  %v12110_v5 = vcombine.low %v3298_v7, %v3301_v10  ;;  %v2651_v36 = vor.u32 %v2650_v31, %v2646_v49  ;;  %v3308_v17 = vsel %vm16320_vm7, %v3306_v38, %v3307_v9  ;;  %v16998_v7 = vld [vmem:[#allocation2 + $0x100] sm:$0xf]  ;;  %v2696_v10 = vshrl.u32 %v16980_v34, 16  ;;  %v3204_v35 = vld [vmem:[#allocation2 + $0xe4] sm:$0xe] }
 0x140   :  { %13870 = vmatpush3.bf16.msra.mxu1 %v14743_v45  ;;  %v2647_v3 = vsel %vm15935_vm4, %v2642_v11, %v2646_v49  ;;  %v2674_v45 = vrot.slane %v2672_v33, 4  ;;  %v2665_v57 = vor.u32 %v2664_v47, %v2661_v0  ;;  %v2688_v49 = vrot.slane %v2686_v32, 5  ;;  %v14747_v11 = vld [vmem:[%s20342_s1 + $0x180] sm:$0xff]  }
 0x141   :  { %13740 = vmatmul.mubr.bf16.gmra.mxu0 %v16883_v63  ;;  %13871 = vmatprep.subr.bf16.mxu1 %v14745_v41  ;;  %v12079_v63 = vrot.slane %v3202_v50, 9  ;;  %v2652_v29 = vrot.slane %v2651_v36, 4  ;;  %v2702_v50 = vshll.u32 %v16996_v26, 16  ;;  %v2698_v31 = vrot.slane %v2696_v10, 4 }
 0x142   :  { %13743 = vmatprep.mubr.bf16.mxu0 %v12053_v4  ;;  %13820 = vmatpush3.bf16.msra.mxu0 %v14736_v18  ;;  %v2675_v28 = vor.u32 %v2674_v45, %v2670_v30  ;;  %v3311_v4 = vrot.slane %v16938_v60, 5  ;;  %v2469_v18 = vld [vmem:[#allocation2 + $0xfc] sm:$0xf]  ;;  %v2666_v1 = vrot.slane %v2665_v57, 4  ;;  %v2716_v54 = vshll.u32 %v16998_v7, 16 }
 0x143   :  { %13792 = vmatmul.mubr.bf16.gmra.mxu1 %v12110_v5  ;;  %13821 = vmatprep.subr.bf16.mxu0 %v14737_v21  ;;  %v3305_v24 = vsel %vm16320_vm7, %v12079_v63, %v3304_v2  ;;  %v2657_v12 = vsel %vm15935_vm4, %v2652_v29, %v2656_v55  ;;  %v2707_v5 = vshrl.u32 %v2469_v18, 16  ;;  %v2704_v55 = vrot.slane %v2702_v50, 5  ;;  %v389_v29 = vld [vmem:[%s20341_s0 + $0x14c] sm:$0x1] }
 0x144   :  { %13872 = vmatpush3.bf16.msra.mxu1 %v14745_v41  ;;  %v12055_v42 = vcombine.low %v2647_v3, %v2657_v12  ;;  %v2676_v13 = vrot.slane %v2675_v28, 4  ;;  %v3312_v20 = vsel %vm16320_vm7, %v12080_v46, %v3311_v4  ;;  %v2671_v60 = vsel %vm15935_vm4, %v2666_v1, %v2670_v30  ;;  %499 = vst.msk [vmem:[#allocation2 + $0x14c] sm:$0x1] %vm417_vm1, %v389_v29  ;;  %v17045_v12 = vld [vmem:[%s20342_s1 + $0x238] sm:$0xff]  }
 0x145   :  { %13873 = vmatprep.subr.bf16.mxu1 %v14746_v22  ;;  %v12111_v41 = vcombine.low %v3305_v24, %v3308_v17  ;;  %v3313_v39 = vrot.slane %v3311_v4, 4  ;;  %v2709_v58 = vrot.slane %v2707_v5, 4  ;;  %v2710_v44 = vshll.u32 %v2469_v18, 16  ;;  %v395_v18 = vld [vmem:[%s20341_s0 + $0x164] sm:$0x1] }
 0x146   :  { %13822 = vmatpush3.bf16.msra.mxu0 %v14737_v21  ;;  %v2681_v48 = vsel %vm15935_vm4, %v2676_v13, %v2680_v16  ;;  %v2692_v21 = vshll.u32 %v16980_v34, 16  ;;  %v2689_v0 = vor.u32 %v2688_v49, %v2685_v52  ;;  %v2720_v43 = vshrl.u32 %v16998_v7, 16  ;;  %505 = vst.msk [vmem:[#allocation2 + $0x164] sm:$0x1] %vm417_vm1, %v395_v18  ;;  %v17060_v52 = vld [vmem:[#allocation2 + $0x134] sm:$0x1] }
 0x147   :  { %13823 = vmatprep.subr.bf16.mxu0 %v14738_v40  ;;  %v12056_v15 = vcombine.low %v2671_v60, %v2681_v48  ;;  %13795 = vmatprep.mubr.bf16.mxu1 %v12111_v41  ;;  %v3315_v19 = vsel %vm16320_vm7, %v3313_v39, %v3314_v23  ;;  %v2712_v47 = vrot.slane %v2710_v44, 5  ;;  %v2718_v30 = vrot.slane %v2716_v54, 5  ;;  %v17058_v39 = vld [vmem:[#allocation2 + $0x130] sm:$0xf]  ;;  %v3206_v49 = vld [vmem:[#allocation2 + $0x114] sm:$0xe] }
 0x148   :  { %13874 = vmatpush3.bf16.msra.mxu1 %v14746_v22  ;;  %v17017_v22 = vld [vmem:[#allocation2 + $0x104] sm:$0x1]  ;;  %v12112_v14 = vcombine.low %v3312_v20, %v3315_v19  ;;  %v2694_v25 = vrot.slane %v2692_v21, 5  ;;  %v12081_v63 = vrot.slane %v3204_v35, 9  ;;  %v3318_v8 = vrot.slane %v16980_v34, 5 }
 0x149   :  { %13744 = vmatmul.mubr.bf16.gmra.mxu0 %v16949_v37  ;;  %13875 = vmatprep.subr.bf16.mxu1 %v14748_v51  ;;  %v14744_v37 = vld [vmem:[%s20342_s1 + $0x188] sm:$0xff]   ;;  %v2726_v36 = vshll.u32 %v17017_v22, 16  ;;  %v2690_v3 = vrot.slane %v2689_v0, 4  ;;  %v2722_v16 = vrot.slane %v2720_v43, 4  ;;  %v2713_v57 = vor.u32 %v2712_v47, %v2709_v58  ;;  %v17037_v34 = vld [vmem:[#allocation2 + $0x118] sm:$0xf] }
 0x14a   :  { %13747 = vmatprep.mubr.bf16.mxu0 %v12055_v42  ;;  %13824 = vmatpush3.bf16.msra.mxu0 %v14738_v40  ;;  %v2699_v33 = vor.u32 %v2698_v31, %v2694_v25  ;;  %v3205_v40 = vld [vmem:[#allocation2 + $0xfc] sm:$0xe]  ;;  %v3319_v9 = vsel %vm16320_vm7, %v12081_v63, %v3318_v8  ;;  %v3320_v46 = vrot.slane %v3318_v8, 4  ;;  %v3321_v6 = vrot.slane %v16996_v26, 5  ;;  %v2475_v42 = vld [vmem:[#allocation2 + $0x12c] sm:$0xf] }
 0x14b   :  { %13825 = vmatprep.subr.bf16.mxu0 %v14741_v61  ;;  %13796 = vmatmul.mubr.bf16.gmra.mxu1 %v12112_v14  ;;  %v2728_v2 = vrot.slane %v2726_v36, 5  ;;  %v2695_v28 = vsel %vm15935_vm4, %v2690_v3, %v2694_v25  ;;  %v2723_v38 = vor.u32 %v2722_v16, %v2718_v30  ;;  %v12082_v4 = vrot.slane %v3205_v40, 9  ;;  %v401_v63 = vld [vmem:[%s20341_s0 + $0x17c] sm:$0x1] }
 0x14c   :  { %13876 = vmatpush3.bf16.msra.mxu1 %v14748_v51  ;;  %v2700_v45 = vrot.slane %v2699_v33, 4  ;;  %v2472_v51 = vld [vmem:[#allocation2 + $0x114] sm:$0xf]  ;;  %v2714_v23 = vrot.slane %v2713_v57, 4  ;;  %v3322_v53 = vsel %vm16320_vm7, %v3320_v46, %v3321_v6  ;;  %v3325_v56 = vrot.slane %v16998_v7, 5 }
 0x14d   :  { %13877 = vmatprep.subr.bf16.mxu1 %v14749_v59  ;;  %v2724_v13 = vrot.slane %v2723_v38, 4  ;;  %v12113_v17 = vcombine.low %v3319_v9, %v3322_v53  ;;  %v3328_v20 = vrot.slane %v17017_v22, 5  ;;  %v2731_v26 = vshrl.u32 %v2472_v51, 16  ;;  %v3207_v33 = vld [vmem:[#allocation2 + $0x12c] sm:$0xe] }
 0x14e   :  { %13826 = vmatpush3.bf16.msra.mxu0 %v14741_v61  ;;  %v2705_v24 = vsel %vm15935_vm4, %v2700_v45, %v2704_v55  ;;  %v17050_v61 = vld [vmem:[#allocation2 + $0x11c] sm:$0x1]  ;;  %v3326_v60 = vsel %vm16320_vm7, %v12082_v4, %v3325_v56  ;;  %v3327_v41 = vrot.slane %v3325_v56, 4  ;;  %v2734_v7 = vshll.u32 %v2472_v51, 16  ;;  %511 = vst.msk [vmem:[#allocation2 + $0x17c] sm:$0x1] %vm417_vm1, %v401_v63 }
 0x14f   :  { %13827 = vmatprep.subr.bf16.mxu0 %v14744_v37  ;;  %v12057_v1 = vcombine.low %v2695_v28, %v2705_v24  ;;  %v2729_v48 = vsel %vm15935_vm4, %v2724_v13, %v2728_v2  ;;  %13799 = vmatprep.mubr.bf16.mxu1 %v12113_v17  ;;  %v2733_v32 = vrot.slane %v2731_v26, 4  ;;  %v2740_v21 = vshll.u32 %v17037_v34, 16  ;;  %v2478_v9 = vld [vmem:[#allocation2 + $0x144] sm:$0xf]  ;;  %v407_v46 = vld [vmem:[%s20341_s0 + $0x194] sm:$0x1] }
 0x150   :  { %13878 = vmatpush3.bf16.msra.mxu1 %v14749_v59  ;;  %v2719_v59 = vsel %vm15935_vm4, %v2714_v23, %v2718_v30  ;;  %v2744_v10 = vshrl.u32 %v17037_v34, 16  ;;  %v2750_v19 = vshll.u32 %v17050_v61, 16  ;;  %v2755_v14 = vshrl.u32 %v2475_v42, 16  ;;  %v2479_v38 = vld [vmem:[#allocation2 + $0x148] sm:$0xf] }
 0x151   :  { %13748 = vmatmul.mubr.bf16.gmra.mxu0 %v12056_v15  ;;  %v12058_v35 = vcombine.low %v2719_v59, %v2729_v48  ;;  %v2736_v15 = vrot.slane %v2734_v7, 5  ;;  %v2742_v22 = vrot.slane %v2740_v21, 5  ;;  %v2758_v55 = vshll.u32 %v2475_v42, 16  ;;  %v17088_v4 = vld [vmem:[#allocation2 + $0x14c] sm:$0x1] }
 0x152   :  { %13828 = vmatpush3.bf16.msra.mxu0 %v14744_v37  ;;  %13751 = vmatprep.mubr.bf16.mxu0 %v12057_v1  ;;  %v3329_v37 = vsel %vm16320_vm7, %v3327_v41, %v3328_v20  ;;  %v2746_v5 = vrot.slane %v2744_v10, 4  ;;  %v2752_v31 = vrot.slane %v2750_v19, 5  ;;  %v2764_v58 = vshll.u32 %v17058_v39, 16  ;;  %517 = vst.msk [vmem:[#allocation2 + $0x194] sm:$0x1] %vm417_vm1, %v407_v46 }
 0x153   :  { %13829 = vmatprep.subr.bf16.mxu0 %v14747_v11  ;;  %v12114_v50 = vcombine.low %v3326_v60, %v3329_v37  ;;  %v2737_v25 = vor.u32 %v2736_v15, %v2733_v32  ;;  %v2757_v54 = vrot.slane %v2755_v14, 4  ;;  %v2774_v0 = vshll.u32 %v17060_v52, 16  ;;  %v2481_v59 = vld [vmem:[#allocation2 + $0x15c] sm:$0xf]  ;;  %v2482_v60 = vld [vmem:[#allocation2 + $0x160] sm:$0xf] }
 0x154   :  { %v2747_v44 = vor.u32 %v2746_v5, %v2742_v22  ;;  %v2760_v36 = vrot.slane %v2758_v55, 5  ;;  %v2766_v47 = vrot.slane %v2764_v58, 5  ;;  %v12083_v30 = vrot.slane %v3206_v49, 9  ;;  %v3208_v48 = vld [vmem:[#allocation2 + $0x144] sm:$0xe] }
 0x155   :  { %13800 = vmatmul.mubr.bf16.gmra.mxu1 %v12114_v50  ;;  %v2738_v43 = vrot.slane %v2737_v25, 4  ;;  %v2776_v3 = vrot.slane %v2774_v0, 5  ;;  %v3332_v45 = vrot.slane %v17037_v34, 5  ;;  %v3335_v29 = vrot.slane %v17050_v61, 5  ;;  %v17104_v37 = vld [vmem:[#allocation2 + $0x164] sm:$0x1] }
 0x156   :  { %13830 = vmatpush3.bf16.msra.mxu0 %v14747_v11  ;;  %v2768_v11 = vshrl.u32 %v17058_v39, 16  ;;  %v2748_v8 = vrot.slane %v2747_v44, 4  ;;  %v2761_v2 = vor.u32 %v2760_v36, %v2757_v54  ;;  %v12084_v57 = vrot.slane %v3207_v33, 9 }
 0x157   :  { %13911 = vmatprep.subr.bf16.mxu0 %v17045_v12  ;;  %v2743_v16 = vsel %vm15935_vm4, %v2738_v43, %v2742_v22  ;;  %v3333_v28 = vsel %vm16320_vm7, %v12083_v30, %v3332_v45  ;;  %v3334_v24 = vrot.slane %v3332_v45, 4  ;;  %v3339_v1 = vrot.slane %v17058_v39, 5 }
 0x158   :  { %v2770_v40 = vrot.slane %v2768_v11, 4  ;;  %v2753_v6 = vsel %vm15935_vm4, %v2748_v8, %v2752_v31  ;;  %v2762_v18 = vrot.slane %v2761_v2, 4  ;;  %v3342_v23 = vrot.slane %v17060_v52, 5  ;;  %v3209_v31 = vld [vmem:[#allocation2 + $0x15c] sm:$0xe] }
 0x159   :  { %13752 = vmatmul.mubr.bf16.gmra.mxu0 %v12058_v35  ;;  %v12059_v34 = vcombine.low %v2743_v16, %v2753_v6  ;;  %v3336_v56 = vsel %vm16320_vm7, %v3334_v24, %v3335_v29  ;;  %v2779_v61 = vshrl.u32 %v2478_v9, 16  ;;  %v2782_v42 = vshll.u32 %v2478_v9, 16  ;;  %v2484_v11 = vld [vmem:[#allocation2 + $0x174] sm:$0xf] }
 0x15a   :  { %v2771_v51 = vor.u32 %v2770_v40, %v2766_v47  ;;  %v2767_v13 = vsel %vm15935_vm4, %v2762_v18, %v2766_v47  ;;  %v12115_v17 = vcombine.low %v3333_v28, %v3336_v56  ;;  %v3340_v20 = vsel %vm16320_vm7, %v12084_v57, %v3339_v1  ;;  %v17125_v56 = vld [vmem:[#allocation2 + $0x17c] sm:$0x1] }
 0x15b   :  { %13755 = vmatprep.mubr.bf16.mxu0 %v12059_v34  ;;  %v3341_v26 = vrot.slane %v3339_v1, 4  ;;  %v2781_v7 = vrot.slane %v2779_v61, 4  ;;  %v2784_v39 = vrot.slane %v2782_v42, 5  ;;  %v2788_v52 = vshll.u32 %v2479_v38, 16  ;;  %v2487_v61 = vld [vmem:[#allocation2 + $0x18c] sm:$0xf] }
 0x15c   :  { %v2772_v53 = vrot.slane %v2771_v51, 4  ;;  %13803 = vmatprep.mubr.bf16.mxu1 %v12115_v17  ;;  %v2792_v10 = vshrl.u32 %v2479_v38, 16  ;;  %v2798_v35 = vshll.u32 %v17088_v4, 16  ;;  %v2803_v22 = vshrl.u32 %v2481_v59, 16 }
 0x15d   :  { %v3343_v21 = vsel %vm16320_vm7, %v3341_v26, %v3342_v23  ;;  %v2785_v19 = vor.u32 %v2784_v39, %v2781_v7  ;;  %v2790_v50 = vrot.slane %v2788_v52, 5  ;;  %v2806_v49 = vshll.u32 %v2481_v59, 16  ;;  %v17131_v59 = vld [vmem:[#allocation2 + $0x190] sm:$0xf] }
 0x15e   :  { %v2777_v41 = vsel %vm15935_vm4, %v2772_v53, %v2776_v3  ;;  %v12116_v15 = vcombine.low %v3340_v20, %v3343_v21  ;;  %v2794_v5 = vrot.slane %v2792_v10, 4  ;;  %v2800_v14 = vrot.slane %v2798_v35, 5 }
 0x15f   :  { %v12060_v32 = vcombine.low %v2767_v13, %v2777_v41  ;;  %v2812_v25 = vshll.u32 %v2482_v60, 16  ;;  %v2786_v55 = vrot.slane %v2785_v19, 4  ;;  %v2805_v58 = vrot.slane %v2803_v22, 4 }
 0x160   :  { %13804 = vmatmul.mubr.bf16.gmra.mxu1 %v12116_v15  ;;  %v2816_v44 = vshrl.u32 %v2482_v60, 16  ;;  %v2822_v54 = vshll.u32 %v17104_v37, 16  ;;  %v2795_v0 = vor.u32 %v2794_v5, %v2790_v50  ;;  %v2808_v33 = vrot.slane %v2806_v49, 5 }
 0x161   :  { %13756 = vmatmul.mubr.bf16.gmra.mxu0 %v12060_v32  ;;  %v2814_v43 = vrot.slane %v2812_v25, 5  ;;  %v12085_v36 = vrot.slane %v3208_v48, 9  ;;  %v2791_v30 = vsel %vm15935_vm4, %v2786_v55, %v2790_v50  ;;  %v3346_v40 = vrot.slane %v2479_v38, 5  ;;  %v2485_v38 = vld [vmem:[#allocation2 + $0x178] sm:$0xf] }
 0x162   :  { %v2818_v63 = vrot.slane %v2816_v44, 4  ;;  %v2824_v8 = vrot.slane %v2822_v54, 5  ;;  %v2796_v3 = vrot.slane %v2795_v0, 4  ;;  %v2809_v45 = vor.u32 %v2808_v33, %v2805_v58  ;;  %v17137_v48 = vld [vmem:[#allocation2 + $0x194] sm:$0x1] }
 0x163   :  { %v17107_v47 = vpop.f32.mrf.mxu1  ;;  %v3349_v16 = vrot.slane %v17088_v4, 5  ;;  %v12086_v2 = vrot.slane %v3209_v31, 9  ;;  %v3347_v9 = vsel %vm16320_vm7, %v12085_v36, %v3346_v40  ;;  %v3348_v46 = vrot.slane %v3346_v40, 4  ;;  %v3210_v32 = vld [vmem:[#allocation2 + $0x174] sm:$0xe] }
 0x164   :  { %v2819_v57 = vor.u32 %v2818_v63, %v2814_v43  ;;  %v3353_v6 = vrot.slane %v2482_v60, 5  ;;  %v2801_v51 = vsel %vm15935_vm4, %v2796_v3, %v2800_v14  ;;  %v2810_v28 = vrot.slane %v2809_v45, 4  ;;  %v3211_v40 = vld [vmem:[#allocation2 + $0x18c] sm:$0xe] }
 0x165   :  { %v17112_v29 = vpop.f32.mrf.mxu1  ;;  %v3356_v24 = vrot.slane %v17104_v37, 5  ;;  %v2827_v34 = vshrl.u32 %v2484_v11, 16  ;;  %v12061_v4 = vcombine.low %v2791_v30, %v2801_v51  ;;  %v3350_v23 = vsel %vm16320_vm7, %v3348_v46, %v3349_v16 }
 0x166   :  { %v2820_v1 = vrot.slane %v2819_v57, 4  ;;  %v3354_v53 = vsel %vm16320_vm7, %v12086_v2, %v3353_v6  ;;  %v2815_v13 = vsel %vm15935_vm4, %v2810_v28, %v2814_v43  ;;  %v12117_v17 = vcombine.low %v3347_v9, %v3350_v23  ;;  %v4081_v28 = vld [vmem:[#allocation2 + $0x18] sm:$0xf]  ;;  %v4082_v23 = vld [vmem:[#allocation2 + $0x1c] sm:$0xf] }
 0x167   :  { %v17119_v18 = vpop.f32.mrf.mxu1  ;;  %v3355_v20 = vrot.slane %v3353_v6, 4  ;;  %v2829_v26 = vrot.slane %v2827_v34, 4  ;;  %13759 = vmatprep.mubr.bf16.mxu0 %v12061_v4  ;;  %v2830_v7 = vshll.u32 %v2484_v11, 16  ;;  %v2836_v39 = vshll.u32 %v2485_v38, 16 }
 0x168   :  { %v2825_v41 = vsel %vm15935_vm4, %v2820_v1, %v2824_v8  ;;  %v2840_v52 = vshrl.u32 %v2485_v38, 16  ;;  %13807 = vmatprep.mubr.bf16.mxu1 %v12117_v17  ;;  %v2846_v37 = vshll.u32 %v17125_v56, 16  ;;  %v2851_v15 = vshrl.u32 %v2487_v61, 16 }
 0x169   :  { %v17127_v42 = vpop.f32.mrf.mxu0  ;;  %v17133_v60 = vpop.f32.mrf.mxu1  ;;  %v12062_v10 = vcombine.low %v2815_v13, %v2825_v41  ;;  %v3357_v35 = vsel %vm16320_vm7, %v3355_v20, %v3356_v24  ;;  %v2832_v22 = vrot.slane %v2830_v7, 5  ;;  %v2838_v5 = vrot.slane %v2836_v39, 5 }
 0x16a   :  { %v12118_v50 = vcombine.low %v3354_v53, %v3357_v35  ;;  %v2842_v14 = vrot.slane %v2840_v52, 4  ;;  %v2848_v25 = vrot.slane %v2846_v37, 5  ;;  %v2853_v31 = vrot.slane %v2851_v15, 4  ;;  %v4083_v53 = vld [vmem:[#allocation2 + $0x20] sm:$0x1]  ;;  %v14750_v15 = vld [vmem:[#allocation2 + $0x18] sm:$0xff]  }
 0x16b   :  { %v17139_v21 = vpop.f32.mrf.mxu0  ;;  %v17144_v19 = vpop.f32.mrf.mxu1  ;;  %13760 = vmatmul.mubr.bf16.gmra.mxu0 %v12062_v10  ;;  %v2854_v55 = vshll.u32 %v2487_v61, 16  ;;  %v2860_v58 = vshll.u32 %v17131_v59, 16  ;;  %v2833_v54 = vor.u32 %v2832_v22, %v2829_v26  ;;  %v2864_v0 = vshrl.u32 %v17131_v59, 16  ;;  %v4084_v22 = vld [vmem:[#allocation2 + $0x30] sm:$0xf] }
 0x16c   :  { %13808 = vmatmul.mubr.bf16.gmra.mxu1 %v12118_v50  ;;  %v2843_v11 = vor.u32 %v2842_v14, %v2838_v5  ;;  %v2870_v33 = vshll.u32 %v17137_v48, 16  ;;  %v12087_v63 = vrot.slane %v3210_v32, 9  ;;  %v3360_v8 = vrot.slane %v2485_v38, 5 }
 0x16d   :  { %v17146_v49 = vpop.f32.mrf.mxu0  ;;  %v17149_v44 = vpop.f32.mrf.mxu1  ;;  %v2856_v36 = vrot.slane %v2854_v55, 5  ;;  %v2862_v30 = vrot.slane %v2860_v58, 5  ;;  %v2834_v45 = vrot.slane %v2833_v54, 4  ;;  %v2866_v2 = vrot.slane %v2864_v0, 4  ;;  %v17192_v54 = vld [vmem:[#allocation2 + $0x34] sm:$0xf] }
 0x16e   :  { %v2844_v16 = vrot.slane %v2843_v11, 4  ;;  %v2872_v57 = vrot.slane %v2870_v33, 5  ;;  %v3361_v46 = vsel %vm16320_vm7, %v12087_v63, %v3360_v8  ;;  %v3362_v6 = vrot.slane %v3360_v8, 4 }
 0x16f   :  { %v17153_v43 = vpop.f32.mrf.mxu0  ;;  %v17155_v3 = vpop.f32.mrf.mxu1  ;;  %v2857_v9 = vor.u32 %v2856_v36, %v2853_v31  ;;  %v3363_v51 = vrot.slane %v17125_v56, 5  ;;  %v2839_v38 = vsel %vm15935_vm4, %v2834_v45, %v2838_v5  ;;  %v2867_v4 = vor.u32 %v2866_v2, %v2862_v30 }
 0x170   :  { %v2849_v34 = vsel %vm15935_vm4, %v2844_v16, %v2848_v25  ;;  %v12088_v1 = vrot.slane %v3211_v40, 9  ;;  %v3367_v20 = vrot.slane %v17131_v59, 5  ;;  %v3370_v7 = vrot.slane %v17137_v48, 5 }
 0x171   :  { %v17160_v24 = vpop.f32.mrf.mxu1  ;;  %v12063_v13 = vcombine.low %v2839_v38, %v2849_v34  ;;  %v2858_v17 = vrot.slane %v2857_v9, 4  ;;  %v3364_v56 = vsel %vm16320_vm7, %v3362_v6, %v3363_v51  ;;  %v2868_v26 = vrot.slane %v2867_v4, 4  ;;  %v4087_v51 = vld [vmem:[#allocation2 + $0x48] sm:$0xf]  ;;  %v14751_v34 = vld [vmem:[#allocation2 + $0x30] sm:$0xff]  }
 0x172   :  { %v12119_v41 = vcombine.low %v3361_v46, %v3364_v56  ;;  %v17174_v39 = vadd.f32 %v17107_v47, %v17127_v42  ;;  %v3368_v35 = vsel %vm16320_vm7, %v12088_v1, %v3367_v20  ;;  %v3369_v59 = vrot.slane %v3367_v20, 4  ;;  %v14753_v56 = vld [vmem:[#allocation2 + $0x48] sm:$0xff]  }
 0x173   :  { %v17178_v32 = vpop.f32.mrf.mxu1  ;;  %13763 = vmatprep.mubr.bf16.mxu0 %v12063_v13  ;;  %v2863_v10 = vsel %vm15935_vm4, %v2858_v17, %v2862_v30  ;;  %v4130_v37 = vshrl.u32 %v4081_v28, 16  ;;  %v2873_v48 = vsel %vm15935_vm4, %v2868_v26, %v2872_v57  ;;  %v4133_v47 = vshll.u32 %v4081_v28, 16  ;;  %v17194_v30 = vld [vmem:[#allocation2 + $0x38] sm:$0x1] }
 0x174   :  { %v17166_v61 = vpop.f32.mrf.mxu0  ;;  %13811 = vmatprep.mubr.bf16.mxu1 %v12119_v41  ;;  %v4139_v42 = vshll.u32 %v4082_v23, 16  ;;  %v4143_v50 = vshrl.u32 %v4082_v23, 16  ;;  %v12064_v25 = vcombine.low %v2863_v10, %v2873_v48  ;;  %v3371_v31 = vsel %vm16320_vm7, %v3369_v59, %v3370_v7  ;;  %v354_v41 = vld [vmem:[%s20341_s0 + $0xc0] sm:$0xf]  ;;  %v355_v59 = vld [vmem:[%s20341_s0 + $0xc4] sm:$0xf] }
 0x175   :  { %v17188_v14 = vpop.f32.mrf.mxu1  ;;  %v4132_v55 = vrot.slane %v4130_v37, 4  ;;  %v4149_v58 = vshll.u32 %v4083_v53, 16  ;;  %v12120_v11 = vcombine.low %v3368_v35, %v3371_v31  ;;  %v4135_v0 = vrot.slane %v4133_v47, 5  ;;  %v4089_v35 = vld [vmem:[#allocation2 + $0x50] sm:$0x1] }
 0x176   :  { %v17176_v52 = vpop.f32.mrf.mxu0  ;;  %v4141_v33 = vrot.slane %v4139_v42, 5  ;;  %v4145_v36 = vrot.slane %v4143_v50, 4  ;;  %13764 = vmatmul.mubr.bf16.gmra.mxu0 %v12064_v25  ;;  %v17202_v45 = vadd.f32 %v17112_v29, %v17139_v21  ;;  %v4154_v16 = vshrl.u32 %v4084_v22, 16  ;;  %v4088_v21 = vld [vmem:[#allocation2 + $0x4c] sm:$0xf] }
 0x177   :  { %v17198_v8 = vpop.f32.mrf.mxu1  ;;  %v4151_v40 = vrot.slane %v4149_v58, 5  ;;  %v4157_v2 = vshll.u32 %v4084_v22, 16  ;;  %13812 = vmatmul.mubr.bf16.gmra.mxu1 %v12120_v11  ;;  %13831 = vmatprep.mubr.bf16.mxu0 %v14750_v15  ;;  %v4136_v57 = vor.u32 %v4135_v0, %v4132_v55  ;;  %v4163_v46 = vshll.u32 %v17192_v54, 16  ;;  %464 = vst.msk [vmem:[#allocation2 + $0xc0] sm:$0xf] %vm414_vm0, %v354_v41 }
 0x178   :  { %v17186_v5 = vpop.f32.mrf.mxu0  ;;  %v4146_v9 = vor.u32 %v4145_v36, %v4141_v33  ;;  %v4167_v6 = vshrl.u32 %v17192_v54, 16  ;;  %v4156_v4 = vrot.slane %v4154_v16, 4  ;;  %v4173_v29 = vshll.u32 %v17194_v30, 16  ;;  %465 = vst.msk [vmem:[#allocation2 + $0xc4] sm:$0xf] %vm414_vm0, %v355_v59 }
 0x179   :  { %v17208_v38 = vpop.f32.mrf.mxu1  ;;  %v4159_v1 = vrot.slane %v4157_v2, 5  ;;  %v4137_v23 = vrot.slane %v4136_v57, 4  ;;  %v4165_v13 = vrot.slane %v4163_v46, 5  ;;  %v17220_v10 = vadd.f32 %v17119_v18, %v17146_v49  ;;  %v14755_v18 = vld [vmem:[%s20342_s1 + $0x230] sm:$0xff]   ;;  %v4090_v49 = vld [vmem:[#allocation2 + $0x60] sm:$0xf] }
 0x17a   :  { %v17196_v63 = vpop.f32.mrf.mxu0  ;;  %v4147_v53 = vrot.slane %v4146_v9, 4  ;;  %v4169_v17 = vrot.slane %v4167_v6, 4  ;;  %v4175_v47 = vrot.slane %v4173_v29, 5  ;;  %v17240_v31 = vadd.f32 %v17144_v19, %v17166_v61  ;;  %v4091_v58 = vld [vmem:[#allocation2 + $0x64] sm:$0xf] }
 0x17b   :  { %v4160_v7 = vor.u32 %v4159_v1, %v4156_v4  ;;  %v4142_v37 = vsel %vm15935_vm4, %v4137_v23, %v4141_v33  ;;  %v4178_v55 = vshrl.u32 %v4087_v51, 16  ;;  %v356_v11 = vld [vmem:[%s20341_s0 + $0xc8] sm:$0x1]  ;;  %v4181_v33 = vshll.u32 %v4087_v51, 16 }
 0x17c   :  { %v4152_v48 = vsel %vm15935_vm4, %v4147_v53, %v4151_v40  ;;  %v4170_v15 = vor.u32 %v4169_v17, %v4165_v13  ;;  %v4187_v36 = vshll.u32 %v4088_v21, 16  ;;  %v4191_v40 = vshrl.u32 %v4088_v21, 16  ;;  %v17245_v16 = vld [vmem:[#allocation2 + $0x68] sm:$0x1]  ;;  %466 = vst.msk [vmem:[#allocation2 + $0xc8] sm:$0x1] %vm417_vm1, %v356_v11 }
 0x17d   :  { %v17206_v28 = vpop.f32.mrf.mxu0  ;;  %v12185_v22 = vcombine.low %v4142_v37, %v4152_v48  ;;  %v4161_v25 = vrot.slane %v4160_v7, 4  ;;  %v4180_v61 = vrot.slane %v4178_v55, 4  ;;  %v4197_v9 = vshll.u32 %v4089_v35, 16  ;;  %v14756_v37 = vld [vmem:[#allocation2 + $0x78] sm:$0xff]  }
 0x17e   :  { %v4171_v0 = vrot.slane %v4170_v15, 4  ;;  %13832 = vmatmul.mubr.bf16.vlgmr.msra.gmra.mxu0 %v14751_v34  ;;  %v17256_v46 = vadd.f32 %v17149_v44, %v17176_v52  ;;  %v4183_v51 = vrot.slane %v4181_v33, 5  ;;  %v4189_v4 = vrot.slane %v4187_v36, 5  ;;  %v14758_v44 = vld [vmem:[%s20342_s1 + $0x228] sm:$0xff]   ;;  %v14754_v52 = vld [vmem:[#allocation2 + $0x60] sm:$0xff]  }
 0x17f   :  { %v17211_v20 = vpop.f32.mrf.mxu0  ;;  %v17213_v26 = vpop.f32.mrf.mxu1  ;;  %13879 = vmatprep.mubr.bf16.mxu1 %v12185_v22  ;;  %v4166_v19 = vsel %vm15935_vm4, %v4161_v25, %v4165_v13  ;;  %13912 = vmatpush3.bf16.msra.mxu0 %v17045_v12  ;;  %v4193_v1 = vrot.slane %v4191_v40, 4  ;;  %v4199_v21 = vrot.slane %v4197_v9, 5  ;;  %v4202_v23 = vshrl.u32 %v4090_v49, 16  ;;  %v4093_v25 = vld [vmem:[#allocation2 + $0x78] sm:$0xf]  ;;  %v14761_v40 = vld [vmem:[%s20342_s1 + $0x220] sm:$0xff]  }
 0x180   :  { %v4176_v6 = vsel %vm15935_vm4, %v4171_v0, %v4175_v47  ;;  %13835 = vmatprep.mubr.bf16.mxu0 %v14753_v56  ;;  %13913 = vmatprep.subr.bf16.mxu0 %v14755_v18  ;;  %v4205_v53 = vshll.u32 %v4090_v49, 16  ;;  %v4184_v12 = vor.u32 %v4183_v51, %v4180_v61  ;;  %v4211_v17 = vshll.u32 %v4091_v58, 16  ;;  %v17277_v33 = vld [vmem:[#allocation2 + $0x7c] sm:$0xf]  ;;  %v4095_v36 = vld [vmem:[#allocation2 + $0x80] sm:$0x1] }
 0x181   :  { %v17233_v42 = vpop.f32.mrf.mxu0  ;;  %v17236_v50 = vpop.f32.mrf.mxu1  ;;  %v12186_v29 = vcombine.low %v4166_v19, %v4176_v6  ;;  %v4194_v13 = vor.u32 %v4193_v1, %v4189_v4  ;;  %v4215_v41 = vshrl.u32 %v4091_v58, 16  ;;  %v4204_v7 = vrot.slane %v4202_v23, 4  ;;  %v14764_v23 = vld [vmem:[%s20342_s1 + $0x218] sm:$0xff]  }
 0x182   :  { %v4207_v35 = vrot.slane %v4205_v53, 5  ;;  %v4221_v59 = vshll.u32 %v17245_v16, 16  ;;  %v4185_v15 = vrot.slane %v4184_v12, 4  ;;  %v4213_v49 = vrot.slane %v4211_v17, 5  ;;  %v4096_v12 = vld [vmem:[#allocation2 + $0x90] sm:$0xf] }
 0x183   :  { %v17247_v2 = vpop.f32.mrf.mxu0  ;;  %v17250_v57 = vpop.f32.mrf.mxu1  ;;  %13880 = vmatmul.mubr.bf16.vlgmr.msra.gmra.mxu1 %v12186_v29  ;;  %v4195_v47 = vrot.slane %v4194_v13, 4  ;;  %13914 = vmatpush3.bf16.msra.mxu0 %v14755_v18  ;;  %v4217_v22 = vrot.slane %v4215_v41, 4  ;;  %v17275_v0 = vadd.f32 %v17155_v3, %v17186_v5  ;;  %v17290_v3 = vadd.f32 %v17178_v32, %v17206_v28 }
 0x184   :  { %v4208_v11 = vor.u32 %v4207_v35, %v4204_v7  ;;  %v4223_v58 = vrot.slane %v4221_v59, 5  ;;  %13915 = vmatprep.subr.bf16.mxu0 %v14758_v44  ;;  %v4190_v19 = vsel %vm15935_vm4, %v4185_v15, %v4189_v4  ;;  %v4226_v1 = vshrl.u32 %v4093_v25, 16  ;;  %v17309_v35 = vld [vmem:[#allocation2 + $0x94] sm:$0xf]  ;;  %v17311_v59 = vld [vmem:[#allocation2 + $0x98] sm:$0x1] }
 0x185   :  { %v17261_v34 = vpop.f32.mrf.mxu1  ;;  %v4200_v61 = vsel %vm15935_vm4, %v4195_v47, %v4199_v21  ;;  %v4218_v9 = vor.u32 %v4217_v22, %v4213_v49  ;;  %v4229_v29 = vshll.u32 %v4093_v25, 16  ;;  %v4235_v21 = vshll.u32 %v17277_v33, 16  ;;  %v14757_v15 = vld [vmem:[#allocation2 + $0x90] sm:$0xff]  }
 0x186   :  { %20414 = vst [vmem:[#allocation16_spill] sm:$0xff] %v17261_v34  ;;  %13836 = vmatmul.mubr.bf16.gmra.mxu0 %v14754_v52  ;;  %v12187_v6 = vcombine.low %v4190_v19, %v4200_v61  ;;  %v4209_v51 = vrot.slane %v4208_v11, 4  ;;  %v4239_v32 = vshrl.u32 %v17277_v33, 16  ;;  %v4245_v28 = vshll.u32 %v4095_v36, 16  ;;  %v4099_v19 = vld [vmem:[#allocation2 + $0xa8] sm:$0xf] }
 0x187   :  { %v17266_v56 = vpop.f32.mrf.mxu0  ;;  %v17269_v48 = vpop.f32.mrf.mxu1  ;;  %v4219_v53 = vrot.slane %v4218_v9, 4  ;;  %13839 = vmatprep.mubr.bf16.mxu0 %v14756_v37  ;;  %13916 = vmatpush3.bf16.msra.mxu0 %v14758_v44  ;;  %v4228_v17 = vrot.slane %v4226_v1, 4  ;;  %v4231_v41 = vrot.slane %v4229_v29, 5  ;;  %v17307_v7 = vadd.f32 %v17188_v14, %v17211_v20  ;;  %v14759_v1 = vld [vmem:[#allocation2 + $0xa8] sm:$0xff]  }
 0x188   :  { %13883 = vmatprep.mubr.bf16.mxu1 %v12187_v6  ;;  %v4214_v13 = vsel %vm15935_vm4, %v4209_v51, %v4213_v49  ;;  %13917 = vmatprep.subr.bf16.mxu0 %v14761_v40  ;;  %v4237_v47 = vrot.slane %v4235_v21, 5  ;;  %v4241_v22 = vrot.slane %v4239_v32, 4  ;;  %v4247_v49 = vrot.slane %v4245_v28, 5 }
 0x189   :  { %v17271_v55 = vpop.f32.mrf.mxu0  ;;  %v17282_v18 = vpop.f32.mrf.mxu1  ;;  %v4224_v44 = vsel %vm15935_vm4, %v4219_v53, %v4223_v58  ;;  %v4232_v36 = vor.u32 %v4231_v41, %v4228_v17  ;;  %v4250_v14 = vshrl.u32 %v4096_v12, 16  ;;  %v4253_v20 = vshll.u32 %v4096_v12, 16  ;;  %v17322_v58 = vld [vmem:[#allocation2 + $0xac] sm:$0xf]  ;;  %v14767_v12 = vld [vmem:[%s20342_s1 + $0x210] sm:$0xff]  }
 0x18a   :  { %v12188_v11 = vcombine.low %v4214_v13, %v4224_v44  ;;  %v4242_v61 = vor.u32 %v4241_v22, %v4237_v47  ;;  %v4259_v9 = vshll.u32 %v17309_v35, 16  ;;  %v4263_v6 = vshrl.u32 %v17309_v35, 16 }
 0x18b   :  { %v17292_v5 = vpop.f32.mrf.mxu0  ;;  %v17297_v4 = vpop.f32.mrf.mxu1  ;;  %v4269_v51 = vshll.u32 %v17311_v59, 16  ;;  %13918 = vmatpush3.bf16.msra.mxu0 %v14761_v40  ;;  %v4233_v21 = vrot.slane %v4232_v36, 4  ;;  %v4252_v32 = vrot.slane %v4250_v14, 4  ;;  %v4255_v28 = vrot.slane %v4253_v20, 5  ;;  %v17341_v20 = vld [vmem:[#allocation2 + $0xb0] sm:$0x1] }
 0x18c   :  { %13884 = vmatmul.mubr.bf16.gmra.mxu1 %v12188_v11  ;;  %13919 = vmatprep.subr.bf16.mxu0 %v14764_v23  ;;  %v4243_v13 = vrot.slane %v4242_v61, 4  ;;  %v4261_v17 = vrot.slane %v4259_v9, 5  ;;  %v4265_v41 = vrot.slane %v4263_v6, 4  ;;  %v17339_v14 = vadd.f32 %v17198_v8, %v17233_v42  ;;  %20417 = vst [vmem:[#allocation19_spill] sm:$0xff] %v17341_v20  ;;  %v14770_v42 = vld [vmem:[%s20342_s1 + $0x208] sm:$0xff]  }
 0x18d   :  { %v17301_v52 = vpop.f32.mrf.mxu0  ;;  %v17313_v37 = vpop.f32.mrf.mxu1  ;;  %v4238_v40 = vsel %vm15935_vm4, %v4233_v21, %v4237_v47  ;;  %v4256_v11 = vor.u32 %v4255_v28, %v4252_v32  ;;  %v4271_v36 = vrot.slane %v4269_v51, 5  ;;  %v17347_v6 = vadd.f32 %v17213_v26, %v17266_v56  ;;  %v17349_v47 = vld [vmem:[#allocation2 + $0xc4] sm:$0xf]  ;;  %v17359_v56 = vld [vmem:[#allocation2 + $0xc8] sm:$0x1] }
 0x18e   :  { %20415 = vst [vmem:[#allocation17_spill] sm:$0xff] %v17301_v52  ;;  %20416 = vst [vmem:[#allocation18_spill] sm:$0xff] %v17313_v37  ;;  %13840 = vmatmul.mubr.bf16.gmra.mxu0 %v14757_v15  ;;  %v4248_v61 = vsel %vm15935_vm4, %v4243_v13, %v4247_v49  ;;  %v4266_v9 = vor.u32 %v4265_v41, %v4261_v17  ;;  %v4274_v15 = vshrl.u32 %v4099_v19, 16  ;;  %v4102_v37 = vld [vmem:[#allocation2 + $0xc0] sm:$0xf]  ;;  %v4277_v32 = vshll.u32 %v4099_v19, 16 }
 0x18f   :  { %v17326_v53 = vpop.f32.mrf.mxu1  ;;  %13843 = vmatprep.mubr.bf16.mxu0 %v14759_v1  ;;  %20418 = vst [vmem:[#allocation20_spill] sm:$0xff] %v17347_v6  ;;  %20419 = vst [vmem:[#allocation21_spill] sm:$0xff] %v17349_v47  ;;  %13920 = vmatpush3.bf16.msra.mxu0 %v14764_v23  ;;  %v12189_v49 = vcombine.low %v4238_v40, %v4248_v61  ;;  %v4257_v21 = vrot.slane %v4256_v11, 4  ;;  %v14760_v1 = vld [vmem:[#allocation2 + $0xc0] sm:$0xff]   ;;  %v4283_v26 = vshll.u32 %v17322_v58, 16  ;;  %v4287_v23 = vshrl.u32 %v17322_v58, 16 }
 0x190   :  { %v17317_v25 = vpop.f32.mrf.mxu0  ;;  %13921 = vmatprep.subr.bf16.mxu0 %v14767_v12  ;;  %v4267_v28 = vrot.slane %v4266_v9, 4  ;;  %v4276_v13 = vrot.slane %v4274_v15, 4  ;;  %v4293_v41 = vshll.u32 %v17341_v20, 16  ;;  %v4279_v40 = vrot.slane %v4277_v32, 5 }
 0x191   :  { %v17333_v22 = vpop.f32.mrf.mxu1  ;;  %13887 = vmatprep.mubr.bf16.mxu1 %v12189_v49  ;;  %v4262_v6 = vsel %vm15935_vm4, %v4257_v21, %v4261_v17  ;;  %v4285_v11 = vrot.slane %v4283_v26, 5  ;;  %v17367_v19 = vadd.f32 %v17236_v50, %v17271_v55  ;;  %v4289_v15 = vrot.slane %v4287_v23, 4  ;;  %v14773_v17 = vld [vmem:[%s20342_s1 + $0x200] sm:$0xff]  }
 0x192   :  { %v17324_v29 = vpop.f32.mrf.mxu0  ;;  %v4272_v9 = vsel %vm15935_vm4, %v4267_v28, %v4271_v36  ;;  %v4295_v34 = vrot.slane %v4293_v41, 5  ;;  %v4298_v52 = vshrl.u32 %v4102_v37, 16  ;;  %v4280_v21 = vor.u32 %v4279_v40, %v4276_v13  ;;  %v4105_v13 = vld [vmem:[#allocation2 + $0xf0] sm:$0xf] }
 0x193   :  { %v17353_v8 = vpop.f32.mrf.mxu1  ;;  %20421 = vst [vmem:[#allocation23_spill] sm:$0xff] %v17367_v19  ;;  %13922 = vmatpush3.bf16.msra.mxu0 %v14767_v12  ;;  %v12190_v49 = vcombine.low %v4262_v6, %v4272_v9  ;;  %v4301_v32 = vshll.u32 %v4102_v37, 16  ;;  %v4307_v50 = vshll.u32 %v17349_v47, 16  ;;  %v4290_v55 = vor.u32 %v4289_v15, %v4285_v11  ;;  %v17391_v19 = vld [vmem:[#allocation2 + $0xf4] sm:$0xf] }
 0x194   :  { %v17331_v44 = vpop.f32.mrf.mxu0  ;;  %13923 = vmatprep.subr.bf16.mxu0 %v14770_v42  ;;  %v4300_v26 = vrot.slane %v4298_v52, 4  ;;  %v4311_v36 = vshrl.u32 %v17349_v47, 16  ;;  %v4317_v28 = vshll.u32 %v17359_v56, 16  ;;  %v4281_v41 = vrot.slane %v4280_v21, 4  ;;  %20424 = vst [vmem:[#allocation26_spill] sm:$0xff] %v17391_v19 }
 0x195   :  { %v17369_v61 = vpop.f32.mrf.mxu1  ;;  %13888 = vmatmul.mubr.bf16.gmra.mxu1 %v12190_v49  ;;  %v4309_v6 = vrot.slane %v4307_v50, 5  ;;  %v4291_v9 = vrot.slane %v4290_v55, 4  ;;  %v17389_v15 = vadd.f32 %v17250_v57, %v17292_v5  ;;  %v14763_v50 = vld [vmem:[#allocation2 + $0x108] sm:$0xff]   ;;  %v17401_v55 = vld [vmem:[#allocation2 + $0xf8] sm:$0x1]  ;;  %v4325_v40 = vshll.u32 %v4105_v13, 16 }
 0x196   :  { %v17351_v51 = vpop.f32.mrf.mxu0  ;;  %20422 = vst [vmem:[#allocation24_spill] sm:$0xff] %v17369_v61  ;;  %13844 = vmatmul.mubr.bf16.gmra.mxu0 %v14760_v1  ;;  %v4303_v61 = vrot.slane %v4301_v32, 5  ;;  %v4313_v52 = vrot.slane %v4311_v36, 4  ;;  %v4286_v1 = vsel %vm15935_vm4, %v4281_v41, %v4285_v11  ;;  %v4319_v21 = vrot.slane %v4317_v28, 5  ;;  %20426 = vst [vmem:[#allocation28_spill] sm:$0xff] %v17401_v55  ;;  %v14765_v41 = vld [vmem:[#allocation2 + $0x120] sm:$0xff]  }
 0x197   :  { %20420 = vst [vmem:[#allocation22_spill] sm:$0xff] %v17351_v51  ;;  %v14762_v51 = vld [vmem:[#allocation2 + $0xf0] sm:$0xff]   ;;  %20423 = vst [vmem:[#allocation25_spill] sm:$0xff] %v17389_v15  ;;  %13924 = vmatpush3.bf16.msra.mxu0 %v14770_v42  ;;  %v17399_v32 = vadd.f32 %v17269_v48, %v17317_v25  ;;  %v4108_v57 = vld [vmem:[#allocation2 + $0x108] sm:$0xf]  ;;  %v4322_v36 = vshrl.u32 %v4105_v13, 16 }
 0x198   :  { %13847 = vmatprep.mubr.bf16.mxu0 %v14762_v51  ;;  %v4304_v49 = vor.u32 %v4303_v61, %v4300_v26  ;;  %13925 = vmatprep.subr.bf16.mxu0 %v14773_v17  ;;  %v4296_v51 = vsel %vm15935_vm4, %v4291_v9, %v4295_v34  ;;  %v4314_v42 = vor.u32 %v4313_v52, %v4309_v6  ;;  %v17407_v11 = vld [vmem:[#allocation2 + $0x10c] sm:$0xf]  ;;  %v4331_v48 = vshll.u32 %v17391_v19, 16  ;;  %v17411_v28 = vld [vmem:[#allocation2 + $0x110] sm:$0x1] }
 0x199   :  { %v17373_v20 = vpop.f32.mrf.mxu0  ;;  %20425 = vst [vmem:[#allocation27_spill] sm:$0xff] %v17399_v32  ;;  %20427 = vst [vmem:[#allocation29_spill] sm:$0xff] %v17407_v11  ;;  %v12191_v61 = vcombine.low %v4286_v1, %v4296_v51  ;;  %v4335_v25 = vshrl.u32 %v17391_v19, 16  ;;  %v408_v34 = vld [vmem:[%s20341_s0 + $0x198] sm:$0xf]  ;;  %v4324_v9 = vrot.slane %v4322_v36, 4 }
 0x19a   :  { %v4305_v26 = vrot.slane %v4304_v49, 4  ;;  %20428 = vst [vmem:[#allocation30_spill] sm:$0xff] %v17411_v28  ;;  %v4315_v13 = vrot.slane %v4314_v42, 4  ;;  %v4327_v52 = vrot.slane %v4325_v40, 5  ;;  %v4341_v1 = vshll.u32 %v17401_v55, 16 }
 0x19b   :  { %v17381_v23 = vpop.f32.mrf.mxu0  ;;  %v409_v49 = vld [vmem:[%s20341_s0 + $0x19c] sm:$0xf]  ;;  %518 = vst.msk [vmem:[#allocation2 + $0x198] sm:$0xf] %vm414_vm0, %v408_v34  ;;  %13926 = vmatpush3.bf16.msra.mxu0 %v14773_v17  ;;  %13891 = vmatprep.mubr.bf16.mxu1 %v12191_v61  ;;  %v4337_v19 = vrot.slane %v4335_v25, 4  ;;  %v17429_v42 = vadd.f32 %v17282_v18, %v17324_v29  ;;  %v4346_v47 = vshrl.u32 %v4108_v57, 16 }
 0x19c   :  { %v17384_v37 = vpop.f32.mrf.mxu1  ;;  %v4310_v51 = vsel %vm15935_vm4, %v4305_v26, %v4309_v6  ;;  %519 = vst.msk [vmem:[#allocation2 + $0x19c] sm:$0xf] %vm414_vm0, %v409_v49  ;;  %v4320_v40 = vsel %vm15935_vm4, %v4315_v13, %v4319_v21  ;;  %v4328_v36 = vor.u32 %v4327_v52, %v4324_v9  ;;  %v4343_v55 = vrot.slane %v4341_v1, 5  ;;  %v410_v18 = vld [vmem:[%s20341_s0 + $0x1a0] sm:$0x1] }
 0x19d   :  { %v17393_v12 = vpop.f32.mrf.mxu0  ;;  %20430 = vst [vmem:[#allocation32_spill] sm:$0xff] %v17429_v42  ;;  %v12192_v34 = vcombine.low %v4310_v51, %v4320_v40  ;;  %v4349_v61 = vshll.u32 %v4108_v57, 16  ;;  %v4355_v6 = vshll.u32 %v17407_v11, 16  ;;  %v4348_v25 = vrot.slane %v4346_v47, 4  ;;  %520 = vst.msk [vmem:[#allocation2 + $0x1a0] sm:$0x1] %vm417_vm1, %v410_v18 }
 0x19e   :  { %v17403_v5 = vpop.f32.mrf.mxu1  ;;  %13848 = vmatmul.mubr.bf16.gmra.mxu0 %v14763_v50  ;;  %v4329_v29 = vrot.slane %v4328_v36, 4  ;;  %v4359_v21 = vshrl.u32 %v17407_v11, 16  ;;  %v4365_v13 = vshll.u32 %v17411_v28, 16  ;;  %v4111_v50 = vld [vmem:[#allocation2 + $0x120] sm:$0xf]  ;;  %v17447_v52 = vadd.f32 %v17297_v4, %v17331_v44  ;;  %v14766_v44 = vld [vmem:[#allocation2 + $0x138] sm:$0xff]  }
 0x19f   :  { %v17413_v32 = vpop.f32.mrf.mxu0  ;;  %13851 = vmatprep.mubr.bf16.mxu0 %v14765_v41  ;;  %13892 = vmatmul.mubr.bf16.gmra.mxu1 %v12192_v34  ;;  %v4351_v57 = vrot.slane %v4349_v61, 5  ;;  %v4357_v9 = vrot.slane %v4355_v6, 5  ;;  %v17449_v1 = vld [vmem:[#allocation2 + $0x124] sm:$0xf]  ;;  %v17456_v36 = vld [vmem:[#allocation2 + $0x128] sm:$0x1]  ;;  %v17462_v4 = vadd.f32 %v17326_v53, %v17373_v20 }
 0x1a0   :  { %20429 = vst [vmem:[#allocation31_spill] sm:$0xff] %v17413_v32  ;;  %v17415_v15 = vpop.f32.mrf.mxu1  ;;  %v4333_v32 = vrot.slane %v4331_v48, 5  ;;  %20432 = vst [vmem:[#allocation34_spill] sm:$0xff] %v17447_v52  ;;  %v4361_v51 = vrot.slane %v4359_v21, 4  ;;  %v4367_v40 = vrot.slane %v4365_v13, 5  ;;  %v4370_v61 = vshrl.u32 %v4111_v50, 16 }
 0x1a1   :  { %20433 = vst [vmem:[#allocation35_spill] sm:$0xff] %v17449_v1  ;;  %20434 = vst [vmem:[#allocation36_spill] sm:$0xff] %v17456_v36  ;;  %v14768_v6 = vld [vmem:[#allocation2 + $0x150] sm:$0xff]   ;;  %v4373_v21 = vshll.u32 %v4111_v50, 16  ;;  %v4379_v13 = vshll.u32 %v17449_v1, 16  ;;  %v4389_v53 = vshll.u32 %v17456_v36, 16  ;;  %v17477_v50 = vadd.f32 %v17333_v22, %v17381_v23 }
 0x1a2   :  { %v4338_v17 = vor.u32 %v4337_v19, %v4333_v32  ;;  %v17437_v48 = vpop.f32.mrf.mxu1  ;;  %v4334_v41 = vsel %vm15935_vm4, %v4329_v29, %v4333_v32  ;;  %20435 = vst [vmem:[#allocation37_spill] sm:$0xff] %v17462_v4  ;;  %v4362_v29 = vor.u32 %v4361_v51, %v4357_v9  ;;  %v17471_v20 = vld [vmem:[#allocation2 + $0x13c] sm:$0xf] }
 0x1a3   :  { %20431 = vst [vmem:[#allocation33_spill] sm:$0xff] %v17437_v48  ;;  %v4114_v48 = vld [vmem:[#allocation2 + $0x138] sm:$0xf]  ;;  %20436 = vst [vmem:[#allocation38_spill] sm:$0xff] %v17471_v20  ;;  %v4375_v4 = vrot.slane %v4373_v21, 5  ;;  %v4381_v52 = vrot.slane %v4379_v13, 5 }
 0x1a4   :  { %v4339_v19 = vrot.slane %v4338_v17, 4  ;;  %v4352_v17 = vor.u32 %v4351_v57, %v4348_v25  ;;  %v4383_v25 = vshrl.u32 %v17449_v1, 16  ;;  %v4363_v57 = vrot.slane %v4362_v29, 4  ;;  %20437 = vst [vmem:[#allocation39_spill] sm:$0xff] %v17477_v50  ;;  %v4117_v50 = vld [vmem:[#allocation2 + $0x150] sm:$0xf] }
 0x1a5   :  { %v17435_v26 = vpop.f32.mrf.mxu0  ;;  %v4397_v21 = vshll.u32 %v4114_v48, 16  ;;  %v4403_v22 = vshll.u32 %v17471_v20, 16 }
 0x1a6   :  { %v4344_v34 = vsel %vm15935_vm4, %v4339_v19, %v4343_v55  ;;  %v4353_v28 = vrot.slane %v4352_v17, 4  ;;  %v4372_v55 = vrot.slane %v4370_v61, 4  ;;  %13852 = vmatmul.mubr.bf16.gmra.mxu0 %v14766_v44  ;;  %v4385_v51 = vrot.slane %v4383_v25, 4  ;;  %v17481_v17 = vld [vmem:[#allocation2 + $0x140] sm:$0x1] }
 0x1a7   :  { %v17451_v49 = vpop.f32.mrf.mxu0  ;;  %v12193_v32 = vcombine.low %v4334_v41, %v4344_v34  ;;  %v4391_v34 = vrot.slane %v4389_v53, 5  ;;  %20438 = vst [vmem:[#allocation40_spill] sm:$0xff] %v17481_v17  ;;  %v4394_v61 = vshrl.u32 %v4114_v48, 16  ;;  %13855 = vmatprep.mubr.bf16.mxu0 %v14768_v6  ;;  %v4407_v44 = vshrl.u32 %v17471_v20, 16 }
 0x1a8   :  { %v17466_v47 = vpop.f32.mrf.mxu1  ;;  %v4358_v41 = vsel %vm15935_vm4, %v4353_v28, %v4357_v9  ;;  %v4376_v29 = vor.u32 %v4375_v4, %v4372_v55  ;;  %v4386_v28 = vor.u32 %v4385_v51, %v4381_v52  ;;  %v4399_v25 = vrot.slane %v4397_v21, 5  ;;  %v14769_v55 = vld [vmem:[#allocation2 + $0x168] sm:$0xff]   ;;  %v17509_v21 = vld [vmem:[#allocation2 + $0x158] sm:$0x1] }
 0x1a9   :  { %v17464_v18 = vpop.f32.mrf.mxu0  ;;  %13895 = vmatprep.mubr.bf16.mxu1 %v12193_v32  ;;  %v4368_v32 = vsel %vm15935_vm4, %v4363_v57, %v4367_v40  ;;  %v4396_v9 = vrot.slane %v4394_v61, 4  ;;  %v4405_v53 = vrot.slane %v4403_v22, 5  ;;  %v4409_v4 = vrot.slane %v4407_v44, 4  ;;  %v17499_v57 = vld [vmem:[#allocation2 + $0x154] sm:$0xf]  ;;  %20444 = vst [vmem:[#allocation46_spill] sm:$0xff] %v17509_v21 }
 0x1aa   :  { %v17473_v19 = vpop.f32.mrf.mxu1  ;;  %v12194_v23 = vcombine.low %v4358_v41, %v4368_v32  ;;  %v4377_v13 = vrot.slane %v4376_v29, 4  ;;  %v4387_v48 = vrot.slane %v4386_v28, 4  ;;  %v17497_v6 = vadd.f32 %v17353_v8, %v17393_v12  ;;  %20442 = vst [vmem:[#allocation44_spill] sm:$0xff] %v17499_v57  ;;  %v14771_v22 = vld [vmem:[#allocation2 + $0x180] sm:$0xff]   ;;  %v4120_v40 = vld [vmem:[#allocation2 + $0x168] sm:$0xf] }
 0x1ab   :  { %v17483_v36 = vpop.f32.mrf.mxu0  ;;  %v4400_v61 = vor.u32 %v4399_v25, %v4396_v9  ;;  %v17507_v29 = vadd.f32 %v17384_v37, %v17435_v26  ;;  %v4410_v12 = vor.u32 %v4409_v4, %v4405_v53  ;;  %v4418_v28 = vshrl.u32 %v4117_v50, 16 }
 0x1ac   :  { %20439 = vst [vmem:[#allocation41_spill] sm:$0xff] %v17483_v36  ;;  %v17485_v1 = vpop.f32.mrf.mxu1  ;;  %v4413_v36 = vshll.u32 %v17481_v17, 16  ;;  %13896 = vmatmul.mubr.bf16.gmra.mxu1 %v12194_v23  ;;  %20441 = vst [vmem:[#allocation43_spill] sm:$0xff] %v17497_v6  ;;  %v4382_v51 = vsel %vm15935_vm4, %v4377_v13, %v4381_v52  ;;  %v4392_v8 = vsel %vm15935_vm4, %v4387_v48, %v4391_v34  ;;  %v4421_v44 = vshll.u32 %v4117_v50, 16  ;;  %v17521_v13 = vld [vmem:[#allocation2 + $0x170] sm:$0x1] }
 0x1ad   :  { %20443 = vst [vmem:[#allocation45_spill] sm:$0xff] %v17507_v29  ;;  %v4401_v9 = vrot.slane %v4400_v61, 4  ;;  %v4427_v37 = vshll.u32 %v17499_v57, 16  ;;  %v4431_v26 = vshrl.u32 %v17499_v57, 16  ;;  %20446 = vst [vmem:[#allocation48_spill] sm:$0xff] %v17521_v13  ;;  %v4411_v29 = vrot.slane %v4410_v12, 4 }
 0x1ae   :  { %v17492_v42 = vpop.f32.mrf.mxu1  ;;  %v4415_v32 = vrot.slane %v4413_v36, 5  ;;  %v12195_v36 = vcombine.low %v4382_v51, %v4392_v8  ;;  %13856 = vmatmul.mubr.bf16.gmra.mxu0 %v14769_v55  ;;  %v4420_v34 = vrot.slane %v4418_v28, 4  ;;  %v4423_v48 = vrot.slane %v4421_v44, 5 }
 0x1af   :  { %20440 = vst [vmem:[#allocation42_spill] sm:$0xff] %v17492_v42  ;;  %v17515_v42 = vld [vmem:[#allocation2 + $0x16c] sm:$0xf]  ;;  %v4437_v50 = vshll.u32 %v17509_v21, 16  ;;  %v4406_v51 = vsel %vm15935_vm4, %v4401_v9, %v4405_v53  ;;  %v4429_v61 = vrot.slane %v4427_v37, 5  ;;  %v4433_v8 = vrot.slane %v4431_v26, 4  ;;  %13859 = vmatprep.mubr.bf16.mxu0 %v14771_v22 }
 0x1b0   :  { %20445 = vst [vmem:[#allocation47_spill] sm:$0xff] %v17515_v42  ;;  %13899 = vmatprep.mubr.bf16.mxu1 %v12195_v36  ;;  %v17532_v17 = vadd.f32 %v17403_v5, %v17451_v49  ;;  %v4416_v55 = vsel %vm15935_vm4, %v4411_v29, %v4415_v32  ;;  %v4424_v12 = vor.u32 %v4423_v48, %v4420_v34  ;;  %v4442_v44 = vshrl.u32 %v4120_v40, 16  ;;  %v14772_v21 = vld [vmem:[#allocation2 + $0x198] sm:$0xff]   ;;  %v4123_v36 = vld [vmem:[#allocation2 + $0x180] sm:$0xf] }
 0x1b1   :  { %v17501_v41 = vpop.f32.mrf.mxu0  ;;  %v17511_v23 = vpop.f32.mrf.mxu1  ;;  %v4439_v28 = vrot.slane %v4437_v50, 5  ;;  %v12196_v53 = vcombine.low %v4406_v51, %v4416_v55  ;;  %v4434_v9 = vor.u32 %v4433_v8, %v4429_v61  ;;  %v4445_v37 = vshll.u32 %v4120_v40, 16  ;;  %v17541_v5 = vld [vmem:[#allocation2 + $0x184] sm:$0xf]  ;;  %v17547_v34 = vld [vmem:[#allocation2 + $0x188] sm:$0x1] }
 0x1b2   :  { %20447 = vst [vmem:[#allocation49_spill] sm:$0xff] %v17532_v17  ;;  %v4451_v26 = vshll.u32 %v17515_v42, 16  ;;  %20449 = vst [vmem:[#allocation51_spill] sm:$0xff] %v17541_v5  ;;  %v4425_v22 = vrot.slane %v4424_v12, 4  ;;  %v4444_v17 = vrot.slane %v4442_v44, 4  ;;  %v4455_v32 = vshrl.u32 %v17515_v42, 16 }
 0x1b3   :  { %v17517_v52 = vpop.f32.mrf.mxu0  ;;  %v17523_v25 = vpop.f32.mrf.mxu1  ;;  %v4461_v29 = vshll.u32 %v17521_v13, 16  ;;  %20451 = vst [vmem:[#allocation53_spill] sm:$0xff] %v17547_v34  ;;  %v4435_v50 = vrot.slane %v4434_v9, 4  ;;  %v4447_v51 = vrot.slane %v4445_v37, 5  ;;  %v17553_v8 = vadd.f32 %v17415_v15, %v17464_v18 }
 0x1b4   :  { %13900 = vmatmul.mubr.bf16.gmra.mxu1 %v12196_v53  ;;  %v4453_v40 = vrot.slane %v4451_v26, 5  ;;  %v17557_v55 = vadd.f32 %v17133_v60, %v17153_v43  ;;  %v4430_v12 = vsel %vm15935_vm4, %v4425_v22, %v4429_v61  ;;  %v4457_v44 = vrot.slane %v4455_v32, 4  ;;  %v17571_v43 = vld [vmem:[#allocation2 + $0x19c] sm:$0xf] }
 0x1b5   :  { %v17526_v4 = vpop.f32.mrf.mxu0  ;;  %v17534_v6 = vpop.f32.mrf.mxu1  ;;  %20452 = vst [vmem:[#allocation54_spill] sm:$0xff] %v17553_v8  ;;  %v4440_v9 = vsel %vm15935_vm4, %v4435_v50, %v4439_v28  ;;  %v4448_v37 = vor.u32 %v4447_v51, %v4444_v17  ;;  %v17569_v15 = vadd.f32 %v17466_v47, %v17501_v41  ;;  %v4466_v60 = vshrl.u32 %v4123_v36, 16  ;;  %v17580_v41 = vld [vmem:[#allocation2 + $0x1a0] sm:$0x1] }
 0x1b6   :  { %v12197_v18 = vcombine.low %v4430_v12, %v4440_v9  ;;  %v4458_v61 = vor.u32 %v4457_v44, %v4453_v40  ;;  %13860 = vmatmul.mubr.bf16.gmra.mxu0 %v14772_v21  ;;  %v4469_v26 = vshll.u32 %v4123_v36, 16  ;;  %v4475_v22 = vshll.u32 %v17541_v5, 16  ;;  %20454 = vst [vmem:[#allocation56_spill] sm:$0xff] %v17580_v41 }
 0x1b7   :  { %v17538_v57 = vpop.f32.mrf.mxu0  ;;  %v17543_v49 = vpop.f32.mrf.mxu1  ;;  %20453 = vst [vmem:[#allocation55_spill] sm:$0xff] %v17569_v15  ;;  %v4449_v8 = vrot.slane %v4448_v37, 4  ;;  %v4468_v28 = vrot.slane %v4466_v60, 4  ;;  %v4479_v17 = vshrl.u32 %v17541_v5, 16  ;;  %v4485_v47 = vshll.u32 %v17547_v34, 16 }
 0x1b8   :  { %20448 = vst [vmem:[#allocation50_spill] sm:$0xff] %v17538_v57  ;;  %20450 = vst [vmem:[#allocation52_spill] sm:$0xff] %v17543_v49  ;;  %v4463_v49 = vrot.slane %v4461_v29, 5  ;;  %v4126_v57 = vld [vmem:[#allocation2 + $0x198] sm:$0xf]  ;;  %13903 = vmatprep.mubr.bf16.mxu1 %v12197_v18  ;;  %v4459_v50 = vrot.slane %v4458_v61, 4  ;;  %v17584_v21 = vadd.f32 %v17473_v19, %v17517_v52 }
 0x1b9   :  { %v17549_v48 = vpop.f32.mrf.mxu0  ;;  %v17563_v53 = vpop.f32.mrf.mxu1  ;;  %v4471_v51 = vrot.slane %v4469_v26, 5  ;;  %v4477_v12 = vrot.slane %v4475_v22, 5  ;;  %v4454_v9 = vsel %vm15935_vm4, %v4449_v8, %v4453_v40  ;;  %v4481_v37 = vrot.slane %v4479_v17, 4  ;;  %v4835_v34 = vld [vmem:[#allocation2 + $0x18] sm:$0xe] }
 0x1ba   :  { %20455 = vst [vmem:[#allocation57_spill] sm:$0xff] %v17584_v21  ;;  %v4487_v60 = vrot.slane %v4485_v47, 5  ;;  %v4490_v15 = vshrl.u32 %v4126_v57, 16  ;;  %v4464_v18 = vsel %vm15935_vm4, %v4459_v50, %v4463_v49  ;;  %v4493_v26 = vshll.u32 %v4126_v57, 16  ;;  %v4836_v8 = vld [vmem:[#allocation2 + $0x30] sm:$0xe] }
 0x1bb   :  { %v17561_v13 = vpop.f32.mrf.mxu0  ;;  %v17576_v29 = vpop.f32.mrf.mxu1  ;;  %v4472_v61 = vor.u32 %v4471_v51, %v4468_v28  ;;  %v4499_v22 = vshll.u32 %v17571_v43, 16  ;;  %v12198_v21 = vcombine.low %v4454_v9, %v4464_v18  ;;  %v4482_v5 = vor.u32 %v4481_v37, %v4477_v12 }
 0x1bc   :  { %v4492_v42 = vrot.slane %v4490_v15, 4  ;;  %v4503_v40 = vshrl.u32 %v17571_v43, 16  ;;  %v4495_v47 = vrot.slane %v4493_v26, 5  ;;  %v4509_v11 = vshll.u32 %v17580_v41, 16 }
 0x1bd   :  { %v17574_v32 = vpop.f32.mrf.mxu0  ;;  %v17588_v44 = vpop.f32.mrf.mxu1  ;;  %v4473_v17 = vrot.slane %v4472_v61, 4  ;;  %v4501_v20 = vrot.slane %v4499_v22, 5  ;;  %v17607_v28 = vadd.f32 %v17160_v24, %v17196_v63  ;;  %13904 = vmatmul.mubr.bf16.gmra.mxu1 %v12198_v21  ;;  %v4483_v50 = vrot.slane %v4482_v5, 4  ;;  %v15398_v21 = vld [vmem:[#allocation2 + $0x1c] sm:$0xf] }
 0x1be   :  { %v4505_v51 = vrot.slane %v4503_v40, 4  ;;  %v17611_v15 = vadd.f32 %v17485_v1, %v17526_v4  ;;  %v4496_v37 = vor.u32 %v4495_v47, %v4492_v42  ;;  %v4511_v18 = vrot.slane %v4509_v11, 5  ;;  %v15399_v40 = vld [vmem:[#allocation2 + $0x20] sm:$0x1]  ;;  %v4837_v42 = vld [vmem:[#allocation2 + $0x48] sm:$0xe] }
 0x1bf   :  { %v17586_v36 = vpop.f32.mrf.mxu0  ;;  %v17597_v52 = vpop.f32.mrf.mxu1  ;;  %v4478_v9 = vsel %vm15935_vm4, %v4473_v17, %v4477_v12  ;;  %v12209_v61 = vrot.slane %v4835_v34, 9  ;;  %v4488_v24 = vsel %vm15935_vm4, %v4483_v50, %v4487_v60  ;;  %v4901_v5 = vrot.slane %v15398_v21, 5  ;;  %v4838_v21 = vld [vmem:[#allocation2 + $0x60] sm:$0xe] }
 0x1c0   :  { %20456 = vst [vmem:[#allocation58_spill] sm:$0xff] %v17597_v52  ;;  %v4506_v63 = vor.u32 %v4505_v51, %v4501_v20  ;;  %v4904_v52 = vrot.slane %v15399_v40, 5  ;;  %v12199_v41 = vcombine.low %v4478_v9, %v4488_v24  ;;  %v4497_v1 = vrot.slane %v4496_v37, 4 }
 0x1c1   :  { %v17595_v19 = vpop.f32.mrf.mxu0  ;;  %v2025_v4 = vadd.f32 %v17549_v48, %v17174_v39  ;;  %v12210_v12 = vrot.slane %v4836_v8, 9  ;;  %v4902_v47 = vsel %vm16320_vm7, %v12209_v61, %v4901_v5  ;;  %v4903_v60 = vrot.slane %v4901_v5, 4 }
 0x1c2   :  { %v4507_v17 = vrot.slane %v4506_v63, 4  ;;  %v20457_v50 = vrot.slane %v17192_v54, 5  ;;  %13907 = vmatprep.mubr.bf16.mxu1 %v12199_v41  ;;  %v4502_v9 = vsel %vm15935_vm4, %v4497_v1, %v4501_v20  ;;  %v2023_v8 = vadd.f32 %v17561_v13, %v17202_v45  ;;  %v4839_v1 = vld [vmem:[#allocation2 + $0x78] sm:$0xe] }
 0x1c3   :  { %v17601_v49 = vpop.f32.mrf.mxu0  ;;  %v17603_v57 = vpop.f32.mrf.mxu1  ;;  %v17636_v37 = vadd.f32 %v17511_v23, %v2025_v4  ;;  %v4905_v20 = vsel %vm16320_vm7, %v4903_v60, %v4904_v52  ;;  %v20460_v54 = vrot.slane %v17194_v30, 5  ;;  %v2026_v45 = vadd.f32 %v17574_v32, %v17220_v10  ;;  %v15401_v32 = vld [vmem:[#allocation2 + $0x50] sm:$0x1]  ;;  %v15402_v60 = vld [vmem:[#allocation2 + $0x64] sm:$0xf] }
 0x1c4   :  { %v4910_v51 = vrot.slane %v20457_v50, 4  ;;  %v20458_v39 = vmov %v20457_v50  ;;  %v4512_v41 = vsel %vm15935_vm4, %v4507_v17, %v4511_v18  ;;  %v12241_v23 = vcombine.low %v4902_v47, %v4905_v20  ;;  %v4841_v20 = vld [vmem:[#allocation2 + $0xa8] sm:$0xe] }
 0x1c5   :  { %v13646_v26 = vpop.f32.mrf.mxu0  ;;  %v17615_v22 = vpop.f32.mrf.mxu1  ;;  %v4909_v48 = vsel %vm16320_vm7, %v12210_v12, %v20458_v39  ;;  %v12200_v13 = vcombine.low %v4502_v9, %v4512_v41  ;;  %v17651_v40 = vadd.f32 %v17523_v25, %v2023_v8  ;;  %v17657_v52 = vadd.f32 %v17586_v36, %v17557_v55  ;;  %v15400_v12 = vld [vmem:[#allocation2 + $0x4c] sm:$0xf]  ;;  %v4840_v39 = vld [vmem:[#allocation2 + $0x90] sm:$0xe] }
 0x1c6   :  { %v4912_v63 = vsel %vm16320_vm7, %v4910_v51, %v20460_v54  ;;  %v17660_v30 = vadd.f32 %v17534_v6, %v2026_v45  ;;  %v12211_v4 = vrot.slane %v4837_v42, 9  ;;  %v4915_v10 = vrot.slane %v15400_v12, 5  ;;  %13927 = vmatprep.mubr.bf16.mxu0 %v12241_v23  ;;  %v4842_v12 = vld [vmem:[#allocation2 + $0xc0] sm:$0xe] }
 0x1c7   :  { %v1915_v11 = vpop.f32.mrf.mxu0  ;;  %v17621_v34 = vpop.f32.mrf.mxu1  ;;  %v12242_v5 = vcombine.low %v4909_v48, %v4912_v63  ;;  %13908 = vmatmul.mubr.bf16.gmra.mxu1 %v12200_v13  ;;  %v4918_v17 = vrot.slane %v15401_v32, 5  ;;  %v2029_v25 = vadd.f32 %v17595_v19, %v17240_v31  ;;  %v12212_v47 = vrot.slane %v4838_v21, 9 }
 0x1c8   :  { %v4922_v50 = vrot.slane %v15402_v60, 5  ;;  %v1479_v6 = vadd.f32 %v17208_v38, %v17247_v2  ;;  %v4916_v55 = vsel %vm16320_vm7, %v12211_v4, %v4915_v10  ;;  %v4917_v36 = vrot.slane %v4915_v10, 4 }
 0x1c9   :  { %v13649_v61 = vpop.f32.mrf.mxu0  ;;  %v17638_v24 = vpop.f32.mrf.mxu1  ;;  %13928 = vmatmul.mubr.bf16.vlgmr.msra.gmra.mxu0 %v12242_v5  ;;  %v2027_v42 = vadd.f32 %v17601_v49, %v17256_v46  ;;  %v17675_v21 = vadd.f32 %v17563_v53, %v2029_v25  ;;  %v2030_v48 = vadd.f32 %v13646_v26, %v17275_v0  ;;  %v17686_v46 = vadd.f32 %v1915_v11, %v17607_v28  ;;  %v15403_v11 = vld [vmem:[#allocation2 + $0x80] sm:$0x1] }
 0x1ca   :  { %20459 = vst [vmem:[#allocation59_spill] sm:$0xff] %v17638_v24  ;;  %v4923_v31 = vsel %vm16320_vm7, %v12212_v47, %v4922_v50  ;;  %v4924_v19 = vrot.slane %v4922_v50, 4  ;;  %v4919_v2 = vsel %vm16320_vm7, %v4917_v36, %v4918_v17  ;;  %v12213_v49 = vrot.slane %v4839_v1, 9  ;;  %v4843_v50 = vld [vmem:[#allocation2 + $0xf0] sm:$0xe] }
 0x1cb   :  { %v1928_v62 = vpop.f32.mrf.mxu0  ;;  %v17653_v18 = vpop.f32.mrf.mxu1  ;;  %v17683_v41 = vadd.f32 %v17576_v29, %v2027_v42  ;;  %v12243_v54 = vcombine.low %v4916_v55, %v4919_v2  ;;  %v20461_v53 = vrot.slane %v17245_v16, 5  ;;  %v17693_v26 = vadd.f32 %v17588_v44, %v2030_v48  ;;  %v20468_v48 = vld [vmem:[#allocation20_spill] sm:$0xff] }
 0x1cc   :  { %v4929_v63 = vrot.slane %v17277_v33, 5  ;;  %v4953_v29 = vrot.slane %v17359_v56, 5  ;;  %v4932_v23 = vrot.slane %v15403_v11, 5  ;;  %v2033_v5 = vadd.f32 %v13649_v61, %v17290_v3 }
 0x1cd   :  { %v13650_v51 = vpop.f32.mrf.mxu0  ;;  %v17664_v9 = vpop.f32.mrf.mxu1  ;;  %v4926_v0 = vsel %vm16320_vm7, %v4924_v19, %v20461_v53  ;;  %13931 = vmatprep.mubr.bf16.mxu0 %v12243_v54  ;;  %v12214_v4 = vrot.slane %v4840_v39, 9  ;;  %v4936_v44 = vrot.slane %v17309_v35, 5  ;;  %v2031_v32 = vadd.f32 %v1928_v62, %v17307_v7  ;;  %v20469_v54 = vld [vmem:[#allocation21_spill] sm:$0xff] }
 0x1ce   :  { %v12244_v28 = vcombine.low %v4923_v31, %v4926_v0  ;;  %v4930_v16 = vsel %vm16320_vm7, %v12213_v49, %v4929_v63  ;;  %v4931_v1 = vrot.slane %v4929_v63, 4  ;;  %v17705_v56 = vadd.f32 %v17603_v57, %v2033_v5  ;;  %v20467_v31 = vld [vmem:[#allocation19_spill] sm:$0xff] }
 0x1cf   :  { %v1931_v8 = vpop.f32.mrf.mxu0  ;;  %v17678_v38 = vpop.f32.mrf.mxu1  ;;  %v2034_v17 = vadd.f32 %v13650_v51, %v17339_v14  ;;  %v4937_v61 = vsel %vm16320_vm7, %v12214_v4, %v4936_v44  ;;  %v4938_v47 = vrot.slane %v4936_v44, 4  ;;  %v12215_v35 = vrot.slane %v4841_v20, 9  ;;  %v20464_v51 = vld [vmem:[#allocation17_spill] sm:$0xff]  ;;  %v20470_v0 = vld [vmem:[#allocation23_spill] sm:$0xff]  ;;  %v20474_v4 = vld [vmem:[#allocation26_spill] sm:$0xff] }
 0x1d0   :  { %v17708_v25 = vadd.f32 %v1931_v8, %v1479_v6  ;;  %v4933_v3 = vsel %vm16320_vm7, %v4931_v1, %v4932_v23  ;;  %v17715_v57 = vadd.f32 %v17615_v22, %v2031_v32  ;;  %v4943_v62 = vrot.slane %v17322_v58, 5  ;;  %v20465_v6 = vld [vmem:[#allocation16_spill] sm:$0xff] }
 0x1d1   :  { %v13653_v45 = vpop.f32.mrf.mxu0  ;;  %v17696_v13 = vpop.f32.mrf.mxu1  ;;  %13932 = vmatmul.mubr.bf16.gmra.mxu0 %v12244_v28  ;;  %v12245_v7 = vcombine.low %v4930_v16, %v4933_v3  ;;  %v17718_v14 = vadd.f32 %v17621_v34, %v2034_v17  ;;  %v1495_v36 = vadd.f32 %v20465_v6, %v20464_v51  ;;  %v20466_v42 = vrot.slane %v17311_v59, 5  ;;  %v20471_v28 = vld [vmem:[#allocation25_spill] sm:$0xff]  ;;  %v4844_v17 = vld [vmem:[#allocation2 + $0x108] sm:$0xe] }
 0x1d2   :  { %20462 = vst [vmem:[#allocation60_spill] sm:$0xff] %v17696_v13  ;;  %20463 = vst [vmem:[#allocation61_spill] sm:$0xff] %v17708_v25  ;;  %v4946_v19 = vrot.slane %v20467_v31, 5  ;;  %v2037_v8 = vadd.f32 %v13653_v45, %v20468_v48  ;;  %v4944_v34 = vsel %vm16320_vm7, %v12215_v35, %v4943_v62  ;;  %v4945_v58 = vrot.slane %v4943_v62, 4  ;;  %v20476_v62 = vld [vmem:[#allocation27_spill] sm:$0xff]  ;;  %v20496_v13 = vld [vmem:[#allocation49_spill] sm:$0xff] }
 0x1d3   :  { %v1944_v33 = vpop.f32.mrf.mxu0  ;;  %v13705_v10 = vpop.f32.mrf.mxu1  ;;  %v4940_v39 = vsel %vm16320_vm7, %v4938_v47, %v20466_v42  ;;  %13935 = vmatprep.mubr.bf16.mxu0 %v12245_v7  ;;  %v12216_v20 = vrot.slane %v4842_v12, 9  ;;  %v4950_v53 = vrot.slane %v20469_v54, 5  ;;  %v12217_v1 = vrot.slane %v4843_v50, 9  ;;  %v20480_v54 = vld [vmem:[#allocation30_spill] sm:$0xff] }
 0x1d4   :  { %v12246_v49 = vcombine.low %v4937_v61, %v4940_v39  ;;  %v2035_v59 = vadd.f32 %v1944_v33, %v20470_v0  ;;  %v17734_v63 = vadd.f32 %v17653_v18, %v2037_v8  ;;  %v4947_v5 = vsel %vm16320_vm7, %v4945_v58, %v4946_v19  ;;  %v20477_v39 = vld [vmem:[#allocation29_spill] sm:$0xff]  ;;  %v20478_v19 = vld [vmem:[#allocation32_spill] sm:$0xff]  ;;  %v20479_v8 = vld [vmem:[#allocation34_spill] sm:$0xff] }
 0x1d5   :  { %v13654_v60 = vpop.f32.mrf.mxu0  ;;  %v2347_v55 = vpop.f32.mrf.mxu1  ;;  %v4957_v44 = vrot.slane %v20474_v4, 5  ;;  %v12247_v12 = vcombine.low %v4944_v34, %v4947_v5  ;;  %v4951_v33 = vsel %vm16320_vm7, %v12216_v20, %v4950_v53  ;;  %v4952_v32 = vrot.slane %v4950_v53, 4 }
 0x1d6   :  { %v2038_v11 = vadd.f32 %v13654_v60, %v20471_v28  ;;  %v17747_v18 = vadd.f32 %v17664_v9, %v2035_v59  ;;  %v20475_v60 = vld [vmem:[#allocation28_spill] sm:$0xff]  ;;  %v4964_v31 = vrot.slane %v20477_v39, 5  ;;  %v4967_v53 = vrot.slane %v20480_v54, 5  ;;  %v17791_v54 = vld [vmem:[#allocation2 + $0x180] sm:$0xe] }
 0x1d7   :  { %v1947_v2 = vpop.f32.mrf.mxu0  ;;  %v13706_v22 = vpop.f32.mrf.mxu1  ;;  %v4959_v35 = vrot.slane %v4957_v44, 4  ;;  %v4960_v7 = vrot.slane %v20475_v60, 5  ;;  %v4954_v50 = vsel %vm16320_vm7, %v4952_v32, %v4953_v29  ;;  %v4958_v29 = vsel %vm16320_vm7, %v12217_v1, %v4957_v44  ;;  %v4846_v1 = vld [vmem:[#allocation2 + $0x138] sm:$0xe] }
 0x1d8   :  { %v17741_v16 = vadd.f32 %v1947_v2, %v1495_v36  ;;  %v17750_v47 = vadd.f32 %v17678_v38, %v2038_v11  ;;  %v4845_v36 = vld [vmem:[#allocation2 + $0x120] sm:$0xe]  ;;  %v12248_v9 = vcombine.low %v4951_v33, %v4954_v50  ;;  %v4966_v5 = vrot.slane %v4964_v31, 4  ;;  %v4847_v50 = vld [vmem:[#allocation2 + $0x150] sm:$0xe]  ;;  %v20487_v39 = vld [vmem:[#allocation44_spill] sm:$0xff] }
 0x1d9   :  { %v13657_v23 = vpop.f32.mrf.mxu0  ;;  %v17737_v45 = vpop.f32.mrf.mxu1  ;;  %13936 = vmatmul.mubr.bf16.gmra.mxu0 %v12246_v49  ;;  %v4961_v20 = vsel %vm16320_vm7, %v4959_v35, %v4960_v7  ;;  %v12218_v49 = vrot.slane %v4844_v17, 9  ;;  %v12219_v4 = vrot.slane %v4845_v36, 9 }
 0x1da   :  { %20472 = vst [vmem:[#allocation17_spill] sm:$0xff] %v17737_v45  ;;  %20473 = vst [vmem:[#allocation16_spill] sm:$0xff] %v17741_v16  ;;  %v2041_v51 = vadd.f32 %v13657_v23, %v20476_v62  ;;  %13939 = vmatprep.mubr.bf16.mxu0 %v12247_v12  ;;  %v20483_v12 = vld [vmem:[#allocation37_spill] sm:$0xff]  ;;  %v12249_v44 = vcombine.low %v4958_v29, %v4961_v20  ;;  %v20486_v62 = vld [vmem:[#allocation38_spill] sm:$0xff] }
 0x1db   :  { %v1960_v3 = vpop.f32.mrf.mxu0  ;;  %v13709_v61 = vpop.f32.mrf.mxu1 }
 0x1dc   :  { %v2039_v48 = vadd.f32 %v1960_v3, %v20478_v19  ;;  %v17758_v38 = vadd.f32 %v13705_v10, %v2041_v51  ;;  %v20481_v10 = vld [vmem:[#allocation35_spill] sm:$0xff]  ;;  %v20484_v3 = vld [vmem:[#allocation36_spill] sm:$0xff]  ;;  %v4978_v51 = vrot.slane %v20486_v62, 5  ;;  %v4985_v19 = vrot.slane %v20487_v39, 5  ;;  %v20494_v39 = vld [vmem:[#allocation45_spill] sm:$0xff] }
 0x1dd   :  { %v13658_v6 = vpop.f32.mrf.mxu0  ;;  %v2363_v42 = vpop.f32.mrf.mxu1  ;;  %v4971_v28 = vrot.slane %v20481_v10, 5  ;;  %v4974_v17 = vrot.slane %v20484_v3, 5  ;;  %v20492_v62 = vld [vmem:[#allocation51_spill] sm:$0xff] }
 0x1de   :  { %v2042_v2 = vadd.f32 %v13658_v6, %v20479_v8  ;;  %v17768_v0 = vadd.f32 %v2347_v55, %v2039_v48  ;;  %v20485_v55 = vld [vmem:[#allocation39_spill] sm:$0xff]  ;;  %v4965_v48 = vsel %vm16320_vm7, %v12218_v49, %v4964_v31  ;;  %v4968_v8 = vsel %vm16320_vm7, %v4966_v5, %v4967_v53  ;;  %v20489_v31 = vld [vmem:[#allocation40_spill] sm:$0xff] }
 0x1df   :  { %v17761_v34 = vpop.f32.mrf.mxu0  ;;  %v13710_v58 = vpop.f32.mrf.mxu1  ;;  %v4973_v32 = vrot.slane %v4971_v28, 4  ;;  %v4972_v10 = vsel %vm16320_vm7, %v12219_v4, %v4971_v28  ;;  %v4981_v49 = vrot.slane %v20489_v31, 5 }
 0x1e0   :  { %v17770_v59 = vadd.f32 %v13706_v22, %v2042_v2  ;;  %v20488_v2 = vld [vmem:[#allocation43_spill] sm:$0xff] }
 0x1e1   :  { %v13661_v11 = vpop.f32.mrf.mxu0  ;;  %v17773_v23 = vpop.f32.mrf.mxu1  ;;  %13940 = vmatmul.mubr.bf16.gmra.mxu0 %v12248_v9  ;;  %v4975_v9 = vsel %vm16320_vm7, %v4973_v32, %v4974_v17  ;;  %v4999_v32 = vrot.slane %v20492_v62, 5  ;;  %v12250_v17 = vcombine.low %v4965_v48, %v4968_v8  ;;  %v20497_v8 = vld [vmem:[#allocation53_spill] sm:$0xff] }
 0x1e2   :  { %20482 = vst [vmem:[#allocation19_spill] sm:$0xff] %v17773_v23  ;;  %v2045_v33 = vadd.f32 %v13661_v11, %v20483_v12  ;;  %13943 = vmatprep.mubr.bf16.mxu0 %v12249_v44  ;;  %v12220_v11 = vrot.slane %v4846_v1, 9  ;;  %v4980_v44 = vrot.slane %v4978_v51, 4  ;;  %v12223_v23 = vrot.slane %v17791_v54, 9 }
 0x1e3   :  { %v1976_v35 = vpop.f32.mrf.mxu0  ;;  %v13713_v60 = vpop.f32.mrf.mxu1  ;;  %v5001_v62 = vrot.slane %v4999_v32, 4 }
 0x1e4   :  { %v2043_v7 = vadd.f32 %v1976_v35, %v20485_v55  ;;  %v17778_v22 = vadd.f32 %v13709_v61, %v2045_v33  ;;  %v17789_v61 = vld [vmem:[#allocation2 + $0x168] sm:$0xe]  ;;  %v20490_v33 = vld [vmem:[#allocation47_spill] sm:$0xff]  ;;  %v17803_v35 = vld [vmem:[#allocation2 + $0x198] sm:$0xe]  ;;  %v4987_v55 = vrot.slane %v4985_v19, 4 }
 0x1e5   :  { %v13662_v6 = vpop.f32.mrf.mxu0  ;;  %v2379_v36 = vpop.f32.mrf.mxu1  ;;  %v4992_v3 = vrot.slane %v20490_v33, 5 }
 0x1e6   :  { %v2046_v29 = vadd.f32 %v13662_v6, %v20488_v2  ;;  %v17787_v20 = vadd.f32 %v2363_v42, %v2043_v7  ;;  %v12221_v42 = vrot.slane %v4847_v50, 9  ;;  %v20491_v7 = vld [vmem:[#allocation46_spill] sm:$0xff]  ;;  %v12251_v6 = vcombine.low %v4972_v10, %v4975_v9 }
 0x1e7   :  { %v17798_v12 = vpop.f32.mrf.mxu0  ;;  %v13714_v53 = vpop.f32.mrf.mxu1  ;;  %v4988_v28 = vrot.slane %v20491_v7, 5  ;;  %v4994_v50 = vrot.slane %v4992_v3, 4  ;;  %v5002_v10 = vrot.slane %v20497_v8, 5  ;;  %v12224_v9 = vrot.slane %v17803_v35, 9 }
 0x1e8   :  { %v17800_v5 = vadd.f32 %v13710_v58, %v2046_v29  ;;  %v12222_v58 = vrot.slane %v17789_v61, 9  ;;  %v20495_v29 = vld [vmem:[#allocation48_spill] sm:$0xff]  ;;  %v4986_v35 = vsel %vm16320_vm7, %v12221_v42, %v4985_v19 }
 0x1e9   :  { %v13665_v4 = vpop.f32.mrf.mxu0  ;;  %v17807_v1 = vpop.f32.mrf.mxu1  ;;  %v4995_v31 = vrot.slane %v20495_v29, 5  ;;  %13944 = vmatmul.mubr.bf16.gmra.mxu0 %v12250_v17 }
 0x1ea   :  { %20493 = vst [vmem:[#allocation20_spill] sm:$0xff] %v17807_v1  ;;  %v2049_v2 = vadd.f32 %v13665_v4, %v20494_v39  ;;  %v5006_v1 = vrot.slane %v17571_v43, 5  ;;  %v20498_v4 = vld [vmem:[#allocation54_spill] sm:$0xff]  ;;  %13947 = vmatprep.mubr.bf16.mxu0 %v12251_v6 }
 0x1eb   :  { %v1992_v33 = vpop.f32.mrf.mxu0  ;;  %v13717_v45 = vpop.f32.mrf.mxu1 }
 0x1ec   :  { %v2047_v7 = vadd.f32 %v1992_v33, %v20496_v13  ;;  %v17814_v16 = vadd.f32 %v13713_v60, %v2049_v2  ;;  %v4979_v13 = vsel %vm16320_vm7, %v12220_v11, %v4978_v51  ;;  %v4982_v60 = vsel %vm16320_vm7, %v4980_v44, %v4981_v49  ;;  %v20499_v2 = vld [vmem:[#allocation56_spill] sm:$0xff]  ;;  %v20500_v11 = vld [vmem:[#allocation55_spill] sm:$0xff] }
 0x1ed   :  { %v13666_v48 = vpop.f32.mrf.mxu0  ;;  %v2395_v61 = vpop.f32.mrf.mxu1  ;;  %v5008_v43 = vrot.slane %v5006_v1, 4  ;;  %v5009_v33 = vrot.slane %v20499_v2, 5  ;;  %v12252_v51 = vcombine.low %v4979_v13, %v4982_v60  ;;  %v20501_v2 = vld [vmem:[#allocation57_spill] sm:$0xff] }
 0x1ee   :  { %v2050_v39 = vadd.f32 %v13666_v48, %v20498_v4  ;;  %v17820_v29 = vadd.f32 %v2379_v36, %v2047_v7  ;;  %v4989_v36 = vsel %vm16320_vm7, %v4987_v55, %v4988_v28  ;;  %v4993_v28 = vsel %vm16320_vm7, %v12222_v58, %v4992_v3 }
 0x1ef   :  { %v17826_v54 = vpop.f32.mrf.mxu0  ;;  %v13718_v8 = vpop.f32.mrf.mxu1  ;;  %v12253_v44 = vcombine.low %v4986_v35, %v4989_v36  ;;  %v5003_v35 = vsel %vm16320_vm7, %v5001_v62, %v5002_v10  ;;  %v5007_v10 = vsel %vm16320_vm7, %v12224_v9, %v5006_v1 }
 0x1f0   :  { %v17833_v17 = vadd.f32 %v13714_v53, %v2050_v39  ;;  %v4996_v39 = vsel %vm16320_vm7, %v4994_v50, %v4995_v31 }
 0x1f1   :  { %v13669_v6 = vpop.f32.mrf.mxu0  ;;  %v17835_v7 = vpop.f32.mrf.mxu1  ;;  %13948 = vmatmul.mubr.bf16.gmra.mxu0 %v12252_v51  ;;  %v12254_v36 = vcombine.low %v4993_v28, %v4996_v39 }
 0x1f2   :  { %v2053_v49 = vadd.f32 %v13669_v6, %v20500_v11  ;;  %13951 = vmatprep.mubr.bf16.mxu0 %v12253_v44 }
 0x1f3   :  { %v2008_v48 = vpop.f32.mrf.mxu0  ;;  %v17838_v4 = vpop.f32.mrf.mxu1 }
 0x1f4   :  { %v2051_v24 = vadd.f32 %v2008_v48, %v20501_v2  ;;  %v17841_v25 = vadd.f32 %v13717_v45, %v2053_v49  ;;  %v5000_v45 = vsel %vm16320_vm7, %v12223_v23, %v4999_v32 }
 0x1f5   :  { %v13670_v19 = vpop.f32.mrf.mxu0  ;;  %v17843_v42 = vpop.f32.mrf.mxu1  ;;  %v12255_v58 = vcombine.low %v5000_v45, %v5003_v35 }
 0x1f6   :  { %v2054_v53 = vadd.f32 %v13670_v19, %v17611_v15  ;;  %v17846_v55 = vadd.f32 %v2395_v61, %v2051_v24 }
 0x1f7   :  { %v17852_v13 = vpop.f32.mrf.mxu0  ;;  %v17854_v60 = vpop.f32.mrf.mxu1 }
 0x1f8   :  { %v17860_v15 = vadd.f32 %v13718_v8, %v2054_v53 }
 0x1f9   :  { %v13737_v24 = vpop.f32.mrf.mxu0  ;;  %v17862_v61 = vpop.f32.mrf.mxu1  ;;  %13952 = vmatmul.mubr.bf16.gmra.mxu0 %v12254_v36 }
 0x1fa   :  { %v17865_v3 = vadd.f32 %v13737_v24, %v17636_v37  ;;  %13955 = vmatprep.mubr.bf16.mxu0 %v12255_v58  ;;  %v5010_v37 = vsel %vm16320_vm7, %v5008_v43, %v5009_v33 }
 0x1fb   :  { %v3037_v50 = vpop.f32.mrf.mxu0  ;;  %v17867_v31 = vpop.f32.mrf.mxu1  ;;  %v12256_v49 = vcombine.low %v5007_v10, %v5010_v37 }
 0x1fc   :  { %v17870_v6 = vadd.f32 %v3037_v50, %v17651_v40 }
 0x1fd   :  { %v13738_v23 = vpop.f32.mrf.mxu0  ;;  %v17872_v32 = vpop.f32.mrf.mxu1 }
 0x1fe   :  { %v17875_v62 = vadd.f32 %v13738_v23, %v17660_v30 }
 0x1ff   :  { %v17881_v8 = vpop.f32.mrf.mxu0  ;;  %v17883_v51 = vpop.f32.mrf.mxu1 }
 0x201   :  { %v13741_v40 = vpop.f32.mrf.mxu0  ;;  %v17885_v11 = vpop.f32.mrf.mxu1  ;;  %13956 = vmatmul.mubr.bf16.gmra.mxu0 %v12256_v49 }
 0x202   :  { %v17888_v44 = vadd.f32 %v13741_v40, %v17675_v21 }
 0x203   :  { %v3053_v30 = vpop.f32.mrf.mxu0  ;;  %v17890_v48 = vpop.f32.mrf.mxu1 }
 0x204   :  { %v17893_v2 = vadd.f32 %v3053_v30, %v17683_v41 }
 0x205   :  { %v13742_v1 = vpop.f32.mrf.mxu0  ;;  %v17895_v9 = vpop.f32.mrf.mxu1 }
 0x206   :  { %v17898_v43 = vadd.f32 %v13742_v1, %v17693_v26 }
 0x207   :  { %v17900_v33 = vpop.f32.mrf.mxu0  ;;  %v17902_v19 = vpop.f32.mrf.mxu1 }
 0x209   :  { %v13745_v53 = vpop.f32.mrf.mxu0  ;;  %v17907_v28 = vpop.f32.mrf.mxu1 }
 0x20a   :  { %v17905_v21 = vadd.f32 %v13745_v53, %v17705_v56  ;;  %20502 = vst [vmem:[#allocation21_spill] sm:$0xff] %v17907_v28 }
 0x20b   :  { %v3069_v39 = vpop.f32.mrf.mxu0  ;;  %v17915_v26 = vpop.f32.mrf.mxu1 }
 0x20c   :  { %v17910_v41 = vadd.f32 %v3069_v39, %v17715_v57  ;;  %20503 = vst [vmem:[#allocation23_spill] sm:$0xff] %v17915_v26 }
 0x20d   :  { %v13746_v45 = vpop.f32.mrf.mxu0  ;;  %v17919_v36 = vpop.f32.mrf.mxu1 }
 0x20e   :  { %v17913_v35 = vadd.f32 %v13746_v45, %v17718_v14  ;;  %20504 = vst [vmem:[#allocation25_spill] sm:$0xff] %v17919_v36  ;;  %v6380_v36 = vld [vmem:[#allocation3 + $0x8] sm:$0x3] }
 0x20f   :  { %v17917_v24 = vpop.f32.mrf.mxu0  ;;  %v17924_v50 = vpop.f32.mrf.mxu1 }
 0x210   :  { %20506 = vst [vmem:[#allocation28_spill] sm:$0xff] %v17924_v50 }
 0x211   :  { %v13749_v58 = vpop.f32.mrf.mxu0  ;;  %v17932_v37 = vpop.f32.mrf.mxu1 }
 0x212   :  { %v17922_v56 = vadd.f32 %v13749_v58, %v17734_v63  ;;  %20509 = vst [vmem:[#allocation32_spill] sm:$0xff] %v17932_v37 }
 0x213   :  { %v3085_v23 = vpop.f32.mrf.mxu0 }
 0x214   :  { %20505 = vst [vmem:[#allocation26_spill] sm:$0xff] %v17922_v56  ;;  %v17927_v57 = vadd.f32 %v3085_v23, %v17747_v18 }
 0x215   :  { %v13750_v10 = vpop.f32.mrf.mxu0  ;;  %v17939_v63 = vpop.f32.mrf.mxu1 }
 0x216   :  { %20507 = vst [vmem:[#allocation27_spill] sm:$0xff] %v17927_v57  ;;  %v17930_v14 = vadd.f32 %v13750_v10, %v17750_v47  ;;  %20511 = vst [vmem:[#allocation30_spill] sm:$0xff] %v17939_v63 }
 0x217   :  { %v17934_v40 = vpop.f32.mrf.mxu0  ;;  %v3599_v39 = vpop.f32.mrf.mxu1 }
 0x218   :  { %20508 = vst [vmem:[#allocation29_spill] sm:$0xff] %v17930_v14  ;;  %v6379_v14 = vld [vmem:[#allocation3] sm:$0xc] }
 0x219   :  { %v13753_v49 = vpop.f32.mrf.mxu0  ;;  %v13802_v47 = vpop.f32.mrf.mxu1  ;;  %v12386_v57 = vrot.slane %v6379_v14, 10 }
 0x21a   :  { %v17937_v30 = vadd.f32 %v13753_v49, %v17758_v38 }
 0x21b   :  { %v3101_v1 = vpop.f32.mrf.mxu0  ;;  %v17949_v37 = vpop.f32.mrf.mxu1 }
 0x21c   :  { %20510 = vst [vmem:[#allocation34_spill] sm:$0xff] %v17937_v30  ;;  %v3180_v53 = vadd.f32 %v3101_v1, %v17768_v0  ;;  %20512 = vst [vmem:[#allocation35_spill] sm:$0xff] %v17949_v37 }
 0x21d   :  { %v13754_v18 = vpop.f32.mrf.mxu0 }
 0x21e   :  { %v3183_v45 = vadd.f32 %v13754_v18, %v17770_v59  ;;  %v17943_v58 = vadd.f32 %v3599_v39, %v3180_v53 }
 0x21f   :  { %v17947_v10 = vpop.f32.mrf.mxu0 }
 0x220   :  { %v17945_v23 = vadd.f32 %v13802_v47, %v3183_v45  ;;  %v13805_v63 = vpop.f32.mrf.mxu1 }
 0x221   :  { %v13757_v38 = vpop.f32.mrf.mxu0 }
 0x222   :  { %v3186_v49 = vadd.f32 %v13757_v38, %v17778_v22  ;;  %v3615_v50 = vpop.f32.mrf.mxu1  ;;  %v14774_v22 = vld [vmem:[%s20344_s3 + $0x78] sm:$0xff]  }
 0x223   :  { %v3117_v30 = vpop.f32.mrf.mxu0  ;;  %13959 = vmatprep.subr.bf16.mxu1 %v14774_v22 }
 0x224   :  { %v3184_v0 = vadd.f32 %v3117_v30, %v17787_v20  ;;  %v17953_v1 = vadd.f32 %v13805_v63, %v3186_v49  ;;  %v13806_v18 = vpop.f32.mrf.mxu1  ;;  %v14776_v20 = vld [vmem:[%s20344_s3 + $0xb8] sm:$0xff]   ;;  %13960 = vmatpush3.bf16.msra.mxu1 %v14774_v22 }
 0x225   :  { %v13758_v59 = vpop.f32.mrf.mxu0  ;;  %14023 = vmatprep.subr.bf16.mxu0 %v14776_v20 }
 0x226   :  { %v3187_v53 = vadd.f32 %v13758_v59, %v17800_v5  ;;  %v17956_v39 = vadd.f32 %v3615_v50, %v3184_v0  ;;  %v17962_v37 = vpop.f32.mrf.mxu1  ;;  %14024 = vmatpush3.bf16.msra.mxu0 %v14776_v20  ;;  %v14775_v59 = vld [vmem:[%s20344_s3 + $0x70] sm:$0xff]  }
 0x227   :  { %v17960_v47 = vpop.f32.mrf.mxu0  ;;  %20514 = vst [vmem:[#allocation36_spill] sm:$0xff] %v17962_v37  ;;  %13961 = vmatprep.subr.bf16.mxu1 %v14775_v59 }
 0x228   :  { %v17958_v45 = vadd.f32 %v13806_v18, %v3187_v53  ;;  %20513 = vst [vmem:[#allocation37_spill] sm:$0xff] %v17960_v47  ;;  %13962 = vmatpush3.bf16.msra.mxu1 %v14775_v59 }
 0x22b   :  { %v13761_v30 = vpop.f32.mrf.mxu0 }
 0x22c   :  { %v3190_v5 = vadd.f32 %v13761_v30, %v17814_v16  ;;  %v13809_v50 = vpop.f32.mrf.mxu1 }
 0x22d   :  { %v3133_v63 = vpop.f32.mrf.mxu0 }
 0x22e   :  { %v3188_v38 = vadd.f32 %v3133_v63, %v17820_v29  ;;  %v17972_v49 = vadd.f32 %v13809_v50, %v3190_v5  ;;  %v3631_v0 = vpop.f32.mrf.mxu1  ;;  %v14777_v29 = vld [vmem:[%s20344_s3 + $0xb0] sm:$0xff]   ;;  %v14778_v63 = vld [vmem:[%s20344_s3 + $0x68] sm:$0xff]  }
 0x22f   :  { %v13762_v53 = vpop.f32.mrf.mxu0  ;;  %14025 = vmatprep.subr.bf16.mxu0 %v14777_v29  ;;  %13963 = vmatprep.subr.bf16.mxu1 %v14778_v63 }
 0x230   :  { %v3191_v18 = vadd.f32 %v13762_v53, %v17833_v17  ;;  %v17978_v37 = vadd.f32 %v3631_v0, %v3188_v38  ;;  %v13810_v16 = vpop.f32.mrf.mxu1  ;;  %14026 = vmatpush3.bf16.msra.mxu0 %v14777_v29  ;;  %v14779_v38 = vld [vmem:[%s20344_s3 + $0xa8] sm:$0xff]   ;;  %13964 = vmatpush3.bf16.msra.mxu1 %v14778_v63 }
 0x231   :  { %v17982_v22 = vpop.f32.mrf.mxu0  ;;  %14027 = vmatprep.subr.bf16.mxu0 %v14779_v38 }
 0x232   :  { %v17980_v30 = vadd.f32 %v13810_v16, %v3191_v18  ;;  %20515 = vst [vmem:[#allocation39_spill] sm:$0xff] %v17982_v22  ;;  %v17987_v20 = vpop.f32.mrf.mxu1  ;;  %v14780_v22 = vld [vmem:[%s20344_s3 + $0x60] sm:$0xff]  }
 0x233   :  { %20516 = vst [vmem:[#allocation38_spill] sm:$0xff] %v17987_v20  ;;  %13965 = vmatprep.subr.bf16.mxu1 %v14780_v22 }
 0x234   :  { %14028 = vmatpush3.bf16.msra.mxu0 %v14779_v38  ;;  %13966 = vmatpush3.bf16.msra.mxu1 %v14780_v22  ;;  %v14782_v38 = vld [vmem:[%s20344_s3 + $0x58] sm:$0xff]  }
 0x235   :  { %13967 = vmatprep.subr.bf16.mxu1 %v14782_v38 }
 0x236   :  { %v13765_v5 = vpop.f32.mrf.mxu0 }
 0x237   :  { %v3194_v17 = vadd.f32 %v13765_v5, %v17841_v25  ;;  %v13813_v50 = vpop.f32.mrf.mxu1 }
 0x238   :  { %v3149_v0 = vpop.f32.mrf.mxu0  ;;  %13968 = vmatpush3.bf16.msra.mxu1 %v14782_v38 }
 0x239   :  { %v3192_v59 = vadd.f32 %v3149_v0, %v17846_v55  ;;  %v17997_v53 = vadd.f32 %v13813_v50, %v3194_v17  ;;  %v3647_v18 = vpop.f32.mrf.mxu1  ;;  %v14781_v55 = vld [vmem:[%s20344_s3 + $0xa0] sm:$0xff]   ;;  %v14783_v0 = vld [vmem:[%s20344_s3 + $0x98] sm:$0xff]  }
 0x23a   :  { %v13766_v16 = vpop.f32.mrf.mxu0  ;;  %14029 = vmatprep.subr.bf16.mxu0 %v14781_v55 }
 0x23b   :  { %v3195_v25 = vadd.f32 %v13766_v16, %v17860_v15  ;;  %v18000_v29 = vadd.f32 %v3647_v18, %v3192_v59  ;;  %v13814_v5 = vpop.f32.mrf.mxu1  ;;  %14030 = vmatpush3.bf16.msra.mxu0 %v14781_v55 }
 0x23c   :  { %v18002_v20 = vpop.f32.mrf.mxu0  ;;  %14031 = vmatprep.subr.bf16.mxu0 %v14783_v0 }
 0x23d   :  { %20517 = vst [vmem:[#allocation44_spill] sm:$0xff] %v18002_v20  ;;  %v18010_v17 = vadd.f32 %v13814_v5, %v3195_v25  ;;  %v18012_v50 = vpop.f32.mrf.mxu1  ;;  %v14784_v25 = vld [vmem:[%s20344_s3 + $0x50] sm:$0xff]  }
 0x23e   :  { %20518 = vst [vmem:[#allocation43_spill] sm:$0xff] %v18012_v50  ;;  %v18014_v63 = vpop.f32.mrf.mxu0  ;;  %v14785_v5 = vld [vmem:[%s20344_s3 + $0x90] sm:$0xff]   ;;  %13969 = vmatprep.subr.bf16.mxu1 %v14784_v25 }
 0x23f   :  { %14032 = vmatpush3.bf16.msra.mxu0 %v14783_v0  ;;  %13970 = vmatpush3.bf16.msra.mxu1 %v14784_v25 }
 0x240   :  { %v18016_v15 = vpop.f32.mrf.mxu0  ;;  %14033 = vmatprep.subr.bf16.mxu0 %v14785_v5 }
 0x241   :  { %20519 = vst [vmem:[#allocation40_spill] sm:$0xff] %v18016_v15 }
 0x242   :  { %v18026_v18 = vpop.f32.mrf.mxu0 }
 0x243   :  { %v18024_v59 = vpop.f32.mrf.mxu1  ;;  %20521 = vst [vmem:[#allocation46_spill] sm:$0xff] %v18026_v18  ;;  %14034 = vmatpush3.bf16.msra.mxu0 %v14785_v5  ;;  %v14788_v18 = vld [vmem:[%s20344_s3 + $0x40] sm:$0xff]  }
 0x244   :  { %20520 = vst [vmem:[#allocation47_spill] sm:$0xff] %v18024_v59  ;;  %v18030_v16 = vpop.f32.mrf.mxu0 }
 0x245   :  { %v18028_v22 = vpop.f32.mrf.mxu1  ;;  %20523 = vst [vmem:[#allocation45_spill] sm:$0xff] %v18030_v16 }
 0x246   :  { %20522 = vst [vmem:[#allocation51_spill] sm:$0xff] %v18028_v22  ;;  %v18040_v50 = vpop.f32.mrf.mxu0 }
 0x247   :  { %v18038_v55 = vpop.f32.mrf.mxu1  ;;  %20525 = vst [vmem:[#allocation49_spill] sm:$0xff] %v18040_v50  ;;  %v14787_v50 = vld [vmem:[%s20344_s3 + $0x88] sm:$0xff]  }
 0x248   :  { %20524 = vst [vmem:[#allocation48_spill] sm:$0xff] %v18038_v55  ;;  %v18044_v0 = vpop.f32.mrf.mxu0  ;;  %v14786_v55 = vld [vmem:[%s20344_s3 + $0x48] sm:$0xff]   ;;  %14035 = vmatprep.subr.bf16.mxu0 %v14787_v50 }
 0x249   :  { %v18042_v38 = vpop.f32.mrf.mxu1  ;;  %20527 = vst [vmem:[#allocation54_spill] sm:$0xff] %v18044_v0  ;;  %13971 = vmatprep.subr.bf16.mxu1 %v14786_v55  ;;  %14036 = vmatpush3.bf16.msra.mxu0 %v14787_v50 }
 0x24a   :  { %20526 = vst [vmem:[#allocation53_spill] sm:$0xff] %v18042_v38  ;;  %v18046_v22 = vpop.f32.mrf.mxu0  ;;  %v5873_v38 = vld [vmem:[#allocation3 + $0x4] sm:$0xf]  ;;  %13972 = vmatpush3.bf16.msra.mxu1 %v14786_v55 }
 0x24b   :  { %20528 = vst [vmem:[#allocation56_spill] sm:$0xff] %v18046_v22  ;;  %v6416_v0 = vrot.slane %v5873_v38, 6  ;;  %13973 = vmatprep.subr.bf16.mxu1 %v14788_v18 }
 0x24c   :  { %v18048_v16 = vpop.f32.mrf.mxu1  ;;  %v18050_v20 = vpop.f32.mrf.mxu0 }
 0x24d   :  { %20529 = vst [vmem:[#allocation55_spill] sm:$0xff] %v18048_v16  ;;  %20530 = vst [vmem:[#allocation57_spill] sm:$0xff] %v18050_v20  ;;  %v5946_v20 = vrot.slane %v5873_v38, 5  ;;  %v20537_v38 = vmov 0  ;;  %v6417_v28 = vsel %vm18076_vm10, %v12386_v57, %v6416_v0 }
 0x24e   :  { %v18058_v25 = vpop.f32.mrf.mxu1  ;;  %v18060_v5 = vpop.f32.mrf.mxu0  ;;  %v20538_v38 = vsel %vm18076_vm10, 4294967295, %v20537_v38  ;;  %13974 = vmatpush3.bf16.msra.mxu1 %v14788_v18 }
 0x24f   :  { %20531 = vst [vmem:[#allocation62_spill] sm:$0xff] %v18058_v25  ;;  %20532 = vst [vmem:[#allocation63_spill] sm:$0xff] %v18060_v5  ;;  %v14789_v25 = vld [vmem:[%s20344_s3 + $0x80] sm:$0xff]   ;;  %v5904_v5 = vld [vmem:[#allocation3] sm:$0xe]  ;;  %v5948_v50 = vrot.slane %v5946_v20, 4 }
 0x250   :  { %v18062_v22 = vpop.f32.mrf.mxu1  ;;  %v18064_v16 = vpop.f32.mrf.mxu0  ;;  %v12330_v55 = vrot.slane %v5904_v5, 9  ;;  %20539 = vst [vmem:[#allocation68_spill] sm:$0xff] %v20538_v38  ;;  %14037 = vmatprep.subr.bf16.mxu0 %v14789_v25  ;;  %v6419_v5 = vrot.slane %v6380_v36, 6 }
 0x251   :  { %20533 = vst [vmem:[#allocation64_spill] sm:$0xff] %v18062_v22  ;;  %20534 = vst [vmem:[#allocation65_spill] sm:$0xff] %v18064_v16  ;;  %v5905_v16 = vld [vmem:[#allocation3 + $0x8] sm:$0x1]  ;;  %14038 = vmatpush3.bf16.msra.mxu0 %v14789_v25 }
 0x252   :  { %v18072_v59 = vpop.f32.mrf.mxu1  ;;  %v18074_v22 = vpop.f32.mrf.mxu0  ;;  %v5949_v47 = vrot.slane %v5905_v16, 5 }
 0x253   :  { %20535 = vst [vmem:[#allocation66_spill] sm:$0xff] %v18072_v59  ;;  %20536 = vst [vmem:[#allocation67_spill] sm:$0xff] %v18074_v22  ;;  %v5947_v22 = vsel %vm16320_vm7, %v12330_v55, %v5946_v20  ;;  %v6418_v59 = vrot.slane %v6416_v0, 4 }
 0x254   :  { %v18080_v26 = vpop.f32.mrf.mxu0  ;;  %v5950_v56 = vsel %vm16320_vm7, %v5948_v50, %v5949_v47 }
 0x255   :  { %20540 = vst [vmem:[#allocation69_spill] sm:$0xff] %v18080_v26  ;;  %v18088_v15 = vpop.f32.mrf.mxu1  ;;  %v12354_v14 = vcombine.low %v5947_v22, %v5950_v56  ;;  %v6420_v18 = vsel %vm18076_vm10, %v6418_v59, %v6419_v5 }
 0x256   :  { %v18090_v16 = vpop.f32.mrf.mxu0  ;;  %v12410_v25 = vcombine.low %v6417_v28, %v6420_v18 }
 0x257   :  { %v18094_v26 = vpop.f32.mrf.mxu1  ;;  %13975 = vmatprep.mubr.bf16.mxu1 %v12354_v14 }
 0x258   :  { %v18096_v20 = vpop.f32.mrf.mxu0  ;;  %14039 = vmatprep.mubr.bf16.mxu0 %v12410_v25 }
 0x259   :  { %v18098_v36 = vpop.f32.mrf.mxu1 }
 0x25a   :  { %v18100_v47 = vpop.f32.mrf.mxu0 }
 0x25b   :  { %v18104_v0 = vpop.f32.mrf.mxu1 }
 0x25c   :  { %v18102_v57 = vpop.f32.mrf.mxu0 }
 0x25e   :  { %v18106_v55 = vpop.f32.mrf.mxu0 }
 0x25f   :  { %v18111_v28 = vpop.f32.mrf.mxu1 }
 0x260   :  { %v3986_v56 = vpop.f32.mrf.mxu0 }
 0x261   :  { %v18109_v59 = vadd.f32 %v3986_v56, %v17943_v58  ;;  %v18118_v14 = vpop.f32.mrf.mxu1 }
 0x262   :  { %v13850_v22 = vpop.f32.mrf.mxu0  ;;  %20543 = vst [vmem:[#allocation72_spill] sm:$0xff] %v18118_v14 }
 0x263   :  { %20541 = vst [vmem:[#allocation70_spill] sm:$0xff] %v18109_v59  ;;  %v18114_v50 = vadd.f32 %v13850_v22, %v17945_v23  ;;  %v18126_v58 = vpop.f32.mrf.mxu1 }
 0x264   :  { %v18116_v5 = vpop.f32.mrf.mxu0  ;;  %20546 = vst [vmem:[#allocation75_spill] sm:$0xff] %v18126_v58  ;;  %v20564_v58 = vld [vmem:[#allocation42_spill] sm:$0xff] }
 0x265   :  { %20542 = vst [vmem:[#allocation71_spill] sm:$0xff] %v18114_v50  ;;  %v18133_v22 = vpop.f32.mrf.mxu1 }
 0x266   :  { %v13853_v18 = vpop.f32.mrf.mxu0  ;;  %20549 = vst [vmem:[#allocation78_spill] sm:$0xff] %v18133_v22  ;;  %v20563_v22 = vld [vmem:[#allocation50_spill] sm:$0xff] }
 0x267   :  { %v18121_v25 = vadd.f32 %v13853_v18, %v17953_v1 }
 0x268   :  { %v4002_v38 = vpop.f32.mrf.mxu0 }
 0x269   :  { %20544 = vst [vmem:[#allocation73_spill] sm:$0xff] %v18121_v25  ;;  %v18124_v27 = vadd.f32 %v4002_v38, %v17956_v39 }
 0x26a   :  { %v13854_v56 = vpop.f32.mrf.mxu0 }
 0x26b   :  { %20545 = vst [vmem:[#allocation74_spill] sm:$0xff] %v18124_v27  ;;  %v18129_v59 = vadd.f32 %v13854_v56, %v17958_v45 }
 0x26c   :  { %v18131_v23 = vpop.f32.mrf.mxu0  ;;  %v18141_v39 = vpop.f32.mrf.mxu1 }
 0x26d   :  { %20547 = vst [vmem:[#allocation76_spill] sm:$0xff] %v18129_v59  ;;  %20548 = vst [vmem:[#allocation77_spill] sm:$0xff] %v18131_v23 }
 0x26e   :  { %v13857_v50 = vpop.f32.mrf.mxu0  ;;  %20552 = vst [vmem:[#allocation81_spill] sm:$0xff] %v18141_v39  ;;  %v18148_v56 = vpop.f32.mrf.mxu1 }
 0x26f   :  { %v18136_v14 = vadd.f32 %v13857_v50, %v17972_v49  ;;  %20555 = vst [vmem:[#allocation84_spill] sm:$0xff] %v18148_v56  ;;  %v20557_v50 = vld [vmem:[#allocation22_spill] sm:$0xff] }
 0x270   :  { %v4018_v1 = vpop.f32.mrf.mxu0 }
 0x271   :  { %20550 = vst [vmem:[#allocation79_spill] sm:$0xff] %v18136_v14  ;;  %v18139_v18 = vadd.f32 %v4018_v1, %v17978_v37  ;;  %v20558_v14 = vld [vmem:[#allocation18_spill] sm:$0xff]  ;;  %v20559_v1 = vld [vmem:[#allocation31_spill] sm:$0xff] }
 0x272   :  { %v13858_v38 = vpop.f32.mrf.mxu0  ;;  %v1511_v23 = vadd.f32 %v20558_v14, %v20557_v50  ;;  %v20566_v50 = vld [vmem:[#allocation58_spill] sm:$0xff] }
 0x273   :  { %20551 = vst [vmem:[#allocation80_spill] sm:$0xff] %v18139_v18  ;;  %v18144_v27 = vadd.f32 %v13858_v38, %v17980_v30  ;;  %v20560_v18 = vld [vmem:[#allocation24_spill] sm:$0xff]  ;;  %v20561_v30 = vld [vmem:[#allocation41_spill] sm:$0xff] }
 0x274   :  { %v18146_v45 = vpop.f32.mrf.mxu0  ;;  %v1527_v39 = vadd.f32 %v20560_v18, %v20559_v1  ;;  %v20562_v38 = vld [vmem:[#allocation33_spill] sm:$0xff]  ;;  %v2415_v1 = vadd.f32 %v20566_v50, %v17686_v46 }
 0x275   :  { %20553 = vst [vmem:[#allocation82_spill] sm:$0xff] %v18144_v27  ;;  %20554 = vst [vmem:[#allocation83_spill] sm:$0xff] %v18146_v45  ;;  %v1543_v27 = vadd.f32 %v20562_v38, %v20561_v30  ;;  %v18162_v45 = vpop.f32.mrf.mxu1 }
 0x276   :  { %v13861_v59 = vpop.f32.mrf.mxu0 }
 0x277   :  { %v18151_v25 = vadd.f32 %v13861_v59, %v17997_v53  ;;  %v1559_v53 = vadd.f32 %v20564_v58, %v20563_v22  ;;  %v2040_v59 = vadd.f32 %v17761_v34, %v1511_v23  ;;  %v2048_v18 = vadd.f32 %v17826_v54, %v1543_v27  ;;  %v18178_v58 = vpop.f32.mrf.mxu1  ;;  %v14790_v34 = vld [vmem:[%s20344_s3 + $0x38] sm:$0xff]   ;;  %v20571_v22 = vld [vmem:[#allocation17_spill] sm:$0xff] }
 0x278   :  { %v4034_v49 = vpop.f32.mrf.mxu0  ;;  %v20569_v54 = vld [vmem:[#allocation16_spill] sm:$0xff]  ;;  %13991 = vmatprep.subr.bf16.mxu1 %v14790_v34 }
 0x279   :  { %20556 = vst [vmem:[#allocation85_spill] sm:$0xff] %v18151_v25  ;;  %v18156_v37 = vadd.f32 %v4034_v49, %v18000_v29  ;;  %v20565_v29 = vld [vmem:[#allocation52_spill] sm:$0xff]  ;;  %v2044_v49 = vadd.f32 %v17798_v12, %v1527_v39  ;;  %v2052_v30 = vadd.f32 %v17852_v13, %v1559_v53  ;;  %v20567_v12 = vld [vmem:[#allocation61_spill] sm:$0xff]  ;;  %v2427_v13 = vadd.f32 %v20571_v22, %v2040_v59  ;;  %v20572_v39 = vld [vmem:[#allocation19_spill] sm:$0xff] }
 0x27a   :  { %v13862_v56 = vpop.f32.mrf.mxu0  ;;  %v2411_v14 = vadd.f32 %v20565_v29, %v17657_v52  ;;  %v14791_v52 = vld [vmem:[%s20344_s3 + $0x138] sm:$0xff]   ;;  %v20587_v22 = vld [vmem:[#allocation34_spill] sm:$0xff] }
 0x27b   :  { %v18168_v25 = vadd.f32 %v13862_v56, %v18010_v17  ;;  %v20568_v17 = vld [vmem:[#allocation59_spill] sm:$0xff]  ;;  %v20570_v23 = vld [vmem:[#allocation60_spill] sm:$0xff]  ;;  %v2431_v56 = vadd.f32 %v20572_v39, %v2044_v49  ;;  %14087 = vmatprep.subr.bf16.mxu0 %v14791_v52  ;;  %v2439_v50 = vadd.f32 %v17835_v7, %v2052_v30  ;;  %v3668_v49 = vadd.f32 %v17867_v31, %v17888_v44 }
 0x27c   :  { %v3165_v38 = vadd.f32 %v17881_v8, %v2411_v14  ;;  %v2419_v27 = vadd.f32 %v20568_v17, %v20567_v12  ;;  %v2423_v46 = vadd.f32 %v20570_v23, %v20569_v54  ;;  %v3169_v8 = vadd.f32 %v17900_v33, %v2415_v1  ;;  %v20573_v53 = vld [vmem:[#allocation20_spill] sm:$0xff]  ;;  %v20580_v1 = vld [vmem:[#allocation37_spill] sm:$0xff] }
 0x27d   :  { %v2435_v29 = vadd.f32 %v20573_v53, %v2048_v18  ;;  %v3664_v14 = vadd.f32 %v17838_v4, %v17865_v3  ;;  %v3662_v12 = vadd.f32 %v17843_v42, %v17870_v6  ;;  %v3665_v17 = vadd.f32 %v17854_v60, %v17875_v62  ;;  %v18208_v18 = vpop.f32.mrf.mxu1  ;;  %v18216_v6 = vpop.f32.mrf.mxu0  ;;  %v20574_v44 = vld [vmem:[#allocation40_spill] sm:$0xff] }
 0x27e   :  { %v3173_v59 = vadd.f32 %v17917_v24, %v2419_v27  ;;  %v3663_v33 = vadd.f32 %v17862_v61, %v3165_v38  ;;  %v3666_v4 = vadd.f32 %v17872_v32, %v17893_v2  ;;  %v3669_v7 = vadd.f32 %v17883_v51, %v17898_v43  ;;  %v20575_v51 = vld [vmem:[#allocation21_spill] sm:$0xff]  ;;  %v20577_v24 = vld [vmem:[#allocation23_spill] sm:$0xff]  ;;  %v20582_v34 = vld [vmem:[#allocation28_spill] sm:$0xff] }
 0x27f   :  { %v4051_v3 = vadd.f32 %v18014_v63, %v3664_v14  ;;  %v3667_v42 = vadd.f32 %v17885_v11, %v3169_v8  ;;  %v3672_v60 = vadd.f32 %v17890_v48, %v17905_v21  ;;  %v3177_v61 = vadd.f32 %v17934_v40, %v2423_v46  ;;  %v20576_v11 = vld [vmem:[#allocation26_spill] sm:$0xff]  ;;  %v20578_v48 = vld [vmem:[#allocation27_spill] sm:$0xff]  ;;  %v20579_v21 = vld [vmem:[#allocation25_spill] sm:$0xff]  ;;  %v18235_v54 = vpop.f32.mrf.mxu1 }
 0x280   :  { %v3670_v31 = vadd.f32 %v17895_v9, %v17910_v41  ;;  %v3673_v32 = vadd.f32 %v17902_v19, %v17913_v35  ;;  %v3181_v62 = vadd.f32 %v17947_v10, %v2427_v13  ;;  %v4049_v2 = vadd.f32 %v20574_v44, %v3662_v12  ;;  %v20581_v38 = vld [vmem:[#allocation29_spill] sm:$0xff]  ;;  %v20583_v41 = vld [vmem:[#allocation39_spill] sm:$0xff]  ;;  %v20585_v10 = vld [vmem:[#allocation46_spill] sm:$0xff] }
 0x281   :  { %v3671_v43 = vadd.f32 %v20575_v51, %v3173_v59  ;;  %v3676_v63 = vadd.f32 %v20577_v24, %v20576_v11  ;;  %v3674_v40 = vadd.f32 %v20579_v21, %v20578_v48  ;;  %v3185_v30 = vadd.f32 %v20580_v1, %v2431_v56  ;;  %v20584_v19 = vld [vmem:[#allocation47_spill] sm:$0xff]  ;;  %v20586_v23 = vld [vmem:[#allocation32_spill] sm:$0xff]  ;;  %v20588_v13 = vld [vmem:[#allocation30_spill] sm:$0xff] }
 0x282   :  { %v3677_v9 = vadd.f32 %v20582_v34, %v20581_v38  ;;  %v3189_v52 = vadd.f32 %v20583_v41, %v2435_v29  ;;  %v4805_v35 = vadd.f32 %v20584_v19, %v4051_v3  ;;  %v4052_v27 = vadd.f32 %v20585_v10, %v3665_v17  ;;  %v20589_v39 = vld [vmem:[#allocation44_spill] sm:$0xff]  ;;  %v20590_v14 = vld [vmem:[#allocation45_spill] sm:$0xff]  ;;  %v20591_v59 = vld [vmem:[#allocation35_spill] sm:$0xff] }
 0x283   :  { %v3675_v46 = vadd.f32 %v20586_v23, %v3177_v61  ;;  %v3680_v8 = vadd.f32 %v20588_v13, %v20587_v22  ;;  %v3193_v53 = vadd.f32 %v20589_v39, %v2439_v50  ;;  %v4050_v56 = vadd.f32 %v20590_v14, %v3663_v33  ;;  %v18245_v29 = vld [vmem:[%s20343_s2] ss:$0 sm:$0xff]  ;;  %v20592_v17 = vld [vmem:[#allocation51_spill] sm:$0xff]  ;;  %v20594_v24 = vld [vmem:[#allocation36_spill] sm:$0xff]  ;;  %v18260_v22 = vpop.f32.mrf.mxu1 }
 0x284   :  { %v3679_v3 = vadd.f32 %v20591_v59, %v3181_v62  ;;  %v4803_v44 = vadd.f32 %v20592_v17, %v4049_v2  ;;  %v20593_v51 = vld [vmem:[#allocation49_spill] sm:$0xff]  ;;  %v18251_v48 = vadd.f32 %v20594_v24, %v3185_v30  ;;  %v20595_v21 = vld [vmem:[#allocation54_spill] sm:$0xff]  ;;  %v20596_v1 = vld [vmem:[#allocation56_spill] sm:$0xff] }
 0x285   :  { %v4055_v11 = vadd.f32 %v20593_v51, %v3668_v49  ;;  %v4053_v50 = vadd.f32 %v20595_v21, %v3666_v4  ;;  %v4056_v33 = vadd.f32 %v20596_v1, %v3669_v7  ;;  %v20597_v38 = vld [vmem:[#allocation57_spill] sm:$0xff]  ;;  %v20598_v19 = vld [vmem:[#allocation38_spill] sm:$0xff]  ;;  %v20599_v23 = vld [vmem:[#allocation48_spill] sm:$0xff] }
 0x286   :  { %v4054_v34 = vadd.f32 %v20597_v38, %v3667_v42  ;;  %v18257_v10 = vadd.f32 %v20598_v19, %v3189_v52  ;;  %v4806_v62 = vadd.f32 %v20599_v23, %v4052_v27  ;;  %v20600_v30 = vld [vmem:[#allocation43_spill] sm:$0xff]  ;;  %v20601_v4 = vld [vmem:[#allocation53_spill] sm:$0xff]  ;;  %v20606_v24 = vld [vmem:[#allocation64_spill] sm:$0xff] }
 0x287   :  { %v4804_v13 = vadd.f32 %v20601_v4, %v4050_v56  ;;  %v20602_v7 = vld [vmem:[#allocation63_spill] sm:$0xff]  ;;  %v20603_v42 = vld [vmem:[#allocation65_spill] sm:$0xff]  ;;  %v20607_v21 = vld [vmem:[#allocation66_spill] sm:$0xff] }
 0x288   :  { %v4059_v39 = vadd.f32 %v20602_v7, %v3672_v60  ;;  %v4057_v14 = vadd.f32 %v20603_v42, %v3670_v31  ;;  %v20604_v52 = vld [vmem:[#allocation55_spill] sm:$0xff]  ;;  %v4808_v1 = vadd.f32 %v20607_v21, %v4054_v34  ;;  %v4063_v34 = vadd.f32 %v18090_v16, %v3676_v63 }
 0x289   :  { %v13929_v12 = vpop.f32.mrf.mxu0  ;;  %v4809_v59 = vadd.f32 %v20604_v52, %v4055_v11  ;;  %v20608_v56 = vld [vmem:[#allocation67_spill] sm:$0xff]  ;;  %v4061_v7 = vadd.f32 %v18096_v20, %v3674_v40 }
 0x28a   :  { %v5303_v61 = vadd.f32 %v13929_v12, %v4805_v35  ;;  %v18266_v35 = vadd.f32 %v20600_v30, %v3193_v53  ;;  %v4810_v53 = vadd.f32 %v20606_v24, %v4056_v33  ;;  %v4060_v38 = vadd.f32 %v20608_v56, %v3673_v32  ;;  %v20611_v52 = vld [vmem:[#allocation75_spill] sm:$0xff]  ;;  %v20614_v24 = vld [vmem:[#allocation70_spill] sm:$0xff] }
 0x28b   :  { %v5174_v41 = vpop.f32.mrf.mxu0  ;;  %v4813_v23 = vadd.f32 %v18088_v15, %v4059_v39  ;;  %v4062_v15 = vadd.f32 %v18102_v57, %v3675_v46  ;;  %v18305_v20 = vadd.f32 %v18111_v28, %v4063_v34  ;;  %v20610_v46 = vld [vmem:[#allocation72_spill] sm:$0xff]  ;;  %v20613_v28 = vld [vmem:[#allocation81_spill] sm:$0xff]  ;;  %v20616_v56 = vld [vmem:[#allocation71_spill] sm:$0xff] }
 0x28c   :  { %v18263_v49 = vadd.f32 %v18245_v29, %v5303_v61  ;;  %v5301_v2 = vadd.f32 %v5174_v41, %v4803_v44  ;;  %v20605_v61 = vld [vmem:[#allocation62_spill] sm:$0xff]  ;;  %v18280_v41 = vpop.f32.mrf.mxu1 }
 0x28d   :  { %v13930_v12 = vpop.f32.mrf.mxu0  ;;  %v4807_v44 = vadd.f32 %v20605_v61, %v4053_v50  ;;  %v4811_v50 = vadd.f32 %v18094_v26, %v4057_v14  ;;  %v4067_v26 = vadd.f32 %v18106_v55, %v3680_v8  ;;  %v4814_v14 = vadd.f32 %v18098_v36, %v4060_v38 }
 0x28e   :  { %v12268_v27 = vmul.f32 -1.442695, %v18263_v49  ;;  %v18274_v17 = vadd.f32 %v18245_v29, %v5301_v2  ;;  %v5304_v51 = vadd.f32 %v13930_v12, %v4806_v62  ;;  %v20609_v62 = vld [vmem:[#allocation69_spill] sm:$0xff]  ;;  %v18313_v8 = vadd.f32 %v20610_v46, %v4061_v7  ;;  %v20620_v7 = vld [vmem:[#allocation76_spill] sm:$0xff] }
 0x28f   :  { %v5177_v60 = vpop.f32.mrf.mxu0  ;;  %v4058_v33 = vadd.f32 %v20609_v62, %v3671_v43  ;;  %v13905_v43 = vpop.f32.mrf.mxu1  ;;  %v18334_v38 = vadd.f32 %v18162_v45, %v20616_v56 }
 0x290   :  { %15014 = vpow2.f32 %v12268_v27  ;;  %v12266_v31 = vmul.f32 -1.442695, %v18274_v17  ;;  %v18284_v11 = vadd.f32 %v18245_v29, %v5304_v51  ;;  %v5302_v19 = vadd.f32 %v5177_v60, %v4804_v13 }
 0x291   :  { %v13933_v2 = vpop.f32.mrf.mxu0  ;;  %v4064_v13 = vadd.f32 %v18100_v47, %v3677_v9  ;;  %v4812_v12 = vadd.f32 %v18104_v0, %v4058_v33  ;;  %v4066_v47 = vadd.f32 %v18116_v5, %v3679_v3  ;;  %v20612_v0 = vld [vmem:[#allocation78_spill] sm:$0xff]  ;;  %v18322_v27 = vadd.f32 %v20613_v28, %v4067_v26  ;;  %v4772_v3 = vpop.f32.mrf.mxu1 }
 0x292   :  { %15016 = vpow2.f32 %v12266_v31  ;;  %v12269_v32 = vmul.f32 -1.442695, %v18284_v11  ;;  %v18292_v30 = vadd.f32 %v18245_v29, %v5302_v19  ;;  %v5307_v4 = vadd.f32 %v13933_v2, %v4809_v59  ;;  %v20617_v31 = vld [vmem:[#allocation77_spill] sm:$0xff]  ;;  %v18345_v2 = vld [vmem:[#allocation3 + $0x7c] sm:$0xf] }
 0x293   :  { %v5190_v39 = vpop.f32.mrf.mxu0  ;;  %v18316_v36 = vadd.f32 %v20611_v52, %v4064_v13  ;;  %v18319_v59 = vadd.f32 %v20612_v0, %v4062_v15  ;;  %v18337_v60 = vadd.f32 %v18178_v58, %v4066_v47  ;;  %v4070_v19 = vadd.f32 %v20617_v31, %v18251_v48  ;;  %v20621_v13 = vld [vmem:[#allocation83_spill] sm:$0xff]  ;;  %v5912_v52 = vld [vmem:[#allocation3 + $0x78] sm:$0xe]  ;;  %v20623_v0 = vld [vmem:[#allocation80_spill] sm:$0xff] }
 0x294   :  { %15018 = vpow2.f32 %v12269_v32  ;;  %v12267_v16 = vmul.f32 -1.442695, %v18292_v30  ;;  %v18300_v63 = vadd.f32 %v18245_v29, %v5307_v4  ;;  %v5305_v42 = vadd.f32 %v5190_v39, %v4807_v44  ;;  %v20618_v32 = vld [vmem:[#allocation73_spill] sm:$0xff]  ;;  %v20619_v4 = vld [vmem:[#allocation74_spill] sm:$0xff]  ;;  %v20622_v47 = vld [vmem:[#allocation79_spill] sm:$0xff] }
 0x295   :  { %v13934_v57 = vpop.f32.mrf.mxu0  ;;  %v18349_v45 = vadd.f32 %v18208_v18, %v20618_v32  ;;  %v18353_v58 = vadd.f32 %v18235_v54, %v20619_v4  ;;  %v18357_v48 = vadd.f32 %v18260_v22, %v20620_v7  ;;  %v18361_v15 = vadd.f32 %v20621_v13, %v18257_v10  ;;  %v6387_v31 = vld [vmem:[#allocation3 + $0x78] sm:$0xc]  ;;  %v6388_v7 = vld [vmem:[#allocation3 + $0x80] sm:$0x3] }
 0x296   :  { %15020 = vpow2.f32 %v12267_v16  ;;  %v12272_v55 = vmul.f32 -1.442695, %v18300_v63  ;;  %v18310_v40 = vadd.f32 %v18245_v29, %v5305_v42  ;;  %v5308_v9 = vadd.f32 %v13934_v57, %v4810_v53  ;;  %v20615_v53 = vld [vmem:[#allocation84_spill] sm:$0xff] }
 0x297   :  { %v5193_v5 = vpop.f32.mrf.mxu0  ;;  %v18330_v21 = vadd.f32 %v20615_v53, %v20614_v24  ;;  %v18368_v54 = vadd.f32 %v18280_v41, %v4070_v19  ;;  %v18371_v22 = vadd.f32 %v13905_v43, %v20622_v47  ;;  %v18375_v10 = vadd.f32 %v18216_v6, %v18266_v35  ;;  %v20624_v43 = vld [vmem:[#allocation82_spill] sm:$0xff] }
 0x298   :  { %15022 = vpow2.f32 %v12272_v55  ;;  %v12270_v51 = vmul.f32 -1.442695, %v18310_v40  ;;  %v18326_v61 = vadd.f32 %v18245_v29, %v5308_v9  ;;  %v5306_v44 = vadd.f32 %v5193_v5, %v4808_v1 }
 0x299   :  { %v13937_v62 = vpop.f32.mrf.mxu0  ;;  %v5974_v55 = vrot.slane %v18345_v2, 5  ;;  %v18383_v28 = vadd.f32 %v4772_v3, %v20623_v0 }
 0x29a   :  { %15024 = vpow2.f32 %v12270_v51  ;;  %v12273_v33 = vmul.f32 -1.442695, %v18326_v61  ;;  %v18343_v1 = vadd.f32 %v18245_v29, %v5306_v44  ;;  %v5311_v34 = vadd.f32 %v13937_v62, %v4813_v23  ;;  %v13906_v23 = vpop.f32.mrf.mxu1  ;;  %v5913_v51 = vld [vmem:[#allocation3 + $0x80] sm:$0x1] }
 0x29b   :  { %v5206_v26 = vpop.f32.mrf.mxu0  ;;  %v18386_v5 = vadd.f32 %v13906_v23, %v20624_v43  ;;  %v6444_v44 = vrot.slane %v18345_v2, 6  ;;  %v5976_v32 = vrot.slane %v5974_v55, 4  ;;  %v5977_v23 = vrot.slane %v5913_v51, 5 }
 0x29c   :  { %15026 = vpow2.f32 %v12273_v33  ;;  %v12271_v39 = vmul.f32 -1.442695, %v18343_v1  ;;  %v18365_v18 = vadd.f32 %v18245_v29, %v5311_v34  ;;  %v5309_v16 = vadd.f32 %v5206_v26, %v4811_v50  ;;  %v4775_v62 = vpop.f32.mrf.mxu1 }
 0x29d   :  { %v15015_v42 = vpop.eup %15014  ;;  %v13938_v57 = vpop.f32.mrf.mxu0  ;;  %v12334_v34 = vrot.slane %v5912_v52, 9  ;;  %v6446_v52 = vrot.slane %v6444_v44, 4 }
 0x29e   :  { %v5470_v9 = vadd.f32 1.0, %v15015_v42  ;;  %15028 = vpow2.f32 %v12271_v39  ;;  %v12276_v46 = vmul.f32 -1.442695, %v18365_v18  ;;  %v18380_v50 = vadd.f32 %v18245_v29, %v5309_v16 }
 0x29f   :  { %v15017_v41 = vpop.eup %15016  ;;  %v5312_v6 = vadd.f32 %v13938_v57, %v4814_v14  ;;  %v5209_v35 = vpop.f32.mrf.mxu0  ;;  %v12390_v39 = vrot.slane %v6387_v31, 10 }
 0x2a0   :  { %15030 = vrcp.f32 %v5470_v9  ;;  %v5468_v24 = vadd.f32 1.0, %v15017_v41  ;;  %v12274_v53 = vmul.f32 -1.442695, %v18380_v50  ;;  %v5310_v56 = vadd.f32 %v5209_v35, %v4812_v12  ;;  %v13909_v9 = vpop.f32.mrf.mxu1 }
 0x2a1   :  { %v15019_v19 = vpop.eup %15018  ;;  %15032 = vpow2.f32 %v12276_v46  ;;  %v18391_v3 = vadd.f32 %v18245_v29, %v5312_v6  ;;  %v13941_v33 = vpop.f32.mrf.mxu0  ;;  %v6447_v41 = vrot.slane %v6388_v7, 6 }
 0x2a2   :  { %15034 = vrcp.f32 %v5468_v24  ;;  %v5471_v14 = vadd.f32 1.0, %v15019_v19  ;;  %v18394_v4 = vadd.f32 %v18245_v29, %v5310_v56  ;;  %v5315_v2 = vadd.f32 %v13941_v33, %v18305_v20 }
 0x2a3   :  { %v15021_v13 = vpop.eup %15020  ;;  %15036 = vpow2.f32 %v12274_v53  ;;  %v12277_v12 = vmul.f32 -1.442695, %v18391_v3  ;;  %v5222_v26 = vpop.f32.mrf.mxu0  ;;  %v18410_v56 = vsel %vm16320_vm7, %v12334_v34, %v5974_v55  ;;  %v18423_v55 = vsel %vm18076_vm10, %v12390_v39, %v6444_v44 }
 0x2a4   :  { %15038 = vrcp.f32 %v5471_v14  ;;  %v5469_v16 = vadd.f32 1.0, %v15021_v13  ;;  %v12275_v42 = vmul.f32 -1.442695, %v18394_v4  ;;  %v18400_v47 = vadd.f32 %v18245_v29, %v5315_v2  ;;  %v4788_v14 = vpop.f32.mrf.mxu1 }
 0x2a5   :  { %v15023_v57 = vpop.eup %15022  ;;  %15040 = vpow2.f32 %v12277_v12  ;;  %v5313_v20 = vadd.f32 %v5222_v26, %v18313_v8  ;;  %v13942_v46 = vpop.f32.mrf.mxu0  ;;  %v18414_v8 = vsel %vm16320_vm7, %v5976_v32, %v5977_v23  ;;  %v18427_v34 = vsel %vm18076_vm10, %v6446_v52, %v6447_v41  ;;  %v20627_v52 = vld [vmem:[#allocation85_spill] sm:$0xff] }
 0x2a6   :  { %15042 = vrcp.f32 %v5469_v16  ;;  %v5474_v0 = vadd.f32 1.0, %v15023_v57  ;;  %v12280_v43 = vmul.f32 -1.442695, %v18400_v47  ;;  %v5316_v6 = vadd.f32 %v13942_v46, %v18316_v36 }
 0x2a7   :  { %v15025_v35 = vpop.eup %15024  ;;  %15044 = vpow2.f32 %v12275_v42  ;;  %v18406_v51 = vadd.f32 %v18245_v29, %v5313_v20  ;;  %v5225_v24 = vpop.f32.mrf.mxu0  ;;  %v18434_v23 = vadd.f32 %v4775_v62, %v18361_v15  ;;  %v12358_v16 = vcombine.low %v18410_v56, %v18414_v8 }
 0x2a8   :  { %15046 = vrcp.f32 %v5474_v0  ;;  %v5472_v31 = vadd.f32 1.0, %v15025_v35  ;;  %v18417_v19 = vadd.f32 %v18245_v29, %v5316_v6  ;;  %v5314_v36 = vadd.f32 %v5225_v24, %v18319_v59  ;;  %v13910_v0 = vpop.f32.mrf.mxu1 }
 0x2a9   :  { %v15027_v33 = vpop.eup %15026  ;;  %15048 = vpow2.f32 %v12280_v43  ;;  %v12278_v2 = vmul.f32 -1.442695, %v18406_v51  ;;  %v13945_v7 = vpop.f32.mrf.mxu0  ;;  %v18442_v41 = vadd.f32 %v13909_v9, %v20627_v52  ;;  %v12414_v62 = vcombine.low %v18423_v55, %v18427_v34  ;;  %v18737_v55 = vld [vmem:[%s20344_s3 + $0xf8] sm:$0xff]  }
 0x2aa   :  { %15050 = vrcp.f32 %v5472_v31  ;;  %v5475_v32 = vadd.f32 1.0, %v15027_v33  ;;  %v12281_v59 = vmul.f32 -1.442695, %v18417_v19  ;;  %v18431_v12 = vadd.f32 %v18245_v29, %v5314_v36 }
 0x2ab   :  { %v15029_v26 = vpop.eup %15028  ;;  %15052 = vpow2.f32 %v12278_v2  ;;  %v5319_v44 = vadd.f32 %v13945_v7, %v18322_v27  ;;  %v5238_v39 = vpop.f32.mrf.mxu0  ;;  %v18455_v24 = vadd.f32 %v4788_v14, %v18156_v37  ;;  %v18459_v7 = vadd.f32 %v13910_v0, %v18168_v25 }
 0x2ac   :  { %15054 = vrcp.f32 %v5475_v32  ;;  %v5473_v42 = vadd.f32 1.0, %v15029_v26  ;;  %v12279_v57 = vmul.f32 -1.442695, %v18431_v12  ;;  %v5317_v20 = vadd.f32 %v5238_v39, %v18330_v21 }
 0x2ad   :  { %v15031_v46 = vpop.eup %15030  ;;  %15056 = vpow2.f32 %v12281_v59  ;;  %v18445_v15 = vadd.f32 %v18245_v29, %v5319_v44  ;;  %v13946_v27 = vpop.f32.mrf.mxu0 }
 0x2ae   :  { %v15033_v43 = vpop.eup %15032  ;;  %v5566_v6 = vmul.f32 %v15031_v46, %v18263_v49  ;;  %15058 = vrcp.f32 %v5473_v42  ;;  %v18451_v35 = vadd.f32 %v18245_v29, %v5317_v20  ;;  %v5320_v21 = vadd.f32 %v13946_v27, %v18334_v38 }
 0x2af   :  { %v15035_v9 = vpop.eup %15034  ;;  %v5478_v31 = vadd.f32 1.0, %v15033_v43  ;;  %15060 = vpow2.f32 %v12279_v57  ;;  %v12284_v36 = vmul.f32 -1.442695, %v18445_v15  ;;  %v5241_v33 = vpop.f32.mrf.mxu0 }
 0x2b0   :  { %v15037_v2 = vpop.eup %15036  ;;  %v12929_v49 = vpack.c.bf16 %v5566_v6, %v5566_v6  ;;  %v5564_v32 = vmul.f32 %v15035_v9, %v18274_v17  ;;  %v18463_v59 = vadd.f32 %v18245_v29, %v5320_v21  ;;  %v18466_v37 = vmul.f32 -1.442695, %v18451_v35 }
 0x2b1   :  { %v15039_v38 = vpop.eup %15038  ;;  %15062 = vrcp.f32 %v5478_v31  ;;  %v5476_v26 = vadd.f32 1.0, %v15037_v2  ;;  %v5318_v14 = vadd.f32 %v5241_v33, %v18337_v60  ;;  %v13949_v44 = vpop.f32.mrf.mxu0 }
 0x2b2   :  { %v15041_v39 = vpop.eup %15040  ;;  %v5700_v42 = vrot.slane %v12929_v49, 7  ;;  %v12927_v57 = vpack.c.bf16 %v5564_v32, %v5564_v32  ;;  %v5567_v25 = vmul.f32 %v15039_v38, %v18284_v11  ;;  %15064 = vpow2.f32 %v12284_v36 }
 0x2b3   :  { %v15043_v20 = vpop.eup %15042  ;;  %15066 = vrcp.f32 %v5476_v26  ;;  %v5479_v17 = vadd.f32 1.0, %v15041_v39  ;;  %v18471_v46 = vmul.f32 -1.442695, %v18463_v59  ;;  %v18474_v52 = vadd.f32 %v18245_v29, %v5318_v14  ;;  %v5254_v0 = vpop.f32.mrf.mxu0 }
 0x2b4   :  { %v15045_v27 = vpop.eup %15044  ;;  %v5701_v43 = vrot.slane %v5700_v42, 4  ;;  %5827 = vst [vmem:[#allocation3 + $0x18] sm:$0xe] %v5700_v42  ;;  %v5695_v60 = vrot.slane %v12927_v57, 7  ;;  %v12930_v6 = vpack.c.bf16 %v5567_v25, %v5567_v25  ;;  %v5565_v21 = vmul.f32 %v15043_v20, %v18292_v30 }
 0x2b5   :  { %v15047_v9 = vpop.eup %15046  ;;  %15068 = vrcp.f32 %v5479_v17  ;;  %v5477_v31 = vadd.f32 1.0, %v15045_v27  ;;  %v18484_v36 = vmul.f32 -1.442695, %v18474_v52  ;;  %v5323_v33 = vadd.f32 %v13949_v44, %v18349_v45  ;;  %v13950_v2 = vpop.f32.mrf.mxu0 }
 0x2b6   :  { %v15049_v49 = vpop.eup %15048  ;;  %v5696_v32 = vrot.slane %v5695_v60, 4  ;;  %5824 = vst [vmem:[#allocation3 + $0xc] sm:$0xe] %v5695_v60  ;;  %v5702_v38 = vrot.slane %v12930_v6, 7  ;;  %v12928_v30 = vpack.c.bf16 %v5565_v21, %v5565_v21  ;;  %v5570_v26 = vmul.f32 %v15047_v9, %v18300_v63 }
 0x2b7   :  { %v15051_v14 = vpop.eup %15050  ;;  %15070 = vrcp.f32 %v5477_v31  ;;  %v5482_v39 = vadd.f32 1.0, %v15049_v49  ;;  %v18489_v42 = vadd.f32 %v18245_v29, %v5323_v33  ;;  %v5321_v57 = vadd.f32 %v5254_v0, %v18353_v58  ;;  %v5257_v25 = vpop.f32.mrf.mxu0 }
 0x2b8   :  { %v15053_v20 = vpop.eup %15052  ;;  %v5703_v45 = vsel %vm18479_vm13, %v5701_v43, %v5702_v38  ;;  %v5704_v44 = vrot.slane %v5702_v38, 4  ;;  %v5697_v17 = vrot.slane %v12928_v30, 7  ;;  %v12933_v27 = vpack.c.bf16 %v5570_v26, %v5570_v26 }
 0x2b9   :  { %v15055_v60 = vpop.eup %15054  ;;  %5828 = vst [vmem:[#allocation3 + $0x1c] sm:$0xf] %v5703_v45  ;;  %v5568_v63 = vmul.f32 %v15051_v14, %v18310_v40  ;;  %15072 = vrcp.f32 %v5482_v39  ;;  %v5480_v6 = vadd.f32 1.0, %v15053_v20  ;;  %v12288_v21 = vmul.f32 -1.442695, %v18489_v42  ;;  %v18496_v9 = vpop.f32.mrf.mxu0 }
 0x2ba   :  { %v15057_v31 = vpop.eup %15056  ;;  %5829 = vst [vmem:[#allocation3 + $0x20] sm:$0x1] %v5704_v44  ;;  %v5698_v58 = vsel %vm18479_vm13, %v5696_v32, %v5697_v17  ;;  %v5699_v0 = vrot.slane %v5697_v17, 4  ;;  %v5710_v43 = vrot.slane %v12933_v27, 7  ;;  %v5571_v33 = vmul.f32 %v15055_v60, %v18326_v61 }
 0x2bb   :  { %v15059_v49 = vpop.eup %15058  ;;  %5825 = vst [vmem:[#allocation3 + $0x10] sm:$0xf] %v5698_v58  ;;  %v12931_v38 = vpack.c.bf16 %v5568_v63, %v5568_v63  ;;  %15074 = vrcp.f32 %v5480_v6  ;;  %v5483_v40 = vadd.f32 1.0, %v15057_v31  ;;  %v18502_v30 = vadd.f32 %v18245_v29, %v5321_v57  ;;  %v5270_v26 = vpop.f32.mrf.mxu0 }
 0x2bc   :  { %v15061_v14 = vpop.eup %15060  ;;  %5826 = vst [vmem:[#allocation3 + $0x14] sm:$0x1] %v5699_v0  ;;  %v5711_v39 = vrot.slane %v5710_v43, 4  ;;  %5833 = vst [vmem:[#allocation3 + $0x30] sm:$0xe] %v5710_v43  ;;  %v12934_v20 = vpack.c.bf16 %v5571_v33, %v5571_v33  ;;  %v5569_v32 = vmul.f32 %v15059_v49, %v18343_v1  ;;  %15076 = vpow2.f32 %v18466_v37 }
 0x2bd   :  { %v5705_v45 = vrot.slane %v12931_v38, 7  ;;  %15078 = vrcp.f32 %v5483_v40  ;;  %v5481_v61 = vadd.f32 1.0, %v15061_v14  ;;  %v12286_v44 = vmul.f32 -1.442695, %v18502_v30  ;;  %v13954_v63 = vpop.f32.mrf.mxu0 }
 0x2be   :  { %v15063_v17 = vpop.eup %15062  ;;  %v5712_v27 = vrot.slane %v12934_v20, 7  ;;  %v12932_v60 = vpack.c.bf16 %v5569_v32, %v5569_v32  ;;  %15080 = vpow2.f32 %v18471_v46  ;;  %v5324_v57 = vadd.f32 %v13950_v2, %v18357_v48 }
 0x2bf   :  { %v15065_v6 = vpop.eup %15064  ;;  %v5706_v31 = vrot.slane %v5705_v45, 4  ;;  %5830 = vst [vmem:[#allocation3 + $0x24] sm:$0xe] %v5705_v45  ;;  %v5574_v1 = vmul.f32 %v15063_v17, %v18365_v18  ;;  %15082 = vrcp.f32 %v5481_v61  ;;  %v5322_v37 = vadd.f32 %v5257_v25, %v18368_v54  ;;  %v18523_v40 = vpop.f32.mrf.mxu0 }
 0x2c0   :  { %v15067_v58 = vpop.eup %15066  ;;  %v5713_v0 = vsel %vm18479_vm13, %v5711_v39, %v5712_v27  ;;  %v5714_v43 = vrot.slane %v5712_v27, 4  ;;  %v5707_v33 = vrot.slane %v12932_v60, 7  ;;  %v5486_v49 = vadd.f32 1.0, %v15065_v6 }
 0x2c1   :  { %5834 = vst [vmem:[#allocation3 + $0x34] sm:$0xf] %v5713_v0  ;;  %v12937_v46 = vpack.c.bf16 %v5574_v1, %v5574_v1  ;;  %v5572_v48 = vmul.f32 %v15067_v58, %v18380_v50  ;;  %15084 = vpow2.f32 %v18484_v36  ;;  %v18516_v2 = vadd.f32 %v18245_v29, %v5324_v57  ;;  %v13957_v6 = vpop.f32.mrf.mxu0 }
 0x2c2   :  { %v15069_v18 = vpop.eup %15068  ;;  %5835 = vst [vmem:[#allocation3 + $0x38] sm:$0x1] %v5714_v43  ;;  %v5708_v54 = vsel %vm18479_vm13, %v5706_v31, %v5707_v33  ;;  %v5709_v25 = vrot.slane %v5707_v33, 4  ;;  %15086 = vrcp.f32 %v5486_v49  ;;  %v18521_v38 = vadd.f32 %v18245_v29, %v5322_v37 }
 0x2c3   :  { %5831 = vst [vmem:[#allocation3 + $0x28] sm:$0xf] %v5708_v54  ;;  %v5720_v14 = vrot.slane %v12937_v46, 7  ;;  %v12935_v50 = vpack.c.bf16 %v5572_v48, %v5572_v48  ;;  %v5575_v36 = vmul.f32 %v15069_v18, %v18391_v3  ;;  %15088 = vpow2.f32 %v12288_v21  ;;  %v5286_v48 = vpop.f32.mrf.mxu0 }
 0x2c4   :  { %v15071_v39 = vpop.eup %15070  ;;  %5832 = vst [vmem:[#allocation3 + $0x2c] sm:$0x1] %v5709_v25  ;;  %15090 = vpow2.f32 %v12286_v44  ;;  %v12289_v20 = vmul.f32 -1.442695, %v18516_v2  ;;  %v12287_v32 = vmul.f32 -1.442695, %v18521_v38  ;;  %v5327_v45 = vadd.f32 %v18496_v9, %v18371_v22 }
 0x2c5   :  { %v5721_v61 = vrot.slane %v5720_v14, 4  ;;  %5839 = vst [vmem:[#allocation3 + $0x48] sm:$0xe] %v5720_v14  ;;  %v5715_v17 = vrot.slane %v12935_v50, 7  ;;  %v12938_v27 = vpack.c.bf16 %v5575_v36, %v5575_v36  ;;  %v5573_v60 = vmul.f32 %v15071_v39, %v18394_v4 }
 0x2c6   :  { %v15073_v57 = vpop.eup %15072  ;;  %15092 = vpow2.f32 %v12289_v20  ;;  %v18532_v3 = vadd.f32 %v18245_v29, %v5327_v45  ;;  %v5325_v21 = vadd.f32 %v5270_v26, %v18383_v28  ;;  %v5328_v44 = vadd.f32 %v13954_v63, %v18386_v5 }
 0x2c7   :  { %v5716_v31 = vrot.slane %v5715_v17, 4  ;;  %5836 = vst [vmem:[#allocation3 + $0x3c] sm:$0xe] %v5715_v17  ;;  %v5722_v1 = vrot.slane %v12938_v27, 7  ;;  %v12936_v22 = vpack.c.bf16 %v5573_v60, %v5573_v60  ;;  %v5578_v9 = vmul.f32 %v15073_v57, %v18400_v47  ;;  %v13958_v57 = vpop.f32.mrf.mxu0 }
 0x2c8   :  { %v15075_v37 = vpop.eup %15074  ;;  %15094 = vpow2.f32 %v12287_v32  ;;  %v12292_v4 = vmul.f32 -1.442695, %v18532_v3  ;;  %v18539_v58 = vadd.f32 %v18245_v29, %v5325_v21  ;;  %v18542_v0 = vadd.f32 %v18245_v29, %v5328_v44  ;;  %v4791_v44 = vpop.f32.mrf.mxu1 }
 0x2c9   :  { %v15077_v28 = vpop.eup %15076  ;;  %v5723_v5 = vsel %vm18479_vm13, %v5721_v61, %v5722_v1  ;;  %v5724_v26 = vrot.slane %v5722_v1, 4  ;;  %v5717_v63 = vrot.slane %v12936_v22, 7  ;;  %v12941_v43 = vpack.c.bf16 %v5578_v9, %v5578_v9 }
 0x2ca   :  { %v15079_v33 = vpop.eup %15078  ;;  %5840 = vst [vmem:[#allocation3 + $0x4c] sm:$0xf] %v5723_v5  ;;  %v5576_v47 = vmul.f32 %v15075_v37, %v18406_v51  ;;  %v5484_v49 = vadd.f32 1.0, %v15077_v28  ;;  %15096 = vpow2.f32 %v12292_v4  ;;  %v12290_v46 = vmul.f32 -1.442695, %v18539_v58 }
 0x2cb   :  { %v15081_v18 = vpop.eup %15080  ;;  %5841 = vst [vmem:[#allocation3 + $0x50] sm:$0x1] %v5724_v26  ;;  %v5718_v54 = vsel %vm18479_vm13, %v5716_v31, %v5717_v63  ;;  %v5719_v25 = vrot.slane %v5717_v63, 4  ;;  %v5730_v14 = vrot.slane %v12941_v43, 7  ;;  %v5579_v50 = vmul.f32 %v15079_v33, %v18417_v19 }
 0x2cc   :  { %v15083_v36 = vpop.eup %15082  ;;  %5837 = vst [vmem:[#allocation3 + $0x40] sm:$0xf] %v5718_v54  ;;  %v12939_v39 = vpack.c.bf16 %v5576_v47, %v5576_v47  ;;  %15098 = vrcp.f32 %v5484_v49  ;;  %v5487_v20 = vadd.f32 1.0, %v15081_v18  ;;  %v12293_v51 = vmul.f32 -1.442695, %v18542_v0 }
 0x2cd   :  { %5838 = vst [vmem:[#allocation3 + $0x44] sm:$0x1] %v5719_v25  ;;  %v5731_v32 = vrot.slane %v5730_v14, 4  ;;  %5845 = vst [vmem:[#allocation3 + $0x60] sm:$0xe] %v5730_v14  ;;  %v12942_v45 = vpack.c.bf16 %v5579_v50, %v5579_v50  ;;  %v5577_v61 = vmul.f32 %v15083_v36, %v18431_v12  ;;  %15100 = vpow2.f32 %v12290_v46 }
 0x2ce   :  { %v15085_v17 = vpop.eup %15084  ;;  %v5725_v27 = vrot.slane %v12939_v39, 7  ;;  %15102 = vrcp.f32 %v5487_v20  ;;  %v5326_v19 = vadd.f32 %v18523_v40, %v18434_v23  ;;  %v5331_v60 = vadd.f32 %v13957_v6, %v18442_v41  ;;  %v5906_v54 = vld [vmem:[#allocation3 + $0x18] sm:$0xe]  ;;  %v18573_v50 = vld [vmem:[#allocation3 + $0x1c] sm:$0xf] }
 0x2cf   :  { %v15087_v21 = vpop.eup %15086  ;;  %v5732_v31 = vrot.slane %v12942_v45, 7  ;;  %v12940_v1 = vpack.c.bf16 %v5577_v61, %v5577_v61  ;;  %v5485_v22 = vadd.f32 1.0, %v15085_v17  ;;  %15104 = vpow2.f32 %v12293_v51  ;;  %v5907_v36 = vld [vmem:[#allocation3 + $0x20] sm:$0x1]  ;;  %v6381_v45 = vld [vmem:[#allocation3 + $0x18] sm:$0xc] }
 0x2d0   :  { %v15089_v9 = vpop.eup %15088  ;;  %v5726_v37 = vrot.slane %v5725_v27, 4  ;;  %5842 = vst [vmem:[#allocation3 + $0x54] sm:$0xe] %v5725_v27  ;;  %v5582_v12 = vmul.f32 %v15087_v21, %v18445_v15  ;;  %v18558_v4 = vadd.f32 %v18245_v29, %v5326_v19  ;;  %v18561_v28 = vadd.f32 %v18245_v29, %v5331_v60  ;;  %v5289_v15 = vpop.f32.mrf.mxu0  ;;  %v6382_v60 = vld [vmem:[#allocation3 + $0x20] sm:$0x3] }
 0x2d1   :  { %v15091_v23 = vpop.eup %15090  ;;  %v5733_v41 = vsel %vm18479_vm13, %v5731_v32, %v5732_v31  ;;  %v5734_v40 = vrot.slane %v5732_v31, 4  ;;  %v5727_v6 = vrot.slane %v12940_v1, 7  ;;  %15106 = vrcp.f32 %v5485_v22 }
 0x2d2   :  { %v4832_v5 = vadd.f32 %v4791_v44, %v18375_v10  ;;  %5846 = vst [vmem:[#allocation3 + $0x64] sm:$0xf] %v5733_v41  ;;  %v12945_v26 = vpack.c.bf16 %v5582_v12, %v5582_v12  ;;  %v5490_v63 = vadd.f32 1.0, %v15089_v9  ;;  %v5488_v43 = vadd.f32 1.0, %v15091_v23 }
 0x2d3   :  { %v15093_v33 = vpop.eup %15092  ;;  %5847 = vst [vmem:[#allocation3 + $0x68] sm:$0x1] %v5734_v40  ;;  %v5728_v47 = vsel %vm18479_vm13, %v5726_v37, %v5727_v6  ;;  %v5729_v49 = vrot.slane %v5727_v6, 4  ;;  %v12291_v46 = vmul.f32 -1.442695, %v18558_v4  ;;  %v5329_v18 = vadd.f32 %v5286_v48, %v18455_v24 }
 0x2d4   :  { %5843 = vst [vmem:[#allocation3 + $0x58] sm:$0xf] %v5728_v47  ;;  %v18570_v25 = vrot.slane %v12945_v26, 7  ;;  %15108 = vrcp.f32 %v5490_v63  ;;  %v5491_v10 = vadd.f32 1.0, %v15093_v33  ;;  %v5332_v14 = vadd.f32 %v13958_v57, %v18459_v7  ;;  %v5908_v26 = vld [vmem:[#allocation3 + $0x30] sm:$0xe] }
 0x2d5   :  { %v15095_v39 = vpop.eup %15094  ;;  %5844 = vst [vmem:[#allocation3 + $0x5c] sm:$0x1] %v5729_v49  ;;  %15110 = vrcp.f32 %v5488_v43  ;;  %v12296_v20 = vmul.f32 -1.442695, %v18561_v28  ;;  %v18577_v51 = vadd.f32 %v18245_v29, %v5329_v18  ;;  %v5330_v24 = vadd.f32 %v5289_v15, %v4832_v5  ;;  %v18597_v47 = vld [vmem:[#allocation3 + $0x34] sm:$0xf] }
 0x2d6   :  { %5851 = vst [vmem:[#allocation3 + $0x90] sm:$0xe] %v18570_v25  ;;  %15112 = vrcp.f32 %v5491_v10  ;;  %v5489_v48 = vadd.f32 1.0, %v15095_v39  ;;  %v18581_v32 = vadd.f32 %v18245_v29, %v5332_v14  ;;  %v12331_v7 = vrot.slane %v5906_v54, 9  ;;  %v5909_v54 = vld [vmem:[#allocation3 + $0x38] sm:$0x1] }
 0x2d7   :  { %v15097_v61 = vpop.eup %15096  ;;  %15114 = vpow2.f32 %v12291_v46  ;;  %v12294_v17 = vmul.f32 -1.442695, %v18577_v51  ;;  %v18585_v27 = vadd.f32 %v18245_v29, %v5330_v24  ;;  %v5953_v19 = vrot.slane %v18573_v50, 5 }
 0x2d8   :  { %15116 = vrcp.f32 %v5489_v48  ;;  %v5494_v57 = vadd.f32 1.0, %v15097_v61  ;;  %v12297_v21 = vmul.f32 -1.442695, %v18581_v32  ;;  %v5956_v44 = vrot.slane %v5907_v36, 5  ;;  %v15404_v48 = vld [vmem:[%s20344_s3 + $0x38] sm:$0xff]  }
 0x2d9   :  { %v15099_v31 = vpop.eup %15098  ;;  %15118 = vpow2.f32 %v12296_v20  ;;  %v12295_v1 = vmul.f32 -1.442695, %v18585_v27  ;;  %v5954_v22 = vsel %vm16320_vm7, %v12331_v7, %v5953_v19  ;;  %v5955_v9 = vrot.slane %v5953_v19, 4  ;;  %v6383_v19 = vld [vmem:[#allocation3 + $0x30] sm:$0xc] }
 0x2da   :  { %v15101_v37 = vpop.eup %15100  ;;  %v5580_v29 = vmul.f32 %v15099_v31, %v18451_v35  ;;  %15120 = vrcp.f32 %v5494_v57  ;;  %v12387_v12 = vrot.slane %v6381_v45, 10  ;;  %v6423_v23 = vrot.slane %v18573_v50, 6  ;;  %v14792_v35 = vld [vmem:[%s20344_s3 + $0x30] sm:$0xff]  }
 0x2db   :  { %v15103_v41 = vpop.eup %15102  ;;  %v5492_v40 = vadd.f32 1.0, %v15101_v37  ;;  %15122 = vpow2.f32 %v12294_v17  ;;  %v5957_v6 = vsel %vm16320_vm7, %v5955_v9, %v5956_v44  ;;  %v6426_v5 = vrot.slane %v6382_v60, 6 }
 0x2dc   :  { %v15105_v63 = vpop.eup %15104  ;;  %v12943_v43 = vpack.c.bf16 %v5580_v29, %v5580_v29  ;;  %v5583_v15 = vmul.f32 %v15103_v41, %v18463_v59  ;;  %15124 = vpow2.f32 %v12297_v21  ;;  %v12355_v33 = vcombine.low %v5954_v22, %v5957_v6 }
 0x2dd   :  { %15126 = vrcp.f32 %v5492_v40  ;;  %v5495_v49 = vadd.f32 1.0, %v15105_v63  ;;  %v6424_v46 = vsel %vm18076_vm10, %v12387_v12, %v6423_v23  ;;  %v6425_v18 = vrot.slane %v6423_v23, 4 }
 0x2de   :  { %v15107_v10 = vpop.eup %15106  ;;  %v5735_v14 = vrot.slane %v12943_v43, 7  ;;  %v12946_v36 = vpack.c.bf16 %v5583_v15, %v5583_v15  ;;  %15128 = vpow2.f32 %v12295_v1  ;;  %13976 = vmatmul.mubr.bf16.vlgmr.msra.gmra.mxu1 %v12355_v33  ;;  %v12332_v59 = vrot.slane %v5908_v26, 9  ;;  %v18617_v1 = vld [vmem:[#allocation3 + $0x38] sm:$0x3]  ;;  %v15405_v26 = vld [vmem:[%s20344_s3 + $0x138] sm:$0xff]  }
 0x2df   :  { %v5581_v39 = vmul.f32 %v15107_v10, %v18474_v52  ;;  %15130 = vrcp.f32 %v5495_v49  ;;  %v6427_v20 = vsel %vm18076_vm10, %v6425_v18, %v6426_v5  ;;  %v5960_v24 = vrot.slane %v18597_v47, 5  ;;  %13992 = vmatpush3.bf16.msra.mxu1 %v15404_v48  ;;  %v14793_v52 = vld [vmem:[%s20344_s3 + $0x130] sm:$0xff]   ;;  %v14796_v49 = vld [vmem:[%s20344_s3 + $0x20] sm:$0xff]  }
 0x2e0   :  { %v5741_v7 = vrot.slane %v18570_v25, 4  ;;  %5848 = vst [vmem:[#allocation3 + $0x84] sm:$0xe] %v5735_v14  ;;  %v5742_v45 = vrot.slane %v12946_v36, 7  ;;  %v12411_v61 = vcombine.low %v6424_v46, %v6427_v20  ;;  %v5963_v17 = vrot.slane %v5909_v54, 5  ;;  %13993 = vmatprep.subr.bf16.mxu1 %v14792_v35  ;;  %v14794_v25 = vld [vmem:[%s20344_s3 + $0x28] sm:$0xff]  }
 0x2e1   :  { %v15109_v60 = vpop.eup %15108  ;;  %v5736_v57 = vrot.slane %v5735_v14, 4  ;;  %v12944_v21 = vpack.c.bf16 %v5581_v39, %v5581_v39  ;;  %v5961_v44 = vsel %vm16320_vm7, %v12332_v59, %v5960_v24  ;;  %v5962_v31 = vrot.slane %v5960_v24, 4 }
 0x2e2   :  { %v15111_v22 = vpop.eup %15110  ;;  %v5743_v9 = vsel %vm18479_vm13, %v5741_v7, %v5742_v45  ;;  %v5744_v37 = vrot.slane %v5742_v45, 4  ;;  %v5586_v29 = vmul.f32 %v15109_v60, %v18489_v42  ;;  %14040 = vmatmul.mubr.bf16.vlgmr.msra.gmra.mxu0 %v12411_v61  ;;  %v6430_v12 = vrot.slane %v18597_v47, 6 }
 0x2e3   :  { %v15113_v23 = vpop.eup %15112  ;;  %5852 = vst [vmem:[#allocation3 + $0x94] sm:$0xf] %v5743_v9  ;;  %v5737_v41 = vrot.slane %v12944_v21, 7  ;;  %v5584_v40 = vmul.f32 %v15111_v22, %v18502_v30  ;;  %v5964_v6 = vsel %vm16320_vm7, %v5962_v31, %v5963_v17  ;;  %v12388_v5 = vrot.slane %v6383_v19, 10  ;;  %14088 = vmatpush3.bf16.msra.mxu0 %v15405_v26  ;;  %13994 = vmatpush3.bf16.msra.mxu1 %v14792_v35  ;;  %v14795_v30 = vld [vmem:[%s20344_s3 + $0x128] sm:$0xff]  }
 0x2e4   :  { %v15115_v63 = vpop.eup %15114  ;;  %5853 = vst [vmem:[#allocation3 + $0x98] sm:$0x1] %v5744_v37  ;;  %v12949_v42 = vpack.c.bf16 %v5586_v29, %v5586_v29  ;;  %v5587_v43 = vmul.f32 %v15113_v23, %v18516_v2  ;;  %v12356_v15 = vcombine.low %v5961_v44, %v5964_v6  ;;  %v6433_v33 = vrot.slane %v18617_v1, 6  ;;  %14089 = vmatprep.subr.bf16.mxu0 %v14793_v52  ;;  %v5910_v1 = vld [vmem:[#allocation3 + $0x48] sm:$0xe] }
 0x2e5   :  { %v15117_v46 = vpop.eup %15116  ;;  %v5738_v35 = vsel %vm18479_vm13, %v5736_v57, %v5737_v41  ;;  %v5739_v18 = vrot.slane %v5737_v41, 4  ;;  %v12947_v54 = vpack.c.bf16 %v5584_v40, %v5584_v40  ;;  %v5493_v10 = vadd.f32 1.0, %v15115_v63  ;;  %13995 = vmatprep.subr.bf16.mxu1 %v14794_v25  ;;  %v14798_v57 = vld [vmem:[%s20344_s3 + $0x18] sm:$0xff]   ;;  %v18659_v26 = vld [vmem:[#allocation3 + $0x50] sm:$0x3] }
 0x2e6   :  { %v15119_v2 = vpop.eup %15118  ;;  %5849 = vst [vmem:[#allocation3 + $0x88] sm:$0xf] %v5738_v35  ;;  %v5750_v14 = vrot.slane %v12949_v42, 7  ;;  %v12950_v36 = vpack.c.bf16 %v5587_v43, %v5587_v43  ;;  %v5585_v59 = vmul.f32 %v15117_v46, %v18521_v38  ;;  %13979 = vmatprep.mubr.bf16.mxu1 %v12356_v15  ;;  %v6432_v39 = vrot.slane %v6430_v12, 4  ;;  %v14797_v38 = vld [vmem:[%s20344_s3 + $0x120] sm:$0xff]   ;;  %v14799_v63 = vld [vmem:[%s20344_s3 + $0x118] sm:$0xff]  }
 0x2e7   :  { %v15121_v20 = vpop.eup %15120  ;;  %5850 = vst [vmem:[#allocation3 + $0x8c] sm:$0x1] %v5739_v18  ;;  %v5745_v24 = vrot.slane %v12947_v54, 7  ;;  %15132 = vrcp.f32 %v5493_v10  ;;  %v5498_v48 = vadd.f32 1.0, %v15119_v2  ;;  %v6431_v7 = vsel %vm18076_vm10, %v12388_v5, %v6430_v12  ;;  %14090 = vmatpush3.bf16.msra.mxu0 %v14793_v52  ;;  %13996 = vmatpush3.bf16.msra.mxu1 %v14794_v25  ;;  %v18656_v29 = vld [vmem:[#allocation3 + $0x4c] sm:$0xf] }
 0x2e8   :  { %v15123_v45 = vpop.eup %15122  ;;  %v5751_v61 = vrot.slane %v5750_v14, 4  ;;  %5857 = vst [vmem:[#allocation3 + $0xa8] sm:$0xe] %v5750_v14  ;;  %v5752_v17 = vrot.slane %v12950_v36, 7  ;;  %v12948_v19 = vpack.c.bf16 %v5585_v59, %v5585_v59  ;;  %v5590_v60 = vmul.f32 %v15121_v20, %v18532_v3  ;;  %14091 = vmatprep.subr.bf16.mxu0 %v14795_v30  ;;  %13997 = vmatprep.subr.bf16.mxu1 %v14796_v49  ;;  %v6385_v12 = vld [vmem:[#allocation3 + $0x48] sm:$0xc] }
 0x2e9   :  { %v15125_v21 = vpop.eup %15124  ;;  %v5746_v52 = vrot.slane %v5745_v24, 4  ;;  %5854 = vst [vmem:[#allocation3 + $0x9c] sm:$0xe] %v5745_v24  ;;  %15134 = vrcp.f32 %v5498_v48  ;;  %v5496_v44 = vadd.f32 1.0, %v15123_v45  ;;  %v6434_v31 = vsel %vm18076_vm10, %v6432_v39, %v6433_v33  ;;  %v5911_v5 = vld [vmem:[#allocation3 + $0x50] sm:$0x1] }
 0x2ea   :  { %v15127_v3 = vpop.eup %15126  ;;  %v5753_v25 = vsel %vm18479_vm13, %v5751_v61, %v5752_v17  ;;  %v5754_v22 = vrot.slane %v5752_v17, 4  ;;  %v5747_v9 = vrot.slane %v12948_v19, 7  ;;  %v12953_v37 = vpack.c.bf16 %v5590_v60, %v5590_v60  ;;  %v5914_v46 = vld [vmem:[#allocation3 + $0x90] sm:$0xe]  ;;  %v18671_v54 = vld [vmem:[#allocation3 + $0x94] sm:$0xf] }
 0x2eb   :  { %v15129_v23 = vpop.eup %15128  ;;  %5858 = vst [vmem:[#allocation3 + $0xac] sm:$0xf] %v5753_v25  ;;  %v5588_v41 = vmul.f32 %v15127_v3, %v18539_v58  ;;  %15136 = vrcp.f32 %v5496_v44  ;;  %v5499_v40 = vadd.f32 1.0, %v15125_v21  ;;  %v12412_v6 = vcombine.low %v6431_v7, %v6434_v31  ;;  %14092 = vmatpush3.bf16.msra.mxu0 %v14795_v30  ;;  %13998 = vmatpush3.bf16.msra.mxu1 %v14796_v49  ;;  %v14800_v30 = vld [vmem:[%s20344_s3 + $0x10] sm:$0xff]   ;;  %v5915_v36 = vld [vmem:[#allocation3 + $0x98] sm:$0x1] }
 0x2ec   :  { %v15131_v42 = vpop.eup %15130  ;;  %5859 = vst [vmem:[#allocation3 + $0xb0] sm:$0x1] %v5754_v22  ;;  %v5748_v43 = vsel %vm18479_vm13, %v5746_v52, %v5747_v9  ;;  %v5749_v15 = vrot.slane %v5747_v9, 4  ;;  %v5760_v33 = vrot.slane %v12953_v37, 7  ;;  %v5497_v58 = vadd.f32 1.0, %v15129_v23  ;;  %14093 = vmatprep.subr.bf16.mxu0 %v14797_v38  ;;  %13999 = vmatprep.subr.bf16.mxu1 %v14798_v57  ;;  %v14801_v17 = vld [vmem:[%s20344_s3 + $0x110] sm:$0xff]  }
 0x2ed   :  { %5855 = vst [vmem:[#allocation3 + $0xa0] sm:$0xf] %v5748_v43  ;;  %v12951_v49 = vpack.c.bf16 %v5588_v41, %v5588_v41  ;;  %v5591_v35 = vmul.f32 %v15131_v42, %v18542_v0  ;;  %15138 = vrcp.f32 %v5499_v40  ;;  %14043 = vmatprep.mubr.bf16.mxu0 %v12412_v6  ;;  %v5967_v18 = vrot.slane %v18656_v29, 5  ;;  %v6389_v61 = vld [vmem:[#allocation3 + $0x90] sm:$0xc]  ;;  %v14802_v52 = vld [vmem:[%s20344_s3 + $0x8] sm:$0xff]  }
 0x2ee   :  { %5856 = vst [vmem:[#allocation3 + $0xa4] sm:$0x1] %v5749_v15  ;;  %v5761_v10 = vrot.slane %v5760_v33, 4  ;;  %5863 = vst [vmem:[#allocation3 + $0xc0] sm:$0xe] %v5760_v33  ;;  %15140 = vrcp.f32 %v5497_v58  ;;  %v12333_v2 = vrot.slane %v5910_v1, 9 }
 0x2ef   :  { %v5970_v14 = vrot.slane %v5911_v5, 5  ;;  %v18673_v59 = vrot.slane %v12951_v49, 7  ;;  %v12954_v39 = vpack.c.bf16 %v5591_v35, %v5591_v35  ;;  %v5969_v20 = vrot.slane %v5967_v18, 4  ;;  %14094 = vmatpush3.bf16.msra.mxu0 %v14797_v38  ;;  %14000 = vmatpush3.bf16.msra.mxu1 %v14798_v57  ;;  %v6390_v21 = vld [vmem:[#allocation3 + $0x98] sm:$0x3]  ;;  %v14804_v49 = vld [vmem:[%s20344_s3] sm:$0xff]  }
 0x2f0   :  { %v12389_v24 = vrot.slane %v6385_v12, 10  ;;  %v5968_v0 = vsel %vm16320_vm7, %v12333_v2, %v5967_v18  ;;  %v6437_v48 = vrot.slane %v18656_v29, 6  ;;  %v6440_v7 = vrot.slane %v18659_v26, 6  ;;  %14095 = vmatprep.subr.bf16.mxu0 %v14799_v63  ;;  %14001 = vmatprep.subr.bf16.mxu1 %v14800_v30  ;;  %v5916_v23 = vld [vmem:[#allocation3 + $0xa8] sm:$0xe]  ;;  %v18706_v43 = vld [vmem:[%s20344_s3 + $0x108] sm:$0xff]  }
 0x2f1   :  { %v5981_v45 = vrot.slane %v18671_v54, 5  ;;  %5860 = vst [vmem:[#allocation3 + $0xb4] sm:$0xe] %v18673_v59  ;;  %v5762_v19 = vrot.slane %v12954_v39, 7  ;;  %v5971_v60 = vsel %vm16320_vm7, %v5969_v20, %v5970_v14  ;;  %v12335_v38 = vrot.slane %v5914_v46, 9 }
 0x2f2   :  { %v5984_v57 = vrot.slane %v5915_v36, 5  ;;  %v5756_v44 = vrot.slane %v18673_v59, 4  ;;  %v12357_v31 = vcombine.low %v5968_v0, %v5971_v60  ;;  %v6438_v1 = vsel %vm18076_vm10, %v12389_v24, %v6437_v48  ;;  %v18692_v25 = vld [vmem:[#allocation3 + $0xac] sm:$0xf]  ;;  %v6391_v46 = vld [vmem:[#allocation3 + $0xa8] sm:$0xc] }
 0x2f3   :  { %v6439_v3 = vrot.slane %v6437_v48, 4  ;;  %v5763_v22 = vsel %vm18479_vm13, %v5761_v10, %v5762_v19  ;;  %v5764_v9 = vrot.slane %v5762_v19, 4  ;;  %v18698_v37 = vsel %vm16320_vm7, %v12335_v38, %v5981_v45  ;;  %v5917_v41 = vld [vmem:[#allocation3 + $0xb0] sm:$0x1]  ;;  %14096 = vmatpush3.bf16.msra.mxu0 %v14799_v63  ;;  %14002 = vmatpush3.bf16.msra.mxu1 %v14800_v30 }
 0x2f4   :  { %v5983_v12 = vrot.slane %v5981_v45, 4  ;;  %v15133_v40 = vpop.eup %15132  ;;  %5864 = vst [vmem:[#allocation3 + $0xc4] sm:$0xf] %v5763_v22  ;;  %13980 = vmatmul.mubr.bf16.gmra.mxu1 %v12357_v31  ;;  %v12391_v5 = vrot.slane %v6389_v61, 10  ;;  %v6451_v26 = vrot.slane %v18671_v54, 6  ;;  %v6454_v42 = vrot.slane %v6390_v21, 6  ;;  %14097 = vmatprep.subr.bf16.mxu0 %v14801_v17 }
 0x2f5   :  { %v6441_v6 = vsel %vm18076_vm10, %v6439_v3, %v6440_v7  ;;  %5865 = vst [vmem:[#allocation3 + $0xc8] sm:$0x1] %v5764_v9  ;;  %v5589_v63 = vmul.f32 %v15133_v40, %v18558_v4  ;;  %13983 = vmatprep.mubr.bf16.mxu1 %v12358_v16  ;;  %v5988_v58 = vrot.slane %v18692_v25, 5  ;;  %v6392_v30 = vld [vmem:[#allocation3 + $0xb0] sm:$0x3]  ;;  %14003 = vmatprep.subr.bf16.mxu1 %v14802_v52  ;;  %v12336_v10 = vrot.slane %v5916_v23, 9 }
 0x2f6   :  { %v12413_v15 = vcombine.low %v6438_v1, %v6441_v6  ;;  %v5985_v33 = vsel %vm16320_vm7, %v5983_v12, %v5984_v57  ;;  %v15135_v35 = vpop.eup %15134  ;;  %v6453_v18 = vrot.slane %v6451_v26, 4  ;;  %v5991_v2 = vrot.slane %v5917_v41, 5  ;;  %v5918_v19 = vld [vmem:[#allocation3 + $0xc0] sm:$0xe]  ;;  %v14805_v38 = vld [vmem:[%s20344_s3 + $0x100] sm:$0xff]  }
 0x2f7   :  { %v12359_v4 = vcombine.low %v18698_v37, %v5985_v33  ;;  %v12952_v56 = vpack.c.bf16 %v5589_v63, %v5589_v63  ;;  %v5594_v8 = vmul.f32 %v15135_v35, %v18561_v28  ;;  %v6452_v16 = vsel %vm18076_vm10, %v12391_v5, %v6451_v26  ;;  %14004 = vmatpush3.bf16.msra.mxu1 %v14802_v52  ;;  %v18728_v28 = vld [vmem:[#allocation3] sm:$0xf]  ;;  %v15406_v5 = vld [vmem:[#allocation3 + $0x4] sm:$0xf]  ;;  %v18765_v33 = vld [vmem:[%s20344_s3 + $0x1b8] sm:$0xff]  }
 0x2f8   :  { %14044 = vmatmul.mubr.bf16.gmra.mxu0 %v12413_v15  ;;  %v5990_v14 = vrot.slane %v5988_v58, 4  ;;  %v15137_v36 = vpop.eup %15136  ;;  %v6455_v39 = vsel %vm18076_vm10, %v6453_v18, %v6454_v42  ;;  %v12392_v20 = vrot.slane %v6391_v46, 10  ;;  %v6458_v24 = vrot.slane %v18692_v25, 6  ;;  %14005 = vmatprep.subr.bf16.mxu1 %v14804_v49  ;;  %v6393_v23 = vld [vmem:[#allocation3 + $0xc0] sm:$0xc] }
 0x2f9   :  { %14047 = vmatprep.mubr.bf16.mxu0 %v12414_v62  ;;  %v6461_v0 = vrot.slane %v6392_v30, 6  ;;  %14098 = vmatpush3.bf16.msra.mxu0 %v14801_v17  ;;  %v5757_v48 = vrot.slane %v12952_v56, 7  ;;  %v12957_v7 = vpack.c.bf16 %v5594_v8, %v5594_v8  ;;  %v5592_v45 = vmul.f32 %v15137_v36, %v18577_v51  ;;  %v18760_v15 = vld [vmem:[#allocation3 + $0x10] sm:$0xf]  ;;  %v6922_v8 = vld [vmem:[#allocation3 + $0xc] sm:$0xe] }
 0x2fa   :  { %v5989_v61 = vsel %vm16320_vm7, %v12336_v10, %v5988_v58  ;;  %14099 = vmatprep.subr.bf16.mxu0 %v18706_v43  ;;  %v15139_v34 = vpop.eup %15138  ;;  %v12415_v62 = vcombine.low %v6452_v16, %v6455_v39  ;;  %v5992_v17 = vsel %vm16320_vm7, %v5990_v14, %v5991_v2  ;;  %v6459_v51 = vsel %vm18076_vm10, %v12392_v20, %v6458_v24  ;;  %v6924_v16 = vld [vmem:[#allocation3 + $0x14] sm:$0x1] }
 0x2fb   :  { %v6460_v60 = vrot.slane %v6458_v24, 4  ;;  %v15141_v57 = vpop.eup %15140  ;;  %v5758_v21 = vsel %vm18479_vm13, %v5756_v44, %v5757_v48  ;;  %v5759_v52 = vrot.slane %v5757_v48, 4  ;;  %v5770_v31 = vrot.slane %v12957_v7, 7  ;;  %v18750_v3 = vld [vmem:[#allocation3 + $0xc4] sm:$0xf]  ;;  %14006 = vmatpush3.bf16.msra.mxu1 %v14804_v49 }
 0x2fc   :  { %v12955_v1 = vpack.c.bf16 %v5592_v45, %v5592_v45  ;;  %5861 = vst [vmem:[#allocation3 + $0xb8] sm:$0xf] %v5758_v21  ;;  %v5595_v22 = vmul.f32 %v15139_v34, %v18581_v32  ;;  %v5593_v9 = vmul.f32 %v15141_v57, %v18585_v27  ;;  %13984 = vmatmul.mubr.bf16.gmra.mxu1 %v12359_v4  ;;  %v5919_v59 = vld [vmem:[#allocation3 + $0xc8] sm:$0x1]  ;;  %v5995_v40 = vrot.slane %v18750_v3, 5 }
 0x2fd   :  { %v12360_v37 = vcombine.low %v5989_v61, %v5992_v17  ;;  %v6462_v12 = vsel %vm18076_vm10, %v6460_v60, %v6461_v0  ;;  %5862 = vst [vmem:[#allocation3 + $0xbc] sm:$0x1] %v5759_v52  ;;  %5869 = vst [vmem:[#allocation3 + $0xd8] sm:$0xe] %v5770_v31  ;;  %v6394_v6 = vld [vmem:[#allocation3 + $0xc8] sm:$0x3]  ;;  %14100 = vmatpush3.bf16.msra.mxu0 %v18706_v43  ;;  %v12370_v32 = vcombine.low %v18728_v28, %v15406_v5 }
 0x2fe   :  { %v5765_v44 = vrot.slane %v12955_v1, 7  ;;  %v12416_v41 = vcombine.low %v6459_v51, %v6462_v12  ;;  %14055 = vmatprep.subr.bf16.mxu1 %v18737_v55  ;;  %v12958_v27 = vpack.c.bf16 %v5595_v22, %v5595_v22  ;;  %v12956_v26 = vpack.c.bf16 %v5593_v9, %v5593_v9  ;;  %14101 = vmatprep.subr.bf16.mxu0 %v14805_v38  ;;  %v18777_v0 = vld [vmem:[#allocation3 + $0x28] sm:$0xf]  ;;  %v6927_v28 = vld [vmem:[#allocation3 + $0x2c] sm:$0x1] }
 0x2ff   :  { %13987 = vmatprep.mubr.bf16.mxu1 %v12360_v37  ;;  %v12337_v42 = vrot.slane %v5918_v19, 9  ;;  %v5998_v63 = vrot.slane %v5919_v59, 5  ;;  %v5771_v58 = vrot.slane %v5770_v31, 4  ;;  %v5997_v43 = vrot.slane %v5995_v40, 4  ;;  %v18784_v19 = vld [vmem:[#allocation3 + $0x40] sm:$0xf] }
 0x300   :  { %5866 = vst [vmem:[#allocation3 + $0xcc] sm:$0xe] %v5765_v44  ;;  %14048 = vmatmul.mubr.bf16.gmra.mxu0 %v12415_v62  ;;  %v12393_v46 = vrot.slane %v6393_v23, 10  ;;  %v6465_v30 = vrot.slane %v18750_v3, 6  ;;  %v5766_v49 = vrot.slane %v5765_v44, 4  ;;  %v5772_v35 = vrot.slane %v12958_v27, 7 }
 0x301   :  { %v5767_v4 = vrot.slane %v12956_v26, 7  ;;  %14051 = vmatprep.mubr.bf16.mxu0 %v12416_v41  ;;  %v6468_v18 = vrot.slane %v6394_v6, 6  ;;  %v5996_v10 = vsel %vm16320_vm7, %v12337_v42, %v5995_v40  ;;  %v5999_v2 = vsel %vm16320_vm7, %v5997_v43, %v5998_v63  ;;  %14102 = vmatpush3.bf16.msra.mxu0 %v14805_v38  ;;  %v6930_v17 = vld [vmem:[#allocation3 + $0x44] sm:$0x1]  ;;  %v6925_v31 = vld [vmem:[#allocation3 + $0x24] sm:$0xe] }
 0x302   :  { %v6467_v56 = vrot.slane %v6465_v30, 4  ;;  %v6972_v14 = vrot.slane %v18760_v15, 5  ;;  %v5773_v36 = vsel %vm18479_vm13, %v5771_v58, %v5772_v35  ;;  %v5774_v39 = vrot.slane %v5772_v35, 4  ;;  %14151 = vmatprep.subr.bf16.mxu0 %v18765_v33  ;;  %v18792_v9 = vld [vmem:[#allocation3 + $0x58] sm:$0xf]  ;;  %v14811_v44 = vld [vmem:[%s20344_s3 + $0xf0] sm:$0xff]  }
 0x303   :  { %v5768_v20 = vsel %vm18479_vm13, %v5766_v49, %v5767_v4  ;;  %v5769_v24 = vrot.slane %v5767_v4, 4  ;;  %5870 = vst [vmem:[#allocation3 + $0xdc] sm:$0xf] %v5773_v36  ;;  %v12361_v48 = vcombine.low %v5996_v10, %v5999_v2  ;;  %v6466_v7 = vsel %vm18076_vm10, %v12393_v46, %v6465_v30  ;;  %v6928_v37 = vld [vmem:[#allocation3 + $0x3c] sm:$0xe] }
 0x304   :  { %5867 = vst [vmem:[#allocation3 + $0xd0] sm:$0xf] %v5768_v20  ;;  %v6469_v45 = vsel %vm18076_vm10, %v6467_v56, %v6468_v18  ;;  %v6974_v61 = vrot.slane %v6972_v14, 4  ;;  %5871 = vst [vmem:[#allocation3 + $0xe0] sm:$0x1] %v5774_v39  ;;  %v12458_v34 = vrot.slane %v6922_v8, 9 }
 0x305   :  { %5868 = vst [vmem:[#allocation3 + $0xd4] sm:$0x1] %v5769_v24  ;;  %v12417_v11 = vcombine.low %v6466_v7, %v6469_v45  ;;  %v6975_v62 = vrot.slane %v6924_v16, 5  ;;  %13988 = vmatmul.mubr.bf16.gmra.mxu1 %v12361_v48  ;;  %v6979_v51 = vrot.slane %v18777_v0, 5  ;;  %v6982_v57 = vrot.slane %v6927_v28, 5  ;;  %v14814_v4 = vld [vmem:[%s20344_s3 + $0xe8] sm:$0xff]  }
 0x306   :  { %v6973_v60 = vsel %vm16320_vm7, %v12458_v34, %v6972_v14  ;;  %14007 = vmatprep.mubr.bf16.mxu1 %v12370_v32  ;;  %v6986_v21 = vrot.slane %v18784_v19, 5  ;;  %v6989_v22 = vrot.slane %v6930_v17, 5  ;;  %v18794_v59 = vld [vmem:[#allocation3 + $0x88] sm:$0xf]  ;;  %v5874_v23 = vld [vmem:[#allocation3 + $0x18] sm:$0xf] }
 0x307   :  { %v6976_v38 = vsel %vm16320_vm7, %v6974_v61, %v6975_v62  ;;  %v6981_v1 = vrot.slane %v6979_v51, 4  ;;  %v12459_v41 = vrot.slane %v6925_v31, 9  ;;  %v5876_v6 = vld [vmem:[#allocation3 + $0x30] sm:$0xf]  ;;  %v6993_v5 = vrot.slane %v18792_v9, 5  ;;  %v14815_v36 = vld [vmem:[%s20344_s3 + $0x1a8] sm:$0xff]  }
 0x308   :  { %14052 = vmatmul.mubr.bf16.gmra.mxu0 %v12417_v11  ;;  %v12482_v52 = vcombine.low %v6973_v60, %v6976_v38  ;;  %v6988_v12 = vrot.slane %v6986_v21, 4  ;;  %v12371_v32 = vcombine.low %v5874_v23, %v18573_v50  ;;  %v12460_v27 = vrot.slane %v6928_v37, 9  ;;  %v6933_v42 = vld [vmem:[#allocation3 + $0x5c] sm:$0x1]  ;;  %v6936_v46 = vld [vmem:[#allocation3 + $0x8c] sm:$0x1] }
 0x309   :  { %v6983_v40 = vsel %vm16320_vm7, %v6981_v1, %v6982_v57  ;;  %v7000_v63 = vrot.slane %v18794_v59, 5  ;;  %v6980_v58 = vsel %vm16320_vm7, %v12459_v41, %v6979_v51  ;;  %v12372_v43 = vcombine.low %v5876_v6, %v18597_v47  ;;  %v14812_v50 = vld [vmem:[%s20344_s3 + $0x1b0] sm:$0xff]   ;;  %v5880_v10 = vld [vmem:[#allocation3 + $0x78] sm:$0xf]  ;;  %v6931_v2 = vld [vmem:[#allocation3 + $0x54] sm:$0xe] }
 0x30a   :  { %14103 = vmatprep.mubr.bf16.mxu0 %v12482_v52  ;;  %v6990_v26 = vsel %vm16320_vm7, %v6988_v12, %v6989_v22  ;;  %v12483_v30 = vcombine.low %v6980_v58, %v6983_v40  ;;  %v6987_v49 = vsel %vm16320_vm7, %v12460_v27, %v6986_v21  ;;  %v6995_v18 = vrot.slane %v6993_v5, 4  ;;  %v18818_v16 = vld [vmem:[#allocation3 + $0xa0] sm:$0xf]  ;;  %v6934_v14 = vld [vmem:[#allocation3 + $0x84] sm:$0xe]  ;;  %v14816_v11 = vld [vmem:[%s20344_s3 + $0xe0] sm:$0xff]  }
 0x30b   :  { %v12484_v35 = vcombine.low %v6987_v49, %v6990_v26  ;;  %v6996_v47 = vrot.slane %v6933_v42, 5  ;;  %v7002_v56 = vrot.slane %v7000_v63, 4  ;;  %v7003_v8 = vrot.slane %v6936_v46, 5  ;;  %v5878_v39 = vld [vmem:[#allocation3 + $0x48] sm:$0xf]  ;;  %v14817_v38 = vld [vmem:[%s20344_s3 + $0x1a0] sm:$0xff]  }
 0x30c   :  { %v12461_v20 = vrot.slane %v6931_v2, 9  ;;  %v15407_v28 = vld [vmem:[#allocation3 + $0x7c] sm:$0xf]  ;;  %v7007_v7 = vrot.slane %v18818_v16, 5  ;;  %v12462_v45 = vrot.slane %v6934_v14, 9  ;;  %v14820_v21 = vld [vmem:[%s20344_s3 + $0xd8] sm:$0xff]  }
 0x30d   :  { %14008 = vmatmul.mubr.bf16.vlgmr.msra.gmra.mxu1 %v12371_v32  ;;  %v6997_v24 = vsel %vm16320_vm7, %v6995_v18, %v6996_v47  ;;  %v12374_v48 = vcombine.low %v5880_v10, %v15407_v28  ;;  %v7004_v61 = vsel %vm16320_vm7, %v7002_v56, %v7003_v8  ;;  %v6939_v34 = vld [vmem:[#allocation3 + $0xa4] sm:$0x1]  ;;  %v6942_v51 = vld [vmem:[#allocation3 + $0xbc] sm:$0x1]  ;;  %v6937_v1 = vld [vmem:[#allocation3 + $0x9c] sm:$0xe] }
 0x30e   :  { %14011 = vmatprep.mubr.bf16.mxu1 %v12372_v43  ;;  %14056 = vmatpush3.bf16.msra.mxu1 %v18737_v55  ;;  %v18821_v55 = vld [vmem:[#allocation3 + $0xb8] sm:$0xf]  ;;  %v6994_v17 = vsel %vm16320_vm7, %v12461_v20, %v6993_v5  ;;  %v7009_v52 = vrot.slane %v7007_v7, 4  ;;  %v7010_v31 = vrot.slane %v6939_v34, 5  ;;  %v7017_v37 = vrot.slane %v6942_v51, 5  ;;  %v14824_v49 = vld [vmem:[%s20344_s3 + $0x190] sm:$0xff]  }
 0x30f   :  { %14057 = vmatprep.subr.bf16.mxu1 %v14811_v44  ;;  %v7014_v62 = vrot.slane %v18821_v55, 5  ;;  %v12485_v60 = vcombine.low %v6994_v17, %v6997_v24  ;;  %v18846_v12 = vld [vmem:[#allocation3 + $0xd0] sm:$0xf]  ;;  %v6940_v23 = vld [vmem:[#allocation3 + $0xb4] sm:$0xe]  ;;  %v12463_v40 = vrot.slane %v6937_v1, 9 }
 0x310   :  { %14104 = vmatmul.mubr.bf16.vlgmr.msra.gmra.mxu0 %v12483_v30  ;;  %v5882_v41 = vld [vmem:[#allocation3 + $0x90] sm:$0xf]  ;;  %v7011_v6 = vsel %vm16320_vm7, %v7009_v52, %v7010_v31  ;;  %v7021_v5 = vrot.slane %v18846_v12, 5  ;;  %v5884_v27 = vld [vmem:[#allocation3 + $0xa8] sm:$0xf]  ;;  %v12464_v26 = vrot.slane %v6940_v23, 9 }
 0x311   :  { %14107 = vmatprep.mubr.bf16.mxu0 %v12484_v35  ;;  %14152 = vmatpush3.bf16.msra.mxu0 %v18765_v33  ;;  %v12373_v33 = vcombine.low %v5878_v39, %v18656_v29  ;;  %v7001_v29 = vsel %vm16320_vm7, %v12462_v45, %v7000_v63  ;;  %v7016_v22 = vrot.slane %v7014_v62, 4  ;;  %v12375_v32 = vcombine.low %v5882_v41, %v18671_v54  ;;  %v14823_v63 = vld [vmem:[%s20344_s3 + $0xd0] sm:$0xff]   ;;  %v6945_v58 = vld [vmem:[#allocation3 + $0xd4] sm:$0x1]  ;;  %v6943_v18 = vld [vmem:[#allocation3 + $0xcc] sm:$0xe] }
 0x312   :  { %14153 = vmatprep.subr.bf16.mxu0 %v14812_v50  ;;  %14058 = vmatpush3.bf16.msra.mxu1 %v14811_v44  ;;  %v12486_v57 = vcombine.low %v7001_v29, %v7004_v61  ;;  %v14821_v44 = vld [vmem:[%s20344_s3 + $0x198] sm:$0xff]   ;;  %v7008_v43 = vsel %vm16320_vm7, %v12463_v40, %v7007_v7  ;;  %v12376_v46 = vcombine.low %v5884_v27, %v18692_v25  ;;  %v7023_v35 = vrot.slane %v7021_v5, 4  ;;  %v14826_v25 = vld [vmem:[%s20344_s3 + $0xc8] sm:$0xff]   ;;  %v5886_v10 = vld [vmem:[#allocation3 + $0xc0] sm:$0xf] }
 0x313   :  { %14059 = vmatprep.subr.bf16.mxu1 %v14814_v4  ;;  %v7018_v42 = vsel %vm16320_vm7, %v7016_v22, %v7017_v37  ;;  %v12487_v30 = vcombine.low %v7008_v43, %v7011_v6  ;;  %v7015_v54 = vsel %vm16320_vm7, %v12464_v26, %v7014_v62  ;;  %v14827_v47 = vld [vmem:[%s20344_s3 + $0x188] sm:$0xff]   ;;  %v12465_v2 = vrot.slane %v6943_v18, 9  ;;  %v14830_v14 = vld [vmem:[%s20344_s3 + $0xc0] sm:$0xff]   ;;  %v14833_v28 = vld [vmem:[%s20344_s3 + $0x178] sm:$0xff]  }
 0x314   :  { %v12377_v8 = vcombine.low %v5886_v10, %v18750_v3  ;;  %v14828_v39 = vld [vmem:[#allocation3 + $0xc] sm:$0xff]   ;;  %v14829_v3 = vld [vmem:[#allocation3 + $0x18] sm:$0xff]   ;;  %v14832_v7 = vld [vmem:[#allocation3 + $0x24] sm:$0xff]   ;;  %v7270_v22 = vrot.slane %v18760_v15, 6  ;;  %v7284_v18 = vrot.slane %v18784_v19, 6 }
 0x315   :  { %14154 = vmatpush3.bf16.msra.mxu0 %v14812_v50  ;;  %14012 = vmatmul.mubr.bf16.gmra.mxu1 %v12373_v33  ;;  %v12488_v50 = vcombine.low %v7015_v54, %v7018_v42  ;;  %v14831_v24 = vld [vmem:[%s20344_s3 + $0x180] sm:$0xff]   ;;  %v14838_v33 = vld [vmem:[%s20344_s3 + $0x170] sm:$0xff]   ;;  %v14837_v34 = vld [vmem:[#allocation3 + $0x48] sm:$0xff]   ;;  %v7277_v54 = vrot.slane %v18777_v0, 6 }
 0x316   :  { %14155 = vmatprep.subr.bf16.mxu0 %v14815_v36  ;;  %14060 = vmatpush3.bf16.msra.mxu1 %v14814_v4  ;;  %v7024_v4 = vrot.slane %v6945_v58, 5  ;;  %v14836_v45 = vld [vmem:[#allocation3 + $0x3c] sm:$0xff]   ;;  %v14834_v61 = vld [vmem:[#allocation3 + $0x30] sm:$0xff]   ;;  %v14844_v29 = vld [vmem:[#allocation3 + $0x84] sm:$0xff]  }
 0x317   :  { %14015 = vmatprep.mubr.bf16.mxu1 %v12374_v48  ;;  %14061 = vmatprep.subr.bf16.mxu1 %v14816_v11  ;;  %v14835_v48 = vld [vmem:[%s20344_s3 + $0x238] sm:$0xff]   ;;  %v14841_v62 = vld [vmem:[%s20344_s3 + $0x168] sm:$0xff]   ;;  %v7237_v37 = vld [vmem:[#allocation3 + $0x14] sm:$0x3] }
 0x318   :  { %14108 = vmatmul.mubr.bf16.gmra.mxu0 %v12485_v60  ;;  %v7025_v56 = vsel %vm16320_vm7, %v7023_v35, %v7024_v4  ;;  %v14843_v17 = vld [vmem:[%s20344_s3 + $0x228] sm:$0xff]   ;;  %v14846_v60 = vld [vmem:[%s20344_s3 + $0x160] sm:$0xff]   ;;  %v14849_v52 = vld [vmem:[%s20344_s3 + $0x158] sm:$0xff]   ;;  %v7273_v27 = vrot.slane %v7237_v37, 6 }
 0x319   :  { %14111 = vmatprep.mubr.bf16.mxu0 %v12486_v57  ;;  %14156 = vmatpush3.bf16.msra.mxu0 %v14815_v36  ;;  %v7022_v36 = vsel %vm16320_vm7, %v12465_v2, %v7021_v5  ;;  %v14840_v51 = vld [vmem:[#allocation3 + $0x54] sm:$0xff]   ;;  %v18912_v31 = vld [vmem:[#allocation3 + $0x1c] sm:$0xf]  ;;  %v14851_v1 = vld [vmem:[%s20344_s3 + $0x218] sm:$0xff]  }
 0x31a   :  { %14157 = vmatprep.subr.bf16.mxu0 %v14817_v38  ;;  %14062 = vmatpush3.bf16.msra.mxu1 %v14816_v11  ;;  %v12489_v20 = vcombine.low %v7022_v36, %v7025_v56  ;;  %v14839_v11 = vld [vmem:[%s20344_s3 + $0x230] sm:$0xff]   ;;  %v14847_v57 = vld [vmem:[%s20344_s3 + $0x220] sm:$0xff]   ;;  %v8125_v41 = vrot.slane %v18912_v31, 6  ;;  %v14850_v5 = vld [vmem:[#allocation3 + $0xa8] sm:$0xff]  }
 0x31b   :  { %14063 = vmatprep.subr.bf16.mxu1 %v14820_v21  ;;  %v14848_v23 = vld [vmem:[#allocation3 + $0x9c] sm:$0xff]   ;;  %v14852_v40 = vld [vmem:[#allocation3 + $0xb4] sm:$0xff]   ;;  %v7236_v42 = vld [vmem:[#allocation3 + $0xc] sm:$0xc] }
 0x31c   :  { %v8092_v6 = vld [vmem:[#allocation3 + $0x20] sm:$0x3]  ;;  %v8127_v58 = vrot.slane %v8125_v41, 4  ;;  %v12498_v35 = vrot.slane %v7236_v42, 10  ;;  %v7241_v10 = vld [vmem:[#allocation3 + $0x44] sm:$0x3] }
 0x31d   :  { %14158 = vmatpush3.bf16.msra.mxu0 %v14817_v38  ;;  %14016 = vmatmul.mubr.bf16.gmra.mxu1 %v12375_v32  ;;  %v14842_v38 = vld [vmem:[#allocation3 + $0x60] sm:$0xff]   ;;  %v7272_v32 = vrot.slane %v7270_v22, 4  ;;  %v8128_v43 = vrot.slane %v8092_v6, 6  ;;  %v14856_v2 = vld [vmem:[#allocation3 + $0xcc] sm:$0xff]   ;;  %v8094_v36 = vld [vmem:[#allocation3 + $0x38] sm:$0x3] }
 0x31e   :  { %14159 = vmatprep.subr.bf16.mxu0 %v14821_v44  ;;  %14019 = vmatprep.mubr.bf16.mxu1 %v12376_v46  ;;  %v14855_v15 = vld [vmem:[%s20344_s3 + $0x210] sm:$0xff]   ;;  %v18928_v46 = vld [vmem:[#allocation3 + $0x34] sm:$0xf]  ;;  %v7271_v0 = vsel %vm18076_vm10, %v12498_v35, %v7270_v22  ;;  %v7291_v22 = vrot.slane %v18792_v9, 6  ;;  %v7298_v6 = vrot.slane %v18794_v59, 6 }
 0x31f   :  { %14064 = vmatpush3.bf16.msra.mxu1 %v14820_v21  ;;  %v14845_v21 = vld [vmem:[#allocation3 + $0x90] sm:$0xff]   ;;  %v14853_v26 = vld [vmem:[#allocation3 + $0xc0] sm:$0xff]   ;;  %v7274_v4 = vsel %vm18076_vm10, %v7272_v32, %v7273_v27  ;;  %v7245_v27 = vld [vmem:[#allocation3 + $0x8c] sm:$0x3] }
 0x320   :  { %14112 = vmatmul.mubr.bf16.gmra.mxu0 %v12487_v30  ;;  %14065 = vmatprep.subr.bf16.mxu1 %v14823_v63  ;;  %v8091_v30 = vld [vmem:[#allocation3 + $0x18] sm:$0xc]  ;;  %v18963_v37 = vld [vmem:[#allocation3 + $0x94] sm:$0xf]  ;;  %v14863_v59 = vld [vmem:[%s20344_s3 + $0x1f0] sm:$0xff]  }
 0x321   :  { %14115 = vmatprep.mubr.bf16.mxu0 %v12488_v50  ;;  %14160 = vmatpush3.bf16.msra.mxu0 %v14821_v44  ;;  %v14854_v44 = vld [vmem:[%s20344_s3 + $0x150] sm:$0xff]   ;;  %v14859_v50 = vld [vmem:[%s20344_s3 + $0x208] sm:$0xff]   ;;  %v12610_v56 = vrot.slane %v8091_v30, 10 }
 0x322   :  { %14161 = vmatprep.subr.bf16.mxu0 %v14824_v49 }
 0x323   :  { %14066 = vmatpush3.bf16.msra.mxu1 %v14823_v63  ;;  %v14857_v63 = vld [vmem:[%s20344_s3 + $0x148] sm:$0xff]  }
 0x324   :  { %14067 = vmatprep.subr.bf16.mxu1 %v14826_v25 }
 0x325   :  { %14162 = vmatpush3.bf16.msra.mxu0 %v14824_v49  ;;  %14020 = vmatmul.mubr.bf16.gmra.mxu1 %v12377_v8  ;;  %v18931_v49 = vld [vmem:[#allocation3 + $0x4c] sm:$0xf]  ;;  %v8129_v8 = vsel %vm18076_vm10, %v8127_v58, %v8128_v43  ;;  %v8098_v58 = vld [vmem:[#allocation3 + $0x68] sm:$0x3]  ;;  %v8153_v43 = vrot.slane %v18963_v37, 6 }
 0x326   :  { %14163 = vmatprep.subr.bf16.mxu0 %v14827_v47  ;;  %14071 = vmatprep.mubr.bf16.mxu1 %v14828_v39  ;;  %v8139_v19 = vrot.slane %v18931_v49, 6  ;;  %v12522_v39 = vcombine.low %v7271_v0, %v7274_v4  ;;  %v8100_v4 = vld [vmem:[#allocation3 + $0x98] sm:$0x3]  ;;  %v7300_v0 = vrot.slane %v7298_v6, 4 }
 0x327   :  { %14068 = vmatpush3.bf16.msra.mxu1 %v14826_v25  ;;  %v7239_v25 = vld [vmem:[#allocation3 + $0x2c] sm:$0x3] }
 0x328   :  { %14116 = vmatmul.mubr.bf16.gmra.mxu0 %v12489_v20  ;;  %14069 = vmatprep.subr.bf16.mxu1 %v14830_v14  ;;  %v14861_v20 = vld [vmem:[%s20344_s3 + $0x200] sm:$0xff]  }
 0x329   :  { %14164 = vmatpush3.bf16.msra.mxu0 %v14827_v47  ;;  %14167 = vmatprep.mubr.bf16.mxu0 %v14829_v3  ;;  %v8132_v47 = vrot.slane %v18928_v46, 6  ;;  %v7280_v3 = vrot.slane %v7239_v25, 6 }
 0x32a   :  { %14165 = vmatprep.subr.bf16.mxu0 %v14831_v24 }
 0x32b   :  { %14070 = vmatpush3.bf16.msra.mxu1 %v14830_v14  ;;  %v14860_v14 = vld [vmem:[%s20344_s3 + $0x140] sm:$0xff]  }
 0x32c   :  { %14119 = vmatprep.subr.bf16.mxu1 %v14833_v28 }
 0x32d   :  { %14166 = vmatpush3.bf16.msra.mxu0 %v14831_v24  ;;  %v7279_v24 = vrot.slane %v7277_v54, 4 }
 0x32e   :  { %14072 = vmatmul.mubr.bf16.vlgmr.msra.gmra.mxu1 %v14832_v7  ;;  %14215 = vmatprep.subr.bf16.mxu0 %v14835_v48  ;;  %v8126_v7 = vsel %vm18076_vm10, %v12610_v56, %v8125_v41  ;;  %v7301_v56 = vrot.slane %v7245_v27, 6 }
 0x32f   :  { %14075 = vmatprep.mubr.bf16.mxu1 %v14836_v45  ;;  %14120 = vmatpush3.bf16.msra.mxu1 %v14833_v28  ;;  %v8096_v28 = vld [vmem:[#allocation3 + $0x50] sm:$0x3]  ;;  %v14862_v45 = vld [vmem:[%s20344_s3 + $0x1f8] sm:$0xff]  }
 0x330   :  { %14168 = vmatmul.mubr.bf16.vlgmr.msra.gmra.mxu0 %v14834_v61  ;;  %14121 = vmatprep.subr.bf16.mxu1 %v14838_v33  ;;  %v7286_v61 = vrot.slane %v7284_v18, 4 }
 0x331   :  { %14171 = vmatprep.mubr.bf16.mxu0 %v14837_v34  ;;  %14216 = vmatpush3.bf16.msra.mxu0 %v14835_v48  ;;  %v14858_v48 = vld [vmem:[#allocation3 + $0xd8] sm:$0xff]   ;;  %v12634_v34 = vcombine.low %v8126_v7, %v8129_v8  ;;  %v7305_v7 = vrot.slane %v18818_v16, 6 }
 0x332   :  { %14217 = vmatprep.subr.bf16.mxu0 %v14839_v11 }
 0x333   :  { %14122 = vmatpush3.bf16.msra.mxu1 %v14838_v33  ;;  %v7238_v33 = vld [vmem:[#allocation3 + $0x24] sm:$0xc] }
 0x334   :  { %14123 = vmatprep.subr.bf16.mxu1 %v14841_v62 }
 0x335   :  { %14218 = vmatpush3.bf16.msra.mxu0 %v14839_v11  ;;  %v7287_v11 = vrot.slane %v7241_v10, 6  ;;  %v7242_v10 = vld [vmem:[#allocation3 + $0x54] sm:$0xc] }
 0x336   :  { %14076 = vmatmul.mubr.bf16.gmra.mxu1 %v14840_v51  ;;  %14219 = vmatprep.subr.bf16.mxu0 %v14843_v17  ;;  %v8135_v51 = vrot.slane %v8094_v36, 6  ;;  %v8149_v36 = vrot.slane %v8098_v58, 6  ;;  %v7248_v58 = vld [vmem:[#allocation3 + $0xb4] sm:$0xc] }
 0x337   :  { %14079 = vmatprep.mubr.bf16.mxu1 %v14844_v29  ;;  %14124 = vmatpush3.bf16.msra.mxu1 %v14841_v62  ;;  %v8093_v62 = vld [vmem:[#allocation3 + $0x30] sm:$0xc]  ;;  %v8095_v29 = vld [vmem:[#allocation3 + $0x48] sm:$0xc]  ;;  %v7288_v41 = vsel %vm18076_vm10, %v7286_v61, %v7287_v11  ;;  %v7302_v11 = vsel %vm18076_vm10, %v7300_v0, %v7301_v56  ;;  %v7251_v0 = vld [vmem:[#allocation3 + $0xd4] sm:$0x3] }
 0x338   :  { %14172 = vmatmul.mubr.bf16.gmra.mxu0 %v14842_v38  ;;  %14125 = vmatprep.subr.bf16.mxu1 %v14846_v60  ;;  %v8141_v38 = vrot.slane %v8139_v19, 4  ;;  %v12612_v32 = vrot.slane %v8095_v29, 10  ;;  %v7249_v29 = vld [vmem:[#allocation3 + $0xbc] sm:$0x3]  ;;  %v7827_v56 = vrot.slane %v18912_v31, 5 }
 0x339   :  { %14175 = vmatprep.mubr.bf16.mxu0 %v14845_v21  ;;  %14220 = vmatpush3.bf16.msra.mxu0 %v14843_v17  ;;  %v8134_v17 = vrot.slane %v8132_v47, 4  ;;  %v18958_v21 = vld [vmem:[#allocation3 + $0x64] sm:$0xf] }
 0x33a   :  { %14221 = vmatprep.subr.bf16.mxu0 %v14847_v57  ;;  %v8146_v9 = vrot.slane %v18958_v21, 6 }
 0x33b   :  { %14126 = vmatpush3.bf16.msra.mxu1 %v14846_v60  ;;  %v7240_v60 = vld [vmem:[#allocation3 + $0x3c] sm:$0xc] }
 0x33c   :  { %14127 = vmatprep.subr.bf16.mxu1 %v14849_v52 }
 0x33d   :  { %14222 = vmatpush3.bf16.msra.mxu0 %v14847_v57  ;;  %v8142_v57 = vrot.slane %v8096_v28, 6  ;;  %v12501_v28 = vrot.slane %v7242_v10, 10  ;;  %v12504_v10 = vrot.slane %v7248_v58, 10  ;;  %v7780_v58 = vld [vmem:[#allocation3 + $0x30] sm:$0xe] }
 0x33e   :  { %14080 = vmatmul.mubr.bf16.gmra.mxu1 %v14848_v23  ;;  %14223 = vmatprep.subr.bf16.mxu0 %v14851_v1  ;;  %v12611_v23 = vrot.slane %v8093_v62, 10  ;;  %v7312_v62 = vrot.slane %v18821_v55, 6  ;;  %v14865_v55 = vld [vmem:[%s20344_s3 + $0x1e0] sm:$0xff]  }
 0x33f   :  { %14083 = vmatprep.mubr.bf16.mxu1 %v14852_v40  ;;  %14128 = vmatpush3.bf16.msra.mxu1 %v14849_v52  ;;  %v12499_v52 = vrot.slane %v7238_v33, 10  ;;  %v7243_v40 = vld [vmem:[#allocation3 + $0x5c] sm:$0x3]  ;;  %v18995_v33 = vld [vmem:[#allocation3 + $0xc4] sm:$0xf] }
 0x340   :  { %14176 = vmatmul.mubr.bf16.gmra.mxu0 %v14850_v5  ;;  %14129 = vmatprep.subr.bf16.mxu1 %v14854_v44  ;;  %v8133_v30 = vsel %vm18076_vm10, %v12611_v23, %v8132_v47  ;;  %v7294_v35 = vrot.slane %v7243_v40, 6  ;;  %v8097_v47 = vld [vmem:[#allocation3 + $0x60] sm:$0xc]  ;;  %v7314_v27 = vrot.slane %v7312_v62, 4 }
 0x341   :  { %14179 = vmatprep.mubr.bf16.mxu0 %v14853_v26  ;;  %14224 = vmatpush3.bf16.msra.mxu0 %v14851_v1  ;;  %v7281_v1 = vsel %vm18076_vm10, %v7279_v24, %v7280_v3  ;;  %v7278_v5 = vsel %vm18076_vm10, %v12499_v52, %v7277_v54  ;;  %v8155_v24 = vrot.slane %v8153_v43, 4  ;;  %v8156_v3 = vrot.slane %v8100_v4, 6 }
 0x342   :  { %14225 = vmatprep.subr.bf16.mxu0 %v14855_v15  ;;  %v12523_v26 = vcombine.low %v7278_v5, %v7281_v1  ;;  %v8102_v1 = vld [vmem:[#allocation3 + $0xb0] sm:$0x3]  ;;  %v8104_v5 = vld [vmem:[#allocation3 + $0xc8] sm:$0x3] }
 0x343   :  { %14130 = vmatpush3.bf16.msra.mxu1 %v14854_v44  ;;  %v12500_v44 = vrot.slane %v7240_v60, 10  ;;  %v8157_v52 = vsel %vm18076_vm10, %v8155_v24, %v8156_v3  ;;  %v14867_v3 = vld [vmem:[%s20344_s3 + $0x1d0] sm:$0xff]  }
 0x344   :  { %14131 = vmatprep.subr.bf16.mxu1 %v14857_v63 }
 0x345   :  { %14226 = vmatpush3.bf16.msra.mxu0 %v14855_v15  ;;  %v8136_v15 = vsel %vm18076_vm10, %v8134_v17, %v8135_v51  ;;  %v7285_v42 = vsel %vm18076_vm10, %v12500_v44, %v7284_v18  ;;  %v8140_v18 = vsel %vm18076_vm10, %v12612_v32, %v8139_v19  ;;  %v18990_v19 = vld [vmem:[#allocation3 + $0xac] sm:$0xf]  ;;  %v7292_v17 = vsel %vm18076_vm10, %v12501_v28, %v7291_v22  ;;  %v7246_v32 = vld [vmem:[#allocation3 + $0x9c] sm:$0xc]  ;;  %v8106_v28 = vld [vmem:[#allocation3 + $0xe0] sm:$0x3] }
 0x346   :  { %14084 = vmatmul.mubr.bf16.gmra.mxu1 %v14856_v2  ;;  %14227 = vmatprep.subr.bf16.mxu0 %v14859_v50  ;;  %v12524_v54 = vcombine.low %v7285_v42, %v7288_v41  ;;  %v12635_v25 = vcombine.low %v8133_v30, %v8136_v15  ;;  %v14864_v2 = vld [vmem:[%s20344_s3 + $0x1e8] sm:$0xff]   ;;  %v8160_v16 = vrot.slane %v18990_v19, 6  ;;  %v7307_v41 = vrot.slane %v7305_v7, 4  ;;  %v8101_v30 = vld [vmem:[#allocation3 + $0xa8] sm:$0xc] }
 0x347   :  { %14132 = vmatpush3.bf16.msra.mxu1 %v14857_v63  ;;  %14135 = vmatprep.mubr.bf16.mxu1 %v12522_v39  ;;  %v8143_v63 = vsel %vm18076_vm10, %v8141_v38, %v8142_v57  ;;  %v7244_v39 = vld [vmem:[#allocation3 + $0x84] sm:$0xc] }
 0x348   :  { %14180 = vmatmul.mubr.bf16.gmra.mxu0 %v14858_v48  ;;  %14133 = vmatprep.subr.bf16.mxu1 %v14860_v14  ;;  %v12636_v8 = vcombine.low %v8140_v18, %v8143_v63  ;;  %v12502_v61 = vrot.slane %v7244_v39, 10  ;;  %v14866_v63 = vld [vmem:[%s20344_s3 + $0x1d8] sm:$0xff]   ;;  %v7319_v18 = vrot.slane %v18846_v12, 6  ;;  %v7779_v39 = vld [vmem:[#allocation3 + $0x20] sm:$0x1]  ;;  %v7313_v12 = vsel %vm18076_vm10, %v12504_v10, %v7312_v62 }
 0x349   :  { %14228 = vmatpush3.bf16.msra.mxu0 %v14859_v50  ;;  %14231 = vmatprep.mubr.bf16.mxu0 %v12634_v34  ;;  %v7293_v50 = vrot.slane %v7291_v22, 4  ;;  %v7247_v34 = vld [vmem:[#allocation3 + $0xa4] sm:$0x3]  ;;  %v8167_v22 = vrot.slane %v18995_v33, 6  ;;  %v7250_v62 = vld [vmem:[#allocation3 + $0xcc] sm:$0xc] }
 0x34a   :  { %14229 = vmatprep.subr.bf16.mxu0 %v14861_v20  ;;  %v7299_v57 = vsel %vm18076_vm10, %v12502_v61, %v7298_v6  ;;  %v7308_v40 = vrot.slane %v7247_v34, 6  ;;  %v7322_v61 = vrot.slane %v7251_v0, 6  ;;  %v7855_v0 = vrot.slane %v18963_v37, 5 }
 0x34b   :  { %14134 = vmatpush3.bf16.msra.mxu1 %v14860_v14  ;;  %v8148_v14 = vrot.slane %v8146_v9, 4  ;;  %v7295_v48 = vsel %vm18076_vm10, %v7293_v50, %v7294_v35  ;;  %v12526_v44 = vcombine.low %v7299_v57, %v7302_v11  ;;  %v8170_v50 = vrot.slane %v8104_v5, 6  ;;  %v19020_v35 = vld [vmem:[#allocation3 + $0xdc] sm:$0xf]  ;;  %v7777_v57 = vld [vmem:[#allocation3 + $0x18] sm:$0xe] }
 0x34c   :  { %14183 = vmatprep.subr.bf16.mxu1 %v14862_v45  ;;  %v12525_v38 = vcombine.low %v7292_v17, %v7295_v48  ;;  %v7309_v4 = vsel %vm18076_vm10, %v7307_v41, %v7308_v40  ;;  %v7829_v17 = vrot.slane %v7827_v56, 4  ;;  %v7782_v41 = vld [vmem:[#allocation3 + $0x38] sm:$0x1]  ;;  %v7841_v40 = vrot.slane %v18931_v49, 5 }
 0x34d   :  { %14230 = vmatpush3.bf16.msra.mxu0 %v14861_v20  ;;  %v8099_v20 = vld [vmem:[#allocation3 + $0x90] sm:$0xc]  ;;  %v8150_v51 = vsel %vm18076_vm10, %v8148_v14, %v8149_v36  ;;  %v8174_v36 = vrot.slane %v19020_v35, 6 }
 0x34e   :  { %14136 = vmatmul.mubr.bf16.vlgmr.msra.gmra.mxu1 %v12523_v26  ;;  %v12614_v60 = vrot.slane %v8099_v20, 10  ;;  %v7315_v26 = vrot.slane %v7249_v29, 6 }
 0x34f   :  { %14139 = vmatprep.mubr.bf16.mxu1 %v12524_v54  ;;  %14184 = vmatpush3.bf16.msra.mxu1 %v14862_v45  ;;  %v12613_v45 = vrot.slane %v8097_v47, 10  ;;  %v8169_v54 = vrot.slane %v8167_v22, 4  ;;  %v12615_v47 = vrot.slane %v8101_v30, 10  ;;  %v8176_v29 = vrot.slane %v8174_v36, 4 }
 0x350   :  { %14232 = vmatmul.mubr.bf16.vlgmr.msra.gmra.mxu0 %v12635_v25  ;;  %14185 = vmatprep.subr.bf16.mxu1 %v14863_v59  ;;  %v8154_v6 = vsel %vm18076_vm10, %v12614_v60, %v8153_v43  ;;  %v12503_v43 = vrot.slane %v7246_v32, 10  ;;  %v8103_v25 = vld [vmem:[#allocation3 + $0xc0] sm:$0xc]  ;;  %v7785_v32 = vld [vmem:[#allocation3 + $0x50] sm:$0x1]  ;;  %v7843_v30 = vrot.slane %v7841_v40, 4 }
 0x351   :  { %14235 = vmatprep.mubr.bf16.mxu0 %v12636_v8  ;;  %v8147_v23 = vsel %vm18076_vm10, %v12613_v45, %v8146_v9  ;;  %v12638_v42 = vcombine.low %v8154_v6, %v8157_v52  ;;  %v8162_v9 = vrot.slane %v8160_v16, 4  ;;  %v12616_v24 = vrot.slane %v8103_v25, 10  ;;  %v8105_v52 = vld [vmem:[#allocation3 + $0xd8] sm:$0xc] }
 0x352   :  { %v12637_v15 = vcombine.low %v8147_v23, %v8150_v51  ;;  %v7306_v8 = vsel %vm18076_vm10, %v12503_v43, %v7305_v7  ;;  %v8171_v31 = vsel %vm18076_vm10, %v8169_v54, %v8170_v50  ;;  %v8161_v48 = vsel %vm18076_vm10, %v12615_v47, %v8160_v16  ;;  %v14868_v16 = vld [vmem:[%s20344_s3 + $0x1c8] sm:$0xff]   ;;  %v7783_v50 = vld [vmem:[#allocation3 + $0x48] sm:$0xe] }
 0x353   :  { %14186 = vmatpush3.bf16.msra.mxu1 %v14863_v59  ;;  %v8163_v59 = vrot.slane %v8102_v1, 6  ;;  %v12527_v20 = vcombine.low %v7306_v8, %v7309_v4  ;;  %v7321_v45 = vrot.slane %v7319_v18, 4  ;;  %v8168_v34 = vsel %vm18076_vm10, %v12616_v24, %v8167_v22  ;;  %v7791_v8 = vld [vmem:[#allocation3 + $0x98] sm:$0x1] }
 0x354   :  { %14187 = vmatprep.subr.bf16.mxu1 %v14864_v2  ;;  %v7830_v51 = vrot.slane %v7779_v39, 5  ;;  %v12640_v60 = vcombine.low %v8168_v34, %v8171_v31  ;;  %v7834_v22 = vrot.slane %v18928_v46, 5  ;;  %v12570_v23 = vrot.slane %v7777_v57, 9  ;;  %v7789_v31 = vld [vmem:[#allocation3 + $0x90] sm:$0xe] }
 0x355   :  { %v8164_v14 = vsel %vm18076_vm10, %v8162_v9, %v8163_v59  ;;  %v7323_v1 = vsel %vm18076_vm10, %v7321_v45, %v7322_v61  ;;  %v7837_v9 = vrot.slane %v7782_v41, 5  ;;  %v7844_v54 = vrot.slane %v7785_v32, 5  ;;  %v7794_v45 = vld [vmem:[#allocation3 + $0xb0] sm:$0x1]  ;;  %v7797_v34 = vld [vmem:[#allocation3 + $0xc8] sm:$0x1] }
 0x356   :  { %14140 = vmatmul.mubr.bf16.gmra.mxu1 %v12525_v38  ;;  %v12639_v11 = vcombine.low %v8161_v48, %v8164_v14  ;;  %v8177_v38 = vrot.slane %v8106_v28, 6  ;;  %v7828_v46 = vsel %vm16320_vm7, %v12570_v23, %v7827_v56  ;;  %v12571_v43 = vrot.slane %v7780_v58, 9  ;;  %v7800_v23 = vld [vmem:[#allocation3 + $0xe0] sm:$0x1]  ;;  %v7798_v32 = vld [vmem:[#allocation3 + $0xd8] sm:$0xe] }
 0x357   :  { %14143 = vmatprep.mubr.bf16.mxu1 %v12526_v44  ;;  %14188 = vmatpush3.bf16.msra.mxu1 %v14864_v2  ;;  %v7316_v2 = vsel %vm18076_vm10, %v7314_v27, %v7315_v26  ;;  %v7831_v44 = vsel %vm16320_vm7, %v7829_v17, %v7830_v51  ;;  %v14869_v26 = vld [vmem:[%s20344_s3 + $0x1c0] sm:$0xff]   ;;  %v7848_v25 = vrot.slane %v18958_v21, 5  ;;  %v7845_v10 = vsel %vm16320_vm7, %v7843_v30, %v7844_v54  ;;  %v7786_v21 = vld [vmem:[#allocation3 + $0x60] sm:$0xe] }
 0x358   :  { %14236 = vmatmul.mubr.bf16.gmra.mxu0 %v12637_v15  ;;  %14189 = vmatprep.subr.bf16.mxu1 %v14865_v55  ;;  %v12528_v7 = vcombine.low %v7313_v12, %v7316_v2  ;;  %v12617_v15 = vrot.slane %v8105_v52, 10  ;;  %v8178_v6 = vsel %vm18076_vm10, %v8176_v29, %v8177_v38  ;;  %v7788_v2 = vld [vmem:[#allocation3 + $0x68] sm:$0x1]  ;;  %v7835_v56 = vsel %vm16320_vm7, %v12571_v43, %v7834_v22 }
 0x359   :  { %14239 = vmatprep.mubr.bf16.mxu0 %v12638_v42  ;;  %v12594_v42 = vcombine.low %v7828_v46, %v7831_v44  ;;  %v7850_v39 = vrot.slane %v7848_v25, 4  ;;  %v7857_v12 = vrot.slane %v7855_v0, 4  ;;  %v7858_v24 = vrot.slane %v7791_v8, 5 }
 0x35a   :  { %v8175_v49 = vsel %vm18076_vm10, %v12617_v15, %v8174_v36  ;;  %v7862_v28 = vrot.slane %v18990_v19, 5  ;;  %v12574_v48 = vrot.slane %v7789_v31, 9  ;;  %v7869_v61 = vrot.slane %v18995_v33, 5  ;;  %v7792_v19 = vld [vmem:[#allocation3 + $0xa8] sm:$0xe] }
 0x35b   :  { %14190 = vmatpush3.bf16.msra.mxu1 %v14865_v55  ;;  %v12505_v55 = vrot.slane %v7250_v62, 10  ;;  %v12641_v59 = vcombine.low %v8175_v49, %v8178_v6  ;;  %v7865_v29 = vrot.slane %v7794_v45, 5  ;;  %v7872_v57 = vrot.slane %v7797_v34, 5 }
 0x35c   :  { %14191 = vmatprep.subr.bf16.mxu1 %v14866_v63  ;;  %v7856_v17 = vsel %vm16320_vm7, %v12574_v48, %v7855_v0  ;;  %v7871_v38 = vrot.slane %v7869_v61, 4  ;;  %v12575_v52 = vrot.slane %v7792_v19, 9  ;;  %v7879_v6 = vrot.slane %v7800_v23, 5 }
 0x35d   :  { %v7320_v5 = vsel %vm18076_vm10, %v12505_v55, %v7319_v18  ;;  %v12572_v18 = vrot.slane %v7783_v50, 9  ;;  %v7876_v55 = vrot.slane %v19020_v35, 5 }
 0x35e   :  { %14144 = vmatmul.mubr.bf16.gmra.mxu1 %v12527_v20  ;;  %v12529_v27 = vcombine.low %v7320_v5, %v7323_v1  ;;  %v7851_v20 = vrot.slane %v7788_v2, 5  ;;  %v7863_v44 = vsel %vm16320_vm7, %v12575_v52, %v7862_v28 }
 0x35f   :  { %14147 = vmatprep.mubr.bf16.mxu1 %v12528_v7  ;;  %14192 = vmatpush3.bf16.msra.mxu1 %v14866_v63  ;;  %v7836_v63 = vrot.slane %v7834_v22, 4  ;;  %v7842_v14 = vsel %vm16320_vm7, %v12572_v18, %v7841_v40  ;;  %v7859_v7 = vsel %vm16320_vm7, %v7857_v12, %v7858_v24  ;;  %v7873_v22 = vsel %vm16320_vm7, %v7871_v38, %v7872_v57 }
 0x360   :  { %14240 = vmatmul.mubr.bf16.gmra.mxu0 %v12639_v11  ;;  %14193 = vmatprep.subr.bf16.mxu1 %v14867_v3  ;;  %v12596_v36 = vcombine.low %v7842_v14, %v7845_v10  ;;  %v7852_v37 = vsel %vm16320_vm7, %v7850_v39, %v7851_v20  ;;  %v12598_v51 = vcombine.low %v7856_v17, %v7859_v7  ;;  %v7878_v15 = vrot.slane %v7876_v55, 4 }
 0x361   :  { %14243 = vmatprep.mubr.bf16.mxu0 %v12640_v60  ;;  %v7838_v4 = vsel %vm16320_vm7, %v7836_v63, %v7837_v9  ;;  %v7864_v60 = vrot.slane %v7862_v28, 4 }
 0x362   :  { %v12595_v47 = vcombine.low %v7835_v56, %v7838_v4  ;;  %v7880_v35 = vsel %vm16320_vm7, %v7878_v15, %v7879_v6 }
 0x363   :  { %14194 = vmatpush3.bf16.msra.mxu1 %v14867_v3  ;;  %v12573_v3 = vrot.slane %v7786_v21, 9  ;;  %v7866_v33 = vsel %vm16320_vm7, %v7864_v60, %v7865_v29 }
 0x364   :  { %14195 = vmatprep.subr.bf16.mxu1 %v14868_v16  ;;  %v12599_v41 = vcombine.low %v7863_v44, %v7866_v33 }
 0x365   :  { %v7849_v11 = vsel %vm16320_vm7, %v12573_v3, %v7848_v25 }
 0x366   :  { %14148 = vmatmul.mubr.bf16.gmra.mxu1 %v12529_v27  ;;  %v12597_v62 = vcombine.low %v7849_v11, %v7852_v37  ;;  %v12577_v27 = vrot.slane %v7798_v32, 9 }
 0x367   :  { %14196 = vmatpush3.bf16.msra.mxu1 %v14868_v16  ;;  %14199 = vmatprep.mubr.bf16.mxu1 %v12594_v42  ;;  %v7795_v16 = vld [vmem:[#allocation3 + $0xc0] sm:$0xe] }
 0x368   :  { %14244 = vmatmul.mubr.bf16.gmra.mxu0 %v12641_v59  ;;  %14197 = vmatprep.subr.bf16.mxu1 %v14869_v26  ;;  %v12576_v1 = vrot.slane %v7795_v16, 9  ;;  %v7877_v46 = vsel %vm16320_vm7, %v12577_v27, %v7876_v55 }
 0x36a   :  { %v7870_v40 = vsel %vm16320_vm7, %v12576_v1, %v7869_v61 }
 0x36b   :  { %14198 = vmatpush3.bf16.msra.mxu1 %v14869_v26  ;;  %v12600_v5 = vcombine.low %v7870_v40, %v7873_v22  ;;  %v12601_v26 = vcombine.low %v7877_v46, %v7880_v35 }
 0x36e   :  { %14200 = vmatmul.mubr.bf16.vlgmr.msra.gmra.mxu1 %v12595_v47 }
 0x36f   :  { %14203 = vmatprep.mubr.bf16.mxu1 %v12596_v36 }
 0x376   :  { %14204 = vmatmul.mubr.bf16.gmra.mxu1 %v12597_v62 }
 0x377   :  { %14207 = vmatprep.mubr.bf16.mxu1 %v12598_v51 }
 0x37e   :  { %14208 = vmatmul.mubr.bf16.gmra.mxu1 %v12599_v41 }
 0x37f   :  { %14211 = vmatprep.mubr.bf16.mxu1 %v12600_v5 }
 0x386   :  { %14212 = vmatmul.mubr.bf16.gmra.mxu1 %v12601_v26 }
 0x39e   :  { %v13977_v49 = vpop.f32.mrf.mxu1 }
 0x3a0   :  { %v6131_v63 = vpop.f32.mrf.mxu1 }
 0x3a2   :  { %v14041_v42 = vpop.f32.mrf.mxu0  ;;  %v13978_v59 = vpop.f32.mrf.mxu1 }
 0x3a4   :  { %v6601_v9 = vpop.f32.mrf.mxu0  ;;  %v19097_v30 = vpop.f32.mrf.mxu1 }
 0x3a6   :  { %v14042_v58 = vpop.f32.mrf.mxu0 }
 0x3a8   :  { %v19099_v50 = vpop.f32.mrf.mxu0 }
 0x3b4   :  { %v13981_v54 = vpop.f32.mrf.mxu1 }
 0x3b6   :  { %v6147_v43 = vpop.f32.mrf.mxu1 }
 0x3b8   :  { %v14045_v4 = vpop.f32.mrf.mxu0  ;;  %v13982_v25 = vpop.f32.mrf.mxu1 }
 0x3ba   :  { %v6617_v18 = vpop.f32.mrf.mxu0  ;;  %v19101_v10 = vpop.f32.mrf.mxu1 }
 0x3bc   :  { %v14046_v53 = vpop.f32.mrf.mxu0  ;;  %v13985_v2 = vpop.f32.mrf.mxu1 }
 0x3be   :  { %v19103_v0 = vpop.f32.mrf.mxu0  ;;  %v6163_v56 = vpop.f32.mrf.mxu1 }
 0x3c0   :  { %v14049_v8 = vpop.f32.mrf.mxu0  ;;  %v13986_v47 = vpop.f32.mrf.mxu1 }
 0x3c2   :  { %v6633_v14 = vpop.f32.mrf.mxu0  ;;  %v19105_v39 = vpop.f32.mrf.mxu1 }
 0x3c4   :  { %v14050_v36 = vpop.f32.mrf.mxu0 }
 0x3c5   :  { %v13989_v21 = vpop.f32.mrf.mxu1 }
 0x3c6   :  { %v19107_v20 = vpop.f32.mrf.mxu0 }
 0x3c7   :  { %v6179_v24 = vpop.f32.mrf.mxu1 }
 0x3c8   :  { %v14053_v12 = vpop.f32.mrf.mxu0 }
 0x3c9   :  { %v13990_v3 = vpop.f32.mrf.mxu1 }
 0x3ca   :  { %v6649_v31 = vpop.f32.mrf.mxu0 }
 0x3cb   :  { %v19109_v28 = vpop.f32.mrf.mxu1 }
 0x3cc   :  { %v14054_v37 = vpop.f32.mrf.mxu0 }
 0x3cd   :  { %v14009_v7 = vpop.f32.mrf.mxu1 }
 0x3ce   :  { %v19111_v48 = vpop.f32.mrf.mxu0  ;;  %v6325_v45 = vadd.f32 %v14009_v7, %v13977_v49 }
 0x3cf   :  { %v6316_v11 = vpop.f32.mrf.mxu1 }
 0x3d0   :  { %v19113_v61 = vpop.f32.mrf.mxu0  ;;  %v6317_v34 = vadd.f32 %v6316_v11, %v6131_v63  ;;  %v19115_v62 = vadd.f32 %v14041_v42, %v6325_v45 }
 0x3d1   :  { %v14010_v51 = vpop.f32.mrf.mxu1 }
 0x3d2   :  { %v19117_v17 = vpop.f32.mrf.mxu0  ;;  %v6328_v60 = vadd.f32 %v14010_v51, %v13978_v59  ;;  %v19119_v29 = vadd.f32 %v6601_v9, %v6317_v34  ;;  %v14871_v34 = vld [vmem:[#allocation5 + $0x30] sm:$0xff]  }
 0x3d3   :  { %v19123_v38 = vpop.f32.mrf.mxu1 }
 0x3d4   :  { %v19121_v19 = vpop.f32.mrf.mxu0  ;;  %v19125_v57 = vadd.f32 %v14042_v58, %v6328_v60 }
 0x3d5   :  { %v14013_v52 = vpop.f32.mrf.mxu1 }
 0x3d6   :  { %v19127_v16 = vpop.f32.mrf.mxu0  ;;  %v6341_v33 = vadd.f32 %v14013_v52, %v13981_v54 }
 0x3d7   :  { %v6332_v1 = vpop.f32.mrf.mxu1 }
 0x3d8   :  { %v19129_v55 = vpop.f32.mrf.mxu0  ;;  %v6333_v22 = vadd.f32 %v6332_v1, %v6147_v43  ;;  %v19131_v23 = vadd.f32 %v14045_v4, %v6341_v33  ;;  %v14872_v33 = vld [vmem:[#allocation5 + $0x28] sm:$0xff]  }
 0x3d9   :  { %v14014_v41 = vpop.f32.mrf.mxu1 }
 0x3da   :  { %v19133_v44 = vpop.f32.mrf.mxu0  ;;  %v6344_v40 = vadd.f32 %v14014_v41, %v13982_v25  ;;  %v19135_v5 = vadd.f32 %v6617_v18, %v6333_v22  ;;  %v14873_v41 = vld [vmem:[#allocation5 + $0x20] sm:$0xff]  }
 0x3db   :  { %v19139_v6 = vpop.f32.mrf.mxu1 }
 0x3dc   :  { %v19137_v15 = vpop.f32.mrf.mxu0  ;;  %v19141_v32 = vadd.f32 %v14046_v53, %v6344_v40  ;;  %v14874_v40 = vld [vmem:[#allocation5 + $0x18] sm:$0xff]  }
 0x3dd   :  { %v14017_v35 = vpop.f32.mrf.mxu1 }
 0x3de   :  { %v19143_v27 = vpop.f32.mrf.mxu0  ;;  %v6357_v46 = vadd.f32 %v14017_v35, %v13985_v2  ;;  %v14870_v2 = vld [vmem:[#allocation5 + $0x38] sm:$0xff]  }
 0x3df   :  { %v6348_v49 = vpop.f32.mrf.mxu1  ;;  %14247 = vmatprep.subr.bf16.mxu1 %v14870_v2 }
 0x3e0   :  { %v19145_v26 = vpop.f32.mrf.mxu0  ;;  %v6349_v42 = vadd.f32 %v6348_v49, %v6163_v56  ;;  %v6674_v63 = vadd.f32 %v14049_v8, %v6357_v46  ;;  %14248 = vmatpush3.bf16.msra.mxu1 %v14870_v2 }
 0x3e1   :  { %v14018_v59 = vpop.f32.mrf.mxu1  ;;  %14249 = vmatprep.subr.bf16.mxu1 %v14871_v34 }
 0x3e2   :  { %v19147_v9 = vpop.f32.mrf.mxu0  ;;  %v6360_v58 = vadd.f32 %v14018_v59, %v13986_v47  ;;  %v19149_v54 = vadd.f32 %v6633_v14, %v6349_v42  ;;  %v14875_v42 = vld [vmem:[#allocation5 + $0x10] sm:$0xff]  }
 0x3e3   :  { %v19153_v4 = vpop.f32.mrf.mxu1 }
 0x3e4   :  { %v19151_v43 = vpop.f32.mrf.mxu0  ;;  %v19155_v25 = vadd.f32 %v14050_v36, %v6360_v58  ;;  %14250 = vmatpush3.bf16.msra.mxu1 %v14871_v34 }
 0x3e5   :  { %20630 = vst [vmem:[#allocation22_spill] sm:$0xff] %v19151_v43  ;;  %v14021_v53 = vpop.f32.mrf.mxu1  ;;  %14251 = vmatprep.subr.bf16.mxu1 %v14872_v33 }
 0x3e6   :  { %v19157_v18 = vpop.f32.mrf.mxu0  ;;  %v6373_v7 = vadd.f32 %v14021_v53, %v13989_v21 }
 0x3e7   :  { %20631 = vst [vmem:[#allocation18_spill] sm:$0xff] %v19157_v18  ;;  %v6364_v56 = vpop.f32.mrf.mxu1 }
 0x3e8   :  { %v19159_v45 = vpop.f32.mrf.mxu0  ;;  %v6365_v8 = vadd.f32 %v6364_v56, %v6179_v24  ;;  %v6678_v11 = vadd.f32 %v14053_v12, %v6373_v7  ;;  %14252 = vmatpush3.bf16.msra.mxu1 %v14872_v33  ;;  %v14876_v7 = vld [vmem:[#allocation5 + $0x8] sm:$0xff]  }
 0x3e9   :  { %v14022_v14 = vpop.f32.mrf.mxu1  ;;  %14253 = vmatprep.subr.bf16.mxu1 %v14873_v41 }
 0x3ea   :  { %v19161_v47 = vpop.f32.mrf.mxu0  ;;  %v6376_v51 = vadd.f32 %v14022_v14, %v13990_v3  ;;  %v19163_v60 = vadd.f32 %v6649_v31, %v6365_v8 }
 0x3eb   :  { %20632 = vst [vmem:[#allocation31_spill] sm:$0xff] %v19161_v47  ;;  %v19167_v52 = vpop.f32.mrf.mxu1 }
 0x3ec   :  { %20633 = vst [vmem:[#allocation24_spill] sm:$0xff] %v19163_v60  ;;  %v19165_v36 = vpop.f32.mrf.mxu0  ;;  %v19169_v21 = vadd.f32 %v14054_v37, %v6376_v51  ;;  %14254 = vmatpush3.bf16.msra.mxu1 %v14873_v41  ;;  %v14877_v51 = vld [vmem:[#allocation5] sm:$0xff]  }
 0x3ed   :  { %20634 = vst [vmem:[#allocation41_spill] sm:$0xff] %v19165_v36  ;;  %14255 = vmatprep.subr.bf16.mxu1 %v14874_v40 }
 0x3ee   :  { %20635 = vst [vmem:[#allocation33_spill] sm:$0xff] %v19169_v21  ;;  %v19171_v1 = vpop.f32.mrf.mxu0  ;;  %v19173_v12 = vpop.f32.mrf.mxu1 }
 0x3ef   :  { %20636 = vst [vmem:[#allocation50_spill] sm:$0xff] %v19171_v1 }
 0x3f0   :  { %v19175_v24 = vpop.f32.mrf.mxu0  ;;  %v19177_v22 = vpop.f32.mrf.mxu1  ;;  %14256 = vmatpush3.bf16.msra.mxu1 %v14874_v40 }
 0x3f1   :  { %14257 = vmatprep.subr.bf16.mxu1 %v14875_v42  ;;  %v6906_v43 = vadd.f32 %v19177_v22, %v19119_v29  ;;  %v6336_v29 = vadd.f32 %v19139_v6, %v19101_v10  ;;  %v6368_v10 = vadd.f32 %v19167_v52, %v19109_v28 }
 0x3f2   :  { %v19179_v31 = vpop.f32.mrf.mxu0  ;;  %v19181_v3 = vpop.f32.mrf.mxu1 }
 0x3f4   :  { %v19183_v37 = vpop.f32.mrf.mxu0  ;;  %v19185_v35 = vpop.f32.mrf.mxu1  ;;  %14258 = vmatpush3.bf16.msra.mxu1 %v14875_v42 }
 0x3f5   :  { %14259 = vmatprep.subr.bf16.mxu1 %v14876_v7 }
 0x3f6   :  { %v19187_v46 = vpop.f32.mrf.mxu0  ;;  %v19189_v49 = vpop.f32.mrf.mxu1 }
 0x3f8   :  { %v19191_v59 = vpop.f32.mrf.mxu0  ;;  %v19193_v58 = vpop.f32.mrf.mxu1  ;;  %14260 = vmatpush3.bf16.msra.mxu1 %v14876_v7 }
 0x3f9   :  { %20637 = vst [vmem:[#allocation42_spill] sm:$0xff] %v19191_v59  ;;  %14261 = vmatprep.subr.bf16.mxu1 %v14877_v51 }
 0x3fa   :  { %v19195_v53 = vpop.f32.mrf.mxu0  ;;  %v19197_v2 = vpop.f32.mrf.mxu1 }
 0x3fb   :  { %20638 = vst [vmem:[#allocation52_spill] sm:$0xff] %v19195_v53  ;;  %v6908_v53 = vadd.f32 %v19173_v12, %v19115_v62  ;;  %v7220_v12 = vadd.f32 %v19117_v17, %v6906_v43 }
 0x3fc   :  { %v19199_v56 = vpop.f32.mrf.mxu0  ;;  %v19201_v8 = vpop.f32.mrf.mxu1  ;;  %14262 = vmatpush3.bf16.msra.mxu1 %v14877_v51 }
 0x3fd   :  { %20639 = vst [vmem:[#allocation58_spill] sm:$0xff] %v19199_v56 }
 0x3fe   :  { %v19203_v14 = vpop.f32.mrf.mxu0  ;;  %v14081_v34 = vpop.f32.mrf.mxu1 }
 0x3ff   :  { %20640 = vst [vmem:[#allocation61_spill] sm:$0xff] %v19203_v14  ;;  %v6916_v33 = vadd.f32 %v14081_v34, %v6674_v63 }
 0x400   :  { %v19205_v41 = vpop.f32.mrf.mxu0  ;;  %v19207_v40 = vpop.f32.mrf.mxu1 }
 0x401   :  { %20641 = vst [vmem:[#allocation59_spill] sm:$0xff] %v19205_v41  ;;  %v19210_v13 = vadd.f32 %v19145_v26, %v6916_v33 }
 0x402   :  { %v19212_v1 = vpop.f32.mrf.mxu0  ;;  %v19214_v36 = vpop.f32.mrf.mxu1 }
 0x403   :  { %20642 = vst [vmem:[#allocation16_spill] sm:$0xff] %v19210_v13  ;;  %20643 = vst [vmem:[#allocation60_spill] sm:$0xff] %v19212_v1  ;;  %v6320_v13 = vadd.f32 %v19123_v38, %v19097_v30 }
 0x404   :  { %v19216_v42 = vpop.f32.mrf.mxu0  ;;  %v19218_v47 = vpop.f32.mrf.mxu1 }
 0x405   :  { %20644 = vst [vmem:[#allocation17_spill] sm:$0xff] %v19216_v42 }
 0x406   :  { %v19220_v21 = vpop.f32.mrf.mxu0  ;;  %v14085_v63 = vpop.f32.mrf.mxu1 }
 0x407   :  { %20645 = vst [vmem:[#allocation19_spill] sm:$0xff] %v19220_v21  ;;  %v6920_v34 = vadd.f32 %v14085_v63, %v6678_v11 }
 0x408   :  { %v19222_v41 = vpop.f32.mrf.mxu0  ;;  %v19224_v14 = vpop.f32.mrf.mxu1 }
 0x409   :  { %20646 = vst [vmem:[#allocation20_spill] sm:$0xff] %v19222_v41  ;;  %20647 = vst [vmem:[#allocation40_spill] sm:$0xff] %v19224_v14  ;;  %v19227_v26 = vadd.f32 %v19159_v45, %v6920_v34 }
 0x40a   :  { %v19229_v7 = vpop.f32.mrf.mxu0  ;;  %v19231_v33 = vpop.f32.mrf.mxu1 }
 0x40b   :  { %20648 = vst [vmem:[#allocation21_spill] sm:$0xff] %v19227_v26  ;;  %20649 = vst [vmem:[#allocation26_spill] sm:$0xff] %v19229_v7 }
 0x40c   :  { %20650 = vst [vmem:[#allocation23_spill] sm:$0xff] %v19231_v33  ;;  %v19233_v1 = vpop.f32.mrf.mxu0  ;;  %v19235_v42 = vpop.f32.mrf.mxu1 }
 0x40d   :  { %20651 = vst [vmem:[#allocation27_spill] sm:$0xff] %v19233_v1  ;;  %20652 = vst [vmem:[#allocation25_spill] sm:$0xff] %v19235_v42 }
 0x40e   :  { %v19237_v51 = vpop.f32.mrf.mxu0  ;;  %v14137_v21 = vpop.f32.mrf.mxu1 }
 0x40f   :  { %20653 = vst [vmem:[#allocation37_spill] sm:$0xff] %v19237_v51 }
 0x410   :  { %v7455_v60 = vpop.f32.mrf.mxu1  ;;  %v14233_v11 = vpop.f32.mrf.mxu0 }
 0x412   :  { %v14138_v63 = vpop.f32.mrf.mxu1  ;;  %v8310_v56 = vpop.f32.mrf.mxu0 }
 0x414   :  { %v7458_v41 = vpop.f32.mrf.mxu1  ;;  %v19239_v45 = vpop.f32.mrf.mxu0 }
 0x416   :  { %v14141_v14 = vpop.f32.mrf.mxu1  ;;  %v19243_v26 = vpop.f32.mrf.mxu0 }
 0x417   :  { %20654 = vst [vmem:[#allocation29_spill] sm:$0xff] %v19243_v26 }
 0x418   :  { %v7471_v18 = vpop.f32.mrf.mxu1  ;;  %v19249_v51 = vpop.f32.mrf.mxu0 }
 0x419   :  { %20657 = vst [vmem:[#allocation47_spill] sm:$0xff] %v19249_v51  ;;  %v6909_v51 = vadd.f32 %v19181_v3, %v19125_v57  ;;  %v6352_v57 = vadd.f32 %v19153_v4, %v19105_v39  ;;  %v6913_v39 = vadd.f32 %v19197_v2, %v19141_v32  ;;  %v6917_v2 = vadd.f32 %v19214_v36, %v19155_v25 }
 0x41a   :  { %v14142_v34 = vpop.f32.mrf.mxu1  ;;  %v19261_v26 = vpop.f32.mrf.mxu0 }
 0x41c   :  { %v19241_v7 = vpop.f32.mrf.mxu1  ;;  %v19275_v22 = vpop.f32.mrf.mxu0 }
 0x41e   :  { %v19245_v1 = vpop.f32.mrf.mxu1  ;;  %v19295_v4 = vpop.f32.mrf.mxu0 }
 0x41f   :  { %20655 = vst [vmem:[#allocation28_spill] sm:$0xff] %v19245_v1 }
 0x420   :  { %v19247_v42 = vpop.f32.mrf.mxu1 }
 0x421   :  { %20656 = vst [vmem:[#allocation39_spill] sm:$0xff] %v19247_v42  ;;  %v7222_v42 = vadd.f32 %v19113_v61, %v6908_v53  ;;  %v6912_v61 = vadd.f32 %v19189_v49, %v19131_v23 }
 0x422   :  { %v19251_v33 = vpop.f32.mrf.mxu1 }
 0x423   :  { %20658 = vst [vmem:[#allocation46_spill] sm:$0xff] %v19251_v33  ;;  %v6665_v33 = vadd.f32 %v19099_v50, %v6320_v13  ;;  %v7520_v38 = vadd.f32 %v14137_v21, %v7222_v42  ;;  %v7518_v13 = vadd.f32 %v7455_v60, %v7220_v12  ;;  %v7223_v50 = vadd.f32 %v19121_v19, %v6909_v51  ;;  %v20662_v12 = vld [vmem:[#allocation52_spill] sm:$0xff] }
 0x424   :  { %v19257_v59 = vpop.f32.mrf.mxu1  ;;  %v6910_v21 = vadd.f32 %v19193_v58, %v19135_v5  ;;  %v6669_v19 = vadd.f32 %v19103_v0, %v6336_v29  ;;  %v6673_v5 = vadd.f32 %v19107_v20, %v6352_v57  ;;  %v7226_v52 = vadd.f32 %v19129_v55, %v6912_v61  ;;  %v19307_v0 = vld [vmem:[%s20345_s4] ss:$0 sm:$0xff] }
 0x425   :  { %v6907_v62 = vadd.f32 %v19185_v35, %v6665_v33  ;;  %v7521_v6 = vadd.f32 %v14138_v63, %v7223_v50  ;;  %v7763_v3 = vadd.f32 %v19175_v24, %v7520_v38  ;;  %v7761_v49 = vadd.f32 %v19179_v31, %v7518_v13  ;;  %v20663_v13 = vld [vmem:[#allocation29_spill] sm:$0xff]  ;;  %v20664_v50 = vld [vmem:[#allocation16_spill] sm:$0xff] }
 0x426   :  { %v19263_v1 = vpop.f32.mrf.mxu1  ;;  %v6911_v28 = vadd.f32 %v19201_v8, %v6669_v19  ;;  %v7224_v32 = vadd.f32 %v19133_v44, %v6910_v21  ;;  %v6677_v20 = vadd.f32 %v19111_v48, %v6368_v10  ;;  %v7227_v55 = vadd.f32 %v19137_v15, %v6913_v39  ;;  %v19314_v44 = vpop.f32.mrf.mxu0  ;;  %v20665_v61 = vld [vmem:[#allocation28_spill] sm:$0xff]  ;;  %v20666_v21 = vld [vmem:[#allocation18_spill] sm:$0xff] }
 0x427   :  { %20659 = vst [vmem:[#allocation32_spill] sm:$0xff] %v19263_v1  ;;  %v7221_v43 = vadd.f32 %v19127_v16, %v6907_v62  ;;  %v6914_v16 = vadd.f32 %v19207_v40, %v19149_v54  ;;  %v7764_v31 = vadd.f32 %v19183_v37, %v7521_v6  ;;  %v7524_v54 = vadd.f32 %v14141_v14, %v7226_v52 }
 0x428   :  { %v19269_v30 = vpop.f32.mrf.mxu1  ;;  %v7522_v8 = vadd.f32 %v7471_v18, %v7224_v32  ;;  %v6915_v51 = vadd.f32 %v19218_v47, %v6673_v5  ;;  %v7525_v37 = vadd.f32 %v14142_v34, %v7227_v55  ;;  %v19329_v62 = vpop.f32.mrf.mxu0  ;;  %v20661_v34 = vld [vmem:[#allocation42_spill] sm:$0xff]  ;;  %v20671_v32 = vld [vmem:[#allocation47_spill] sm:$0xff]  ;;  %v20673_v55 = vld [vmem:[#allocation33_spill] sm:$0xff] }
 0x429   :  { %v7519_v60 = vadd.f32 %v7458_v41, %v7221_v43  ;;  %v7228_v25 = vadd.f32 %v19147_v9, %v6914_v16  ;;  %v7767_v38 = vadd.f32 %v20661_v34, %v7524_v54 }
 0x42a   :  { %v19277_v1 = vpop.f32.mrf.mxu1  ;;  %v7765_v9 = vadd.f32 %v20662_v12, %v7522_v8  ;;  %v7229_v10 = vadd.f32 %v20666_v21, %v6915_v51  ;;  %v14242_v52 = vpop.f32.mrf.mxu0  ;;  %v20682_v21 = vld [vmem:[#allocation17_spill] sm:$0xff] }
 0x42b   :  { %v7762_v48 = vadd.f32 %v19187_v46, %v7519_v60  ;;  %v20660_v46 = vld [vmem:[#allocation22_spill] sm:$0xff]  ;;  %v20668_v60 = vld [vmem:[#allocation24_spill] sm:$0xff] }
 0x42c   :  { %v19286_v17 = vpop.f32.mrf.mxu1  ;;  %v7231_v47 = vadd.f32 %v20660_v46, %v6917_v2  ;;  %v20678_v46 = vld [vmem:[#allocation31_spill] sm:$0xff] }
 0x42e   :  { %v14201_v23 = vpop.f32.mrf.mxu1 }
 0x42f   :  { %v8077_v35 = vadd.f32 %v14201_v23, %v7763_v3  ;;  %v20667_v3 = vld [vmem:[#allocation58_spill] sm:$0xff] }
 0x430   :  { %v8012_v24 = vpop.f32.mrf.mxu1  ;;  %v7768_v39 = vadd.f32 %v20667_v3, %v7525_v37 }
 0x431   :  { %v8375_v58 = vadd.f32 %v14233_v11, %v8077_v35  ;;  %v8075_v53 = vadd.f32 %v8012_v24, %v7761_v49  ;;  %v7225_v11 = vadd.f32 %v19143_v27, %v6911_v28  ;;  %v20669_v35 = vld [vmem:[#allocation40_spill] sm:$0xff]  ;;  %v20670_v28 = vld [vmem:[#allocation39_spill] sm:$0xff] }
 0x432   :  { %v14202_v41 = vpop.f32.mrf.mxu1  ;;  %v6918_v49 = vadd.f32 %v20669_v35, %v20668_v60  ;;  %v7526_v16 = vadd.f32 %v20670_v28, %v7228_v25 }
 0x433   :  { %v19317_v40 = vadd.f32 %v19307_v0, %v8375_v58  ;;  %v8373_v42 = vadd.f32 %v8310_v56, %v8075_v53  ;;  %v8078_v33 = vadd.f32 %v14202_v41, %v7764_v31  ;;  %v7523_v56 = vadd.f32 %v19241_v7, %v7225_v11  ;;  %v20672_v53 = vld [vmem:[#allocation61_spill] sm:$0xff]  ;;  %v20674_v41 = vld [vmem:[#allocation23_spill] sm:$0xff] }
 0x434   :  { %v8015_v18 = vpop.f32.mrf.mxu1  ;;  %v7528_v7 = vadd.f32 %v20665_v61, %v20664_v50  ;;  %v20676_v11 = vld [vmem:[#allocation59_spill] sm:$0xff]  ;;  %v7232_v34 = vadd.f32 %v20678_v46, %v6918_v49  ;;  %v20680_v50 = vld [vmem:[#allocation21_spill] sm:$0xff] }
 0x435   :  { %v12653_v15 = vmul.f32 -1.442695, %v19317_v40  ;;  %v19325_v36 = vadd.f32 %v19307_v0, %v8373_v42  ;;  %v8376_v14 = vadd.f32 %v19239_v45, %v8078_v33  ;;  %v8076_v63 = vadd.f32 %v8015_v18, %v7762_v48  ;;  %v20675_v33 = vld [vmem:[#allocation46_spill] sm:$0xff] }
 0x436   :  { %v14205_v27 = vpop.f32.mrf.mxu1  ;;  %v7766_v31 = vadd.f32 %v20672_v53, %v7523_v56  ;;  %v6921_v42 = vadd.f32 %v20674_v41, %v20673_v55  ;;  %v7529_v48 = vadd.f32 %v20675_v33, %v7231_v47  ;;  %v7771_v25 = vadd.f32 %v20676_v11, %v7528_v7  ;;  %v8345_v56 = vpop.f32.mrf.mxu0  ;;  %v20685_v53 = vld [vmem:[#allocation19_spill] sm:$0xff] }
 0x437   :  { %15142 = vpow2.f32 %v12653_v15  ;;  %v12651_v29 = vmul.f32 -1.442695, %v19325_v36  ;;  %v19336_v57 = vadd.f32 %v19307_v0, %v8376_v14  ;;  %v8374_v45 = vadd.f32 %v20663_v13, %v8076_v63 }
 0x438   :  { %v8081_v6 = vadd.f32 %v14205_v27, %v7767_v38  ;;  %v8028_v43 = vpop.f32.mrf.mxu1  ;;  %v20679_v27 = vld [vmem:[#allocation60_spill] sm:$0xff] }
 0x439   :  { %15144 = vpow2.f32 %v12651_v29  ;;  %v12654_v19 = vmul.f32 -1.442695, %v19336_v57  ;;  %v19345_v23 = vadd.f32 %v19307_v0, %v8374_v45  ;;  %v8079_v5 = vadd.f32 %v8028_v43, %v7765_v9 }
 0x43a   :  { %v8379_v24 = vadd.f32 %v20671_v32, %v8081_v6  ;;  %v14206_v58 = vpop.f32.mrf.mxu1  ;;  %v7769_v12 = vadd.f32 %v20679_v27, %v7526_v16  ;;  %v7772_v6 = vadd.f32 %v20682_v21, %v7529_v48 }
 0x43b   :  { %15146 = vpow2.f32 %v12654_v19  ;;  %v12652_v2 = vmul.f32 -1.442695, %v19345_v23  ;;  %v8377_v54 = vadd.f32 %v19261_v26, %v8079_v5  ;;  %v8082_v8 = vadd.f32 %v14206_v58, %v7768_v39  ;;  %v20677_v26 = vld [vmem:[#allocation25_spill] sm:$0xff]  ;;  %v14245_v19 = vpop.f32.mrf.mxu0 }
 0x43c   :  { %v19358_v51 = vadd.f32 %v19307_v0, %v8379_v24  ;;  %v8031_v37 = vpop.f32.mrf.mxu1  ;;  %v6919_v63 = vadd.f32 %v20677_v26, %v6677_v20  ;;  %v20681_v20 = vld [vmem:[#allocation32_spill] sm:$0xff]  ;;  %v20683_v5 = vld [vmem:[#allocation41_spill] sm:$0xff] }
 0x43d   :  { %15148 = vpow2.f32 %v12652_v2  ;;  %v19362_v18 = vadd.f32 %v19307_v0, %v8377_v54  ;;  %v8380_v15 = vadd.f32 %v19275_v22, %v8082_v8  ;;  %v8080_v14 = vadd.f32 %v8031_v37, %v7766_v31  ;;  %v20686_v2 = vld [vmem:[#allocation20_spill] sm:$0xff]  ;;  %v8358_v33 = vpop.f32.mrf.mxu0 }
 0x43e   :  { %v12657_v47 = vmul.f32 -1.442695, %v19358_v51  ;;  %v14209_v38 = vpop.f32.mrf.mxu1  ;;  %v7527_v22 = vadd.f32 %v19257_v59, %v7229_v10  ;;  %v7532_v61 = vadd.f32 %v20681_v20, %v20680_v50  ;;  %v7235_v59 = vadd.f32 %v20683_v5, %v6921_v42  ;;  %v20684_v10 = vld [vmem:[#allocation50_spill] sm:$0xff]  ;;  %v20689_v20 = vld [vmem:[#allocation37_spill] sm:$0xff] }
 0x43f   :  { %v12655_v9 = vmul.f32 -1.442695, %v19362_v18  ;;  %v19371_v29 = vadd.f32 %v19307_v0, %v8380_v15  ;;  %v8378_v13 = vadd.f32 %v19295_v4, %v8080_v14  ;;  %v8085_v45 = vadd.f32 %v14209_v38, %v7771_v25 }
 0x440   :  { %15150 = vpow2.f32 %v12657_v47  ;;  %v8044_v7 = vpop.f32.mrf.mxu1  ;;  %v7530_v4 = vadd.f32 %v19269_v30, %v7232_v34  ;;  %v7233_v60 = vadd.f32 %v20684_v10, %v6919_v63  ;;  %v7533_v58 = vadd.f32 %v19277_v1, %v7235_v59 }
 0x441   :  { %15152 = vpow2.f32 %v12655_v9  ;;  %v12658_v43 = vmul.f32 -1.442695, %v19371_v29  ;;  %v19380_v3 = vadd.f32 %v19307_v0, %v8378_v13  ;;  %v8383_v39 = vadd.f32 %v19314_v44, %v8085_v45  ;;  %v14246_v13 = vpop.f32.mrf.mxu0 }
 0x442   :  { %v8083_v35 = vadd.f32 %v8044_v7, %v7769_v12  ;;  %v14210_v49 = vpop.f32.mrf.mxu1  ;;  %v7770_v30 = vadd.f32 %v20685_v53, %v7527_v22  ;;  %v7775_v54 = vadd.f32 %v20686_v2, %v7532_v61  ;;  %v7531_v48 = vadd.f32 %v19286_v17, %v7233_v60  ;;  %v20688_v17 = vld [vmem:[#allocation27_spill] sm:$0xff] }
 0x443   :  { %15154 = vpow2.f32 %v12658_v43  ;;  %v12656_v28 = vmul.f32 -1.442695, %v19380_v3  ;;  %v19388_v16 = vadd.f32 %v19307_v0, %v8383_v39  ;;  %v8086_v32 = vadd.f32 %v14210_v49, %v7772_v6  ;;  %v8361_v60 = vpop.f32.mrf.mxu0 }
 0x444   :  { %v15143_v24 = vpop.eup %15142  ;;  %v8381_v44 = vadd.f32 %v19329_v62, %v8083_v35  ;;  %v8047_v31 = vpop.f32.mrf.mxu1  ;;  %v20687_v62 = vld [vmem:[#allocation26_spill] sm:$0xff]  ;;  %v7776_v47 = vadd.f32 %v20688_v17, %v7533_v58  ;;  %v7774_v61 = vadd.f32 %v20689_v20, %v7531_v48 }
 0x445   :  { %v8462_v8 = vadd.f32 1.0, %v15143_v24  ;;  %15156 = vpow2.f32 %v12656_v28  ;;  %v12661_v55 = vmul.f32 -1.442695, %v19388_v16  ;;  %v8384_v41 = vadd.f32 %v14242_v52, %v8086_v32 }
 0x446   :  { %v15145_v42 = vpop.eup %15144  ;;  %v19397_v37 = vadd.f32 %v19307_v0, %v8381_v44  ;;  %v8084_v1 = vadd.f32 %v8047_v31, %v7770_v30  ;;  %v14213_v11 = vpop.f32.mrf.mxu1  ;;  %v7773_v25 = vadd.f32 %v20687_v62, %v7530_v4 }
 0x447   :  { %15158 = vrcp.f32 %v8462_v8  ;;  %v8460_v15 = vadd.f32 1.0, %v15145_v42  ;;  %v19401_v14 = vadd.f32 %v19307_v0, %v8384_v41  ;;  %v8089_v26 = vadd.f32 %v14213_v11, %v7775_v54 }
 0x448   :  { %v15147_v63 = vpop.eup %15146  ;;  %15160 = vpow2.f32 %v12661_v55  ;;  %v12659_v52 = vmul.f32 -1.442695, %v19397_v37  ;;  %v8382_v46 = vadd.f32 %v8345_v56, %v8084_v1  ;;  %v8060_v34 = vpop.f32.mrf.mxu1 }
 0x449   :  { %15162 = vrcp.f32 %v8460_v15  ;;  %v8463_v38 = vadd.f32 1.0, %v15147_v63  ;;  %v12662_v27 = vmul.f32 -1.442695, %v19401_v14  ;;  %v8387_v12 = vadd.f32 %v14245_v19, %v8089_v26 }
 0x44a   :  { %v15149_v9 = vpop.eup %15148  ;;  %15164 = vpow2.f32 %v12659_v52  ;;  %v19407_v45 = vadd.f32 %v19307_v0, %v8382_v46  ;;  %v8087_v22 = vadd.f32 %v8060_v34, %v7773_v25  ;;  %v14214_v50 = vpop.f32.mrf.mxu1 }
 0x44b   :  { %15166 = vrcp.f32 %v8463_v38  ;;  %v8461_v56 = vadd.f32 1.0, %v15149_v9  ;;  %v19411_v7 = vadd.f32 %v19307_v0, %v8387_v12  ;;  %v8090_v21 = vadd.f32 %v14214_v50, %v7776_v47 }
 0x44c   :  { %15168 = vpow2.f32 %v12662_v27  ;;  %v12660_v6 = vmul.f32 -1.442695, %v19407_v45  ;;  %v8385_v43 = vadd.f32 %v8358_v33, %v8087_v22  ;;  %v8063_v39 = vpop.f32.mrf.mxu1 }
 0x44d   :  { %v15151_v19 = vpop.eup %15150  ;;  %15170 = vrcp.f32 %v8461_v56  ;;  %v12665_v4 = vmul.f32 -1.442695, %v19411_v7  ;;  %v8388_v5 = vadd.f32 %v14246_v13, %v8090_v21  ;;  %v8088_v59 = vadd.f32 %v8063_v39, %v7774_v61 }
 0x44e   :  { %v15153_v10 = vpop.eup %15152  ;;  %v8466_v35 = vadd.f32 1.0, %v15151_v19  ;;  %15172 = vpow2.f32 %v12660_v6  ;;  %v19416_v49 = vadd.f32 %v19307_v0, %v8385_v43 }
 0x44f   :  { %v8464_v28 = vadd.f32 1.0, %v15153_v10  ;;  %15174 = vpow2.f32 %v12665_v4  ;;  %v19419_v32 = vadd.f32 %v19307_v0, %v8388_v5  ;;  %v8386_v24 = vadd.f32 %v8361_v60, %v8088_v59 }
 0x450   :  { %v15155_v58 = vpop.eup %15154  ;;  %15176 = vrcp.f32 %v8466_v35  ;;  %v12663_v44 = vmul.f32 -1.442695, %v19416_v49 }
 0x451   :  { %15178 = vrcp.f32 %v8464_v28  ;;  %v8467_v53 = vadd.f32 1.0, %v15155_v58  ;;  %v12666_v30 = vmul.f32 -1.442695, %v19419_v32  ;;  %v19424_v31 = vadd.f32 %v19307_v0, %v8386_v24 }
 0x452   :  { %v15157_v2 = vpop.eup %15156  ;;  %15180 = vpow2.f32 %v12663_v44 }
 0x453   :  { %15182 = vrcp.f32 %v8467_v53  ;;  %v8465_v54 = vadd.f32 1.0, %v15157_v2  ;;  %v12664_v8 = vmul.f32 -1.442695, %v19424_v31  ;;  %v14881_v2 = vld [vmem:[#allocation7 + $0x28] sm:$0xff]  }
 0x454   :  { %v15159_v55 = vpop.eup %15158  ;;  %15184 = vpow2.f32 %v12666_v30  ;;  %v14878_v30 = vld [vmem:[#allocation7 + $0x38] sm:$0xff]  }
 0x455   :  { %v15161_v41 = vpop.eup %15160  ;;  %15186 = vrcp.f32 %v8465_v54  ;;  %v19437_v34 = vmul.f32 %v15159_v55, %v19317_v40  ;;  %14311 = vmatprep.subr.bf16.mxu1 %v14878_v30  ;;  %v14882_v54 = vld [vmem:[#allocation7 + $0x70] sm:$0xff]  }
 0x456   :  { %v15163_v42 = vpop.eup %15162  ;;  %15188 = vpow2.f32 %v12664_v8  ;;  %v8470_v62 = vadd.f32 1.0, %v15161_v41  ;;  %v8949_v8 = vld [vmem:[#allocation4] sm:$0xf]  ;;  %v19491_v55 = vld [vmem:[#allocation4 + $0x4] sm:$0xf] }
 0x457   :  { %v15165_v33 = vpop.eup %15164  ;;  %v19431_v63 = vmul.f32 %v15163_v42, %v19325_v36  ;;  %20693 = vst [vmem:[#allocation45_spill] sm:$0xff] %v19437_v34  ;;  %v9023_v41 = vrot.slane %v19491_v55, 6  ;;  %v12732_v42 = vcombine.low %v8949_v8, %v19491_v55 }
 0x458   :  { %v15167_v48 = vpop.eup %15166  ;;  %v8468_v1 = vadd.f32 1.0, %v15165_v33  ;;  %v8981_v33 = vld [vmem:[#allocation4] sm:$0xc] }
 0x459   :  { %v15169_v11 = vpop.eup %15168  ;;  %v19428_v0 = vmul.f32 %v15167_v48, %v19336_v57  ;;  %20691 = vst [vmem:[#allocation30_spill] sm:$0xff] %v19431_v63  ;;  %v8982_v48 = vld [vmem:[#allocation4 + $0x8] sm:$0x3] }
 0x45a   :  { %v15171_v25 = vpop.eup %15170  ;;  %v8471_v15 = vadd.f32 1.0, %v15169_v11  ;;  %15190 = vrcp.f32 %v8468_v1  ;;  %v12708_v1 = vrot.slane %v8981_v33, 10  ;;  %v9026_v11 = vrot.slane %v8982_v48, 6 }
 0x45b   :  { %20690 = vst [vmem:[#allocation34_spill] sm:$0xff] %v19428_v0  ;;  %v15173_v26 = vpop.eup %15172  ;;  %v19434_v52 = vmul.f32 %v15171_v25, %v19345_v23  ;;  %v8525_v27 = vpack.c.bf16 %v19428_v0, %v19437_v34  ;;  %v14886_v25 = vld [vmem:[#allocation7 + $0x60] sm:$0xff]  }
 0x45c   :  { %v15175_v46 = vpop.eup %15174  ;;  %15192 = vrcp.f32 %v8471_v15  ;;  %v8469_v17 = vadd.f32 1.0, %v15173_v26  ;;  %v9025_v15 = vrot.slane %v9023_v41, 4 }
 0x45d   :  { %20692 = vst [vmem:[#allocation44_spill] sm:$0xff] %v19434_v52  ;;  %v15177_v47 = vpop.eup %15176  ;;  %15194 = vrcp.f32 %v8470_v62  ;;  %v8524_v57 = vpack.c.bf16 %v19434_v52, %v19431_v63  ;;  %v8474_v40 = vadd.f32 1.0, %v15175_v46  ;;  %v14885_v62 = vld [vmem:[#allocation7 + $0x18] sm:$0xff]   ;;  %v9024_v46 = vsel %vm18076_vm10, %v12708_v1, %v9023_v41 }
 0x45e   :  { %v15179_v38 = vpop.eup %15178  ;;  %15196 = vrcp.f32 %v8469_v17  ;;  %v19453_v21 = vmul.f32 %v15177_v47, %v19358_v51  ;;  %v9027_v17 = vsel %vm18076_vm10, %v9025_v15, %v9026_v11 }
 0x45f   :  { %v15181_v36 = vpop.eup %15180  ;;  %14263 = vmatprep.mubr.bf16.mxu1 %v8524_v57  ;;  %v19447_v61 = vmul.f32 %v15179_v38, %v19362_v18  ;;  %v12716_v47 = vcombine.low %v9024_v46, %v9027_v17  ;;  %v14887_v57 = vld [vmem:[#allocation7 + $0x10] sm:$0xff]   ;;  %v14888_v38 = vld [vmem:[#allocation7 + $0x58] sm:$0xff]  }
 0x460   :  { %v15183_v23 = vpop.eup %15182  ;;  %v8472_v12 = vadd.f32 1.0, %v15181_v36  ;;  %14264 = vmatmul.mubr.bf16.vlgmr.msra.gmra.mxu1 %v8525_v27  ;;  %20697 = vst [vmem:[#allocation36_spill] sm:$0xff] %v19453_v21  ;;  %v14889_v27 = vld [vmem:[#allocation7 + $0x8] sm:$0xff]   ;;  %v14890_v36 = vld [vmem:[#allocation7 + $0x50] sm:$0xff]  }
 0x461   :  { %v15185_v9 = vpop.eup %15184  ;;  %v19444_v22 = vmul.f32 %v15183_v23, %v19371_v29  ;;  %20695 = vst [vmem:[#allocation51_spill] sm:$0xff] %v19447_v61  ;;  %14312 = vmatpush3.bf16.msra.mxu1 %v14878_v30  ;;  %14295 = vmatprep.mubr.bf16.mxu0 %v12716_v47  ;;  %v14891_v23 = vld [vmem:[#allocation7] sm:$0xff]  }
 0x462   :  { %v15187_v13 = vpop.eup %15186  ;;  %v8475_v50 = vadd.f32 1.0, %v15185_v9  ;;  %15198 = vrcp.f32 %v8472_v12  ;;  %v14892_v12 = vld [vmem:[#allocation7 + $0x48] sm:$0xff]   ;;  %v19499_v9 = vld [vmem:[#allocation7 + $0xf8] sm:$0xff]  }
 0x463   :  { %20694 = vst [vmem:[#allocation35_spill] sm:$0xff] %v19444_v22  ;;  %v15189_v20 = vpop.eup %15188  ;;  %v19450_v56 = vmul.f32 %v15187_v13, %v19380_v3  ;;  %v8527_v29 = vpack.c.bf16 %v19444_v22, %v19453_v21  ;;  %v19502_v13 = vld [vmem:[#allocation7 + $0xb8] sm:$0xff]  }
 0x464   :  { %15200 = vrcp.f32 %v8475_v50  ;;  %v8473_v6 = vadd.f32 1.0, %v15189_v20  ;;  %v19508_v50 = vld [vmem:[%s20347_s6] ss:$0 sm:$0xff] }
 0x465   :  { %20696 = vst [vmem:[#allocation49_spill] sm:$0xff] %v19450_v56  ;;  %15202 = vrcp.f32 %v8474_v40  ;;  %v8526_v43 = vpack.c.bf16 %v19450_v56, %v19447_v61  ;;  %v14896_v40 = vld [vmem:[#allocation7 + $0x40] sm:$0xff]  }
 0x466   :  { %15204 = vrcp.f32 %v8473_v6 }
 0x467   :  { %14267 = vmatprep.mubr.bf16.mxu1 %v8526_v43  ;;  %v15191_v39 = vpop.eup %15190 }
 0x468   :  { %14268 = vmatmul.mubr.bf16.gmra.mxu1 %v8527_v29  ;;  %v19463_v51 = vmul.f32 %v15191_v39, %v19397_v37 }
 0x469   :  { %v15193_v18 = vpop.eup %15192 }
 0x46a   :  { %v15195_v19 = vpop.eup %15194  ;;  %v19460_v4 = vmul.f32 %v15193_v18, %v19401_v14  ;;  %20699 = vst [vmem:[#allocation56_spill] sm:$0xff] %v19463_v51 }
 0x46b   :  { %v15197_v3 = vpop.eup %15196  ;;  %v19469_v59 = vmul.f32 %v15195_v19, %v19388_v16 }
 0x46c   :  { %20698 = vst [vmem:[#allocation54_spill] sm:$0xff] %v19460_v4  ;;  %v19466_v5 = vmul.f32 %v15197_v3, %v19407_v45 }
 0x46d   :  { %20701 = vst [vmem:[#allocation38_spill] sm:$0xff] %v19469_v59  ;;  %v8529_v60 = vpack.c.bf16 %v19460_v4, %v19469_v59  ;;  %v15010_v4 = vld [vmem:[#allocation9 + $0x8] sm:$0xff]  }
 0x46e   :  { %20700 = vst [vmem:[#allocation57_spill] sm:$0xff] %v19466_v5  ;;  %v8528_v10 = vpack.c.bf16 %v19466_v5, %v19463_v51  ;;  %v19931_v59 = vld [vmem:[#allocation10 + $0x8] sm:$0xff]  }
 0x46f   :  { %v15199_v35 = vpop.eup %15198  ;;  %20717 = vst [vmem:[#allocation81_spill] sm:$0xff] %v19931_v59 }
 0x470   :  { %14271 = vmatprep.mubr.bf16.mxu1 %v8528_v10  ;;  %v19479_v45 = vmul.f32 %v15199_v35, %v19416_v49  ;;  %v14880_v49 = vld [vmem:[#allocation7 + $0x78] sm:$0xff]  }
 0x471   :  { %v15201_v28 = vpop.eup %15200  ;;  %14272 = vmatmul.mubr.bf16.gmra.mxu1 %v8529_v60  ;;  %14279 = vmatprep.subr.bf16.mxu0 %v14880_v49 }
 0x472   :  { %v15203_v14 = vpop.eup %15202  ;;  %v19476_v37 = vmul.f32 %v15201_v28, %v19419_v32  ;;  %20703 = vst [vmem:[#allocation43_spill] sm:$0xff] %v19479_v45  ;;  %v14879_v32 = vld [vmem:[#allocation7 + $0x30] sm:$0xff]   ;;  %14280 = vmatpush3.bf16.msra.mxu0 %v14880_v49 }
 0x473   :  { %v15205_v24 = vpop.eup %15204  ;;  %v19485_v58 = vmul.f32 %v15203_v14, %v19411_v7  ;;  %14313 = vmatprep.subr.bf16.mxu1 %v14879_v32  ;;  %14281 = vmatprep.subr.bf16.mxu0 %v14882_v54  ;;  %v14883_v7 = vld [vmem:[#allocation7 + $0x20] sm:$0xff]  }
 0x474   :  { %20702 = vst [vmem:[#allocation48_spill] sm:$0xff] %v19476_v37  ;;  %v19482_v16 = vmul.f32 %v15205_v24, %v19424_v31  ;;  %14314 = vmatpush3.bf16.msra.mxu1 %v14879_v32  ;;  %v14884_v31 = vld [vmem:[#allocation7 + $0x68] sm:$0xff]  }
 0x475   :  { %20705 = vst [vmem:[#allocation63_spill] sm:$0xff] %v19485_v58  ;;  %v8531_v53 = vpack.c.bf16 %v19476_v37, %v19485_v58  ;;  %14315 = vmatprep.subr.bf16.mxu1 %v14881_v2  ;;  %v15008_v37 = vld [vmem:[#allocation9 + $0x10] sm:$0xff]  }
 0x476   :  { %20704 = vst [vmem:[#allocation53_spill] sm:$0xff] %v19482_v16  ;;  %v8530_v44 = vpack.c.bf16 %v19482_v16, %v19479_v45  ;;  %14282 = vmatpush3.bf16.msra.mxu0 %v14882_v54  ;;  %v19919_v58 = vld [vmem:[#allocation10 + $0x10] sm:$0xff]  }
 0x477   :  { %14283 = vmatprep.subr.bf16.mxu0 %v14884_v31  ;;  %20714 = vst [vmem:[#allocation72_spill] sm:$0xff] %v19919_v58 }
 0x478   :  { %14275 = vmatprep.mubr.bf16.mxu1 %v8530_v44  ;;  %14316 = vmatpush3.bf16.msra.mxu1 %v14881_v2 }
 0x479   :  { %14276 = vmatmul.mubr.bf16.gmra.mxu1 %v8531_v53  ;;  %14317 = vmatprep.subr.bf16.mxu1 %v14883_v7 }
 0x47a   :  { %14327 = vmatprep.mubr.bf16.mxu1 %v12732_v42  ;;  %14284 = vmatpush3.bf16.msra.mxu0 %v14884_v31 }
 0x47b   :  { %14285 = vmatprep.subr.bf16.mxu0 %v14886_v25 }
 0x47c   :  { %14318 = vmatpush3.bf16.msra.mxu1 %v14883_v7 }
 0x47d   :  { %14319 = vmatprep.subr.bf16.mxu1 %v14885_v62 }
 0x47e   :  { %14286 = vmatpush3.bf16.msra.mxu0 %v14886_v25 }
 0x47f   :  { %14287 = vmatprep.subr.bf16.mxu0 %v14888_v38 }
 0x480   :  { %14320 = vmatpush3.bf16.msra.mxu1 %v14885_v62 }
 0x481   :  { %14321 = vmatprep.subr.bf16.mxu1 %v14887_v57 }
 0x482   :  { %14288 = vmatpush3.bf16.msra.mxu0 %v14888_v38 }
 0x483   :  { %14289 = vmatprep.subr.bf16.mxu0 %v14890_v36 }
 0x484   :  { %14322 = vmatpush3.bf16.msra.mxu1 %v14887_v57 }
 0x485   :  { %14323 = vmatprep.subr.bf16.mxu1 %v14889_v27 }
 0x486   :  { %14290 = vmatpush3.bf16.msra.mxu0 %v14890_v36 }
 0x487   :  { %14291 = vmatprep.subr.bf16.mxu0 %v14892_v12 }
 0x488   :  { %14324 = vmatpush3.bf16.msra.mxu1 %v14889_v27 }
 0x489   :  { %14325 = vmatprep.subr.bf16.mxu1 %v14891_v23 }
 0x48a   :  { %14292 = vmatpush3.bf16.msra.mxu0 %v14892_v12 }
 0x48b   :  { %14293 = vmatprep.subr.bf16.mxu0 %v14896_v40 }
 0x48c   :  { %14326 = vmatpush3.bf16.msra.mxu1 %v14891_v23 }
 0x48d   :  { %14375 = vmatprep.subr.bf16.mxu1 %v19499_v9 }
 0x48e   :  { %14294 = vmatpush3.bf16.msra.mxu0 %v14896_v40 }
 0x48f   :  { %14343 = vmatprep.subr.bf16.mxu0 %v19502_v13 }
 0x520   :  { %v14265_v20 = vpop.f32.mrf.mxu1 }
 0x521   :  { %v19511_v6 = vadd.f32 %v14265_v20, %v19508_v50 }
 0x522   :  { %v8637_v43 = vpop.f32.mrf.mxu1 }
 0x523   :  { %v12678_v29 = vmul.f32 -1.442695, %v19511_v6  ;;  %v19515_v39 = vadd.f32 %v19508_v50, %v8637_v43 }
 0x524   :  { %v14266_v18 = vpop.f32.mrf.mxu1 }
 0x525   :  { %15206 = vpow2.f32 %v12678_v29  ;;  %v12676_v19 = vmul.f32 -1.442695, %v19515_v39  ;;  %v19519_v3 = vadd.f32 %v14266_v18, %v19508_v50 }
 0x526   :  { %v8640_v10 = vpop.f32.mrf.mxu1 }
 0x527   :  { %15208 = vpow2.f32 %v12676_v19  ;;  %v12679_v60 = vmul.f32 -1.442695, %v19519_v3  ;;  %v19523_v35 = vadd.f32 %v19508_v50, %v8640_v10 }
 0x528   :  { %v14269_v28 = vpop.f32.mrf.mxu1 }
 0x529   :  { %15210 = vpow2.f32 %v12679_v60  ;;  %v12677_v14 = vmul.f32 -1.442695, %v19523_v35  ;;  %v19527_v24 = vadd.f32 %v14269_v28, %v19508_v50 }
 0x52a   :  { %v8653_v44 = vpop.f32.mrf.mxu1 }
 0x52b   :  { %15212 = vpow2.f32 %v12677_v14  ;;  %v12682_v53 = vmul.f32 -1.442695, %v19527_v24  ;;  %v19531_v30 = vadd.f32 %v19508_v50, %v8653_v44 }
 0x52c   :  { %v14270_v32 = vpop.f32.mrf.mxu1 }
 0x52d   :  { %15214 = vpow2.f32 %v12682_v53  ;;  %v12680_v49 = vmul.f32 -1.442695, %v19531_v30  ;;  %v19535_v2 = vadd.f32 %v14270_v32, %v19508_v50 }
 0x52e   :  { %v8656_v54 = vpop.f32.mrf.mxu1 }
 0x52f   :  { %15216 = vpow2.f32 %v12680_v49  ;;  %v12683_v7 = vmul.f32 -1.442695, %v19535_v2  ;;  %v19539_v31 = vadd.f32 %v19508_v50, %v8656_v54 }
 0x531   :  { %15218 = vpow2.f32 %v12683_v7  ;;  %v12681_v8 = vmul.f32 -1.442695, %v19539_v31  ;;  %v14273_v41 = vpop.f32.mrf.mxu1 }
 0x532   :  { %v15207_v42 = vpop.eup %15206  ;;  %v19543_v33 = vadd.f32 %v14273_v41, %v19508_v50 }
 0x533   :  { %v8750_v48 = vadd.f32 1.0, %v15207_v42  ;;  %15220 = vpow2.f32 %v12681_v8  ;;  %v8669_v1 = vpop.f32.mrf.mxu1 }
 0x534   :  { %v15209_v11 = vpop.eup %15208  ;;  %v12686_v62 = vmul.f32 -1.442695, %v19543_v33  ;;  %v19547_v25 = vadd.f32 %v19508_v50, %v8669_v1 }
 0x535   :  { %15222 = vrcp.f32 %v8750_v48  ;;  %v8748_v15 = vadd.f32 1.0, %v15209_v11  ;;  %v14274_v46 = vpop.f32.mrf.mxu1 }
 0x536   :  { %v15211_v17 = vpop.eup %15210  ;;  %15224 = vpow2.f32 %v12686_v62  ;;  %v12684_v47 = vmul.f32 -1.442695, %v19547_v25  ;;  %v19551_v57 = vadd.f32 %v14274_v46, %v19508_v50 }
 0x537   :  { %15226 = vrcp.f32 %v8748_v15  ;;  %v8751_v38 = vadd.f32 1.0, %v15211_v17  ;;  %v8672_v27 = vpop.f32.mrf.mxu1 }
 0x538   :  { %v15213_v36 = vpop.eup %15212  ;;  %15228 = vpow2.f32 %v12684_v47  ;;  %v12687_v23 = vmul.f32 -1.442695, %v19551_v57  ;;  %v19555_v12 = vadd.f32 %v19508_v50, %v8672_v27 }
 0x539   :  { %15230 = vrcp.f32 %v8751_v38  ;;  %v8749_v40 = vadd.f32 1.0, %v15213_v36  ;;  %v14277_v20 = vpop.f32.mrf.mxu1 }
 0x53a   :  { %v15215_v43 = vpop.eup %15214  ;;  %15232 = vpow2.f32 %v12687_v23  ;;  %v12685_v29 = vmul.f32 -1.442695, %v19555_v12  ;;  %v19559_v18 = vadd.f32 %v14277_v20, %v19508_v50 }
 0x53b   :  { %15234 = vrcp.f32 %v8749_v40  ;;  %v8754_v19 = vadd.f32 1.0, %v15215_v43  ;;  %v8685_v10 = vpop.f32.mrf.mxu1 }
 0x53c   :  { %v15217_v60 = vpop.eup %15216  ;;  %15236 = vpow2.f32 %v12685_v29  ;;  %v12690_v28 = vmul.f32 -1.442695, %v19559_v18  ;;  %v19563_v14 = vadd.f32 %v19508_v50, %v8685_v10 }
 0x53d   :  { %15238 = vrcp.f32 %v8754_v19  ;;  %v8752_v44 = vadd.f32 1.0, %v15217_v60  ;;  %v14278_v53 = vpop.f32.mrf.mxu1 }
 0x53e   :  { %v15219_v32 = vpop.eup %15218  ;;  %15240 = vpow2.f32 %v12690_v28  ;;  %v12688_v49 = vmul.f32 -1.442695, %v19563_v14  ;;  %v19567_v54 = vadd.f32 %v14278_v53, %v19508_v50 }
 0x53f   :  { %15242 = vrcp.f32 %v8752_v44  ;;  %v8755_v7 = vadd.f32 1.0, %v15219_v32  ;;  %v8688_v8 = vpop.f32.mrf.mxu1 }
 0x540   :  { %v15221_v41 = vpop.eup %15220  ;;  %15244 = vpow2.f32 %v12688_v49  ;;  %v12691_v42 = vmul.f32 -1.442695, %v19567_v54  ;;  %v19571_v48 = vadd.f32 %v19508_v50, %v8688_v8 }
 0x541   :  { %15246 = vrcp.f32 %v8755_v7  ;;  %v8753_v1 = vadd.f32 1.0, %v15221_v41 }
 0x542   :  { %v15223_v11 = vpop.eup %15222  ;;  %15248 = vpow2.f32 %v12691_v42  ;;  %v12689_v62 = vmul.f32 -1.442695, %v19571_v48 }
 0x543   :  { %v15225_v15 = vpop.eup %15224  ;;  %v8798_v46 = vmul.f32 %v15223_v11, %v19511_v6  ;;  %15250 = vrcp.f32 %v8753_v1 }
 0x544   :  { %v15227_v17 = vpop.eup %15226  ;;  %v8758_v47 = vadd.f32 1.0, %v15225_v15  ;;  %15252 = vpow2.f32 %v12689_v62 }
 0x545   :  { %v15229_v38 = vpop.eup %15228  ;;  %v12961_v27 = vpack.c.bf16 %v8798_v46, %v8798_v46  ;;  %v8796_v36 = vmul.f32 %v15227_v17, %v19515_v39 }
 0x546   :  { %v15231_v23 = vpop.eup %15230  ;;  %15254 = vrcp.f32 %v8758_v47  ;;  %v8756_v50 = vadd.f32 1.0, %v15229_v38 }
 0x547   :  { %v15233_v40 = vpop.eup %15232  ;;  %v8865_v20 = vrot.slane %v12961_v27, 6  ;;  %v12959_v43 = vpack.c.bf16 %v8796_v36, %v8796_v36  ;;  %v8799_v29 = vmul.f32 %v15231_v23, %v19519_v3 }
 0x548   :  { %v15235_v19 = vpop.eup %15234  ;;  %15256 = vrcp.f32 %v8756_v50  ;;  %v8759_v10 = vadd.f32 1.0, %v15233_v40  ;;  %v19585_v40 = vld [vmem:[#allocation4 + $0x4c] sm:$0xf] }
 0x549   :  { %v15237_v6 = vpop.eup %15236  ;;  %8928 = vst [vmem:[#allocation4 + $0x18] sm:$0xc] %v8865_v20  ;;  %v8860_v60 = vrot.slane %v12959_v43, 6  ;;  %v12962_v28 = vpack.c.bf16 %v8799_v29, %v8799_v29  ;;  %v8797_v44 = vmul.f32 %v15235_v19, %v19523_v35  ;;  %v8866_v49 = vrot.slane %v8865_v20, 4  ;;  %v19587_v19 = vld [vmem:[#allocation4 + $0x48] sm:$0xc] }
 0x54a   :  { %v15239_v53 = vpop.eup %15238  ;;  %15258 = vrcp.f32 %v8759_v10  ;;  %v8757_v39 = vadd.f32 1.0, %v15237_v6 }
 0x54b   :  { %v15241_v32 = vpop.eup %15240  ;;  %8925 = vst [vmem:[#allocation4 + $0xc] sm:$0xc] %v8860_v60  ;;  %v8867_v7 = vrot.slane %v12962_v28, 6  ;;  %v12960_v8 = vpack.c.bf16 %v8797_v44, %v8797_v44  ;;  %v8802_v41 = vmul.f32 %v15239_v53, %v19527_v24  ;;  %v8861_v42 = vrot.slane %v8860_v60, 4  ;;  %v19590_v60 = vld [vmem:[#allocation4 + $0x50] sm:$0x3] }
 0x54c   :  { %v15243_v3 = vpop.eup %15242  ;;  %15260 = vrcp.f32 %v8757_v39  ;;  %v8762_v1 = vadd.f32 1.0, %v15241_v32  ;;  %v9051_v44 = vrot.slane %v19585_v40, 6 }
 0x54d   :  { %v15245_v11 = vpop.eup %15244  ;;  %v8868_v62 = vsel %vm18076_vm10, %v8866_v49, %v8867_v7  ;;  %v8869_v15 = vrot.slane %v8867_v7, 4  ;;  %v8862_v35 = vrot.slane %v12960_v8, 6  ;;  %v12965_v46 = vpack.c.bf16 %v8802_v41, %v8802_v41 }
 0x54e   :  { %v15247_v17 = vpop.eup %15246  ;;  %8929 = vst [vmem:[#allocation4 + $0x1c] sm:$0xf] %v8868_v62  ;;  %v8800_v47 = vmul.f32 %v15243_v3, %v19531_v30  ;;  %15262 = vrcp.f32 %v8762_v1  ;;  %v8760_v38 = vadd.f32 1.0, %v15245_v11  ;;  %v12712_v7 = vrot.slane %v19587_v19, 10  ;;  %v19595_v3 = vld [vmem:[#allocation4 + $0x48] sm:$0xf] }
 0x54f   :  { %v15249_v27 = vpop.eup %15248  ;;  %8930 = vst [vmem:[#allocation4 + $0x20] sm:$0x3] %v8869_v15  ;;  %v8863_v24 = vsel %vm18076_vm10, %v8861_v42, %v8862_v35  ;;  %v8864_v36 = vrot.slane %v8862_v35, 4  ;;  %v8875_v23 = vrot.slane %v12965_v46, 6  ;;  %v8803_v50 = vmul.f32 %v15247_v17, %v19535_v2 }
 0x550   :  { %v15251_v20 = vpop.eup %15250  ;;  %8926 = vst [vmem:[#allocation4 + $0x10] sm:$0xf] %v8863_v24  ;;  %v12963_v43 = vpack.c.bf16 %v8800_v47, %v8800_v47  ;;  %15264 = vrcp.f32 %v8760_v38  ;;  %v8763_v29 = vadd.f32 1.0, %v15249_v27  ;;  %v8985_v47 = vld [vmem:[#allocation4 + $0x18] sm:$0xc]  ;;  %v19606_v27 = vrot.slane %v9051_v44, 4 }
 0x551   :  { %v15253_v30 = vpop.eup %15252  ;;  %8927 = vst [vmem:[#allocation4 + $0x14] sm:$0x3] %v8864_v36  ;;  %8934 = vst [vmem:[#allocation4 + $0x30] sm:$0xc] %v8875_v23  ;;  %v12966_v10 = vpack.c.bf16 %v8803_v50, %v8803_v50  ;;  %v8801_v6 = vmul.f32 %v15251_v20, %v19539_v31  ;;  %v8876_v39 = vrot.slane %v8875_v23, 4  ;;  %v9054_v31 = vrot.slane %v19590_v60, 6 }
 0x552   :  { %v8870_v28 = vrot.slane %v12963_v43, 6  ;;  %15266 = vrcp.f32 %v8763_v29  ;;  %v8761_v2 = vadd.f32 1.0, %v15253_v30  ;;  %v8951_v17 = vld [vmem:[#allocation4 + $0xc] sm:$0xf]  ;;  %v14898_v20 = vld [vmem:[#allocation7 + $0xf0] sm:$0xff]  }
 0x553   :  { %v15255_v53 = vpop.eup %15254  ;;  %v8877_v32 = vrot.slane %v12966_v10, 6  ;;  %v12964_v49 = vpack.c.bf16 %v8801_v6, %v8801_v6  ;;  %v8983_v6 = vld [vmem:[#allocation4 + $0xc] sm:$0xc] }
 0x554   :  { %v8871_v8 = vrot.slane %v8870_v28, 4  ;;  %8931 = vst [vmem:[#allocation4 + $0x24] sm:$0xc] %v8870_v28  ;;  %v8806_v41 = vmul.f32 %v15255_v53, %v19543_v33  ;;  %15268 = vrcp.f32 %v8761_v2 }
 0x555   :  { %v15257_v42 = vpop.eup %15256  ;;  %v8878_v1 = vsel %vm18076_vm10, %v8876_v39, %v8877_v32  ;;  %v8879_v11 = vrot.slane %v8877_v32, 4  ;;  %v8872_v62 = vrot.slane %v12964_v49, 6  ;;  %v19600_v15 = vld [vmem:[#allocation4 + $0x1c] sm:$0xf]  ;;  %v8953_v39 = vld [vmem:[#allocation4 + $0x18] sm:$0xf] }
 0x556   :  { %8935 = vst [vmem:[#allocation4 + $0x34] sm:$0xf] %v8878_v1  ;;  %v12969_v35 = vpack.c.bf16 %v8806_v41, %v8806_v41  ;;  %v8804_v46 = vmul.f32 %v15257_v42, %v19547_v25  ;;  %v9037_v33 = vrot.slane %v19600_v15, 6  ;;  %v8986_v38 = vld [vmem:[#allocation4 + $0x20] sm:$0x3] }
 0x557   :  { %v15259_v24 = vpop.eup %15258  ;;  %8936 = vst [vmem:[#allocation4 + $0x38] sm:$0x3] %v8879_v11  ;;  %v8873_v36 = vsel %vm18076_vm10, %v8871_v8, %v8872_v62  ;;  %v8874_v23 = vrot.slane %v8872_v62, 4  ;;  %v19610_v50 = vld [vmem:[#allocation4 + $0x10] sm:$0xf]  ;;  %v9040_v43 = vrot.slane %v8986_v38, 6  ;;  %v12736_v8 = vcombine.low %v19595_v3, %v19585_v40 }
 0x558   :  { %8932 = vst [vmem:[#allocation4 + $0x28] sm:$0xf] %v8873_v36  ;;  %v8885_v25 = vrot.slane %v12969_v35, 6  ;;  %v12967_v29 = vpack.c.bf16 %v8804_v46, %v8804_v46  ;;  %v8807_v30 = vmul.f32 %v15259_v24, %v19551_v57  ;;  %v9030_v10 = vrot.slane %v19610_v50, 6  ;;  %v8984_v28 = vld [vmem:[#allocation4 + $0x14] sm:$0x3] }
 0x559   :  { %v15261_v2 = vpop.eup %15260  ;;  %8933 = vst [vmem:[#allocation4 + $0x2c] sm:$0x3] %v8874_v23  ;;  %v12733_v53 = vcombine.low %v8951_v17, %v19610_v50  ;;  %v9033_v32 = vrot.slane %v8984_v28, 6  ;;  %v9039_v49 = vrot.slane %v9037_v33, 4  ;;  %v12734_v57 = vcombine.low %v8953_v39, %v19600_v15 }
 0x55a   :  { %8940 = vst [vmem:[#allocation4 + $0x60] sm:$0xc] %v8885_v25  ;;  %v8880_v41 = vrot.slane %v12967_v29, 6  ;;  %v12970_v42 = vpack.c.bf16 %v8807_v30, %v8807_v30  ;;  %v8805_v1 = vmul.f32 %v15261_v2, %v19555_v12  ;;  %v8886_v62 = vrot.slane %v8885_v25, 4 }
 0x55b   :  { %v15263_v11 = vpop.eup %15262  ;;  %14328 = vmatmul.mubr.bf16.vlgmr.msra.gmra.mxu1 %v12733_v53  ;;  %v12709_v35 = vrot.slane %v8983_v6, 10  ;;  %v9032_v46 = vrot.slane %v9030_v10, 4  ;;  %v12710_v38 = vrot.slane %v8985_v47, 10  ;;  %v9041_v23 = vsel %vm18076_vm10, %v9039_v49, %v9040_v43  ;;  %v14901_v6 = vld [vmem:[#allocation7 + $0xe8] sm:$0xff]   ;;  %v14902_v43 = vld [vmem:[#allocation7 + $0xb0] sm:$0xff]  }
 0x55c   :  { %8937 = vst [vmem:[#allocation4 + $0x54] sm:$0xc] %v8880_v41  ;;  %v8887_v17 = vrot.slane %v12970_v42, 6  ;;  %v12968_v24 = vpack.c.bf16 %v8805_v1, %v8805_v1  ;;  %v8810_v36 = vmul.f32 %v15263_v11, %v19559_v18  ;;  %14331 = vmatprep.mubr.bf16.mxu1 %v12734_v57  ;;  %14376 = vmatpush3.bf16.msra.mxu1 %v19499_v9  ;;  %v8881_v29 = vrot.slane %v8880_v41, 4  ;;  %v8955_v41 = vld [vmem:[#allocation4 + $0x24] sm:$0xf] }
 0x55d   :  { %v15265_v12 = vpop.eup %15264  ;;  %14377 = vmatprep.subr.bf16.mxu1 %v14898_v20  ;;  %v9031_v25 = vsel %vm18076_vm10, %v12709_v35, %v9030_v10  ;;  %v9034_v47 = vsel %vm18076_vm10, %v9032_v46, %v9033_v32  ;;  %v9038_v30 = vsel %vm18076_vm10, %v12710_v38, %v9037_v33  ;;  %v19640_v33 = vsel %vm18076_vm10, %v12712_v7, %v9051_v44  ;;  %v8987_v11 = vld [vmem:[#allocation4 + $0x24] sm:$0xc]  ;;  %v14903_v7 = vld [vmem:[#allocation7 + $0xe0] sm:$0xff]  }
 0x55e   :  { %v8888_v18 = vsel %vm18076_vm10, %v8886_v62, %v8887_v17  ;;  %v8889_v9 = vrot.slane %v8887_v17, 4  ;;  %v8882_v28 = vrot.slane %v12968_v24, 6  ;;  %v12973_v2 = vpack.c.bf16 %v8810_v36, %v8810_v36 }
 0x55f   :  { %v15267_v53 = vpop.eup %15266  ;;  %8941 = vst [vmem:[#allocation4 + $0x64] sm:$0xf] %v8888_v18  ;;  %v8808_v39 = vmul.f32 %v15265_v12, %v19563_v14  ;;  %v12717_v49 = vcombine.low %v9031_v25, %v9034_v47  ;;  %v12718_v10 = vcombine.low %v9038_v30, %v9041_v23  ;;  %v19632_v42 = vld [vmem:[#allocation4 + $0x28] sm:$0xf]  ;;  %v12711_v36 = vrot.slane %v8987_v11, 10  ;;  %v14904_v12 = vld [vmem:[#allocation7 + $0xa8] sm:$0xff]  }
 0x560   :  { %8942 = vst [vmem:[#allocation4 + $0x68] sm:$0x3] %v8889_v9  ;;  %v8883_v32 = vsel %vm18076_vm10, %v8881_v29, %v8882_v28  ;;  %v8884_v1 = vrot.slane %v8882_v28, 4  ;;  %v8895_v57 = vrot.slane %v12973_v2, 6  ;;  %v8811_v14 = vmul.f32 %v15267_v53, %v19567_v54  ;;  %14378 = vmatpush3.bf16.msra.mxu1 %v14898_v20  ;;  %v8988_v62 = vld [vmem:[#allocation4 + $0x2c] sm:$0x3] }
 0x561   :  { %v15269_v35 = vpop.eup %15268  ;;  %8938 = vst [vmem:[#allocation4 + $0x58] sm:$0xf] %v8883_v32  ;;  %v12971_v46 = vpack.c.bf16 %v8808_v39, %v8808_v39  ;;  %14296 = vmatmul.mubr.bf16.vlgmr.msra.gmra.mxu0 %v12717_v49  ;;  %v9044_v19 = vrot.slane %v19632_v42, 6  ;;  %v12735_v44 = vcombine.low %v8955_v41, %v19632_v42  ;;  %14379 = vmatprep.subr.bf16.mxu1 %v14901_v6  ;;  %v9047_v38 = vrot.slane %v8988_v62, 6  ;;  %v8961_v28 = vld [vmem:[#allocation4 + $0x60] sm:$0xf] }
 0x562   :  { %8939 = vst [vmem:[#allocation4 + $0x5c] sm:$0x3] %v8884_v1  ;;  %8946 = vst [vmem:[#allocation4 + $0x78] sm:$0xc] %v8895_v57  ;;  %v12974_v17 = vpack.c.bf16 %v8811_v14, %v8811_v14  ;;  %v8809_v24 = vmul.f32 %v15269_v35, %v19571_v48  ;;  %14299 = vmatprep.mubr.bf16.mxu0 %v12718_v10  ;;  %14344 = vmatpush3.bf16.msra.mxu0 %v19502_v13  ;;  %v8896_v29 = vrot.slane %v8895_v57, 4  ;;  %v14909_v53 = vld [vmem:[#allocation7 + $0xa0] sm:$0xff]  }
 0x563   :  { %v9055_v54 = vsel %vm18076_vm10, %v19606_v27, %v9054_v31  ;;  %v8890_v20 = vrot.slane %v12971_v46, 6  ;;  %14332 = vmatmul.mubr.bf16.gmra.mxu1 %v12735_v44  ;;  %14345 = vmatprep.subr.bf16.mxu0 %v14902_v43  ;;  %v9046_v23 = vrot.slane %v9044_v19, 4  ;;  %v9045_v48 = vsel %vm18076_vm10, %v12711_v36, %v9044_v19  ;;  %v14907_v31 = vld [vmem:[#allocation7 + $0xd8] sm:$0xff]   ;;  %v8991_v39 = vld [vmem:[#allocation4 + $0x54] sm:$0xc]  ;;  %v14910_v1 = vld [vmem:[#allocation7 + $0xd0] sm:$0xff]  }
 0x564   :  { %v8897_v25 = vrot.slane %v12974_v17, 6  ;;  %v12972_v47 = vpack.c.bf16 %v8809_v24, %v8809_v24  ;;  %14380 = vmatpush3.bf16.msra.mxu1 %v14901_v6  ;;  %14335 = vmatprep.mubr.bf16.mxu1 %v12736_v8  ;;  %v12720_v27 = vcombine.low %v19640_v33, %v9055_v54  ;;  %v8959_v8 = vld [vmem:[#allocation4 + $0x54] sm:$0xf]  ;;  %v8993_v46 = vld [vmem:[#allocation4 + $0x60] sm:$0xc]  ;;  %v12713_v19 = vrot.slane %v8991_v39, 10 }
 0x565   :  { %v8891_v13 = vrot.slane %v8890_v20, 4  ;;  %8943 = vst [vmem:[#allocation4 + $0x6c] sm:$0xc] %v8890_v20  ;;  %14381 = vmatprep.subr.bf16.mxu1 %v14903_v7  ;;  %v9048_v60 = vsel %vm18076_vm10, %v9046_v23, %v9047_v38  ;;  %v12714_v24 = vrot.slane %v8993_v46, 10  ;;  %v14913_v20 = vld [vmem:[#allocation7 + $0xc8] sm:$0xff]   ;;  %v14919_v39 = vld [vmem:[#allocation7 + $0x178] sm:$0xff]  }
 0x566   :  { %v8898_v30 = vsel %vm18076_vm10, %v8896_v29, %v8897_v25  ;;  %v8899_v6 = vrot.slane %v8897_v25, 4  ;;  %v8892_v18 = vrot.slane %v12972_v47, 6  ;;  %14346 = vmatpush3.bf16.msra.mxu0 %v14902_v43  ;;  %v12719_v3 = vcombine.low %v9045_v48, %v9048_v60  ;;  %v19664_v9 = vld [vmem:[#allocation4 + $0x64] sm:$0xf] }
 0x567   :  { %8947 = vst [vmem:[#allocation4 + $0x7c] sm:$0xf] %v8898_v30  ;;  %14347 = vmatprep.subr.bf16.mxu0 %v14904_v12  ;;  %v9065_v2 = vrot.slane %v19664_v9, 6  ;;  %v8994_v49 = vld [vmem:[#allocation4 + $0x68] sm:$0x3]  ;;  %v12738_v62 = vcombine.low %v8961_v28, %v19664_v9  ;;  %v14914_v29 = vld [vmem:[#allocation7 + $0x90] sm:$0xff]  }
 0x568   :  { %8948 = vst [vmem:[#allocation4 + $0x80] sm:$0x3] %v8899_v6  ;;  %v8893_v10 = vsel %vm18076_vm10, %v8891_v13, %v8892_v18  ;;  %v8894_v41 = vrot.slane %v8892_v18, 4  ;;  %14382 = vmatpush3.bf16.msra.mxu1 %v14903_v7  ;;  %v19669_v33 = vld [vmem:[#allocation4 + $0x58] sm:$0xf]  ;;  %v9068_v11 = vrot.slane %v8994_v49, 6 }
 0x569   :  { %8944 = vst [vmem:[#allocation4 + $0x70] sm:$0xf] %v8893_v10  ;;  %14300 = vmatmul.mubr.bf16.gmra.mxu0 %v12719_v3  ;;  %v9058_v43 = vrot.slane %v19669_v33, 6  ;;  %v12737_v32 = vcombine.low %v8959_v8, %v19669_v33  ;;  %14383 = vmatprep.subr.bf16.mxu1 %v14907_v31  ;;  %v8992_v57 = vld [vmem:[#allocation4 + $0x5c] sm:$0x3]  ;;  %v9067_v14 = vrot.slane %v9065_v2, 4  ;;  %v9066_v23 = vsel %vm18076_vm10, %v12714_v24, %v9065_v2 }
 0x56a   :  { %8945 = vst [vmem:[#allocation4 + $0x74] sm:$0x3] %v8894_v41  ;;  %14348 = vmatpush3.bf16.msra.mxu0 %v14904_v12  ;;  %14303 = vmatprep.mubr.bf16.mxu0 %v12720_v27  ;;  %v9061_v35 = vrot.slane %v8992_v57, 6  ;;  %v14911_v7 = vld [vmem:[#allocation7 + $0x98] sm:$0xff]   ;;  %v14917_v8 = vld [vmem:[#allocation7 + $0x88] sm:$0xff]   ;;  %v14920_v41 = vld [vmem:[#allocation7 + $0x80] sm:$0xff]  }
 0x56b   :  { %14336 = vmatmul.mubr.bf16.gmra.mxu1 %v12737_v32  ;;  %14349 = vmatprep.subr.bf16.mxu0 %v14909_v53  ;;  %v9060_v44 = vrot.slane %v9058_v43, 4  ;;  %v9059_v38 = vsel %vm18076_vm10, %v12713_v19, %v9058_v43  ;;  %v9069_v54 = vsel %vm18076_vm10, %v9067_v14, %v9068_v11  ;;  %v14915_v30 = vld [vmem:[#allocation4 + $0xc] sm:$0xff]   ;;  %v9456_v28 = vld [vmem:[#allocation4 + $0x8] sm:$0xf]  ;;  %v14918_v43 = vld [vmem:[#allocation4 + $0x18] sm:$0xff]  }
 0x56c   :  { %14339 = vmatprep.mubr.bf16.mxu1 %v12738_v62  ;;  %14384 = vmatpush3.bf16.msra.mxu1 %v14907_v31  ;;  %v8963_v12 = vld [vmem:[#allocation4 + $0x6c] sm:$0xf]  ;;  %v12722_v25 = vcombine.low %v9066_v23, %v9069_v54  ;;  %v14916_v31 = vld [vmem:[#allocation7 + $0xc0] sm:$0xff]   ;;  %v12748_v10 = vcombine.low %v19491_v55, %v9456_v28  ;;  %v14923_v32 = vld [vmem:[#allocation7 + $0x170] sm:$0xff]  }
 0x56d   :  { %14385 = vmatprep.subr.bf16.mxu1 %v14910_v1  ;;  %v9062_v17 = vsel %vm18076_vm10, %v9060_v44, %v9061_v35  ;;  %v8995_v13 = vld [vmem:[#allocation4 + $0x6c] sm:$0xc]  ;;  %v9457_v14 = vld [vmem:[#allocation4 + $0x14] sm:$0xf]  ;;  %v9458_v11 = vld [vmem:[#allocation4 + $0x20] sm:$0xf] }
 0x56e   :  { %14350 = vmatpush3.bf16.msra.mxu0 %v14909_v53  ;;  %v12721_v36 = vcombine.low %v9059_v38, %v9062_v17  ;;  %v12715_v18 = vrot.slane %v8995_v13, 10  ;;  %v14925_v57 = vld [vmem:[#allocation7 + $0x138] sm:$0xff]   ;;  %v14928_v62 = vld [vmem:[#allocation7 + $0x168] sm:$0xff]   ;;  %v12749_v55 = vcombine.low %v19610_v50, %v9457_v14  ;;  %v14930_v35 = vld [vmem:[#allocation7 + $0x130] sm:$0xff]   ;;  %v12750_v46 = vcombine.low %v19600_v15, %v9458_v11 }
 0x56f   :  { %14351 = vmatprep.subr.bf16.mxu0 %v14911_v7  ;;  %v14931_v19 = vld [vmem:[#allocation7 + $0x160] sm:$0xff]   ;;  %v14933_v38 = vld [vmem:[#allocation7 + $0x128] sm:$0xff]   ;;  %v9459_v24 = vld [vmem:[#allocation4 + $0x2c] sm:$0xf] }
 0x570   :  { %14386 = vmatpush3.bf16.msra.mxu1 %v14910_v1  ;;  %v19682_v47 = vld [vmem:[#allocation4 + $0x70] sm:$0xf]  ;;  %v14921_v1 = vld [vmem:[#allocation4 + $0x24] sm:$0xff]   ;;  %v12751_v15 = vcombine.low %v19632_v42, %v9459_v24  ;;  %v9461_v13 = vld [vmem:[#allocation4 + $0x5c] sm:$0xf] }
 0x571   :  { %14304 = vmatmul.mubr.bf16.gmra.mxu0 %v12721_v36  ;;  %v9072_v48 = vrot.slane %v19682_v47, 6  ;;  %v12739_v60 = vcombine.low %v8963_v12, %v19682_v47  ;;  %14387 = vmatprep.subr.bf16.mxu1 %v14913_v20  ;;  %v8996_v27 = vld [vmem:[#allocation4 + $0x74] sm:$0x3]  ;;  %v9460_v17 = vld [vmem:[#allocation4 + $0x50] sm:$0xf]  ;;  %v14935_v50 = vld [vmem:[#allocation7 + $0x158] sm:$0xff]  }
 0x572   :  { %14307 = vmatprep.mubr.bf16.mxu0 %v12722_v25  ;;  %14352 = vmatpush3.bf16.msra.mxu0 %v14911_v7  ;;  %v9075_v6 = vrot.slane %v8996_v27, 6  ;;  %v14927_v44 = vld [vmem:[#allocation4 + $0x30] sm:$0xff]   ;;  %v12752_v54 = vcombine.low %v19585_v40, %v9460_v17  ;;  %v14934_v36 = vld [vmem:[#allocation4 + $0x60] sm:$0xff]   ;;  %v14941_v25 = vld [vmem:[#allocation7 + $0x118] sm:$0xff]  }
 0x573   :  { %14340 = vmatmul.mubr.bf16.gmra.mxu1 %v12739_v60  ;;  %14353 = vmatprep.subr.bf16.mxu0 %v14914_v29  ;;  %v9074_v3 = vrot.slane %v9072_v48, 4  ;;  %v9073_v2 = vsel %vm18076_vm10, %v12715_v18, %v9072_v48  ;;  %v14929_v7 = vld [vmem:[#allocation4 + $0x54] sm:$0xff]   ;;  %v14939_v23 = vld [vmem:[#allocation7 + $0x150] sm:$0xff]   ;;  %v14936_v12 = vld [vmem:[#allocation4 + $0x6c] sm:$0xff]  }
 0x574   :  { %14388 = vmatpush3.bf16.msra.mxu1 %v14913_v20  ;;  %14391 = vmatprep.mubr.bf16.mxu1 %v14915_v30  ;;  %v14937_v20 = vld [vmem:[#allocation7 + $0x120] sm:$0xff]   ;;  %v9462_v40 = vld [vmem:[#allocation4 + $0x68] sm:$0xf]  ;;  %v14944_v42 = vld [vmem:[#allocation7 + $0x148] sm:$0xff]  }
 0x575   :  { %14389 = vmatprep.subr.bf16.mxu1 %v14916_v31  ;;  %v9076_v53 = vsel %vm18076_vm10, %v9074_v3, %v9075_v6  ;;  %v9918_v60 = vld [vmem:[#allocation4 + $0x14] sm:$0x3]  ;;  %v14945_v27 = vld [vmem:[#allocation7 + $0x110] sm:$0xff]   ;;  %v12754_v6 = vcombine.low %v19664_v9, %v9462_v40  ;;  %v14943_v18 = vld [vmem:[#allocation4 + $0x78] sm:$0xff]  }
 0x576   :  { %14354 = vmatpush3.bf16.msra.mxu0 %v14914_v29  ;;  %v12723_v49 = vcombine.low %v9073_v2, %v9076_v53  ;;  %v9917_v29 = vld [vmem:[#allocation4 + $0x10] sm:$0xf]  ;;  %v10230_v30 = vld [vmem:[#allocation4 + $0x14] sm:$0xf]  ;;  %v9969_v28 = vrot.slane %v9918_v60, 6 }
 0x577   :  { %14355 = vmatprep.subr.bf16.mxu0 %v14917_v8  ;;  %v9966_v48 = vrot.slane %v9917_v29, 6  ;;  %v9920_v2 = vld [vmem:[#allocation4 + $0x1c] sm:$0xf]  ;;  %v12804_v53 = vcombine.low %v9917_v29, %v10230_v30  ;;  %v10231_v14 = vld [vmem:[#allocation4 + $0x20] sm:$0xf] }
 0x578   :  { %14390 = vmatpush3.bf16.msra.mxu1 %v14916_v31  ;;  %v12753_v31 = vcombine.low %v19669_v33, %v9461_v13  ;;  %v14949_v33 = vld [vmem:[#allocation7 + $0x108] sm:$0xff]   ;;  %v9924_v11 = vld [vmem:[#allocation4 + $0x2c] sm:$0x3]  ;;  %v12805_v17 = vcombine.low %v9920_v2, %v10231_v14 }
 0x579   :  { %14308 = vmatmul.mubr.bf16.gmra.mxu0 %v12723_v49  ;;  %14439 = vmatprep.subr.bf16.mxu1 %v14919_v39  ;;  %v9968_v3 = vrot.slane %v9966_v48, 4  ;;  %v9923_v49 = vld [vmem:[#allocation4 + $0x28] sm:$0xf]  ;;  %v9927_v60 = vld [vmem:[#allocation4 + $0x38] sm:$0x3] }
 0x57a   :  { %14356 = vmatpush3.bf16.msra.mxu0 %v14917_v8  ;;  %14359 = vmatprep.mubr.bf16.mxu0 %v12748_v10  ;;  %v14947_v8 = vld [vmem:[#allocation7 + $0x140] sm:$0xff]   ;;  %v9930_v30 = vld [vmem:[#allocation4 + $0x5c] sm:$0x3] }
 0x57b   :  { %14392 = vmatmul.mubr.bf16.vlgmr.msra.gmra.mxu1 %v14918_v43  ;;  %14357 = vmatprep.subr.bf16.mxu0 %v14920_v41  ;;  %v9463_v10 = vld [vmem:[#allocation4 + $0x74] sm:$0xf]  ;;  %v9970_v43 = vsel %vm18076_vm10, %v9968_v3, %v9969_v28  ;;  %v10234_v3 = vld [vmem:[#allocation4 + $0x5c] sm:$0xf] }
 0x57c   :  { %14395 = vmatprep.mubr.bf16.mxu1 %v14921_v1  ;;  %14440 = vmatpush3.bf16.msra.mxu1 %v14919_v39  ;;  %v9916_v39 = vld [vmem:[#allocation4 + $0xc] sm:$0xc]  ;;  %v9980_v1 = vrot.slane %v9923_v49, 6 }
 0x57d   :  { %14441 = vmatprep.subr.bf16.mxu1 %v14923_v32  ;;  %v12780_v9 = vrot.slane %v9916_v39, 10  ;;  %v9990_v39 = vrot.slane %v9927_v60, 6 }
 0x57e   :  { %14358 = vmatpush3.bf16.msra.mxu0 %v14920_v41  ;;  %v9973_v41 = vrot.slane %v9920_v2, 6  ;;  %v9982_v24 = vrot.slane %v9980_v1, 4 }
 0x57f   :  { %14407 = vmatprep.subr.bf16.mxu0 %v14925_v57 }
 0x580   :  { %14442 = vmatpush3.bf16.msra.mxu1 %v14923_v32  ;;  %v14951_v32 = vld [vmem:[#allocation7 + $0x1f8] sm:$0xff]  }
 0x581   :  { %14360 = vmatmul.mubr.bf16.vlgmr.msra.gmra.mxu0 %v12749_v55  ;;  %14443 = vmatprep.subr.bf16.mxu1 %v14928_v62  ;;  %v9967_v55 = vsel %vm18076_vm10, %v12780_v9, %v9966_v48  ;;  %v19717_v9 = vld [vmem:[#allocation4 + $0x64] sm:$0xf] }
 0x582   :  { %14363 = vmatprep.mubr.bf16.mxu0 %v12750_v46  ;;  %14408 = vmatpush3.bf16.msra.mxu0 %v14925_v57  ;;  %v9921_v57 = vld [vmem:[#allocation4 + $0x20] sm:$0x3]  ;;  %v10232_v46 = vld [vmem:[#allocation4 + $0x2c] sm:$0xf] }
 0x583   :  { %14396 = vmatmul.mubr.bf16.gmra.mxu1 %v14927_v44  ;;  %14409 = vmatprep.subr.bf16.mxu0 %v14930_v35  ;;  %v9975_v44 = vrot.slane %v9973_v41, 4 }
 0x584   :  { %14399 = vmatprep.mubr.bf16.mxu1 %v14929_v7  ;;  %14444 = vmatpush3.bf16.msra.mxu1 %v14928_v62  ;;  %v12755_v62 = vcombine.low %v19682_v47, %v9463_v10  ;;  %v14954_v7 = vld [vmem:[#allocation7 + $0x1f0] sm:$0xff]   ;;  %v12806_v47 = vcombine.low %v9923_v49, %v10232_v46  ;;  %v9925_v10 = vld [vmem:[#allocation4 + $0x30] sm:$0xc] }
 0x585   :  { %14445 = vmatprep.subr.bf16.mxu1 %v14931_v19  ;;  %v12783_v14 = vrot.slane %v9925_v10, 10  ;;  %v14969_v10 = vld [vmem:[#allocation7 + $0x1c8] sm:$0xff]  }
 0x586   :  { %14410 = vmatpush3.bf16.msra.mxu0 %v14930_v35  ;;  %v14952_v35 = vld [vmem:[#allocation7 + $0x100] sm:$0xff]  }
 0x587   :  { %14411 = vmatprep.subr.bf16.mxu0 %v14933_v38 }
 0x588   :  { %14446 = vmatpush3.bf16.msra.mxu1 %v14931_v19  ;;  %v12788_v19 = vcombine.low %v9967_v55, %v9970_v43  ;;  %v19725_v55 = vld [vmem:[#allocation4 + $0x1c] sm:$0xf] }
 0x589   :  { %14364 = vmatmul.mubr.bf16.gmra.mxu0 %v12751_v15  ;;  %14447 = vmatprep.subr.bf16.mxu1 %v14935_v50  ;;  %v19702_v15 = vld [vmem:[#allocation4 + $0x34] sm:$0xf] }
 0x58a   :  { %14412 = vmatpush3.bf16.msra.mxu0 %v14933_v38  ;;  %14367 = vmatprep.mubr.bf16.mxu0 %v12752_v54  ;;  %v9976_v38 = vrot.slane %v9921_v57, 6  ;;  %v9983_v54 = vrot.slane %v9924_v11, 6  ;;  %v14961_v57 = vld [vmem:[#allocation7 + $0x1a8] sm:$0xff]  }
 0x58b   :  { %14400 = vmatmul.mubr.bf16.gmra.mxu1 %v14934_v36  ;;  %14413 = vmatprep.subr.bf16.mxu0 %v14937_v20  ;;  %v19704_v36 = vld [vmem:[#allocation4 + $0x58] sm:$0xf] }
 0x58c   :  { %14403 = vmatprep.mubr.bf16.mxu1 %v14936_v12  ;;  %14448 = vmatpush3.bf16.msra.mxu1 %v14935_v50  ;;  %v9919_v50 = vld [vmem:[#allocation4 + $0x18] sm:$0xc]  ;;  %v9977_v29 = vsel %vm18076_vm10, %v9975_v44, %v9976_v38  ;;  %v9984_v40 = vsel %vm18076_vm10, %v9982_v24, %v9983_v54  ;;  %v9994_v48 = vrot.slane %v19704_v36, 6  ;;  %v12808_v43 = vcombine.low %v19704_v36, %v10234_v3  ;;  %v9936_v24 = vld [vmem:[#allocation4 + $0x74] sm:$0x3] }
 0x58d   :  { %14449 = vmatprep.subr.bf16.mxu1 %v14939_v23  ;;  %v12781_v12 = vrot.slane %v9919_v50, 10  ;;  %v10011_v60 = vrot.slane %v9936_v24, 6 }
 0x58e   :  { %14414 = vmatpush3.bf16.msra.mxu0 %v14937_v20  ;;  %v9922_v20 = vld [vmem:[#allocation4 + $0x24] sm:$0xc] }
 0x58f   :  { %14415 = vmatprep.subr.bf16.mxu0 %v14941_v25  ;;  %v12782_v13 = vrot.slane %v9922_v20, 10  ;;  %v10749_v20 = vrot.slane %v19725_v55, 6 }
 0x590   :  { %14450 = vmatpush3.bf16.msra.mxu1 %v14939_v23  ;;  %v14955_v23 = vld [vmem:[#allocation7 + $0x1b8] sm:$0xff]  }
 0x591   :  { %14368 = vmatmul.mubr.bf16.gmra.mxu0 %v12753_v31  ;;  %14451 = vmatprep.subr.bf16.mxu1 %v14944_v42  ;;  %v9974_v31 = vsel %vm18076_vm10, %v12781_v12, %v9973_v41  ;;  %v9997_v41 = vrot.slane %v9930_v30, 6  ;;  %v14966_v12 = vld [vmem:[#allocation7 + $0x1d0] sm:$0xff]   ;;  %v9934_v30 = vld [vmem:[#allocation4 + $0x6c] sm:$0xc] }
 0x592   :  { %14371 = vmatprep.mubr.bf16.mxu0 %v12754_v6  ;;  %14416 = vmatpush3.bf16.msra.mxu0 %v14941_v25  ;;  %v9987_v25 = vrot.slane %v19702_v15, 6  ;;  %v12789_v6 = vcombine.low %v9974_v31, %v9977_v29  ;;  %v19736_v31 = vld [vmem:[#allocation4 + $0x7c] sm:$0xf] }
 0x593   :  { %14404 = vmatmul.mubr.bf16.gmra.mxu1 %v14943_v18  ;;  %14417 = vmatprep.subr.bf16.mxu0 %v14945_v27  ;;  %v9981_v18 = vsel %vm18076_vm10, %v12782_v13, %v9980_v1  ;;  %v19720_v1 = vld [vmem:[#allocation4 + $0x70] sm:$0xf]  ;;  %v10701_v13 = vld [vmem:[#allocation4 + $0x20] sm:$0x3] }
 0x594   :  { %14452 = vmatpush3.bf16.msra.mxu1 %v14944_v42  ;;  %14455 = vmatprep.mubr.bf16.mxu1 %v12804_v53  ;;  %v14957_v42 = vld [vmem:[#allocation7 + $0x1e8] sm:$0xff]   ;;  %v12790_v28 = vcombine.low %v9981_v18, %v9984_v40  ;;  %v9989_v2 = vrot.slane %v9987_v25, 4  ;;  %v14960_v53 = vld [vmem:[#allocation7 + $0x1e0] sm:$0xff]   ;;  %v10008_v44 = vrot.slane %v19720_v1, 6  ;;  %v9988_v38 = vsel %vm18076_vm10, %v12783_v14, %v9987_v25 }
 0x595   :  { %14453 = vmatprep.subr.bf16.mxu1 %v14947_v8  ;;  %v10751_v18 = vrot.slane %v10749_v20, 4  ;;  %v10752_v3 = vrot.slane %v10701_v13, 6 }
 0x596   :  { %14418 = vmatpush3.bf16.msra.mxu0 %v14945_v27  ;;  %v10233_v27 = vld [vmem:[#allocation4 + $0x38] sm:$0xf]  ;;  %v9991_v11 = vsel %vm18076_vm10, %v9989_v2, %v9990_v39  ;;  %v10010_v40 = vrot.slane %v10008_v44, 4  ;;  %v19744_v39 = vld [vmem:[#allocation4 + $0x34] sm:$0xf] }
 0x597   :  { %14419 = vmatprep.subr.bf16.mxu0 %v14949_v33  ;;  %v12807_v49 = vcombine.low %v19702_v15, %v10233_v27  ;;  %v12791_v50 = vcombine.low %v9988_v38, %v9991_v11  ;;  %v10236_v15 = vld [vmem:[#allocation4 + $0x74] sm:$0xf]  ;;  %v14967_v27 = vld [vmem:[#allocation7 + $0x198] sm:$0xff]   ;;  %v14970_v11 = vld [vmem:[#allocation7 + $0x190] sm:$0xff]  }
 0x598   :  { %14454 = vmatpush3.bf16.msra.mxu1 %v14947_v8  ;;  %v14959_v8 = vld [vmem:[#allocation7 + $0x1b0] sm:$0xff]  }
 0x599   :  { %14372 = vmatmul.mubr.bf16.gmra.mxu0 %v12755_v62  ;;  %14503 = vmatprep.subr.bf16.mxu1 %v14951_v32  ;;  %v10001_v62 = vrot.slane %v19717_v9, 6 }
 0x59a   :  { %14420 = vmatpush3.bf16.msra.mxu0 %v14949_v33  ;;  %14423 = vmatprep.mubr.bf16.mxu0 %v12788_v19  ;;  %v9996_v33 = vrot.slane %v9994_v48, 4  ;;  %v14963_v19 = vld [vmem:[#allocation7 + $0x1d8] sm:$0xff]  }
 0x59b   :  { %14456 = vmatmul.mubr.bf16.vlgmr.msra.gmra.mxu1 %v12805_v17  ;;  %14421 = vmatprep.subr.bf16.mxu0 %v14952_v35  ;;  %v10235_v17 = vld [vmem:[#allocation4 + $0x68] sm:$0xf] }
 0x59c   :  { %14459 = vmatprep.mubr.bf16.mxu1 %v12806_v47  ;;  %14504 = vmatpush3.bf16.msra.mxu1 %v14951_v32  ;;  %v9928_v32 = vld [vmem:[#allocation4 + $0x54] sm:$0xc]  ;;  %v9998_v46 = vsel %vm18076_vm10, %v9996_v33, %v9997_v41  ;;  %v12809_v25 = vcombine.low %v19717_v9, %v10235_v17  ;;  %v10012_v33 = vsel %vm18076_vm10, %v10010_v40, %v10011_v60  ;;  %v9939_v41 = vld [vmem:[#allocation4 + $0x80] sm:$0x3]  ;;  %v10707_v17 = vld [vmem:[#allocation4 + $0x38] sm:$0x3] }
 0x59d   :  { %14505 = vmatprep.subr.bf16.mxu1 %v14954_v7  ;;  %v14965_v47 = vld [vmem:[#allocation7 + $0x1a0] sm:$0xff]  }
 0x59e   :  { %14422 = vmatpush3.bf16.msra.mxu0 %v14952_v35  ;;  %v12784_v35 = vrot.slane %v9928_v32, 10 }
 0x59f   :  { %14471 = vmatprep.subr.bf16.mxu0 %v14955_v23 }
 0x5a0   :  { %14506 = vmatpush3.bf16.msra.mxu1 %v14954_v7  ;;  %v9933_v7 = vld [vmem:[#allocation4 + $0x68] sm:$0x3]  ;;  %v9995_v54 = vsel %vm18076_vm10, %v12784_v35, %v9994_v48  ;;  %v12810_v48 = vcombine.low %v19720_v1, %v10236_v15  ;;  %v10753_v35 = vsel %vm18076_vm10, %v10751_v18, %v10752_v3  ;;  %v19759_v15 = vld [vmem:[#allocation4 + $0x40] sm:$0xf] }
 0x5a1   :  { %14424 = vmatmul.mubr.bf16.vlgmr.msra.gmra.mxu0 %v12789_v6  ;;  %14507 = vmatprep.subr.bf16.mxu1 %v14957_v42  ;;  %v12792_v36 = vcombine.low %v9995_v54, %v9998_v46  ;;  %v10004_v29 = vrot.slane %v9933_v7, 6  ;;  %v10699_v6 = vld [vmem:[#allocation4 + $0x18] sm:$0xc]  ;;  %v10704_v46 = vld [vmem:[#allocation4 + $0x2c] sm:$0x3]  ;;  %v10770_v60 = vrot.slane %v19759_v15, 6 }
 0x5a2   :  { %14427 = vmatprep.mubr.bf16.mxu0 %v12790_v28  ;;  %14472 = vmatpush3.bf16.msra.mxu0 %v14955_v23  ;;  %v10003_v23 = vrot.slane %v10001_v62, 4  ;;  %v12836_v32 = vrot.slane %v10699_v6, 10  ;;  %v9937_v54 = vld [vmem:[#allocation4 + $0x78] sm:$0xc] }
 0x5a3   :  { %14460 = vmatmul.mubr.bf16.gmra.mxu1 %v12807_v49  ;;  %14473 = vmatprep.subr.bf16.mxu0 %v14959_v8  ;;  %v12786_v49 = vrot.slane %v9934_v30, 10  ;;  %v12787_v40 = vrot.slane %v9937_v54, 10 }
 0x5a4   :  { %14463 = vmatprep.mubr.bf16.mxu1 %v12808_v43  ;;  %14508 = vmatpush3.bf16.msra.mxu1 %v14957_v42  ;;  %v9931_v42 = vld [vmem:[#allocation4 + $0x60] sm:$0xc]  ;;  %v10005_v2 = vsel %vm18076_vm10, %v10003_v23, %v10004_v29  ;;  %v10759_v23 = vrot.slane %v10704_v46, 6  ;;  %v10702_v29 = vld [vmem:[#allocation4 + $0x24] sm:$0xc] }
 0x5a5   :  { %14509 = vmatprep.subr.bf16.mxu1 %v14960_v53  ;;  %v12785_v28 = vrot.slane %v9931_v42, 10  ;;  %v10237_v43 = vld [vmem:[#allocation4 + $0x80] sm:$0xf]  ;;  %v10009_v14 = vsel %vm18076_vm10, %v12786_v49, %v10008_v44  ;;  %v14971_v44 = vld [vmem:[#allocation7 + $0x1c0] sm:$0xff]   ;;  %v12837_v6 = vrot.slane %v10702_v29, 10 }
 0x5a6   :  { %14474 = vmatpush3.bf16.msra.mxu0 %v14959_v8  ;;  %v19739_v8 = vld [vmem:[#allocation4 + $0x28] sm:$0xf]  ;;  %v12794_v7 = vcombine.low %v10009_v14, %v10012_v33  ;;  %v12811_v24 = vcombine.low %v19736_v31, %v10237_v43  ;;  %v10705_v42 = vld [vmem:[#allocation4 + $0x30] sm:$0xc] }
 0x5a7   :  { %14475 = vmatprep.subr.bf16.mxu0 %v14961_v57  ;;  %v10002_v9 = vsel %vm18076_vm10, %v12785_v28, %v10001_v62  ;;  %v10756_v1 = vrot.slane %v19739_v8, 6  ;;  %v10018_v62 = vrot.slane %v9939_v41, 6  ;;  %v14974_v28 = vld [vmem:[#allocation7 + $0x180] sm:$0xff]  }
 0x5a8   :  { %14510 = vmatpush3.bf16.msra.mxu1 %v14960_v53  ;;  %v10015_v53 = vrot.slane %v19736_v31, 6  ;;  %v19764_v31 = vld [vmem:[#allocation4 + $0x64] sm:$0xf]  ;;  %v14977_v29 = vld [vmem:[#allocation4 + $0x30] sm:$0xff]  }
 0x5a9   :  { %14428 = vmatmul.mubr.bf16.gmra.mxu0 %v12791_v50  ;;  %14511 = vmatprep.subr.bf16.mxu1 %v14963_v19  ;;  %v10750_v50 = vsel %vm18076_vm10, %v12836_v32, %v10749_v20  ;;  %v10777_v33 = vrot.slane %v19764_v31, 6  ;;  %v10757_v41 = vsel %vm18076_vm10, %v12837_v6, %v10756_v1  ;;  %v10713_v32 = vld [vmem:[#allocation4 + $0x68] sm:$0x3] }
 0x5aa   :  { %14431 = vmatprep.mubr.bf16.mxu0 %v12792_v36  ;;  %14476 = vmatpush3.bf16.msra.mxu0 %v14961_v57  ;;  %v12793_v57 = vcombine.low %v10002_v9, %v10005_v2  ;;  %v10017_v38 = vrot.slane %v10015_v53, 4  ;;  %v10758_v36 = vrot.slane %v10756_v1, 4  ;;  %v10016_v30 = vsel %vm18076_vm10, %v12787_v40, %v10015_v53  ;;  %v19791_v40 = vld [vmem:[#allocation4 + $0x88] sm:$0xf] }
 0x5ab   :  { %14464 = vmatmul.mubr.bf16.gmra.mxu1 %v12809_v25  ;;  %14477 = vmatprep.subr.bf16.mxu0 %v14965_v47  ;;  %v10766_v25 = vrot.slane %v10707_v17, 6  ;;  %v12838_v2 = vrot.slane %v10705_v42, 10  ;;  %v10772_v53 = vrot.slane %v10770_v60, 4  ;;  %v10779_v46 = vrot.slane %v10777_v33, 4  ;;  %v10711_v17 = vld [vmem:[#allocation4 + $0x60] sm:$0xc] }
 0x5ac   :  { %14467 = vmatprep.mubr.bf16.mxu1 %v12810_v48  ;;  %14512 = vmatpush3.bf16.msra.mxu1 %v14963_v19  ;;  %v10763_v19 = vrot.slane %v19744_v39, 6  ;;  %v10019_v20 = vsel %vm18076_vm10, %v10017_v38, %v10018_v62  ;;  %v10708_v48 = vld [vmem:[#allocation4 + $0x3c] sm:$0xc]  ;;  %v10760_v18 = vsel %vm18076_vm10, %v10758_v36, %v10759_v23  ;;  %v19777_v38 = vld [vmem:[#allocation4 + $0x70] sm:$0xf]  ;;  %v12840_v54 = vrot.slane %v10711_v17, 10 }
 0x5ad   :  { %14513 = vmatprep.subr.bf16.mxu1 %v14966_v12  ;;  %v12795_v3 = vcombine.low %v10016_v30, %v10019_v20  ;;  %v12839_v9 = vrot.slane %v10708_v48, 10  ;;  %v14978_v36 = vld [vmem:[#allocation7 + $0x230] sm:$0xff]   ;;  %v10716_v23 = vld [vmem:[#allocation4 + $0x74] sm:$0x3]  ;;  %v14980_v48 = vld [vmem:[#allocation7 + $0x228] sm:$0xff]  }
 0x5ae   :  { %14478 = vmatpush3.bf16.msra.mxu0 %v14965_v47  ;;  %v12844_v47 = vcombine.low %v10750_v50, %v10753_v35  ;;  %v10765_v13 = vrot.slane %v10763_v19, 4  ;;  %v10764_v14 = vsel %vm18076_vm10, %v12838_v2, %v10763_v19  ;;  %v14976_v35 = vld [vmem:[#allocation7 + $0x238] sm:$0xff]   ;;  %v10784_v19 = vrot.slane %v19777_v38, 6  ;;  %v10720_v2 = vld [vmem:[#allocation4 + $0x84] sm:$0xc] }
 0x5af   :  { %14479 = vmatprep.subr.bf16.mxu0 %v14967_v27  ;;  %v10771_v1 = vsel %vm18076_vm10, %v12839_v9, %v10770_v60  ;;  %v14975_v50 = vld [vmem:[#allocation4 + $0x24] sm:$0xff]   ;;  %v10787_v60 = vrot.slane %v10716_v23, 6  ;;  %v11013_v23 = vld [vmem:[#allocation4 + $0x20] sm:$0xf] }
 0x5b0   :  { %14514 = vmatpush3.bf16.msra.mxu1 %v14966_v12  ;;  %v14972_v12 = vld [vmem:[#allocation7 + $0x188] sm:$0xff]   ;;  %v10767_v49 = vsel %vm18076_vm10, %v10765_v13, %v10766_v25  ;;  %v10719_v13 = vld [vmem:[#allocation4 + $0x80] sm:$0x3]  ;;  %v10778_v25 = vsel %vm18076_vm10, %v12840_v54, %v10777_v33  ;;  %v10786_v42 = vrot.slane %v10784_v19, 4  ;;  %v12860_v26 = vcombine.low %v19725_v55, %v11013_v23  ;;  %v11018_v55 = vld [vmem:[#allocation4 + $0x74] sm:$0xf] }
 0x5b1   :  { %14432 = vmatmul.mubr.bf16.gmra.mxu0 %v12793_v57  ;;  %14515 = vmatprep.subr.bf16.mxu1 %v14969_v10  ;;  %v12845_v57 = vcombine.low %v10757_v41, %v10760_v18  ;;  %v10794_v6 = vrot.slane %v10719_v13, 6  ;;  %v10717_v18 = vld [vmem:[#allocation4 + $0x78] sm:$0xc] }
 0x5b2   :  { %14435 = vmatprep.mubr.bf16.mxu0 %v12794_v7  ;;  %14480 = vmatpush3.bf16.msra.mxu0 %v14967_v27  ;;  %v10710_v27 = vld [vmem:[#allocation4 + $0x44] sm:$0x3]  ;;  %v10780_v7 = vrot.slane %v10713_v32, 6  ;;  %v12842_v41 = vrot.slane %v10717_v18, 10  ;;  %v14985_v54 = vld [vmem:[#allocation4 + $0x78] sm:$0xff]  }
 0x5b3   :  { %14468 = vmatmul.mubr.bf16.gmra.mxu1 %v12811_v24  ;;  %14481 = vmatprep.subr.bf16.mxu0 %v14970_v11  ;;  %v10773_v43 = vrot.slane %v10710_v27, 6  ;;  %v19783_v24 = vld [vmem:[#allocation4 + $0x7c] sm:$0xf]  ;;  %v10714_v27 = vld [vmem:[#allocation4 + $0x6c] sm:$0xc] }
 0x5b4   :  { %14516 = vmatpush3.bf16.msra.mxu1 %v14969_v10  ;;  %14519 = vmatprep.mubr.bf16.mxu1 %v12844_v47  ;;  %v14973_v10 = vld [vmem:[#allocation4 + $0x18] sm:$0xff]   ;;  %v10781_v47 = vsel %vm18076_vm10, %v10779_v46, %v10780_v7  ;;  %v12841_v33 = vrot.slane %v10714_v27, 10 }
 0x5b5   :  { %14517 = vmatprep.subr.bf16.mxu1 %v14971_v44  ;;  %v10774_v62 = vsel %vm18076_vm10, %v10772_v53, %v10773_v43  ;;  %v12848_v20 = vcombine.low %v10778_v25, %v10781_v47  ;;  %v14982_v53 = vld [vmem:[#allocation7 + $0x220] sm:$0xff]   ;;  %v14981_v43 = vld [vmem:[#allocation4 + $0x60] sm:$0xff]   ;;  %v14988_v47 = vld [vmem:[#allocation7 + $0x208] sm:$0xff]  }
 0x5b6   :  { %14482 = vmatpush3.bf16.msra.mxu0 %v14970_v11  ;;  %v12846_v11 = vcombine.low %v10764_v14, %v10767_v49  ;;  %v10722_v49 = vld [vmem:[#allocation4 + $0x8c] sm:$0x3]  ;;  %v10785_v32 = vsel %vm18076_vm10, %v12841_v33, %v10784_v19  ;;  %v11015_v13 = vld [vmem:[#allocation4 + $0x38] sm:$0xf] }
 0x5b7   :  { %14483 = vmatprep.subr.bf16.mxu0 %v14972_v12  ;;  %v14983_v19 = vld [vmem:[#allocation4 + $0x6c] sm:$0xff]  }
 0x5b8   :  { %14518 = vmatpush3.bf16.msra.mxu1 %v14971_v44  ;;  %v12847_v44 = vcombine.low %v10771_v1, %v10774_v62  ;;  %v14984_v1 = vld [vmem:[#allocation7 + $0x218] sm:$0xff]  }
 0x5b9   :  { %14436 = vmatmul.mubr.bf16.gmra.mxu0 %v12795_v3  ;;  %v10798_v3 = vrot.slane %v19791_v40, 6 }
 0x5ba   :  { %14484 = vmatpush3.bf16.msra.mxu0 %v14972_v12  ;;  %14487 = vmatprep.mubr.bf16.mxu0 %v14973_v10  ;;  %v10791_v12 = vrot.slane %v19783_v24, 6  ;;  %v10788_v10 = vsel %vm18076_vm10, %v10786_v42, %v10787_v60  ;;  %v11016_v42 = vld [vmem:[#allocation4 + $0x44] sm:$0xf] }
 0x5bb   :  { %14520 = vmatmul.mubr.bf16.vlgmr.msra.gmra.mxu1 %v12845_v57  ;;  %14485 = vmatprep.subr.bf16.mxu0 %v14974_v28  ;;  %v12843_v57 = vrot.slane %v10720_v2, 10  ;;  %v10800_v14 = vrot.slane %v10798_v3, 4  ;;  %v12863_v60 = vcombine.low %v19759_v15, %v11016_v42 }
 0x5bc   :  { %14523 = vmatprep.mubr.bf16.mxu1 %v12846_v11  ;;  %v10793_v30 = vrot.slane %v10791_v12, 4  ;;  %v10801_v11 = vrot.slane %v10722_v49, 6  ;;  %v10792_v46 = vsel %vm18076_vm10, %v12842_v41, %v10791_v12  ;;  %v14990_v12 = vld [vmem:[#allocation7 + $0x200] sm:$0xff]  }
 0x5bd   :  { %v10799_v62 = vsel %vm18076_vm10, %v12843_v57, %v10798_v3 }
 0x5be   :  { %14486 = vmatpush3.bf16.msra.mxu0 %v14974_v28  ;;  %v14979_v28 = vld [vmem:[#allocation4 + $0x3c] sm:$0xff]   ;;  %v10795_v9 = vsel %vm18076_vm10, %v10793_v30, %v10794_v6  ;;  %v10802_v17 = vsel %vm18076_vm10, %v10800_v14, %v10801_v11  ;;  %v12865_v6 = vcombine.low %v19777_v38, %v11018_v55 }
 0x5bf   :  { %14535 = vmatprep.subr.bf16.mxu0 %v14976_v35  ;;  %v12850_v7 = vcombine.low %v10792_v46, %v10795_v9  ;;  %v11019_v30 = vld [vmem:[#allocation4 + $0x80] sm:$0xf] }
 0x5c0   :  { %v12866_v18 = vcombine.low %v19783_v24, %v11019_v30 }
 0x5c1   :  { %14488 = vmatmul.mubr.bf16.vlgmr.msra.gmra.mxu0 %v14975_v50  ;;  %v14986_v50 = vld [vmem:[#allocation7 + $0x210] sm:$0xff]  }
 0x5c2   :  { %14491 = vmatprep.mubr.bf16.mxu0 %v14977_v29  ;;  %14536 = vmatpush3.bf16.msra.mxu0 %v14976_v35  ;;  %v12849_v35 = vcombine.low %v10785_v32, %v10788_v10  ;;  %v11014_v29 = vld [vmem:[#allocation4 + $0x2c] sm:$0xf] }
 0x5c3   :  { %14524 = vmatmul.mubr.bf16.gmra.mxu1 %v12847_v44  ;;  %14537 = vmatprep.subr.bf16.mxu0 %v14978_v36  ;;  %v12851_v44 = vcombine.low %v10799_v62, %v10802_v17  ;;  %v12861_v25 = vcombine.low %v19739_v8, %v11014_v29  ;;  %v11020_v8 = vld [vmem:[#allocation4 + $0x8c] sm:$0xf] }
 0x5c4   :  { %14527 = vmatprep.mubr.bf16.mxu1 %v12848_v20  ;;  %v12862_v20 = vcombine.low %v19744_v39, %v11015_v13  ;;  %v12867_v39 = vcombine.low %v19791_v40, %v11020_v8 }
 0x5c6   :  { %14538 = vmatpush3.bf16.msra.mxu0 %v14978_v36  ;;  %v14987_v36 = vld [vmem:[#allocation4 + $0x84] sm:$0xff]  }
 0x5c7   :  { %14539 = vmatprep.subr.bf16.mxu0 %v14980_v48 }
 0x5c9   :  { %14492 = vmatmul.mubr.bf16.gmra.mxu0 %v14979_v28 }
 0x5ca   :  { %14495 = vmatprep.mubr.bf16.mxu0 %v14981_v43  ;;  %14540 = vmatpush3.bf16.msra.mxu0 %v14980_v48  ;;  %v11017_v48 = vld [vmem:[#allocation4 + $0x68] sm:$0xf] }
 0x5cb   :  { %14528 = vmatmul.mubr.bf16.gmra.mxu1 %v12849_v35  ;;  %14541 = vmatprep.subr.bf16.mxu0 %v14982_v53  ;;  %v12864_v27 = vcombine.low %v19764_v31, %v11017_v48 }
 0x5cc   :  { %14531 = vmatprep.mubr.bf16.mxu1 %v12850_v7 }
 0x5ce   :  { %14542 = vmatpush3.bf16.msra.mxu0 %v14982_v53 }
 0x5cf   :  { %14543 = vmatprep.subr.bf16.mxu0 %v14984_v1 }
 0x5d1   :  { %14496 = vmatmul.mubr.bf16.gmra.mxu0 %v14983_v19 }
 0x5d2   :  { %14499 = vmatprep.mubr.bf16.mxu0 %v14985_v54  ;;  %14544 = vmatpush3.bf16.msra.mxu0 %v14984_v1 }
 0x5d3   :  { %14545 = vmatprep.subr.bf16.mxu0 %v14986_v50  ;;  %14532 = vmatmul.mubr.bf16.gmra.mxu1 %v12851_v44 }
 0x5d6   :  { %14546 = vmatpush3.bf16.msra.mxu0 %v14986_v50 }
 0x5d7   :  { %14547 = vmatprep.subr.bf16.mxu0 %v14988_v47 }
 0x5d9   :  { %14500 = vmatmul.mubr.bf16.gmra.mxu0 %v14987_v36 }
 0x5da   :  { %14548 = vmatpush3.bf16.msra.mxu0 %v14988_v47  ;;  %14551 = vmatprep.mubr.bf16.mxu0 %v12860_v26 }
 0x5db   :  { %14549 = vmatprep.subr.bf16.mxu0 %v14990_v12 }
 0x5de   :  { %14550 = vmatpush3.bf16.msra.mxu0 %v14990_v12 }
 0x5e1   :  { %14552 = vmatmul.mubr.bf16.vlgmr.msra.gmra.mxu0 %v12861_v25 }
 0x5e2   :  { %14555 = vmatprep.mubr.bf16.mxu0 %v12862_v20 }
 0x5e9   :  { %14556 = vmatmul.mubr.bf16.gmra.mxu0 %v12863_v60 }
 0x5ea   :  { %14559 = vmatprep.mubr.bf16.mxu0 %v12864_v27 }
 0x5f1   :  { %14560 = vmatmul.mubr.bf16.gmra.mxu0 %v12865_v6 }
 0x5f2   :  { %14563 = vmatprep.mubr.bf16.mxu0 %v12866_v18 }
 0x5f9   :  { %14564 = vmatmul.mubr.bf16.gmra.mxu0 %v12867_v39 }
 0x61b   :  { %v14329_v3 = vpop.f32.mrf.mxu1 }
 0x61d   :  { %v9393_v28 = vpop.f32.mrf.mxu1 }
 0x61f   :  { %v14330_v15 = vpop.f32.mrf.mxu1 }
 0x621   :  { %v14297_v2 = vpop.f32.mrf.mxu0  ;;  %v9396_v49 = vpop.f32.mrf.mxu1 }
 0x622   :  { %v9402_v31 = vadd.f32 %v14329_v3, %v14297_v2 }
 0x623   :  { %v9208_v33 = vpop.f32.mrf.mxu0  ;;  %v14333_v10 = vpop.f32.mrf.mxu1 }
 0x624   :  { %v9394_v41 = vadd.f32 %v9393_v28, %v9208_v33 }
 0x625   :  { %v14298_v9 = vpop.f32.mrf.mxu0  ;;  %v9409_v53 = vpop.f32.mrf.mxu1 }
 0x626   :  { %v9405_v38 = vadd.f32 %v14330_v15, %v14298_v9 }
 0x627   :  { %v9211_v43 = vpop.f32.mrf.mxu0  ;;  %v14334_v24 = vpop.f32.mrf.mxu1 }
 0x628   :  { %v9397_v32 = vadd.f32 %v9396_v49, %v9211_v43 }
 0x629   :  { %v14301_v57 = vpop.f32.mrf.mxu0  ;;  %v9412_v14 = vpop.f32.mrf.mxu1 }
 0x62a   :  { %v9418_v11 = vadd.f32 %v14333_v10, %v14301_v57 }
 0x62b   :  { %v9224_v40 = vpop.f32.mrf.mxu0  ;;  %v14337_v35 = vpop.f32.mrf.mxu1 }
 0x62c   :  { %v9410_v46 = vadd.f32 %v9409_v53, %v9224_v40 }
 0x62d   :  { %v14302_v7 = vpop.f32.mrf.mxu0  ;;  %v9425_v1 = vpop.f32.mrf.mxu1 }
 0x62e   :  { %v9421_v62 = vadd.f32 %v14334_v24, %v14302_v7 }
 0x62f   :  { %v9227_v17 = vpop.f32.mrf.mxu0  ;;  %v14338_v19 = vpop.f32.mrf.mxu1 }
 0x630   :  { %v9413_v50 = vadd.f32 %v9412_v14, %v9227_v17 }
 0x631   :  { %v14305_v44 = vpop.f32.mrf.mxu0  ;;  %v9428_v54 = vpop.f32.mrf.mxu1 }
 0x632   :  { %v9434_v47 = vadd.f32 %v14337_v35, %v14305_v44 }
 0x633   :  { %v9240_v36 = vpop.f32.mrf.mxu0  ;;  %v14341_v23 = vpop.f32.mrf.mxu1 }
 0x634   :  { %v9426_v12 = vadd.f32 %v9425_v1, %v9240_v36 }
 0x635   :  { %v14306_v26 = vpop.f32.mrf.mxu0  ;;  %v9441_v29 = vpop.f32.mrf.mxu1 }
 0x636   :  { %v9437_v13 = vadd.f32 %v14338_v19, %v14306_v26 }
 0x637   :  { %v9243_v25 = vpop.f32.mrf.mxu0  ;;  %v14342_v20 = vpop.f32.mrf.mxu1 }
 0x638   :  { %v9429_v42 = vadd.f32 %v9428_v54, %v9243_v25 }
 0x639   :  { %v14309_v60 = vpop.f32.mrf.mxu0  ;;  %v9444_v48 = vpop.f32.mrf.mxu1 }
 0x63a   :  { %v9450_v27 = vadd.f32 %v14341_v23, %v14309_v60 }
 0x63b   :  { %v9256_v55 = vpop.f32.mrf.mxu0  ;;  %v19814_v30 = vpop.f32.mrf.mxu1 }
 0x63c   :  { %v9442_v6 = vadd.f32 %v9441_v29, %v9256_v55 }
 0x63d   :  { %v14310_v18 = vpop.f32.mrf.mxu0  ;;  %v19816_v8 = vpop.f32.mrf.mxu1 }
 0x63e   :  { %v9453_v39 = vadd.f32 %v14342_v20, %v14310_v18 }
 0x63f   :  { %v9259_v3 = vpop.f32.mrf.mxu0  ;;  %v19818_v28 = vpop.f32.mrf.mxu1 }
 0x640   :  { %v9445_v15 = vadd.f32 %v9444_v48, %v9259_v3 }
 0x641   :  { %v14361_v2 = vpop.f32.mrf.mxu0  ;;  %v19820_v49 = vpop.f32.mrf.mxu1 }
 0x642   :  { %v19822_v33 = vadd.f32 %v14361_v2, %v9402_v31 }
 0x643   :  { %v9595_v10 = vpop.f32.mrf.mxu0  ;;  %v19824_v9 = vpop.f32.mrf.mxu1 }
 0x644   :  { %v19826_v53 = vadd.f32 %v9595_v10, %v9394_v41 }
 0x645   :  { %v14362_v43 = vpop.f32.mrf.mxu0  ;;  %v19828_v24 = vpop.f32.mrf.mxu1 }
 0x646   :  { %v19830_v57 = vadd.f32 %v14362_v43, %v9405_v38  ;;  %v19866_v43 = vld [vmem:[#allocation10 + $0x38] sm:$0xff]  }
 0x647   :  { %v9598_v14 = vpop.f32.mrf.mxu0  ;;  %v19832_v40 = vpop.f32.mrf.mxu1  ;;  %20708 = vst [vmem:[#allocation55_spill] sm:$0xff] %v19866_v43  ;;  %14599 = vmatprep.subr.bf16.mxu0 %v19866_v43 }
 0x648   :  { %v19834_v35 = vadd.f32 %v9598_v14, %v9397_v32  ;;  %14600 = vmatpush3.bf16.msra.mxu0 %v19866_v43 }
 0x649   :  { %v14365_v7 = vpop.f32.mrf.mxu0  ;;  %v19836_v1 = vpop.f32.mrf.mxu1 }
 0x64a   :  { %v19838_v31 = vadd.f32 %v14365_v7, %v9418_v11 }
 0x64b   :  { %v9611_v17 = vpop.f32.mrf.mxu0  ;;  %v14401_v19 = vpop.f32.mrf.mxu1 }
 0x64c   :  { %v19840_v44 = vadd.f32 %v9611_v17, %v9410_v46 }
 0x64d   :  { %v14366_v41 = vpop.f32.mrf.mxu0  ;;  %v19842_v54 = vpop.f32.mrf.mxu1 }
 0x64e   :  { %v19844_v36 = vadd.f32 %v14366_v41, %v9421_v62  ;;  %v15000_v41 = vld [vmem:[#allocation9 + $0x30] sm:$0xff]  }
 0x64f   :  { %v9614_v38 = vpop.f32.mrf.mxu0  ;;  %v19846_v23 = vpop.f32.mrf.mxu1 }
 0x650   :  { %v19848_v26 = vadd.f32 %v9614_v38, %v9413_v50  ;;  %v19878_v38 = vld [vmem:[#allocation10 + $0x30] sm:$0xff]  }
 0x651   :  { %v14369_v32 = vpop.f32.mrf.mxu0  ;;  %v19850_v29 = vpop.f32.mrf.mxu1  ;;  %20709 = vst [vmem:[#allocation62_spill] sm:$0xff] %v19878_v38  ;;  %14601 = vmatprep.subr.bf16.mxu0 %v19878_v38 }
 0x652   :  { %v9668_v25 = vadd.f32 %v14369_v32, %v9434_v47  ;;  %v14998_v47 = vld [vmem:[#allocation9 + $0x38] sm:$0xff]   ;;  %14602 = vmatpush3.bf16.msra.mxu0 %v19878_v38  ;;  %v19941_v38 = vld [vmem:[#allocation10] sm:$0xff]  }
 0x653   :  { %v9627_v11 = vpop.f32.mrf.mxu0  ;;  %v14405_v20 = vpop.f32.mrf.mxu1  ;;  %14567 = vmatprep.subr.bf16.mxu1 %v14998_v47  ;;  %20720 = vst [vmem:[#allocation71_spill] sm:$0xff] %v19941_v38 }
 0x654   :  { %v19852_v60 = vadd.f32 %v9627_v11, %v9426_v12  ;;  %v19854_v46 = vadd.f32 %v14401_v19, %v9668_v25  ;;  %14568 = vmatpush3.bf16.msra.mxu1 %v14998_v47 }
 0x655   :  { %v14370_v48 = vpop.f32.mrf.mxu0  ;;  %v19856_v55 = vpop.f32.mrf.mxu1  ;;  %14569 = vmatprep.subr.bf16.mxu1 %v15000_v41 }
 0x656   :  { %v19858_v62 = vadd.f32 %v14370_v48, %v9437_v13  ;;  %v15002_v48 = vld [vmem:[#allocation9 + $0x28] sm:$0xff]  }
 0x657   :  { %v9630_v18 = vpop.f32.mrf.mxu0  ;;  %v19860_v3 = vpop.f32.mrf.mxu1 }
 0x658   :  { %v19862_v50 = vadd.f32 %v9630_v18, %v9429_v42  ;;  %14570 = vmatpush3.bf16.msra.mxu1 %v15000_v41  ;;  %v19892_v18 = vld [vmem:[#allocation10 + $0x28] sm:$0xff]   ;;  %v19906_v41 = vld [vmem:[#allocation10 + $0x18] sm:$0xff]  }
 0x659   :  { %v14373_v2 = vpop.f32.mrf.mxu0  ;;  %v19864_v10 = vpop.f32.mrf.mxu1  ;;  %20711 = vst [vmem:[#allocation66_spill] sm:$0xff] %v19892_v18  ;;  %14571 = vmatprep.subr.bf16.mxu1 %v15002_v48  ;;  %14603 = vmatprep.subr.bf16.mxu0 %v19892_v18  ;;  %20713 = vst [vmem:[#allocation69_spill] sm:$0xff] %v19906_v41 }
 0x65a   :  { %20707 = vst [vmem:[#allocation65_spill] sm:$0xff] %v19864_v10  ;;  %v9672_v12 = vadd.f32 %v14373_v2, %v9450_v27  ;;  %14604 = vmatpush3.bf16.msra.mxu0 %v19892_v18 }
 0x65b   :  { %v9643_v14 = vpop.f32.mrf.mxu0  ;;  %v19868_v7 = vpop.f32.mrf.mxu1 }
 0x65c   :  { %v19871_v13 = vadd.f32 %v9643_v14, %v9442_v6  ;;  %v19873_v17 = vadd.f32 %v14405_v20, %v9672_v12  ;;  %14572 = vmatpush3.bf16.msra.mxu1 %v15002_v48  ;;  %v15004_v12 = vld [vmem:[#allocation9 + $0x20] sm:$0xff]  }
 0x65d   :  { %v14374_v42 = vpop.f32.mrf.mxu0  ;;  %v19876_v19 = vpop.f32.mrf.mxu1  ;;  %v19904_v14 = vld [vmem:[#allocation10 + $0x20] sm:$0xff]   ;;  %14573 = vmatprep.subr.bf16.mxu1 %v15004_v12 }
 0x65e   :  { %v19880_v27 = vadd.f32 %v14374_v42, %v9453_v39  ;;  %20712 = vst [vmem:[#allocation67_spill] sm:$0xff] %v19904_v14  ;;  %v15006_v42 = vld [vmem:[#allocation9 + $0x18] sm:$0xff]   ;;  %14605 = vmatprep.subr.bf16.mxu0 %v19904_v14 }
 0x65f   :  { %v9646_v32 = vpop.f32.mrf.mxu0  ;;  %v19882_v25 = vpop.f32.mrf.mxu1  ;;  %14606 = vmatpush3.bf16.msra.mxu0 %v19904_v14 }
 0x660   :  { %v19885_v6 = vadd.f32 %v9646_v32, %v9445_v15  ;;  %14574 = vmatpush3.bf16.msra.mxu1 %v15004_v12  ;;  %14607 = vmatprep.subr.bf16.mxu0 %v19906_v41 }
 0x661   :  { %v19888_v11 = vpop.f32.mrf.mxu0  ;;  %v19890_v20 = vpop.f32.mrf.mxu1  ;;  %14575 = vmatprep.subr.bf16.mxu1 %v15006_v42 }
 0x662   :  { %20710 = vst [vmem:[#allocation64_spill] sm:$0xff] %v19885_v6 }
 0x663   :  { %v19894_v39 = vpop.f32.mrf.mxu0  ;;  %v19896_v2 = vpop.f32.mrf.mxu1  ;;  %14608 = vmatpush3.bf16.msra.mxu0 %v19906_v41  ;;  %v15012_v41 = vld [vmem:[#allocation9] sm:$0xff]  }
 0x664   :  { %14576 = vmatpush3.bf16.msra.mxu1 %v15006_v42  ;;  %14609 = vmatprep.subr.bf16.mxu0 %v19919_v58 }
 0x665   :  { %v19900_v15 = vpop.f32.mrf.mxu0  ;;  %v19902_v47 = vpop.f32.mrf.mxu1  ;;  %14577 = vmatprep.subr.bf16.mxu1 %v15008_v37 }
 0x667   :  { %v19908_v32 = vpop.f32.mrf.mxu0  ;;  %v19910_v16 = vpop.f32.mrf.mxu1  ;;  %14610 = vmatpush3.bf16.msra.mxu0 %v19919_v58 }
 0x668   :  { %14578 = vmatpush3.bf16.msra.mxu1 %v15008_v37  ;;  %14611 = vmatprep.subr.bf16.mxu0 %v19931_v59 }
 0x669   :  { %v19914_v48 = vpop.f32.mrf.mxu0  ;;  %v19916_v45 = vpop.f32.mrf.mxu1  ;;  %14579 = vmatprep.subr.bf16.mxu1 %v15010_v4 }
 0x66b   :  { %v19921_v5 = vpop.f32.mrf.mxu0  ;;  %v19923_v51 = vpop.f32.mrf.mxu1  ;;  %14612 = vmatpush3.bf16.msra.mxu0 %v19931_v59 }
 0x66c   :  { %20715 = vst [vmem:[#allocation75_spill] sm:$0xff] %v19923_v51  ;;  %14580 = vmatpush3.bf16.msra.mxu1 %v15010_v4  ;;  %14613 = vmatprep.subr.bf16.mxu0 %v19941_v38  ;;  %v9900_v51 = vadd.f32 %v19816_v8, %v19826_v53  ;;  %v9906_v8 = vadd.f32 %v19824_v9, %v19838_v31 }
 0x66d   :  { %v19926_v12 = vpop.f32.mrf.mxu0  ;;  %v19928_v14 = vpop.f32.mrf.mxu1  ;;  %14581 = vmatprep.subr.bf16.mxu1 %v15012_v41  ;;  %v9907_v31 = vadd.f32 %v19832_v40, %v19844_v36  ;;  %v20037_v40 = vld [vmem:[%s20349_s8] ss:$0 sm:$0xff] }
 0x66e   :  { %20716 = vst [vmem:[#allocation78_spill] sm:$0xff] %v19928_v14 }
 0x66f   :  { %v19933_v18 = vpop.f32.mrf.mxu0  ;;  %v19935_v56 = vpop.f32.mrf.mxu1  ;;  %14614 = vmatpush3.bf16.msra.mxu0 %v19941_v38 }
 0x670   :  { %20718 = vst [vmem:[#allocation70_spill] sm:$0xff] %v19935_v56  ;;  %14582 = vmatpush3.bf16.msra.mxu1 %v15012_v41 }
 0x671   :  { %v14433_v42 = vpop.f32.mrf.mxu0  ;;  %v19938_v61 = vpop.f32.mrf.mxu1  ;;  %14631 = vmatprep.subr.bf16.mxu1 %v19866_v43 }
 0x672   :  { %20719 = vst [vmem:[#allocation84_spill] sm:$0xff] %v19938_v61  ;;  %v19944_v22 = vadd.f32 %v14433_v42, %v19854_v46 }
 0x673   :  { %v19946_v21 = vpop.f32.mrf.mxu0  ;;  %v19948_v52 = vpop.f32.mrf.mxu1 }
 0x674   :  { %20721 = vst [vmem:[#allocation77_spill] sm:$0xff] %v19944_v22  ;;  %20722 = vst [vmem:[#allocation73_spill] sm:$0xff] %v19948_v52 }
 0x675   :  { %v19951_v37 = vpop.f32.mrf.mxu0  ;;  %v19953_v58 = vpop.f32.mrf.mxu1 }
 0x676   :  { %20723 = vst [vmem:[#allocation74_spill] sm:$0xff] %v19951_v37  ;;  %20724 = vst [vmem:[#allocation76_spill] sm:$0xff] %v19953_v58 }
 0x677   :  { %v19956_v63 = vpop.f32.mrf.mxu0  ;;  %v19958_v0 = vpop.f32.mrf.mxu1 }
 0x678   :  { %20725 = vst [vmem:[#allocation83_spill] sm:$0xff] %v19956_v63  ;;  %20726 = vst [vmem:[#allocation79_spill] sm:$0xff] %v19958_v0 }
 0x679   :  { %v14437_v46 = vpop.f32.mrf.mxu0  ;;  %v19967_v59 = vpop.f32.mrf.mxu1 }
 0x67a   :  { %v19963_v4 = vadd.f32 %v14437_v46, %v19873_v17  ;;  %20729 = vst [vmem:[#allocation15_spill] sm:$0xff] %v19967_v59 }
 0x67b   :  { %v19965_v42 = vpop.f32.mrf.mxu0  ;;  %v14521_v52 = vpop.f32.mrf.mxu1 }
 0x67c   :  { %20727 = vst [vmem:[#allocation80_spill] sm:$0xff] %v19963_v4  ;;  %20728 = vst [vmem:[#allocation82_spill] sm:$0xff] %v19965_v42 }
 0x67d   :  { %v19969_v34 = vpop.f32.mrf.mxu0  ;;  %v10934_v41 = vpop.f32.mrf.mxu1 }
 0x67e   :  { %20730 = vst [vmem:[#allocation85_spill] sm:$0xff] %v19969_v34  ;;  %v9902_v34 = vadd.f32 %v19814_v30, %v19822_v33  ;;  %v9901_v33 = vadd.f32 %v19820_v49, %v19834_v35 }
 0x67f   :  { %v19971_v58 = vpop.f32.mrf.mxu0  ;;  %v14522_v14 = vpop.f32.mrf.mxu1 }
 0x680   :  { %20731 = vst [vmem:[#allocation22_spill] sm:$0xff] %v19971_v58  ;;  %v10216_v37 = vadd.f32 %v19888_v11, %v9902_v34 }
 0x681   :  { %v14489_v61 = vpop.f32.mrf.mxu0  ;;  %v19973_v6 = vpop.f32.mrf.mxu1 }
 0x682   :  { %v10442_v34 = vadd.f32 %v19868_v7, %v10216_v37 }
 0x683   :  { %v10620_v0 = vpop.f32.mrf.mxu0  ;;  %v19979_v59 = vpop.f32.mrf.mxu1 }
 0x684   :  { %20733 = vst [vmem:[#allocation52_spill] sm:$0xff] %v19979_v59  ;;  %v10685_v11 = vadd.f32 %v14489_v61, %v10442_v34  ;;  %v9905_v61 = vadd.f32 %v19836_v1, %v19848_v26 }
 0x685   :  { %v14490_v56 = vpop.f32.mrf.mxu0  ;;  %v19987_v42 = vpop.f32.mrf.mxu1 }
 0x687   :  { %v10623_v38 = vpop.f32.mrf.mxu0 }
 0x689   :  { %v14493_v10 = vpop.f32.mrf.mxu0 }
 0x68b   :  { %v10636_v43 = vpop.f32.mrf.mxu0 }
 0x68d   :  { %v19975_v17 = vpop.f32.mrf.mxu0 }
 0x68f   :  { %v19977_v46 = vpop.f32.mrf.mxu0 }
 0x690   :  { %20732 = vst [vmem:[#allocation42_spill] sm:$0xff] %v19977_v46  ;;  %v10214_v46 = vadd.f32 %v19894_v39, %v9900_v51  ;;  %v10215_v51 = vadd.f32 %v19908_v32, %v9901_v33  ;;  %v10220_v39 = vadd.f32 %v19914_v48, %v9906_v8  ;;  %v20736_v33 = vld [vmem:[#allocation77_spill] sm:$0xff] }
 0x691   :  { %v19981_v4 = vpop.f32.mrf.mxu0 }
 0x692   :  { %20734 = vst [vmem:[#allocation29_spill] sm:$0xff] %v19981_v4  ;;  %v9903_v4 = vadd.f32 %v19818_v28, %v19830_v57  ;;  %v10440_v28 = vadd.f32 %v19876_v19, %v10214_v46  ;;  %v10441_v48 = vadd.f32 %v19890_v20, %v10215_v51  ;;  %v9909_v20 = vadd.f32 %v19850_v29, %v19862_v50 }
 0x693   :  { %v19983_v58 = vpop.f32.mrf.mxu0 }
 0x694   :  { %20735 = vst [vmem:[#allocation16_spill] sm:$0xff] %v19983_v58  ;;  %v19999_v58 = vpop.f32.mrf.mxu1  ;;  %v10217_v30 = vadd.f32 %v19900_v15, %v9903_v4  ;;  %v9904_v15 = vadd.f32 %v19828_v24, %v19840_v44  ;;  %v10683_v35 = vadd.f32 %v10620_v0, %v10440_v28  ;;  %v10999_v24 = vadd.f32 %v14521_v52, %v10685_v11 }
 0x695   :  { %v19989_v63 = vpop.f32.mrf.mxu0  ;;  %v10221_v0 = vadd.f32 %v19926_v12, %v9907_v31  ;;  %v10219_v44 = vadd.f32 %v19933_v18, %v9905_v61  ;;  %v10684_v1 = vadd.f32 %v10623_v38, %v10441_v48  ;;  %v9911_v52 = vadd.f32 %v19846_v23, %v19858_v62  ;;  %v20743_v48 = vld [vmem:[#allocation65_spill] sm:$0xff] }
 0x696   :  { %v20013_v57 = vpop.f32.mrf.mxu1  ;;  %v10443_v7 = vadd.f32 %v19882_v25, %v10217_v30  ;;  %v10218_v9 = vadd.f32 %v19921_v5, %v9904_v15  ;;  %v10446_v5 = vadd.f32 %v19896_v2, %v10220_v39  ;;  %v10997_v26 = vadd.f32 %v10934_v41, %v10683_v35 }
 0x697   :  { %v19994_v22 = vpop.f32.mrf.mxu0  ;;  %v9912_v4 = vadd.f32 %v19856_v55, %v19871_v13  ;;  %v9915_v23 = vadd.f32 %v19860_v3, %v19880_v27  ;;  %v10447_v29 = vadd.f32 %v19910_v16, %v10221_v0  ;;  %v10445_v50 = vadd.f32 %v19916_v45, %v10219_v44  ;;  %v20737_v3 = vld [vmem:[#allocation75_spill] sm:$0xff]  ;;  %v20738_v16 = vld [vmem:[#allocation52_spill] sm:$0xff] }
 0x698   :  { %v10686_v32 = vadd.f32 %v14490_v56, %v10443_v7  ;;  %v20029_v37 = vpop.f32.mrf.mxu1  ;;  %v9908_v56 = vadd.f32 %v19842_v54, %v19852_v60  ;;  %v10689_v18 = vadd.f32 %v14493_v10, %v10446_v5  ;;  %v10444_v2 = vadd.f32 %v19902_v47, %v10218_v9  ;;  %v20745_v5 = vld [vmem:[#allocation78_spill] sm:$0xff] }
 0x699   :  { %v20001_v59 = vpop.f32.mrf.mxu0  ;;  %v10998_v41 = vadd.f32 %v19973_v6, %v10684_v1  ;;  %v20739_v6 = vld [vmem:[#allocation74_spill] sm:$0xff]  ;;  %v20744_v0 = vld [vmem:[#allocation29_spill] sm:$0xff] }
 0x69a   :  { %v20048_v46 = vpop.f32.mrf.mxu1  ;;  %v11000_v38 = vadd.f32 %v14522_v14, %v10686_v32  ;;  %v10687_v62 = vadd.f32 %v10636_v43, %v10444_v2  ;;  %v10222_v30 = vadd.f32 %v19946_v21, %v9908_v56  ;;  %v10690_v14 = vadd.f32 %v19975_v17, %v10447_v29  ;;  %v20740_v21 = vld [vmem:[#allocation83_spill] sm:$0xff]  ;;  %v20741_v17 = vld [vmem:[#allocation42_spill] sm:$0xff]  ;;  %v20742_v32 = vld [vmem:[#allocation64_spill] sm:$0xff] }
 0x69b   :  { %v20009_v53 = vpop.f32.mrf.mxu0  ;;  %v10450_v43 = vadd.f32 %v20737_v3, %v20736_v33  ;;  %v11003_v34 = vadd.f32 %v20738_v16, %v10689_v18  ;;  %v10225_v28 = vadd.f32 %v20739_v6, %v9911_v52  ;;  %v10223_v39 = vadd.f32 %v20740_v21, %v9909_v20  ;;  %v20746_v20 = vld [vmem:[#allocation16_spill] sm:$0xff]  ;;  %v20747_v2 = vld [vmem:[#allocation70_spill] sm:$0xff]  ;;  %v20752_v3 = vld [vmem:[#allocation73_spill] sm:$0xff] }
 0x69c   :  { %v20067_v45 = vpop.f32.mrf.mxu1  ;;  %v10688_v15 = vadd.f32 %v20741_v17, %v10445_v50  ;;  %v11001_v7 = vadd.f32 %v19987_v42, %v10687_v62  ;;  %v11004_v1 = vadd.f32 %v19999_v58, %v10690_v14  ;;  %v20751_v33 = vld [vmem:[#allocation80_spill] sm:$0xff] }
 0x69d   :  { %v20018_v49 = vpop.f32.mrf.mxu0  ;;  %v10693_v44 = vadd.f32 %v20744_v0, %v10450_v43  ;;  %v10454_v43 = vadd.f32 %v20752_v3, %v20751_v33  ;;  %v20756_v0 = vld [vmem:[#allocation15_spill] sm:$0xff] }
 0x69e   :  { %v11002_v29 = vadd.f32 %v20013_v57, %v10688_v15 }
 0x69f   :  { %v20026_v19 = vpop.f32.mrf.mxu0  ;;  %v11007_v16 = vadd.f32 %v20029_v37, %v10693_v44 }
 0x6a1   :  { %v14553_v25 = vpop.f32.mrf.mxu0 }
 0x6a2   :  { %v11225_v36 = vadd.f32 %v14553_v25, %v10999_v24  ;;  %v9913_v24 = vadd.f32 %v20743_v48, %v20742_v32  ;;  %v10448_v25 = vadd.f32 %v20745_v5, %v10222_v30  ;;  %v20750_v30 = vld [vmem:[#allocation85_spill] sm:$0xff]  ;;  %v20755_v48 = vld [vmem:[#allocation79_spill] sm:$0xff] }
 0x6a3   :  { %v11160_v12 = vpop.f32.mrf.mxu0  ;;  %v10229_v14 = vadd.f32 %v20750_v30, %v9915_v23 }
 0x6a4   :  { %v20051_v54 = vadd.f32 %v20037_v40, %v11225_v36  ;;  %v11223_v60 = vadd.f32 %v11160_v12, %v10997_v26  ;;  %v10969_v36 = vpop.f32.mrf.mxu1  ;;  %v10691_v18 = vadd.f32 %v20746_v20, %v10448_v25  ;;  %v10451_v12 = vadd.f32 %v20747_v2, %v10225_v28 }
 0x6a5   :  { %v14554_v10 = vpop.f32.mrf.mxu0 }
 0x6a6   :  { %v12879_v47 = vmul.f32 -1.442695, %v20051_v54  ;;  %v20059_v55 = vadd.f32 %v20037_v40, %v11223_v60  ;;  %v11226_v13 = vadd.f32 %v14554_v10, %v11000_v38  ;;  %v20748_v60 = vld [vmem:[#allocation84_spill] sm:$0xff]  ;;  %v14533_v50 = vpop.f32.mrf.mxu1  ;;  %v10694_v28 = vadd.f32 %v19989_v63, %v10451_v12 }
 0x6a7   :  { %v11163_v27 = vpop.f32.mrf.mxu0  ;;  %v10449_v38 = vadd.f32 %v20748_v60, %v10223_v39  ;;  %v11005_v21 = vadd.f32 %v20048_v46, %v10691_v18 }
 0x6a8   :  { %15270 = vpow2.f32 %v12879_v47  ;;  %v12877_v8 = vmul.f32 -1.442695, %v20059_v55  ;;  %v20071_v51 = vadd.f32 %v20037_v40, %v11226_v13  ;;  %v11224_v11 = vadd.f32 %v11163_v27, %v10998_v41  ;;  %v20749_v13 = vld [vmem:[#allocation82_spill] sm:$0xff]  ;;  %v10982_v39 = vpop.f32.mrf.mxu1 }
 0x6a9   :  { %v14557_v35 = vpop.f32.mrf.mxu0  ;;  %v10226_v41 = vadd.f32 %v20749_v13, %v9912_v4  ;;  %v10692_v4 = vadd.f32 %v19994_v22, %v10449_v38  ;;  %v11008_v5 = vadd.f32 %v20067_v45, %v10694_v28 }
 0x6aa   :  { %15272 = vpow2.f32 %v12877_v8  ;;  %v12880_v9 = vmul.f32 -1.442695, %v20071_v51  ;;  %v20079_v31 = vadd.f32 %v20037_v40, %v11224_v11  ;;  %v11229_v61 = vadd.f32 %v14557_v35, %v11003_v34  ;;  %v20753_v11 = vld [vmem:[#allocation22_spill] sm:$0xff] }
 0x6ab   :  { %v11176_v56 = vpop.f32.mrf.mxu0  ;;  %v10227_v6 = vadd.f32 %v20753_v11, %v9913_v24  ;;  %v10697_v35 = vadd.f32 %v20001_v59, %v10454_v43  ;;  %v10455_v24 = vadd.f32 %v20755_v48, %v10229_v14  ;;  %v14534_v59 = vpop.f32.mrf.mxu1 }
 0x6ac   :  { %15274 = vpow2.f32 %v12880_v9  ;;  %v12878_v42 = vmul.f32 -1.442695, %v20079_v31  ;;  %v20088_v26 = vadd.f32 %v20037_v40, %v11229_v61  ;;  %v11227_v52 = vadd.f32 %v11176_v56, %v11001_v7  ;;  %v20754_v7 = vld [vmem:[#allocation76_spill] sm:$0xff] }
 0x6ad   :  { %v14558_v62 = vpop.f32.mrf.mxu0  ;;  %v10452_v9 = vadd.f32 %v20754_v7, %v10226_v41  ;;  %v10453_v44 = vadd.f32 %v20756_v0, %v10227_v6  ;;  %v11006_v56 = vadd.f32 %v10969_v36, %v10692_v4  ;;  %v11011_v2 = vadd.f32 %v14533_v50, %v10697_v35  ;;  %v10985_v41 = vpop.f32.mrf.mxu1 }
 0x6ae   :  { %15276 = vpow2.f32 %v12878_v42  ;;  %v12883_v58 = vmul.f32 -1.442695, %v20088_v26  ;;  %v20096_v10 = vadd.f32 %v20037_v40, %v11227_v52  ;;  %v11230_v47 = vadd.f32 %v14558_v62, %v11004_v1 }
 0x6af   :  { %v11179_v27 = vpop.f32.mrf.mxu0  ;;  %v10695_v18 = vadd.f32 %v20009_v53, %v10452_v9  ;;  %v10698_v12 = vadd.f32 %v20018_v49, %v10455_v24 }
 0x6b0   :  { %15278 = vpow2.f32 %v12883_v58  ;;  %v12881_v57 = vmul.f32 -1.442695, %v20096_v10  ;;  %v20105_v34 = vadd.f32 %v20037_v40, %v11230_v47  ;;  %v11228_v8 = vadd.f32 %v11179_v27, %v11002_v29 }
 0x6b1   :  { %v14561_v23 = vpop.f32.mrf.mxu0  ;;  %v10696_v58 = vadd.f32 %v20026_v19, %v10453_v44  ;;  %v11009_v14 = vadd.f32 %v10982_v39, %v10695_v18  ;;  %v11012_v33 = vadd.f32 %v14534_v59, %v10698_v12 }
 0x6b2   :  { %15280 = vpow2.f32 %v12881_v57  ;;  %v12884_v37 = vmul.f32 -1.442695, %v20105_v34  ;;  %v20113_v17 = vadd.f32 %v20037_v40, %v11228_v8  ;;  %v11233_v15 = vadd.f32 %v14561_v23, %v11007_v16 }
 0x6b3   :  { %v11192_v61 = vpop.f32.mrf.mxu0  ;;  %v11010_v8 = vadd.f32 %v10985_v41, %v10696_v58 }
 0x6b4   :  { %15282 = vpow2.f32 %v12884_v37  ;;  %v12882_v63 = vmul.f32 -1.442695, %v20113_v17  ;;  %v20119_v22 = vadd.f32 %v20037_v40, %v11233_v15  ;;  %v11231_v46 = vadd.f32 %v11192_v61, %v11005_v21 }
 0x6b5   :  { %v15271_v32 = vpop.eup %15270  ;;  %v14562_v25 = vpop.f32.mrf.mxu0 }
 0x6b6   :  { %v11312_v1 = vadd.f32 1.0, %v15271_v32  ;;  %15284 = vpow2.f32 %v12882_v63  ;;  %v12887_v42 = vmul.f32 -1.442695, %v20119_v22  ;;  %v20126_v52 = vadd.f32 %v20037_v40, %v11231_v46 }
 0x6b7   :  { %v15273_v20 = vpop.eup %15272  ;;  %v11234_v60 = vadd.f32 %v14562_v25, %v11008_v5  ;;  %v11195_v38 = vpop.f32.mrf.mxu0 }
 0x6b8   :  { %15286 = vrcp.f32 %v11312_v1  ;;  %v11310_v45 = vadd.f32 1.0, %v15273_v20  ;;  %v12885_v36 = vmul.f32 -1.442695, %v20126_v52  ;;  %v11232_v62 = vadd.f32 %v11195_v38, %v11006_v56 }
 0x6b9   :  { %v15275_v29 = vpop.eup %15274  ;;  %15288 = vpow2.f32 %v12887_v42  ;;  %v20133_v47 = vadd.f32 %v20037_v40, %v11234_v60  ;;  %v14565_v13 = vpop.f32.mrf.mxu0 }
 0x6ba   :  { %15290 = vrcp.f32 %v11310_v45  ;;  %v11313_v53 = vadd.f32 1.0, %v15275_v29  ;;  %v20136_v49 = vadd.f32 %v20037_v40, %v11232_v62  ;;  %v11237_v50 = vadd.f32 %v14565_v13, %v11011_v2  ;;  %v20757_v45 = vld [vmem:[#allocation45_spill] sm:$0xff]  ;;  %v20758_v62 = vld [vmem:[#allocation34_spill] sm:$0xff] }
 0x6bb   :  { %v15277_v30 = vpop.eup %15276  ;;  %15292 = vpow2.f32 %v12885_v36  ;;  %v12888_v3 = vmul.f32 -1.442695, %v20133_v47  ;;  %v11208_v43 = vpop.f32.mrf.mxu0 }
 0x6bc   :  { %15294 = vrcp.f32 %v11313_v53  ;;  %v11311_v19 = vadd.f32 1.0, %v15277_v30  ;;  %v12886_v27 = vmul.f32 -1.442695, %v20136_v49  ;;  %v20141_v16 = vadd.f32 %v20037_v40, %v11237_v50  ;;  %v20759_v50 = vld [vmem:[#allocation30_spill] sm:$0xff] }
 0x6bd   :  { %v15279_v57 = vpop.eup %15278  ;;  %15296 = vpow2.f32 %v12888_v3  ;;  %v11235_v11 = vadd.f32 %v11208_v43, %v11009_v14  ;;  %v14566_v6 = vpop.f32.mrf.mxu0 }
 0x6be   :  { %15298 = vrcp.f32 %v11311_v19  ;;  %v11316_v28 = vadd.f32 1.0, %v15279_v57  ;;  %v12891_v4 = vmul.f32 -1.442695, %v20141_v16  ;;  %v11238_v23 = vadd.f32 %v14566_v6, %v11012_v33 }
 0x6bf   :  { %v15281_v21 = vpop.eup %15280  ;;  %15300 = vpow2.f32 %v12886_v27  ;;  %v20145_v39 = vadd.f32 %v20037_v40, %v11235_v11  ;;  %v11211_v37 = vpop.f32.mrf.mxu0 }
 0x6c0   :  { %15302 = vrcp.f32 %v11316_v28  ;;  %v11314_v15 = vadd.f32 1.0, %v15281_v21  ;;  %v20148_v35 = vadd.f32 %v20037_v40, %v11238_v23  ;;  %v11236_v7 = vadd.f32 %v11211_v37, %v11010_v8  ;;  %v20761_v23 = vld [vmem:[#allocation36_spill] sm:$0xff] }
 0x6c1   :  { %v15283_v9 = vpop.eup %15282  ;;  %15304 = vpow2.f32 %v12891_v4  ;;  %v12889_v61 = vmul.f32 -1.442695, %v20145_v39 }
 0x6c2   :  { %15306 = vrcp.f32 %v11314_v15  ;;  %v11317_v63 = vadd.f32 1.0, %v15283_v9  ;;  %v12892_v46 = vmul.f32 -1.442695, %v20148_v35  ;;  %v20153_v32 = vadd.f32 %v20037_v40, %v11236_v7  ;;  %v20763_v7 = vld [vmem:[#allocation55_spill] sm:$0xff]  ;;  %v20764_v9 = vld [vmem:[#allocation62_spill] sm:$0xff] }
 0x6c3   :  { %v15285_v48 = vpop.eup %15284  ;;  %15308 = vpow2.f32 %v12889_v61  ;;  %v20765_v61 = vld [vmem:[#allocation51_spill] sm:$0xff] }
 0x6c4   :  { %15310 = vrcp.f32 %v11317_v63  ;;  %v11315_v24 = vadd.f32 1.0, %v15285_v48  ;;  %v12890_v0 = vmul.f32 -1.442695, %v20153_v32 }
 0x6c5   :  { %v15287_v44 = vpop.eup %15286  ;;  %15312 = vpow2.f32 %v12892_v46  ;;  %v20766_v46 = vld [vmem:[#allocation49_spill] sm:$0xff] }
 0x6c6   :  { %v15289_v5 = vpop.eup %15288  ;;  %15314 = vrcp.f32 %v11315_v24  ;;  %v11360_v1 = vmul.f32 %v15287_v44, %v20051_v54 }
 0x6c7   :  { %v15291_v25 = vpop.eup %15290  ;;  %v11320_v56 = vadd.f32 1.0, %v15289_v5  ;;  %15316 = vpow2.f32 %v12890_v0 }
 0x6c8   :  { %v15293_v59 = vpop.eup %15292  ;;  %v11358_v18 = vmul.f32 %v15291_v25, %v20059_v55  ;;  %v11376_v36 = vadd.f32 %v11360_v1, %v20757_v45  ;;  %v20760_v55 = vld [vmem:[#allocation44_spill] sm:$0xff]  ;;  %v20772_v45 = vld [vmem:[#allocation57_spill] sm:$0xff] }
 0x6c9   :  { %v15295_v42 = vpop.eup %15294  ;;  %15318 = vrcp.f32 %v11320_v56  ;;  %v11318_v40 = vadd.f32 1.0, %v15293_v59 }
 0x6ca   :  { %v15297_v20 = vpop.eup %15296  ;;  %v11361_v2 = vmul.f32 %v15295_v42, %v20071_v51  ;;  %v11374_v30 = vadd.f32 %v11358_v18, %v20759_v50  ;;  %v20768_v42 = vld [vmem:[#allocation38_spill] sm:$0xff] }
 0x6cb   :  { %v15299_v12 = vpop.eup %15298  ;;  %15320 = vrcp.f32 %v11318_v40  ;;  %v11321_v60 = vadd.f32 1.0, %v15297_v20  ;;  %v20769_v20 = vld [vmem:[#allocation54_spill] sm:$0xff] }
 0x6cc   :  { %v15301_v38 = vpop.eup %15300  ;;  %v11377_v29 = vadd.f32 %v11361_v2, %v20758_v62  ;;  %v11359_v58 = vmul.f32 %v15299_v12, %v20079_v31  ;;  %v20770_v2 = vld [vmem:[#allocation67_spill] sm:$0xff] }
 0x6cd   :  { %v15303_v13 = vpop.eup %15302  ;;  %15322 = vrcp.f32 %v11321_v60  ;;  %v11319_v54 = vadd.f32 1.0, %v15301_v38  ;;  %v20771_v60 = vld [vmem:[#allocation56_spill] sm:$0xff] }
 0x6ce   :  { %v15305_v41 = vpop.eup %15304  ;;  %v11391_v53 = vpack.c.bf16 %v11377_v29, %v11376_v36  ;;  %v11375_v14 = vadd.f32 %v11359_v58, %v20760_v55  ;;  %v11364_v43 = vmul.f32 %v15303_v13, %v20088_v26  ;;  %v20762_v26 = vld [vmem:[#allocation35_spill] sm:$0xff]  ;;  %v20773_v58 = vld [vmem:[#allocation69_spill] sm:$0xff] }
 0x6cf   :  { %v15307_v51 = vpop.eup %15306  ;;  %15324 = vrcp.f32 %v11319_v54  ;;  %v11324_v33 = vadd.f32 1.0, %v15305_v41 }
 0x6d0   :  { %v15309_v3 = vpop.eup %15308  ;;  %v11390_v19 = vpack.c.bf16 %v11375_v14, %v11374_v30  ;;  %v11362_v8 = vmul.f32 %v15307_v51, %v20096_v10  ;;  %v11380_v21 = vadd.f32 %v11364_v43, %v20761_v23  ;;  %v20775_v30 = vld [vmem:[#allocation48_spill] sm:$0xff]  ;;  %v20777_v51 = vld [vmem:[#allocation43_spill] sm:$0xff] }
 0x6d1   :  { %v15311_v27 = vpop.eup %15310  ;;  %15326 = vrcp.f32 %v11324_v33  ;;  %v11322_v57 = vadd.f32 1.0, %v15309_v3  ;;  %v20778_v3 = vld [vmem:[#allocation53_spill] sm:$0xff] }
 0x6d2   :  { %v15313_v31 = vpop.eup %15312  ;;  %v11365_v11 = vmul.f32 %v15311_v27, %v20105_v34  ;;  %14583 = vmatprep.mubr.bf16.mxu1 %v11390_v19  ;;  %14615 = vmatprep.mubr.bf16.mxu0 %v11390_v19  ;;  %v11378_v63 = vadd.f32 %v11362_v8, %v20765_v61  ;;  %v20779_v19 = vld [vmem:[#allocation81_spill] sm:$0xff] }
 0x6d3   :  { %v15315_v6 = vpop.eup %15314  ;;  %15328 = vrcp.f32 %v11322_v57  ;;  %v11325_v28 = vadd.f32 1.0, %v15313_v31  ;;  %14584 = vmatmul.mubr.bf16.vlgmr.msra.gmra.mxu1 %v11391_v53  ;;  %14616 = vmatmul.mubr.bf16.vlgmr.msra.gmra.mxu0 %v11391_v53  ;;  %v20774_v53 = vld [vmem:[#allocation63_spill] sm:$0xff]  ;;  %v20206_v27 = vld [vmem:[%s20351_s10] ss:$0 sm:$0xff] }
 0x6d4   :  { %v15317_v4 = vpop.eup %15316  ;;  %v11381_v37 = vadd.f32 %v11365_v11, %v20762_v26  ;;  %v11363_v15 = vmul.f32 %v15315_v6, %v20113_v17  ;;  %14639 = vmatpush3.bf16.msra.mxu1 %v20763_v7  ;;  %v20767_v17 = vld [vmem:[#allocation66_spill] sm:$0xff]  ;;  %v20211_v57 = vld [vmem:[%s20353_s12] ss:$0 sm:$0xff] }
 0x6d5   :  { %15330 = vrcp.f32 %v11325_v28  ;;  %v11323_v10 = vadd.f32 1.0, %v15317_v4  ;;  %14632 = vmatprep.subr.bf16.mxu1 %v20764_v9 }
 0x6d6   :  { %v15319_v34 = vpop.eup %15318  ;;  %v11379_v48 = vadd.f32 %v11363_v15, %v20766_v46  ;;  %v11393_v24 = vpack.c.bf16 %v11381_v37, %v11380_v21 }
 0x6d7   :  { %15332 = vrcp.f32 %v11323_v10  ;;  %v11368_v5 = vmul.f32 %v15319_v34, %v20119_v22 }
 0x6d8   :  { %v15321_v0 = vpop.eup %15320  ;;  %14640 = vmatpush3.bf16.msra.mxu1 %v20764_v9  ;;  %v11392_v44 = vpack.c.bf16 %v11379_v48, %v11378_v63 }
 0x6d9   :  { %14633 = vmatprep.subr.bf16.mxu1 %v20767_v17  ;;  %v11366_v56 = vmul.f32 %v15321_v0, %v20126_v52  ;;  %v11384_v40 = vadd.f32 %v11368_v5, %v20768_v42 }
 0x6da   :  { %v15323_v25 = vpop.eup %15322  ;;  %14587 = vmatprep.mubr.bf16.mxu1 %v11392_v44  ;;  %14619 = vmatprep.mubr.bf16.mxu0 %v11392_v44 }
 0x6db   :  { %v11369_v59 = vmul.f32 %v15323_v25, %v20133_v47  ;;  %14588 = vmatmul.mubr.bf16.gmra.mxu1 %v11393_v24  ;;  %14620 = vmatmul.mubr.bf16.gmra.mxu0 %v11393_v24  ;;  %v11382_v38 = vadd.f32 %v11366_v56, %v20771_v60 }
 0x6dc   :  { %v15325_v1 = vpop.eup %15324  ;;  %14641 = vmatpush3.bf16.msra.mxu1 %v20767_v17 }
 0x6dd   :  { %v11385_v18 = vadd.f32 %v11369_v59, %v20769_v20  ;;  %v11367_v22 = vmul.f32 %v15325_v1, %v20136_v49  ;;  %14634 = vmatprep.subr.bf16.mxu1 %v20770_v2 }
 0x6de   :  { %v15327_v12 = vpop.eup %15326 }
 0x6df   :  { %v11383_v52 = vadd.f32 %v11367_v22, %v20772_v45  ;;  %v11395_v36 = vpack.c.bf16 %v11385_v18, %v11384_v40  ;;  %v11372_v62 = vmul.f32 %v15327_v12, %v20141_v16  ;;  %v20776_v16 = vld [vmem:[#allocation72_spill] sm:$0xff] }
 0x6e0   :  { %v15329_v47 = vpop.eup %15328  ;;  %14642 = vmatpush3.bf16.msra.mxu1 %v20770_v2 }
 0x6e1   :  { %v11394_v29 = vpack.c.bf16 %v11383_v52, %v11382_v38  ;;  %14635 = vmatprep.subr.bf16.mxu1 %v20773_v58  ;;  %v11370_v54 = vmul.f32 %v15329_v47, %v20145_v39  ;;  %v11388_v50 = vadd.f32 %v11372_v62, %v20774_v53 }
 0x6e2   :  { %v15331_v13 = vpop.eup %15330 }
 0x6e3   :  { %v11373_v49 = vmul.f32 %v15331_v13, %v20148_v35  ;;  %14591 = vmatprep.mubr.bf16.mxu1 %v11394_v29  ;;  %v11386_v33 = vadd.f32 %v11370_v54, %v20777_v51 }
 0x6e4   :  { %v15333_v41 = vpop.eup %15332  ;;  %14592 = vmatmul.mubr.bf16.gmra.mxu1 %v11395_v36 }
 0x6e5   :  { %v11389_v55 = vadd.f32 %v11373_v49, %v20775_v30  ;;  %v11371_v14 = vmul.f32 %v15333_v41, %v20153_v32  ;;  %14643 = vmatpush3.bf16.msra.mxu1 %v20773_v58  ;;  %v20780_v32 = vld [vmem:[#allocation71_spill] sm:$0xff] }
 0x6e6   :  { %14636 = vmatprep.subr.bf16.mxu1 %v20776_v16 }
 0x6e7   :  { %v11387_v43 = vadd.f32 %v11371_v14, %v20778_v3  ;;  %v11397_v39 = vpack.c.bf16 %v11389_v55, %v11388_v50 }
 0x6e9   :  { %14644 = vmatpush3.bf16.msra.mxu1 %v20776_v16  ;;  %v11396_v35 = vpack.c.bf16 %v11387_v43, %v11386_v33 }
 0x6ea   :  { %14637 = vmatprep.subr.bf16.mxu1 %v20779_v19 }
 0x6eb   :  { %14595 = vmatprep.mubr.bf16.mxu1 %v11396_v35 }
 0x6ec   :  { %14596 = vmatmul.mubr.bf16.gmra.mxu1 %v11397_v39 }
 0x6ed   :  { %14645 = vmatpush3.bf16.msra.mxu1 %v20779_v19  ;;  %14623 = vmatprep.mubr.bf16.mxu1 %v11394_v29 }
 0x6ee   :  { %14638 = vmatprep.subr.bf16.mxu1 %v20780_v32 }
 0x6f1   :  { %14646 = vmatpush3.bf16.msra.mxu1 %v20780_v32 }
 0x6f4   :  { %14624 = vmatmul.mubr.bf16.vlgmr.msra.gmra.mxu1 %v11395_v36 }
 0x6f5   :  { %14627 = vmatprep.mubr.bf16.mxu1 %v11396_v35 }
 0x6fc   :  { %14628 = vmatmul.mubr.bf16.gmra.mxu1 %v11397_v39 }
 0x793   :  { %v14585_v31 = vpop.f32.mrf.mxu1  ;;  %v14617_v8 = vpop.f32.mrf.mxu0 }
 0x794   :  { %v11512_v11 = vadd.f32 %v14585_v31, %v20206_v27  ;;  %v11696_v6 = vadd.f32 %v14617_v8, %v20211_v57 }
 0x795   :  { %v11503_v28 = vpop.f32.mrf.mxu1  ;;  %v11687_v4 = vpop.f32.mrf.mxu0 }
 0x796   :  { %11568 = vst [vmem:[%s20354_s13 + $0x10] sm:$0xff] %v11512_v11  ;;  %v12913_v23 = vmul.f32 -1.442695, %v11696_v6  ;;  %v11504_v21 = vadd.f32 %v20206_v27, %v11503_v28  ;;  %v11688_v26 = vadd.f32 %v20211_v57, %v11687_v4 }
 0x797   :  { %v14586_v37 = vpop.f32.mrf.mxu1  ;;  %v14618_v15 = vpop.f32.mrf.mxu0 }
 0x798   :  { %15334 = vpow2.f32 %v12913_v23  ;;  %11566 = vst [vmem:[%s20354_s13] sm:$0xff] %v11504_v21  ;;  %v12911_v7 = vmul.f32 -1.442695, %v11688_v26  ;;  %v11515_v10 = vadd.f32 %v14586_v37, %v20206_v27  ;;  %v11699_v9 = vadd.f32 %v14618_v15, %v20211_v57 }
 0x799   :  { %v11506_v34 = vpop.f32.mrf.mxu1  ;;  %v11690_v61 = vpop.f32.mrf.mxu0 }
 0x79a   :  { %15336 = vpow2.f32 %v12911_v7  ;;  %11569 = vst [vmem:[%s20354_s13 + $0x18] sm:$0xff] %v11515_v10  ;;  %v12914_v63 = vmul.f32 -1.442695, %v11699_v9  ;;  %v11507_v46 = vadd.f32 %v20206_v27, %v11506_v34  ;;  %v11691_v48 = vadd.f32 %v20211_v57, %v11690_v61 }
 0x79b   :  { %v14589_v24 = vpop.f32.mrf.mxu1  ;;  %v14621_v0 = vpop.f32.mrf.mxu0 }
 0x79c   :  { %15338 = vpow2.f32 %v12914_v63  ;;  %11567 = vst [vmem:[%s20354_s13 + $0x8] sm:$0xff] %v11507_v46  ;;  %v12912_v44 = vmul.f32 -1.442695, %v11691_v48  ;;  %v11528_v5 = vadd.f32 %v14589_v24, %v20206_v27  ;;  %v11712_v17 = vadd.f32 %v14621_v0, %v20211_v57 }
 0x79d   :  { %v11519_v25 = vpop.f32.mrf.mxu1  ;;  %v11703_v56 = vpop.f32.mrf.mxu0 }
 0x79e   :  { %15340 = vpow2.f32 %v12912_v44  ;;  %11572 = vst [vmem:[%s20354_s13 + $0x30] sm:$0xff] %v11528_v5  ;;  %v12917_v59 = vmul.f32 -1.442695, %v11712_v17  ;;  %v11520_v1 = vadd.f32 %v20206_v27, %v11519_v25  ;;  %v11704_v42 = vadd.f32 %v20211_v57, %v11703_v56 }
 0x79f   :  { %v14590_v40 = vpop.f32.mrf.mxu1  ;;  %v14622_v20 = vpop.f32.mrf.mxu0 }
 0x7a0   :  { %15342 = vpow2.f32 %v12917_v59  ;;  %11570 = vst [vmem:[%s20354_s13 + $0x20] sm:$0xff] %v11520_v1  ;;  %v12915_v18 = vmul.f32 -1.442695, %v11704_v42  ;;  %v11531_v22 = vadd.f32 %v14590_v40, %v20206_v27  ;;  %v11715_v2 = vadd.f32 %v14622_v20, %v20211_v57 }
 0x7a1   :  { %v11522_v12 = vpop.f32.mrf.mxu1  ;;  %v11706_v60 = vpop.f32.mrf.mxu0 }
 0x7a2   :  { %15344 = vpow2.f32 %v12915_v18  ;;  %11573 = vst [vmem:[%s20354_s13 + $0x38] sm:$0xff] %v11531_v22  ;;  %v12918_v38 = vmul.f32 -1.442695, %v11715_v2  ;;  %v11523_v45 = vadd.f32 %v20206_v27, %v11522_v12  ;;  %v11707_v52 = vadd.f32 %v20211_v57, %v11706_v60 }
 0x7a4   :  { %15346 = vpow2.f32 %v12918_v38  ;;  %11571 = vst [vmem:[%s20354_s13 + $0x28] sm:$0xff] %v11523_v45  ;;  %v12916_v36 = vmul.f32 -1.442695, %v11707_v52  ;;  %v14593_v47 = vpop.f32.mrf.mxu1 }
 0x7a5   :  { %v15335_v62 = vpop.eup %15334  ;;  %v11544_v29 = vadd.f32 %v14593_v47, %v20206_v27 }
 0x7a6   :  { %v11800_v58 = vadd.f32 1.0, %v15335_v62  ;;  %15348 = vpow2.f32 %v12916_v36  ;;  %v11535_v13 = vpop.f32.mrf.mxu1 }
 0x7a7   :  { %v15337_v54 = vpop.eup %15336  ;;  %11576 = vst [vmem:[%s20354_s13 + $0x50] sm:$0xff] %v11544_v29  ;;  %v11536_v49 = vadd.f32 %v20206_v27, %v11535_v13 }
 0x7a8   :  { %15350 = vrcp.f32 %v11800_v58  ;;  %v11798_v41 = vadd.f32 1.0, %v15337_v54  ;;  %v14594_v53 = vpop.f32.mrf.mxu1 }
 0x7a9   :  { %v15339_v50 = vpop.eup %15338  ;;  %11574 = vst [vmem:[%s20354_s13 + $0x40] sm:$0xff] %v11536_v49  ;;  %v11547_v30 = vadd.f32 %v14594_v53, %v20206_v27 }
 0x7aa   :  { %15352 = vrcp.f32 %v11798_v41  ;;  %v11801_v55 = vadd.f32 1.0, %v15339_v50  ;;  %v11538_v14 = vpop.f32.mrf.mxu1 }
 0x7ab   :  { %v15341_v16 = vpop.eup %15340  ;;  %11577 = vst [vmem:[%s20354_s13 + $0x58] sm:$0xff] %v11547_v30  ;;  %v11539_v51 = vadd.f32 %v20206_v27, %v11538_v14 }
 0x7ac   :  { %15354 = vrcp.f32 %v11801_v55  ;;  %v11799_v33 = vadd.f32 1.0, %v15341_v16  ;;  %v14597_v3 = vpop.f32.mrf.mxu1 }
 0x7ad   :  { %v15343_v43 = vpop.eup %15342  ;;  %11575 = vst [vmem:[%s20354_s13 + $0x48] sm:$0xff] %v11539_v51  ;;  %v11560_v39 = vadd.f32 %v14597_v3, %v20206_v27 }
 0x7ae   :  { %15356 = vrcp.f32 %v11799_v33  ;;  %v11804_v35 = vadd.f32 1.0, %v15343_v43  ;;  %v11551_v19 = vpop.f32.mrf.mxu1 }
 0x7af   :  { %v15345_v32 = vpop.eup %15344  ;;  %11580 = vst [vmem:[%s20354_s13 + $0x70] sm:$0xff] %v11560_v39  ;;  %v11552_v31 = vadd.f32 %v20206_v27, %v11551_v19 }
 0x7b0   :  { %15358 = vrcp.f32 %v11804_v35  ;;  %v11802_v8 = vadd.f32 1.0, %v15345_v32  ;;  %v14598_v11 = vpop.f32.mrf.mxu1 }
 0x7b1   :  { %v15347_v6 = vpop.eup %15346  ;;  %11578 = vst [vmem:[%s20354_s13 + $0x60] sm:$0xff] %v11552_v31  ;;  %v11563_v28 = vadd.f32 %v14598_v11, %v20206_v27 }
 0x7b2   :  { %15360 = vrcp.f32 %v11802_v8  ;;  %v11805_v4 = vadd.f32 1.0, %v15347_v6  ;;  %v11554_v23 = vpop.f32.mrf.mxu1 }
 0x7b3   :  { %v15349_v21 = vpop.eup %15348  ;;  %11581 = vst [vmem:[%s20354_s13 + $0x78] sm:$0xff] %v11563_v28  ;;  %v11555_v26 = vadd.f32 %v20206_v27, %v11554_v23 }
 0x7b4   :  { %15362 = vrcp.f32 %v11805_v4  ;;  %v11803_v37 = vadd.f32 1.0, %v15349_v21  ;;  %v14625_v15 = vpop.f32.mrf.mxu1 }
 0x7b5   :  { %v15351_v7 = vpop.eup %15350  ;;  %11579 = vst [vmem:[%s20354_s13 + $0x68] sm:$0xff] %v11555_v26  ;;  %v11728_v10 = vadd.f32 %v14625_v15, %v20211_v57 }
 0x7b6   :  { %11848 = vst [vmem:[%s20355_s14 + $0x10] sm:$0xff] %v15351_v7  ;;  %15364 = vrcp.f32 %v11803_v37  ;;  %v11719_v9 = vpop.f32.mrf.mxu1 }
 0x7b7   :  { %v15353_v34 = vpop.eup %15352  ;;  %v12921_v61 = vmul.f32 -1.442695, %v11728_v10  ;;  %v11720_v27 = vadd.f32 %v20211_v57, %v11719_v9 }
 0x7b8   :  { %11846 = vst [vmem:[%s20355_s14] sm:$0xff] %v15353_v34  ;;  %v14626_v63 = vpop.f32.mrf.mxu1 }
 0x7b9   :  { %v15355_v46 = vpop.eup %15354  ;;  %15366 = vpow2.f32 %v12921_v61  ;;  %v12919_v48 = vmul.f32 -1.442695, %v11720_v27  ;;  %v11731_v24 = vadd.f32 %v14626_v63, %v20211_v57 }
 0x7ba   :  { %11849 = vst [vmem:[%s20355_s14 + $0x18] sm:$0xff] %v15355_v46  ;;  %v11722_v0 = vpop.f32.mrf.mxu1 }
 0x7bb   :  { %v15357_v44 = vpop.eup %15356  ;;  %15368 = vpow2.f32 %v12919_v48  ;;  %v12922_v5 = vmul.f32 -1.442695, %v11731_v24  ;;  %v11723_v17 = vadd.f32 %v20211_v57, %v11722_v0 }
 0x7bc   :  { %11847 = vst [vmem:[%s20355_s14 + $0x8] sm:$0xff] %v15357_v44  ;;  %v14629_v25 = vpop.f32.mrf.mxu1 }
 0x7bd   :  { %v15359_v56 = vpop.eup %15358  ;;  %15370 = vpow2.f32 %v12922_v5  ;;  %v12920_v59 = vmul.f32 -1.442695, %v11723_v17  ;;  %v11744_v1 = vadd.f32 %v14629_v25, %v20211_v57 }
 0x7be   :  { %11852 = vst [vmem:[%s20355_s14 + $0x30] sm:$0xff] %v15359_v56  ;;  %v11735_v42 = vpop.f32.mrf.mxu1 }
 0x7bf   :  { %v15361_v40 = vpop.eup %15360  ;;  %15372 = vpow2.f32 %v12920_v59  ;;  %v12925_v20 = vmul.f32 -1.442695, %v11744_v1  ;;  %v11736_v18 = vadd.f32 %v20211_v57, %v11735_v42 }
 0x7c0   :  { %11850 = vst [vmem:[%s20355_s14 + $0x20] sm:$0xff] %v15361_v40  ;;  %v14630_v22 = vpop.f32.mrf.mxu1 }
 0x7c1   :  { %v15363_v2 = vpop.eup %15362  ;;  %15374 = vpow2.f32 %v12925_v20  ;;  %v12923_v12 = vmul.f32 -1.442695, %v11736_v18  ;;  %v11747_v60 = vadd.f32 %v14630_v22, %v20211_v57 }
 0x7c2   :  { %11853 = vst [vmem:[%s20355_s14 + $0x38] sm:$0xff] %v15363_v2  ;;  %v11738_v38 = vpop.f32.mrf.mxu1 }
 0x7c3   :  { %v15365_v45 = vpop.eup %15364  ;;  %15376 = vpow2.f32 %v12923_v12  ;;  %v12926_v52 = vmul.f32 -1.442695, %v11747_v60  ;;  %v11739_v36 = vadd.f32 %v20211_v57, %v11738_v38 }
 0x7c4   :  { %11851 = vst [vmem:[%s20355_s14 + $0x28] sm:$0xff] %v15365_v45 }
 0x7c5   :  { %15378 = vpow2.f32 %v12926_v52  ;;  %v12924_v47 = vmul.f32 -1.442695, %v11739_v36 }
 0x7c6   :  { %v15367_v62 = vpop.eup %15366 }
 0x7c7   :  { %v11808_v29 = vadd.f32 1.0, %v15367_v62  ;;  %15380 = vpow2.f32 %v12924_v47 }
 0x7c8   :  { %v15369_v58 = vpop.eup %15368 }
 0x7c9   :  { %15382 = vrcp.f32 %v11808_v29  ;;  %v11806_v13 = vadd.f32 1.0, %v15369_v58 }
 0x7ca   :  { %v15371_v54 = vpop.eup %15370 }
 0x7cb   :  { %15384 = vrcp.f32 %v11806_v13  ;;  %v11809_v49 = vadd.f32 1.0, %v15371_v54 }
 0x7cc   :  { %v15373_v41 = vpop.eup %15372 }
 0x7cd   :  { %15386 = vrcp.f32 %v11809_v49  ;;  %v11807_v53 = vadd.f32 1.0, %v15373_v41 }
 0x7ce   :  { %v15375_v50 = vpop.eup %15374 }
 0x7cf   :  { %15388 = vrcp.f32 %v11807_v53  ;;  %v11812_v57 = vadd.f32 1.0, %v15375_v50 }
 0x7d0   :  { %v15377_v30 = vpop.eup %15376 }
 0x7d1   :  { %15390 = vrcp.f32 %v11812_v57  ;;  %v11810_v55 = vadd.f32 1.0, %v15377_v30 }
 0x7d2   :  { %v15379_v14 = vpop.eup %15378 }
 0x7d3   :  { %15392 = vrcp.f32 %v11810_v55  ;;  %v11813_v16 = vadd.f32 1.0, %v15379_v14 }
 0x7d4   :  { %v15381_v51 = vpop.eup %15380 }
 0x7d5   :  { %15394 = vrcp.f32 %v11813_v16  ;;  %v11811_v33 = vadd.f32 1.0, %v15381_v51 }
 0x7d6   :  { %v15383_v3 = vpop.eup %15382 }
 0x7d7   :  { %11856 = vst [vmem:[%s20355_s14 + $0x50] sm:$0xff] %v15383_v3  ;;  %15396 = vrcp.f32 %v11811_v33 }
 0x7d8   :  { %v15385_v43 = vpop.eup %15384 }
 0x7d9   :  { %11854 = vst [vmem:[%s20355_s14 + $0x40] sm:$0xff] %v15385_v43 }
 0x7da   :  { %v15387_v39 = vpop.eup %15386 }
 0x7db   :  { %11857 = vst [vmem:[%s20355_s14 + $0x58] sm:$0xff] %v15387_v39 }
 0x7dc   :  { %v15389_v35 = vpop.eup %15388 }
 0x7dd   :  { %11855 = vst [vmem:[%s20355_s14 + $0x48] sm:$0xff] %v15389_v35 }
 0x7de   :  { %v15391_v19 = vpop.eup %15390 }
 0x7df   :  { %11860 = vst [vmem:[%s20355_s14 + $0x70] sm:$0xff] %v15391_v19 }
 0x7e0   :  { %v15393_v32 = vpop.eup %15392 }
 0x7e1   :  { %11858 = vst [vmem:[%s20355_s14 + $0x60] sm:$0xff] %v15393_v32 }
 0x7e2   :  { %v15395_v31 = vpop.eup %15394 }
 0x7e3   :  { %11861 = vst [vmem:[%s20355_s14 + $0x78] sm:$0xff] %v15395_v31 }
 0x7e4   :  { %v15397_v8 = vpop.eup %15396 }
 0x7e5   :  { %11859 = vst [vmem:[%s20355_s14 + $0x68] sm:$0xff] %v15397_v8 }
 0x7e6   :  { %11870 = vsyncpa [#allocation6], 1 }
 0x7e7   :  { %11871 = vsyncpa [#allocation8], 1 }
 0x7e8   :  { %11872 = vsyncpa [#allocation11], 1 }

</bundles_post_ra>
